<compile_context>
chip_gen: v7x
topology: tpu7x:2x2x1
jax: 0.10.0
libtpu: 0.0.40
codegen_flags: <defaults>
</compile_context>

<pallas_src>
import functools
import math

import jax
import jax.numpy as jnp
from jax.experimental import pallas as pl
from jax.experimental.pallas import tpu as pltpu


NCLS_PAD = 128                  # pad class dim to a full 128-lane store
DILATIONS = (6, 12, 18)         # ASPP dilated branches (mult=1)
_TAPS9 = tuple((ti, tj) for ti in range(3) for tj in range(3))


def _surviving_taps(d, h, w):
    """Taps of a dilated 3x3 conv (padding==dilation) that can touch real data
    on an (h, w) map; the others read pure zero padding and are skipped."""
    return tuple((ti, tj) for (ti, tj) in _TAPS9
                 if abs(ti - 1) * d < h and abs(tj - 1) * d < w)


def _round_up(x, m):
    return ((x + m - 1) // m) * m


# -----------------------------------------------------------------------------
# Plain-JAX glue: im2col for the two stride-2 3x3 convs (stem0, stem2).
# TODO(synk): at large resolutions the stride-2 tap extraction should also move
#             in-kernel (strided pl.ds reads) to avoid the 9x HBM expansion; at
#             these sizes it is negligible and kept wrapper-side.
# -----------------------------------------------------------------------------
def im2col(x_nhwc, k, stride, padding, dilation=1):
    N, H, W, C = x_nhwc.shape
    xp = jnp.pad(x_nhwc, ((0, 0), (padding, padding), (padding, padding), (0, 0)))
    Hp, Wp = H + 2 * padding, W + 2 * padding
    Ho = (Hp - dilation * (k - 1) - 1) // stride + 1
    Wo = (Wp - dilation * (k - 1) - 1) // stride + 1
    cols = []
    for i in range(k):
        for j in range(k):
            patch = xp[
                :,
                i * dilation: i * dilation + stride * (Ho - 1) + 1: stride,
                j * dilation: j * dilation + stride * (Wo - 1) + 1: stride,
                :,
            ]
            cols.append(patch)
    return jnp.concatenate(cols, axis=-1)                   # (N, Ho, Wo, k*k*C)


# -----------------------------------------------------------------------------
# Kernel 1: stem0 + stem1 (fused, folded BN + ReLU), one batch image per step
# -----------------------------------------------------------------------------
def _stem01_kernel(cols0_ref, w0_ref, s0_ref, b0_ref,
                   w1_ref, s1_ref, b1_ref, out_ref, p1_ref, cols1_ref, *, h, w):
    f32 = jnp.float32
    bf16 = jnp.bfloat16
    m = h * w

    # stem0: 3x3 s2 conv (wrapper im2col) + BN + ReLU
    y0 = jnp.dot(cols0_ref[0], w0_ref[...], preferred_element_type=f32)
    y0 = jnp.maximum(y0 * s0_ref[...] + b0_ref[...], 0.0)              # (m, 64)

    # zero-padded stem1 input (interior at an 8-aligned sublane offset)
    p1_ref[...] = jnp.zeros(p1_ref.shape, p1_ref.dtype)
    p1_ref[:, 1:1 + h, 8:8 + w, :] = y0.astype(bf16).reshape(1, h, w, 64)

    # stem1: build the 9-tap im2col block ONCE in VMEM, then one K=576 matmul
    for t, (ti, tj) in enumerate(_TAPS9):
        cols1_ref[:, t * 64:(t + 1) * 64] = (
            p1_ref[:, ti:ti + h, 7 + tj:7 + tj + w, :].reshape(m, 64))
    y1 = jnp.dot(cols1_ref[...], w1_ref[...], preferred_element_type=f32)
    y1 = jnp.maximum(y1 * s1_ref[...] + b1_ref[...], 0.0)              # (m, 64)
    out_ref[0] = y1.astype(out_ref.dtype)


def stems_forward(x_nhwc, sp):
    N, H, W, _ = x_nhwc.shape
    H1, W1 = H // 2, W // 2
    cols0 = im2col(x_nhwc, 3, 2, 1)                                    # (N,H1,W1,27)
    cols0 = jnp.pad(cols0, ((0, 0), (0, 0), (0, 0), (0, 5)))
    cols0 = cols0.reshape(N, H1 * W1, 32).astype(jnp.bfloat16)

    kern = functools.partial(_stem01_kernel, h=H1, w=W1)
    out = pl.pallas_call(
        kern,
        out_shape=jax.ShapeDtypeStruct((N, H1 * W1, 64), jnp.bfloat16),
        grid_spec=pltpu.PrefetchScalarGridSpec(
            num_scalar_prefetch=0,
            grid=(N,),
            in_specs=[
                pl.BlockSpec((1, H1 * W1, 32), lambda b: (b, 0, 0)),
                pl.BlockSpec(sp["w0"].shape, lambda b: (0, 0)),
                pl.BlockSpec(sp["s0"].shape, lambda b: (0, 0)),
                pl.BlockSpec(sp["b0"].shape, lambda b: (0, 0)),
                pl.BlockSpec(sp["w1"].shape, lambda b: (0, 0)),
                pl.BlockSpec(sp["s1"].shape, lambda b: (0, 0)),
                pl.BlockSpec(sp["b1"].shape, lambda b: (0, 0)),
            ],
            out_specs=pl.BlockSpec((1, H1 * W1, 64), lambda b: (b, 0, 0)),
            scratch_shapes=[
                pltpu.VMEM((1, H1 + 2, W1 + 16, 64), jnp.bfloat16),     # padded y0
                pltpu.VMEM((H1 * W1, 9 * 64), jnp.bfloat16),            # im2col block
            ],
        ),
        compiler_params=pltpu.CompilerParams(
            dimension_semantics=("parallel",),
            vmem_limit_bytes=32 * 1024 * 1024),
    )(cols0, sp["w0"], sp["s0"], sp["b0"], sp["w1"], sp["s1"], sp["b1"])
    return out.reshape(N, H1, W1, 64)


# -----------------------------------------------------------------------------
# Kernel 2: stem2 + global average pool (head-independent, computed ONCE)
# -----------------------------------------------------------------------------
def _stem2_kernel(cols2_ref, w2_ref, s2_ref, b2_ref, s1_ref, pool_ref):
    f32 = jnp.float32
    s1 = jnp.dot(cols2_ref[0], w2_ref[...], preferred_element_type=f32)
    s1 = jnp.maximum(s1 * s2_ref[...] + b2_ref[...], 0.0)              # (h*w, 128)
    s1_ref[0] = s1.astype(s1_ref.dtype)
    pool_ref[0] = jnp.mean(s1, axis=0, keepdims=True).astype(pool_ref.dtype)


def stem2_forward(s0p, sp):
    N, H1, W1, C = s0p.shape
    H2, W2 = H1 // 2, W1 // 2
    cols2 = im2col(s0p, 3, 2, 1).reshape(N, H2 * W2, 9 * C)            # bf16

    s1, pooled = pl.pallas_call(
        _stem2_kernel,
        out_shape=(jax.ShapeDtypeStruct((N, H2 * W2, 128), jnp.bfloat16),
                   jax.ShapeDtypeStruct((N, 1, 128), jnp.bfloat16)),
        grid_spec=pltpu.PrefetchScalarGridSpec(
            num_scalar_prefetch=0,
            grid=(N,),
            in_specs=[
                pl.BlockSpec((1, H2 * W2, 9 * C), lambda b: (b, 0, 0)),
                pl.BlockSpec(sp["w2"].shape, lambda b: (0, 0)),
                pl.BlockSpec(sp["s2"].shape, lambda b: (0, 0)),
                pl.BlockSpec(sp["b2"].shape, lambda b: (0, 0)),
            ],
            out_specs=[
                pl.BlockSpec((1, H2 * W2, 128), lambda b: (b, 0, 0)),
                pl.BlockSpec((1, 1, 128), lambda b: (b, 0, 0)),
            ],
        ),
        compiler_params=pltpu.CompilerParams(
            dimension_semantics=("parallel",),
            vmem_limit_bytes=32 * 1024 * 1024),
    )(cols2, sp["w2"], sp["s2"], sp["b2"])
    return s1, pooled


# -----------------------------------------------------------------------------
# Kernel 3: full ASPP for both heads, one grid step per head ("parallel")
# -----------------------------------------------------------------------------
def _aspp_kernel(s1_ref, pad_ref, pool_ref,
                 w1_ref, wdA_ref, wdB_ref, wdC_ref, w5_ref,
                 wc2_ref, wc3_ref, sc_ref, bi_ref, bc3_ref,
                 out_ref, cols_ref, *, n, h, w, cin, depth, pad, taps):
    f32 = jnp.float32
    bf16 = jnp.bfloat16
    m = n * h * w
    s1v = s1_ref[...]                                                  # (m, cin) bf16
    sc = sc_ref[0]
    bi = bi_ref[0]

    def bn_relu(x, k):
        return jnp.maximum(x * sc[k][None, :] + bi[k][None, :], 0.0)

    def conv2_part(x, k):
        return jnp.dot(x.astype(bf16), wc2_ref[0, k * depth:(k + 1) * depth, :],
                       preferred_element_type=f32)

    # branch 1: 1x1 conv + BN + ReLU
    x1 = bn_relu(jnp.dot(s1v, w1_ref[0], preferred_element_type=f32), 0)
    acc2 = conv2_part(x1, 0)                                           # (m, depth) f32

    # branches 2-4: dilated 3x3 convs; surviving taps packed into ONE matmul each
    wd_refs = (wdA_ref, wdB_ref, wdC_ref)
    for bidx, d in enumerate(DILATIONS):
        tlist = taps[bidx]
        if len(tlist) == 1:
            cols = s1v                                  # only the center tap is live
        else:
            for t, (ti, tj) in enumerate(tlist):
                r0 = pad + (ti - 1) * d
                c0 = pad + (tj - 1) * d
                cols_ref[:, t * cin:(t + 1) * cin] = (
                    pad_ref[:, r0:r0 + h, c0:c0 + w, :].reshape(m, cin))
            cols = cols_ref[:, :len(tlist) * cin]
        xk = bn_relu(jnp.dot(cols, wd_refs[bidx][0], preferred_element_type=f32),
                     1 + bidx)
        acc2 = acc2 + conv2_part(xk, 1 + bidx)

    # branch 5: GAP -> 1x1 conv -> BN/ReLU -> 1x1 bilinear upsample (== broadcast).
    # Its conv2 partial is spatially constant: tiny (n, depth) matmul + broadcast add.
    x5 = bn_relu(jnp.dot(pool_ref[...].reshape(n, cin), w5_ref[0],
                         preferred_element_type=f32), 4)               # (n, depth)
    c5 = conv2_part(x5, 4)                                             # (n, depth)
    acc2 = (acc2.reshape(n, h * w, depth) + c5[:, None, :]).reshape(m, depth)

    # conv2 BN + ReLU, then conv3 (bias, no BN/ReLU); classes padded -> dense store
    y = bn_relu(acc2, 5)
    out = jnp.dot(y.astype(bf16), wc3_ref[0], preferred_element_type=f32) + bc3_ref[0]
    out_ref[0] = out.astype(out_ref.dtype)


def aspp_both_heads(s1, pooled, ap, *, n, h, w):
    cin = s1.shape[-1]
    depth = ap["w1"].shape[-1]
    m = n * h * w
    s1_flat = s1.reshape(m, cin)
    s1_4d = s1.reshape(n, h, w, cin)

    # static (trace-time) tap survival + minimal halo (multiple of 8 for alignment)
    taps = tuple(_surviving_taps(d, h, w) for d in DILATIONS)
    live_off = [d for d in DILATIONS if d < h] + [d for d in DILATIONS if d < w]
    P = _round_up(max(live_off), 8) if live_off else 0
    s1_pad = jnp.pad(s1_4d, ((0, 0), (P, P), (P, P), (0, 0))) if P else s1_4d

    # pack only the surviving taps' weights per dilated branch (wrapper-side, static)
    wd_packed = []
    for b, tl in enumerate(taps):
        wd_packed.append(jnp.concatenate(
            [ap["wd"][:, b, ti, tj] for (ti, tj) in tl], axis=1))      # (2, T*cin, depth)

    kern = functools.partial(_aspp_kernel, n=n, h=h, w=w, cin=cin, depth=depth,
                             pad=P, taps=taps)
    return pl.pallas_call(
        kern,
        out_shape=jax.ShapeDtypeStruct((2, m, NCLS_PAD), jnp.bfloat16),
        grid_spec=pltpu.PrefetchScalarGridSpec(
            num_scalar_prefetch=0,
            grid=(2,),                                                 # device, cloud
            in_specs=[
                pl.BlockSpec(s1_flat.shape, lambda hd: (0, 0)),
                pl.BlockSpec(s1_pad.shape, lambda hd: (0, 0, 0, 0)),
                pl.BlockSpec(pooled.shape, lambda hd: (0, 0, 0)),
                pl.BlockSpec((1,) + ap["w1"].shape[1:], lambda hd: (hd, 0, 0)),
                pl.BlockSpec((1,) + wd_packed[0].shape[1:], lambda hd: (hd, 0, 0)),
                pl.BlockSpec((1,) + wd_packed[1].shape[1:], lambda hd: (hd, 0, 0)),
                pl.BlockSpec((1,) + wd_packed[2].shape[1:], lambda hd: (hd, 0, 0)),
                pl.BlockSpec((1,) + ap["w5"].shape[1:], lambda hd: (hd, 0, 0)),
                pl.BlockSpec((1,) + ap["wc2"].shape[1:], lambda hd: (hd, 0, 0)),
                pl.BlockSpec((1,) + ap["wc3"].shape[1:], lambda hd: (hd, 0, 0)),
                pl.BlockSpec((1,) + ap["sc"].shape[1:], lambda hd: (hd, 0, 0)),
                pl.BlockSpec((1,) + ap["bi"].shape[1:], lambda hd: (hd, 0, 0)),
                pl.BlockSpec((1,) + ap["bc3"].shape[1:], lambda hd: (hd, 0, 0)),
            ],
            out_specs=pl.BlockSpec((1, m, NCLS_PAD), lambda hd: (hd, 0, 0)),
            scratch_shapes=[pltpu.VMEM((m, 9 * cin), jnp.bfloat16)],   # im2col block
        ),
        compiler_params=pltpu.CompilerParams(
            dimension_semantics=("parallel",),
            vmem_limit_bytes=32 * 1024 * 1024),
    )(s1_flat, s1_pad, pooled, ap["w1"], wd_packed[0], wd_packed[1], wd_packed[2],
      ap["w5"], ap["wc2"], ap["wc3"], ap["sc"], ap["bi"], ap["bc3"])


# -----------------------------------------------------------------------------
# Deterministic parameter construction (synthetic init, folded BN)
# -----------------------------------------------------------------------------
def _conv_init(key, cin, cout, k, *, bias):
    kw, kb = jax.random.split(key)
    w = jax.random.normal(kw, (k, k, cin, cout), jnp.float32) / math.sqrt(cin * k * k)
    b = (jax.random.normal(kb, (cout,), jnp.float32) * 0.01 if bias
         else jnp.zeros((cout,), jnp.float32))
    return w, b


def _bn_fold(conv_bias, eps):
    # BN at init (gamma=1, beta=0, mean=0, var=1): y = (conv_out + b) / sqrt(1+eps)
    s = 1.0 / math.sqrt(1.0 + eps)
    return jnp.full_like(conv_bias, s), conv_bias * s


def make_stem_params(key):
    bf16 = jnp.bfloat16
    k0, k1, k2 = jax.random.split(key, 3)

    # stem0: Conv2d(3, 64, 3, s=2, p=1) + BN + ReLU        (K padded 27 -> 32)
    w0, b0 = _conv_init(k0, 3, 64, 3, bias=True)
    g0, b0 = _bn_fold(b0, 1e-5)
    w0 = jnp.pad(w0.reshape(27, 64), ((0, 5), (0, 0)))

    # stem1: Conv2d(64, 64, 3, p=1) + BN + ReLU             (single K=576 matmul)
    w1, b1 = _conv_init(k1, 64, 64, 3, bias=True)
    g1, b1 = _bn_fold(b1, 1e-5)

    # stem2: Conv2d(64, 128, 3, s=2, p=1) + BN + ReLU       (single K=576 matmul)
    w2, b2 = _conv_init(k2, 64, 128, 3, bias=True)
    g2, b2 = _bn_fold(b2, 1e-5)

    return {
        "w0": w0.astype(bf16), "s0": g0[None, :], "b0": b0[None, :],
        "w1": w1.reshape(576, 64).astype(bf16), "s1": g1[None, :], "b1": b1[None, :],
        "w2": w2.reshape(576, 128).astype(bf16), "s2": g2[None, :], "b2": b2[None, :],
    }


def _aspp_head_params(key, C, depth, ncls, eps=0.0003):
    ks = jax.random.split(key, 7)
    w1, _ = _conv_init(ks[0], C, depth, 1, bias=False)
    wd = jnp.stack([_conv_init(ks[1 + i], C, depth, 3, bias=False)[0]
                    for i in range(3)], axis=0)                 # (3, 3, 3, C, depth)
    w5, _ = _conv_init(ks[4], C, depth, 1, bias=False)
    wc2, _ = _conv_init(ks[5], 5 * depth, depth, 1, bias=False)
    wc3, bc3 = _conv_init(ks[6], depth, ncls, 1, bias=True)
    s = 1.0 / math.sqrt(1.0 + eps)
    return {
        "w1": w1.reshape(C, depth),
        "wd": wd,                                               # per-branch 3x3 weights
        "w5": w5.reshape(C, depth),
        "wc2": wc2.reshape(5 * depth, depth),
        "wc3": jnp.pad(wc3.reshape(depth, ncls), ((0, 0), (0, NCLS_PAD - ncls))),
        "sc": jnp.full((6, depth), s, jnp.float32),             # BN scales: a1..a5, c2
        "bi": jnp.zeros((6, depth), jnp.float32),               # BN biases (no conv bias)
        "bc3": jnp.pad(bc3, (0, NCLS_PAD - ncls))[None, :],
    }


def make_aspp_params(key, C, depth, ncls):
    kd, kc = jax.random.split(key)
    dev = _aspp_head_params(kd, C, depth, ncls)
    cld = _aspp_head_params(kc, C, depth, ncls)
    p = {k: jnp.stack([dev[k], cld[k]], axis=0) for k in dev}   # head-stacked
    for k in ("w1", "wd", "w5", "wc2", "wc3"):
        p[k] = p[k].astype(jnp.bfloat16)
    return p


# -----------------------------------------------------------------------------
# Dist_Network forward
# -----------------------------------------------------------------------------
def dist_network_forward(x_nchw, stem_p, aspp_p, *, num_classes):
    x = jnp.transpose(x_nchw, (0, 2, 3, 1)).astype(jnp.bfloat16)       # NCHW -> NHWC
    N, H, W, _ = x.shape
    s0p = stems_forward(x, stem_p)                                     # (N, H/2, W/2, 64)
    # TODO(synk): genotype-driven device/cloud Cell stacks are undefined in the
    #             reference -> identity pass-through; stem2 output feeds both heads.
    s1, pooled = stem2_forward(s0p, stem_p)                            # (N, H4*W4, 128), (N,1,128)
    H4, W4 = H // 4, W // 4
    out = aspp_both_heads(s1, pooled, aspp_p, n=N, h=H4, w=W4)         # (2, N*H4*W4, 128)
    out = out.reshape(2, N, H4, W4, NCLS_PAD)[..., :num_classes].astype(jnp.float32)
    out = jnp.transpose(out, (0, 1, 4, 2, 3))                          # -> NCHW per head
    return out[0], out[1]


# -----------------------------------------------------------------------------
# main
# -----------------------------------------------------------------------------
if __name__ == "__main__":
    NUM_CLASSES = 4
    DEPTH = 256          # ASPP depth, as in the reference ASPP(C, 256, ...)

    key = jax.random.PRNGKey(0)
    k_params, k_input = jax.random.split(key)
    k_stem, k_aspp = jax.random.split(k_params)

    stem_params = make_stem_params(k_stem)
    aspp_params = make_aspp_params(k_aspp, 128, DEPTH, NUM_CLASSES)
    x = jax.random.normal(k_input, (2, 3, 32, 32), jnp.float32)        # NCHW input

    fwd = jax.jit(functools.partial(dist_network_forward, num_classes=NUM_CLASSES))
    device_out, cloud_out = fwd(x, stem_params, aspp_params)
    jax.block_until_ready((device_out, cloud_out))

    assert device_out.shape == (2, NUM_CLASSES, 8, 8), device_out.shape
    assert cloud_out.shape == (2, NUM_CLASSES, 8, 8), cloud_out.shape
    assert bool(jnp.isfinite(device_out).all()) and bool(jnp.isfinite(cloud_out).all())
    print("KERNEL_OK")
</pallas_src>

<mosaic_0001>
module attributes {stable_mosaic.version = 11 : i64} {
  func.func @_stem01_kernel(%arg0: i32, %arg1: memref<1x256x32xbf16, #tpu.memory_space<vmem>>, %arg2: memref<32x64xbf16, #tpu.memory_space<vmem>>, %arg3: memref<1x64xf32, #tpu.memory_space<vmem>>, %arg4: memref<1x64xf32, #tpu.memory_space<vmem>>, %arg5: memref<576x64xbf16, #tpu.memory_space<vmem>>, %arg6: memref<1x64xf32, #tpu.memory_space<vmem>>, %arg7: memref<1x64xf32, #tpu.memory_space<vmem>>, %arg8: memref<1x256x64xbf16, #tpu.memory_space<vmem>>, %arg9: memref<1x18x32x64xbf16, #tpu.memory_space<vmem>>, %arg10: memref<256x576xbf16, #tpu.memory_space<vmem>>) attributes {dimension_semantics = [#tpu.dimension_semantics<parallel>], iteration_bounds = array<i64: 2>, scalar_prefetch = 0 : i64, scratch_operands = 2 : i64, tpu.core_type = #tpu.core_type<tc>, window_params = [{transform_indices = @transform_0, window_bounds = array<i64: 1, 256, 32>}, {pipeline_mode = #tpu.pipeline_mode<synchronous>, transform_indices = @transform_1, window_bounds = array<i64: 32, 64>}, {pipeline_mode = #tpu.pipeline_mode<synchronous>, transform_indices = @transform_2, window_bounds = array<i64: 1, 64>}, {pipeline_mode = #tpu.pipeline_mode<synchronous>, transform_indices = @transform_3, window_bounds = array<i64: 1, 64>}, {pipeline_mode = #tpu.pipeline_mode<synchronous>, transform_indices = @transform_4, window_bounds = array<i64: 576, 64>}, {pipeline_mode = #tpu.pipeline_mode<synchronous>, transform_indices = @transform_5, window_bounds = array<i64: 1, 64>}, {pipeline_mode = #tpu.pipeline_mode<synchronous>, transform_indices = @transform_6, window_bounds = array<i64: 1, 64>}, {transform_indices = @transform_7, window_bounds = array<i64: 1, 256, 64>}]} {
    %c0 = arith.constant 0 : index
    %c0_0 = arith.constant 0 : index
    %c0_1 = arith.constant 0 : index
    %0 = vector.load %arg1[%c0, %c0_0, %c0_1] : memref<1x256x32xbf16, #tpu.memory_space<vmem>>, vector<1x256x32xbf16>
    %1 = vector.shape_cast %0 : vector<1x256x32xbf16> to vector<256x32xbf16>
    %c0_2 = arith.constant 0 : index
    %c0_3 = arith.constant 0 : index
    %2 = vector.load %arg2[%c0_2, %c0_3] : memref<32x64xbf16, #tpu.memory_space<vmem>>, vector<32x64xbf16>
    %cst = arith.constant dense<0.000000e+00> : vector<256x64xf32>
    %3 = tpu.matmul %1, %2, %cst {dimension_numbers = #tpu.dot_dimension_numbers<[1], [0], [0], [1], [0, 0, 1, 1], [], []>} : vector<256x32xbf16>, vector<32x64xbf16>, vector<256x64xf32> -> vector<256x64xf32>
    %c0_4 = arith.constant 0 : index
    %c0_5 = arith.constant 0 : index
    %4 = vector.load %arg3[%c0_4, %c0_5] : memref<1x64xf32, #tpu.memory_space<vmem>>, vector<1x64xf32>
    %5 = vector.broadcast %4 : vector<1x64xf32> to vector<256x64xf32>
    %6 = arith.mulf %3, %5 : vector<256x64xf32>
    %c0_6 = arith.constant 0 : index
    %c0_7 = arith.constant 0 : index
    %7 = vector.load %arg4[%c0_6, %c0_7] : memref<1x64xf32, #tpu.memory_space<vmem>>, vector<1x64xf32>
    %8 = vector.broadcast %7 : vector<1x64xf32> to vector<256x64xf32>
    %9 = arith.addf %6, %8 : vector<256x64xf32>
    %cst_8 = arith.constant 0.000000e+00 : f32
    %10 = vector.broadcast %cst_8 : f32 to vector<256x64xf32>
    %11 = arith.maximumf %9, %10 : vector<256x64xf32>
    %cst_9 = arith.constant 0.000000e+00 : bf16
    %12 = vector.broadcast %cst_9 : bf16 to vector<1x18x32x64xbf16>
    %c0_10 = arith.constant 0 : index
    %c0_11 = arith.constant 0 : index
    %c0_12 = arith.constant 0 : index
    %c0_13 = arith.constant 0 : index
    %13 = vector.load %arg9[%c0_10, %c0_11, %c0_12, %c0_13] : memref<1x18x32x64xbf16, #tpu.memory_space<vmem>>, vector<1x18x32x64xbf16>
    tpu.vector_store %arg9[%c0_10, %c0_11, %c0_12, %c0_13], %12 {strides = array<i32>} : memref<1x18x32x64xbf16, #tpu.memory_space<vmem>>, vector<1x18x32x64xbf16>,
    %14 = arith.truncf %11 : vector<256x64xf32> to vector<256x64xbf16>
    %15 = vector.shape_cast %14 : vector<256x64xbf16> to vector<1x16x16x64xbf16>
    %c0_14 = arith.constant 0 : index
    %c1 = arith.constant 1 : index
    %c8 = arith.constant 8 : index
    %c0_15 = arith.constant 0 : index
    %16 = vector.load %arg9[%c0_14, %c1, %c8, %c0_15] : memref<1x18x32x64xbf16, #tpu.memory_space<vmem>>, vector<1x16x16x64xbf16>
    tpu.vector_store %arg9[%c0_14, %c1, %c8, %c0_15], %15 {strides = array<i32>} : memref<1x18x32x64xbf16, #tpu.memory_space<vmem>>, vector<1x16x16x64xbf16>,
    %c0_16 = arith.constant 0 : index
    %c0_17 = arith.constant 0 : index
    %c7 = arith.constant 7 : index
    %c0_18 = arith.constant 0 : index
    %17 = vector.load %arg9[%c0_16, %c0_17, %c7, %c0_18] : memref<1x18x32x64xbf16, #tpu.memory_space<vmem>>, vector<1x16x16x64xbf16>
    %18 = vector.shape_cast %17 : vector<1x16x16x64xbf16> to vector<256x64xbf16>
    %c0_19 = arith.constant 0 : index
    %c0_20 = arith.constant 0 : index
    %19 = vector.load %arg10[%c0_19, %c0_20] : memref<256x576xbf16, #tpu.memory_space<vmem>>, vector<256x64xbf16>
    tpu.vector_store %arg10[%c0_19, %c0_20], %18 {strides = array<i32>} : memref<256x576xbf16, #tpu.memory_space<vmem>>, vector<256x64xbf16>,
    %c0_21 = arith.constant 0 : index
    %c0_22 = arith.constant 0 : index
    %c8_23 = arith.constant 8 : index
    %c0_24 = arith.constant 0 : index
    %20 = vector.load %arg9[%c0_21, %c0_22, %c8_23, %c0_24] : memref<1x18x32x64xbf16, #tpu.memory_space<vmem>>, vector<1x16x16x64xbf16>
    %21 = vector.shape_cast %20 : vector<1x16x16x64xbf16> to vector<256x64xbf16>
    %c0_25 = arith.constant 0 : index
    %c64 = arith.constant 64 : index
    %22 = vector.load %arg10[%c0_25, %c64] : memref<256x576xbf16, #tpu.memory_space<vmem>>, vector<256x64xbf16>
    tpu.vector_store %arg10[%c0_25, %c64], %21 {strides = array<i32>} : memref<256x576xbf16, #tpu.memory_space<vmem>>, vector<256x64xbf16>,
    %c0_26 = arith.constant 0 : index
    %c0_27 = arith.constant 0 : index
    %c9 = arith.constant 9 : index
    %c0_28 = arith.constant 0 : index
    %23 = vector.load %arg9[%c0_26, %c0_27, %c9, %c0_28] : memref<1x18x32x64xbf16, #tpu.memory_space<vmem>>, vector<1x16x16x64xbf16>
    %24 = vector.shape_cast %23 : vector<1x16x16x64xbf16> to vector<256x64xbf16>
    %c0_29 = arith.constant 0 : index
    %c128 = arith.constant 128 : index
    %25 = vector.load %arg10[%c0_29, %c128] : memref<256x576xbf16, #tpu.memory_space<vmem>>, vector<256x64xbf16>
    tpu.vector_store %arg10[%c0_29, %c128], %24 {strides = array<i32>} : memref<256x576xbf16, #tpu.memory_space<vmem>>, vector<256x64xbf16>,
    %c0_30 = arith.constant 0 : index
    %c1_31 = arith.constant 1 : index
    %c7_32 = arith.constant 7 : index
    %c0_33 = arith.constant 0 : index
    %26 = vector.load %arg9[%c0_30, %c1_31, %c7_32, %c0_33] : memref<1x18x32x64xbf16, #tpu.memory_space<vmem>>, vector<1x16x16x64xbf16>
    %27 = vector.shape_cast %26 : vector<1x16x16x64xbf16> to vector<256x64xbf16>
    %c0_34 = arith.constant 0 : index
    %c192 = arith.constant 192 : index
    %28 = vector.load %arg10[%c0_34, %c192] : memref<256x576xbf16, #tpu.memory_space<vmem>>, vector<256x64xbf16>
    tpu.vector_store %arg10[%c0_34, %c192], %27 {strides = array<i32>} : memref<256x576xbf16, #tpu.memory_space<vmem>>, vector<256x64xbf16>,
    %c0_35 = arith.constant 0 : index
    %c1_36 = arith.constant 1 : index
    %c8_37 = arith.constant 8 : index
    %c0_38 = arith.constant 0 : index
    %29 = vector.load %arg9[%c0_35, %c1_36, %c8_37, %c0_38] : memref<1x18x32x64xbf16, #tpu.memory_space<vmem>>, vector<1x16x16x64xbf16>
    %30 = vector.shape_cast %29 : vector<1x16x16x64xbf16> to vector<256x64xbf16>
    %c0_39 = arith.constant 0 : index
    %c256 = arith.constant 256 : index
    %31 = vector.load %arg10[%c0_39, %c256] : memref<256x576xbf16, #tpu.memory_space<vmem>>, vector<256x64xbf16>
    tpu.vector_store %arg10[%c0_39, %c256], %30 {strides = array<i32>} : memref<256x576xbf16, #tpu.memory_space<vmem>>, vector<256x64xbf16>,
    %c0_40 = arith.constant 0 : index
    %c1_41 = arith.constant 1 : index
    %c9_42 = arith.constant 9 : index
    %c0_43 = arith.constant 0 : index
    %32 = vector.load %arg9[%c0_40, %c1_41, %c9_42, %c0_43] : memref<1x18x32x64xbf16, #tpu.memory_space<vmem>>, vector<1x16x16x64xbf16>
    %33 = vector.shape_cast %32 : vector<1x16x16x64xbf16> to vector<256x64xbf16>
    %c0_44 = arith.constant 0 : index
    %c320 = arith.constant 320 : index
    %34 = vector.load %arg10[%c0_44, %c320] : memref<256x576xbf16, #tpu.memory_space<vmem>>, vector<256x64xbf16>
    tpu.vector_store %arg10[%c0_44, %c320], %33 {strides = array<i32>} : memref<256x576xbf16, #tpu.memory_space<vmem>>, vector<256x64xbf16>,
    %c0_45 = arith.constant 0 : index
    %c2 = arith.constant 2 : index
    %c7_46 = arith.constant 7 : index
    %c0_47 = arith.constant 0 : index
    %35 = vector.load %arg9[%c0_45, %c2, %c7_46, %c0_47] : memref<1x18x32x64xbf16, #tpu.memory_space<vmem>>, vector<1x16x16x64xbf16>
    %36 = vector.shape_cast %35 : vector<1x16x16x64xbf16> to vector<256x64xbf16>
    %c0_48 = arith.constant 0 : index
    %c384 = arith.constant 384 : index
    %37 = vector.load %arg10[%c0_48, %c384] : memref<256x576xbf16, #tpu.memory_space<vmem>>, vector<256x64xbf16>
    tpu.vector_store %arg10[%c0_48, %c384], %36 {strides = array<i32>} : memref<256x576xbf16, #tpu.memory_space<vmem>>, vector<256x64xbf16>,
    %c0_49 = arith.constant 0 : index
    %c2_50 = arith.constant 2 : index
    %c8_51 = arith.constant 8 : index
    %c0_52 = arith.constant 0 : index
    %38 = vector.load %arg9[%c0_49, %c2_50, %c8_51, %c0_52] : memref<1x18x32x64xbf16, #tpu.memory_space<vmem>>, vector<1x16x16x64xbf16>
    %39 = vector.shape_cast %38 : vector<1x16x16x64xbf16> to vector<256x64xbf16>
    %c0_53 = arith.constant 0 : index
    %c448 = arith.constant 448 : index
    %40 = vector.load %arg10[%c0_53, %c448] : memref<256x576xbf16, #tpu.memory_space<vmem>>, vector<256x64xbf16>
    tpu.vector_store %arg10[%c0_53, %c448], %39 {strides = array<i32>} : memref<256x576xbf16, #tpu.memory_space<vmem>>, vector<256x64xbf16>,
    %c0_54 = arith.constant 0 : index
    %c2_55 = arith.constant 2 : index
    %c9_56 = arith.constant 9 : index
    %c0_57 = arith.constant 0 : index
    %41 = vector.load %arg9[%c0_54, %c2_55, %c9_56, %c0_57] : memref<1x18x32x64xbf16, #tpu.memory_space<vmem>>, vector<1x16x16x64xbf16>
    %42 = vector.shape_cast %41 : vector<1x16x16x64xbf16> to vector<256x64xbf16>
    %c0_58 = arith.constant 0 : index
    %c512 = arith.constant 512 : index
    %43 = vector.load %arg10[%c0_58, %c512] : memref<256x576xbf16, #tpu.memory_space<vmem>>, vector<256x64xbf16>
    tpu.vector_store %arg10[%c0_58, %c512], %42 {strides = array<i32>} : memref<256x576xbf16, #tpu.memory_space<vmem>>, vector<256x64xbf16>,
    %c0_59 = arith.constant 0 : index
    %c0_60 = arith.constant 0 : index
    %44 = vector.load %arg10[%c0_59, %c0_60] : memref<256x576xbf16, #tpu.memory_space<vmem>>, vector<256x576xbf16>
    %c0_61 = arith.constant 0 : index
    %c0_62 = arith.constant 0 : index
    %45 = vector.load %arg5[%c0_61, %c0_62] : memref<576x64xbf16, #tpu.memory_space<vmem>>, vector<576x64xbf16>
    %cst_63 = arith.constant dense<0.000000e+00> : vector<256x64xf32>
    %46 = tpu.matmul %44, %45, %cst_63 {dimension_numbers = #tpu.dot_dimension_numbers<[1], [0], [0], [1], [0, 0, 1, 1], [], []>} : vector<256x576xbf16>, vector<576x64xbf16>, vector<256x64xf32> -> vector<256x64xf32>
    %c0_64 = arith.constant 0 : index
    %c0_65 = arith.constant 0 : index
    %47 = vector.load %arg6[%c0_64, %c0_65] : memref<1x64xf32, #tpu.memory_space<vmem>>, vector<1x64xf32>
    %48 = vector.broadcast %47 : vector<1x64xf32> to vector<256x64xf32>
    %49 = arith.mulf %46, %48 : vector<256x64xf32>
    %c0_66 = arith.constant 0 : index
    %c0_67 = arith.constant 0 : index
    %50 = vector.load %arg7[%c0_66, %c0_67] : memref<1x64xf32, #tpu.memory_space<vmem>>, vector<1x64xf32>
    %51 = vector.broadcast %50 : vector<1x64xf32> to vector<256x64xf32>
    %52 = arith.addf %49, %51 : vector<256x64xf32>
    %cst_68 = arith.constant 0.000000e+00 : f32
    %53 = vector.broadcast %cst_68 : f32 to vector<256x64xf32>
    %54 = arith.maximumf %52, %53 : vector<256x64xf32>
    %55 = arith.truncf %54 : vector<256x64xf32> to vector<256x64xbf16>
    %c0_69 = arith.constant 0 : index
    %c0_70 = arith.constant 0 : index
    %c0_71 = arith.constant 0 : index
    %56 = vector.load %arg8[%c0_69, %c0_70, %c0_71] : memref<1x256x64xbf16, #tpu.memory_space<vmem>>, vector<1x256x64xbf16>
    %57 = vector.shape_cast %56 : vector<1x256x64xbf16> to vector<256x64xbf16>
    %58 = vector.shape_cast %55 : vector<256x64xbf16> to vector<1x256x64xbf16>
    tpu.vector_store %arg8[%c0_69, %c0_70, %c0_71], %58 {strides = array<i32>} : memref<1x256x64xbf16, #tpu.memory_space<vmem>>, vector<1x256x64xbf16>,
    return
  }
  func.func @transform_0(%arg0: i32) -> (i32, i32, i32) {
    %c0_i32 = arith.constant 0 : i32
    %c0_i32_0 = arith.constant 0 : i32
    %c0_i32_1 = arith.constant 0 : i32
    return %arg0, %c0_i32, %c0_i32_0 : i32, i32, i32
  }
  func.func @transform_1(%arg0: i32) -> (i32, i32) {
    %c0_i32 = arith.constant 0 : i32
    %c0_i32_0 = arith.constant 0 : i32
    %c0_i32_1 = arith.constant 0 : i32
    return %c0_i32, %c0_i32_0 : i32, i32
  }
  func.func @transform_2(%arg0: i32) -> (i32, i32) {
    %c0_i32 = arith.constant 0 : i32
    %c0_i32_0 = arith.constant 0 : i32
    %c0_i32_1 = arith.constant 0 : i32
    return %c0_i32, %c0_i32_0 : i32, i32
  }
  func.func @transform_3(%arg0: i32) -> (i32, i32) {
    %c0_i32 = arith.constant 0 : i32
    %c0_i32_0 = arith.constant 0 : i32
    %c0_i32_1 = arith.constant 0 : i32
    return %c0_i32, %c0_i32_0 : i32, i32
  }
  func.func @transform_4(%arg0: i32) -> (i32, i32) {
    %c0_i32 = arith.constant 0 : i32
    %c0_i32_0 = arith.constant 0 : i32
    %c0_i32_1 = arith.constant 0 : i32
    return %c0_i32, %c0_i32_0 : i32, i32
  }
  func.func @transform_5(%arg0: i32) -> (i32, i32) {
    %c0_i32 = arith.constant 0 : i32
    %c0_i32_0 = arith.constant 0 : i32
    %c0_i32_1 = arith.constant 0 : i32
    return %c0_i32, %c0_i32_0 : i32, i32
  }
  func.func @transform_6(%arg0: i32) -> (i32, i32) {
    %c0_i32 = arith.constant 0 : i32
    %c0_i32_0 = arith.constant 0 : i32
    %c0_i32_1 = arith.constant 0 : i32
    return %c0_i32, %c0_i32_0 : i32, i32
  }
  func.func @transform_7(%arg0: i32) -> (i32, i32, i32) {
    %c0_i32 = arith.constant 0 : i32
    %c0_i32_0 = arith.constant 0 : i32
    %c0_i32_1 = arith.constant 0 : i32
    return %arg0, %c0_i32, %c0_i32_0 : i32, i32, i32
  }
}

module attributes {stable_mosaic.version = 11 : i64} {
  func.func @_stem2_kernel(%arg0: i32, %arg1: memref<1x64x576xbf16, #tpu.memory_space<vmem>>, %arg2: memref<576x128xbf16, #tpu.memory_space<vmem>>, %arg3: memref<1x128xf32, #tpu.memory_space<vmem>>, %arg4: memref<1x128xf32, #tpu.memory_space<vmem>>, %arg5: memref<1x64x128xbf16, #tpu.memory_space<vmem>>, %arg6: memref<1x1x128xbf16, #tpu.memory_space<vmem>>) attributes {dimension_semantics = [#tpu.dimension_semantics<parallel>], iteration_bounds = array<i64: 2>, scalar_prefetch = 0 : i64, scratch_operands = 0 : i64, tpu.core_type = #tpu.core_type<tc>, window_params = [{transform_indices = @transform_0, window_bounds = array<i64: 1, 64, 576>}, {pipeline_mode = #tpu.pipeline_mode<synchronous>, transform_indices = @transform_1, window_bounds = array<i64: 576, 128>}, {pipeline_mode = #tpu.pipeline_mode<synchronous>, transform_indices = @transform_2, window_bounds = array<i64: 1, 128>}, {pipeline_mode = #tpu.pipeline_mode<synchronous>, transform_indices = @transform_3, window_bounds = array<i64: 1, 128>}, {transform_indices = @transform_4, window_bounds = array<i64: 1, 64, 128>}, {transform_indices = @transform_5, window_bounds = array<i64: 1, 1, 128>}]} {
    %c0 = arith.constant 0 : index
    %c0_0 = arith.constant 0 : index
    %c0_1 = arith.constant 0 : index
    %0 = vector.load %arg1[%c0, %c0_0, %c0_1] : memref<1x64x576xbf16, #tpu.memory_space<vmem>>, vector<1x64x576xbf16>
    %1 = vector.shape_cast %0 : vector<1x64x576xbf16> to vector<64x576xbf16>
    %c0_2 = arith.constant 0 : index
    %c0_3 = arith.constant 0 : index
    %2 = vector.load %arg2[%c0_2, %c0_3] : memref<576x128xbf16, #tpu.memory_space<vmem>>, vector<576x128xbf16>
    %cst = arith.constant dense<0.000000e+00> : vector<64x128xf32>
    %3 = tpu.matmul %1, %2, %cst {dimension_numbers = #tpu.dot_dimension_numbers<[1], [0], [0], [1], [0, 0, 1, 1], [], []>} : vector<64x576xbf16>, vector<576x128xbf16>, vector<64x128xf32> -> vector<64x128xf32>
    %c0_4 = arith.constant 0 : index
    %c0_5 = arith.constant 0 : index
    %4 = vector.load %arg3[%c0_4, %c0_5] : memref<1x128xf32, #tpu.memory_space<vmem>>, vector<1x128xf32>
    %5 = vector.broadcast %4 : vector<1x128xf32> to vector<64x128xf32>
    %6 = arith.mulf %3, %5 : vector<64x128xf32>
    %c0_6 = arith.constant 0 : index
    %c0_7 = arith.constant 0 : index
    %7 = vector.load %arg4[%c0_6, %c0_7] : memref<1x128xf32, #tpu.memory_space<vmem>>, vector<1x128xf32>
    %8 = vector.broadcast %7 : vector<1x128xf32> to vector<64x128xf32>
    %9 = arith.addf %6, %8 : vector<64x128xf32>
    %cst_8 = arith.constant 0.000000e+00 : f32
    %10 = vector.broadcast %cst_8 : f32 to vector<64x128xf32>
    %11 = arith.maximumf %9, %10 : vector<64x128xf32>
    %12 = arith.truncf %11 : vector<64x128xf32> to vector<64x128xbf16>
    %c0_9 = arith.constant 0 : index
    %c0_10 = arith.constant 0 : index
    %c0_11 = arith.constant 0 : index
    %13 = vector.load %arg5[%c0_9, %c0_10, %c0_11] : memref<1x64x128xbf16, #tpu.memory_space<vmem>>, vector<1x64x128xbf16>
    %14 = vector.shape_cast %13 : vector<1x64x128xbf16> to vector<64x128xbf16>
    %15 = vector.shape_cast %12 : vector<64x128xbf16> to vector<1x64x128xbf16>
    tpu.vector_store %arg5[%c0_9, %c0_10, %c0_11], %15 {strides = array<i32>} : memref<1x64x128xbf16, #tpu.memory_space<vmem>>, vector<1x64x128xbf16>,
    %cst_12 = arith.constant dense<0.000000e+00> : vector<128xf32>
    %16 = vector.multi_reduction <add>, %11, %cst_12 [0] : vector<64x128xf32> to vector<128xf32>
    %17 = vector.shape_cast %16 : vector<128xf32> to vector<1x128xf32>
    %cst_13 = arith.constant 6.400000e+01 : f32
    %18 = vector.broadcast %cst_13 : f32 to vector<1x128xf32>
    %19 = arith.divf %17, %18 : vector<1x128xf32>
    %20 = arith.truncf %19 : vector<1x128xf32> to vector<1x128xbf16>
    %c0_14 = arith.constant 0 : index
    %c0_15 = arith.constant 0 : index
    %c0_16 = arith.constant 0 : index
    %21 = vector.load %arg6[%c0_14, %c0_15, %c0_16] : memref<1x1x128xbf16, #tpu.memory_space<vmem>>, vector<1x1x128xbf16>
    %22 = vector.shape_cast %21 : vector<1x1x128xbf16> to vector<1x128xbf16>
    %23 = vector.shape_cast %20 : vector<1x128xbf16> to vector<1x1x128xbf16>
    tpu.vector_store %arg6[%c0_14, %c0_15, %c0_16], %23 {strides = array<i32>} : memref<1x1x128xbf16, #tpu.memory_space<vmem>>, vector<1x1x128xbf16>,
    return
  }
  func.func @transform_0(%arg0: i32) -> (i32, i32, i32) {
    %c0_i32 = arith.constant 0 : i32
    %c0_i32_0 = arith.constant 0 : i32
    %c0_i32_1 = arith.constant 0 : i32
    return %arg0, %c0_i32, %c0_i32_0 : i32, i32, i32
  }
  func.func @transform_1(%arg0: i32) -> (i32, i32) {
    %c0_i32 = arith.constant 0 : i32
    %c0_i32_0 = arith.constant 0 : i32
    %c0_i32_1 = arith.constant 0 : i32
    return %c0_i32, %c0_i32_0 : i32, i32
  }
  func.func @transform_2(%arg0: i32) -> (i32, i32) {
    %c0_i32 = arith.constant 0 : i32
    %c0_i32_0 = arith.constant 0 : i32
    %c0_i32_1 = arith.constant 0 : i32
    return %c0_i32, %c0_i32_0 : i32, i32
  }
  func.func @transform_3(%arg0: i32) -> (i32, i32) {
    %c0_i32 = arith.constant 0 : i32
    %c0_i32_0 = arith.constant 0 : i32
    %c0_i32_1 = arith.constant 0 : i32
    return %c0_i32, %c0_i32_0 : i32, i32
  }
  func.func @transform_4(%arg0: i32) -> (i32, i32, i32) {
    %c0_i32 = arith.constant 0 : i32
    %c0_i32_0 = arith.constant 0 : i32
    %c0_i32_1 = arith.constant 0 : i32
    return %arg0, %c0_i32, %c0_i32_0 : i32, i32, i32
  }
  func.func @transform_5(%arg0: i32) -> (i32, i32, i32) {
    %c0_i32 = arith.constant 0 : i32
    %c0_i32_0 = arith.constant 0 : i32
    %c0_i32_1 = arith.constant 0 : i32
    return %arg0, %c0_i32, %c0_i32_0 : i32, i32, i32
  }
}

module attributes {stable_mosaic.version = 11 : i64} {
  func.func @_aspp_kernel(%arg0: i32, %arg1: memref<128x128xbf16, #tpu.memory_space<vmem>>, %arg2: memref<2x24x24x128xbf16, #tpu.memory_space<vmem>>, %arg3: memref<2x1x128xbf16, #tpu.memory_space<vmem>>, %arg4: memref<1x128x256xbf16, #tpu.memory_space<vmem>>, %arg5: memref<1x1152x256xbf16, #tpu.memory_space<vmem>>, %arg6: memref<1x128x256xbf16, #tpu.memory_space<vmem>>, %arg7: memref<1x128x256xbf16, #tpu.memory_space<vmem>>, %arg8: memref<1x128x256xbf16, #tpu.memory_space<vmem>>, %arg9: memref<1x1280x256xbf16, #tpu.memory_space<vmem>>, %arg10: memref<1x256x128xbf16, #tpu.memory_space<vmem>>, %arg11: memref<1x6x256xf32, #tpu.memory_space<vmem>>, %arg12: memref<1x6x256xf32, #tpu.memory_space<vmem>>, %arg13: memref<1x1x128xf32, #tpu.memory_space<vmem>>, %arg14: memref<1x128x128xbf16, #tpu.memory_space<vmem>>, %arg15: memref<128x1152xbf16, #tpu.memory_space<vmem>>) attributes {dimension_semantics = [#tpu.dimension_semantics<parallel>], iteration_bounds = array<i64: 2>, scalar_prefetch = 0 : i64, scratch_operands = 1 : i64, tpu.core_type = #tpu.core_type<tc>, window_params = [{pipeline_mode = #tpu.pipeline_mode<synchronous>, transform_indices = @transform_0, window_bounds = array<i64: 128, 128>}, {pipeline_mode = #tpu.pipeline_mode<synchronous>, transform_indices = @transform_1, window_bounds = array<i64: 2, 24, 24, 128>}, {pipeline_mode = #tpu.pipeline_mode<synchronous>, transform_indices = @transform_2, window_bounds = array<i64: 2, 1, 128>}, {transform_indices = @transform_3, window_bounds = array<i64: 1, 128, 256>}, {transform_indices = @transform_4, window_bounds = array<i64: 1, 1152, 256>}, {transform_indices = @transform_5, window_bounds = array<i64: 1, 128, 256>}, {transform_indices = @transform_6, window_bounds = array<i64: 1, 128, 256>}, {transform_indices = @transform_7, window_bounds = array<i64: 1, 128, 256>}, {transform_indices = @transform_8, window_bounds = array<i64: 1, 1280, 256>}, {transform_indices = @transform_9, window_bounds = array<i64: 1, 256, 128>}, {transform_indices = @transform_10, window_bounds = array<i64: 1, 6, 256>}, {transform_indices = @transform_11, window_bounds = array<i64: 1, 6, 256>}, {transform_indices = @transform_12, window_bounds = array<i64: 1, 1, 128>}, {transform_indices = @transform_13, window_bounds = array<i64: 1, 128, 128>}]} {
    %c0 = arith.constant 0 : index
    %c0_0 = arith.constant 0 : index
    %0 = vector.load %arg1[%c0, %c0_0] : memref<128x128xbf16, #tpu.memory_space<vmem>>, vector<128x128xbf16>
    %c0_1 = arith.constant 0 : index
    %c0_2 = arith.constant 0 : index
    %c0_3 = arith.constant 0 : index
    %1 = vector.load %arg11[%c0_1, %c0_2, %c0_3] : memref<1x6x256xf32, #tpu.memory_space<vmem>>, vector<1x6x256xf32>
    %2 = vector.shape_cast %1 : vector<1x6x256xf32> to vector<6x256xf32>
    %c0_4 = arith.constant 0 : index
    %c0_5 = arith.constant 0 : index
    %c0_6 = arith.constant 0 : index
    %3 = vector.load %arg12[%c0_4, %c0_5, %c0_6] : memref<1x6x256xf32, #tpu.memory_space<vmem>>, vector<1x6x256xf32>
    %4 = vector.shape_cast %3 : vector<1x6x256xf32> to vector<6x256xf32>
    %c0_7 = arith.constant 0 : index
    %c0_8 = arith.constant 0 : index
    %c0_9 = arith.constant 0 : index
    %5 = vector.load %arg4[%c0_7, %c0_8, %c0_9] : memref<1x128x256xbf16, #tpu.memory_space<vmem>>, vector<1x128x256xbf16>
    %6 = vector.shape_cast %5 : vector<1x128x256xbf16> to vector<128x256xbf16>
    %cst = arith.constant dense<0.000000e+00> : vector<128x256xf32>
    %7 = tpu.matmul %0, %6, %cst {dimension_numbers = #tpu.dot_dimension_numbers<[1], [0], [0], [1], [0, 0, 1, 1], [], []>} : vector<128x128xbf16>, vector<128x256xbf16>, vector<128x256xf32> -> vector<128x256xf32>
    %8 = vector.extract_strided_slice %2 {offsets = [0, 0], sizes = [1, 256], strides = [1, 1]} : vector<6x256xf32> to vector<1x256xf32>
    %9 = vector.shape_cast %8 : vector<1x256xf32> to vector<256xf32>
    %10 = vector.shape_cast %9 : vector<256xf32> to vector<1x256xf32>
    %11 = vector.broadcast %10 : vector<1x256xf32> to vector<128x256xf32>
    %12 = arith.mulf %7, %11 : vector<128x256xf32>
    %13 = vector.extract_strided_slice %4 {offsets = [0, 0], sizes = [1, 256], strides = [1, 1]} : vector<6x256xf32> to vector<1x256xf32>
    %14 = vector.shape_cast %13 : vector<1x256xf32> to vector<256xf32>
    %15 = vector.shape_cast %14 : vector<256xf32> to vector<1x256xf32>
    %16 = vector.broadcast %15 : vector<1x256xf32> to vector<128x256xf32>
    %17 = arith.addf %12, %16 : vector<128x256xf32>
    %cst_10 = arith.constant 0.000000e+00 : f32
    %18 = vector.broadcast %cst_10 : f32 to vector<128x256xf32>
    %19 = arith.maximumf %17, %18 : vector<128x256xf32>
    %20 = arith.truncf %19 : vector<128x256xf32> to vector<128x256xbf16>
    %c0_11 = arith.constant 0 : index
    %c0_12 = arith.constant 0 : index
    %c0_13 = arith.constant 0 : index
    %21 = vector.load %arg9[%c0_11, %c0_12, %c0_13] : memref<1x1280x256xbf16, #tpu.memory_space<vmem>>, vector<1x256x256xbf16>
    %22 = vector.shape_cast %21 : vector<1x256x256xbf16> to vector<256x256xbf16>
    %cst_14 = arith.constant dense<0.000000e+00> : vector<128x256xf32>
    %23 = tpu.matmul %20, %22, %cst_14 {dimension_numbers = #tpu.dot_dimension_numbers<[1], [0], [0], [1], [0, 0, 1, 1], [], []>} : vector<128x256xbf16>, vector<256x256xbf16>, vector<128x256xf32> -> vector<128x256xf32>
    %c0_15 = arith.constant 0 : index
    %c2 = arith.constant 2 : index
    %c2_16 = arith.constant 2 : index
    %c0_17 = arith.constant 0 : index
    %24 = vector.load %arg2[%c0_15, %c2, %c2_16, %c0_17] : memref<2x24x24x128xbf16, #tpu.memory_space<vmem>>, vector<2x8x8x128xbf16>
    %25 = vector.shape_cast %24 : vector<2x8x8x128xbf16> to vector<128x128xbf16>
    %c0_18 = arith.constant 0 : index
    %c0_19 = arith.constant 0 : index
    %26 = vector.load %arg15[%c0_18, %c0_19] : memref<128x1152xbf16, #tpu.memory_space<vmem>>, vector<128x128xbf16>
    tpu.vector_store %arg15[%c0_18, %c0_19], %25 {strides = array<i32>} : memref<128x1152xbf16, #tpu.memory_space<vmem>>, vector<128x128xbf16>,
    %c0_20 = arith.constant 0 : index
    %c2_21 = arith.constant 2 : index
    %c8 = arith.constant 8 : index
    %c0_22 = arith.constant 0 : index
    %27 = vector.load %arg2[%c0_20, %c2_21, %c8, %c0_22] : memref<2x24x24x128xbf16, #tpu.memory_space<vmem>>, vector<2x8x8x128xbf16>
    %28 = vector.shape_cast %27 : vector<2x8x8x128xbf16> to vector<128x128xbf16>
    %c0_23 = arith.constant 0 : index
    %c128 = arith.constant 128 : index
    %29 = vector.load %arg15[%c0_23, %c128] : memref<128x1152xbf16, #tpu.memory_space<vmem>>, vector<128x128xbf16>
    tpu.vector_store %arg15[%c0_23, %c128], %28 {strides = array<i32>} : memref<128x1152xbf16, #tpu.memory_space<vmem>>, vector<128x128xbf16>,
    %c0_24 = arith.constant 0 : index
    %c2_25 = arith.constant 2 : index
    %c14 = arith.constant 14 : index
    %c0_26 = arith.constant 0 : index
    %30 = vector.load %arg2[%c0_24, %c2_25, %c14, %c0_26] : memref<2x24x24x128xbf16, #tpu.memory_space<vmem>>, vector<2x8x8x128xbf16>
    %31 = vector.shape_cast %30 : vector<2x8x8x128xbf16> to vector<128x128xbf16>
    %c0_27 = arith.constant 0 : index
    %c256 = arith.constant 256 : index
    %32 = vector.load %arg15[%c0_27, %c256] : memref<128x1152xbf16, #tpu.memory_space<vmem>>, vector<128x128xbf16>
    tpu.vector_store %arg15[%c0_27, %c256], %31 {strides = array<i32>} : memref<128x1152xbf16, #tpu.memory_space<vmem>>, vector<128x128xbf16>,
    %c0_28 = arith.constant 0 : index
    %c8_29 = arith.constant 8 : index
    %c2_30 = arith.constant 2 : index
    %c0_31 = arith.constant 0 : index
    %33 = vector.load %arg2[%c0_28, %c8_29, %c2_30, %c0_31] : memref<2x24x24x128xbf16, #tpu.memory_space<vmem>>, vector<2x8x8x128xbf16>
    %34 = vector.shape_cast %33 : vector<2x8x8x128xbf16> to vector<128x128xbf16>
    %c0_32 = arith.constant 0 : index
    %c384 = arith.constant 384 : index
    %35 = vector.load %arg15[%c0_32, %c384] : memref<128x1152xbf16, #tpu.memory_space<vmem>>, vector<128x128xbf16>
    tpu.vector_store %arg15[%c0_32, %c384], %34 {strides = array<i32>} : memref<128x1152xbf16, #tpu.memory_space<vmem>>, vector<128x128xbf16>,
    %c0_33 = arith.constant 0 : index
    %c8_34 = arith.constant 8 : index
    %c8_35 = arith.constant 8 : index
    %c0_36 = arith.constant 0 : index
    %36 = vector.load %arg2[%c0_33, %c8_34, %c8_35, %c0_36] : memref<2x24x24x128xbf16, #tpu.memory_space<vmem>>, vector<2x8x8x128xbf16>
    %37 = vector.shape_cast %36 : vector<2x8x8x128xbf16> to vector<128x128xbf16>
    %c0_37 = arith.constant 0 : index
    %c512 = arith.constant 512 : index
    %38 = vector.load %arg15[%c0_37, %c512] : memref<128x1152xbf16, #tpu.memory_space<vmem>>, vector<128x128xbf16>
    tpu.vector_store %arg15[%c0_37, %c512], %37 {strides = array<i32>} : memref<128x1152xbf16, #tpu.memory_space<vmem>>, vector<128x128xbf16>,
    %c0_38 = arith.constant 0 : index
    %c8_39 = arith.constant 8 : index
    %c14_40 = arith.constant 14 : index
    %c0_41 = arith.constant 0 : index
    %39 = vector.load %arg2[%c0_38, %c8_39, %c14_40, %c0_41] : memref<2x24x24x128xbf16, #tpu.memory_space<vmem>>, vector<2x8x8x128xbf16>
    %40 = vector.shape_cast %39 : vector<2x8x8x128xbf16> to vector<128x128xbf16>
    %c0_42 = arith.constant 0 : index
    %c640 = arith.constant 640 : index
    %41 = vector.load %arg15[%c0_42, %c640] : memref<128x1152xbf16, #tpu.memory_space<vmem>>, vector<128x128xbf16>
    tpu.vector_store %arg15[%c0_42, %c640], %40 {strides = array<i32>} : memref<128x1152xbf16, #tpu.memory_space<vmem>>, vector<128x128xbf16>,
    %c0_43 = arith.constant 0 : index
    %c14_44 = arith.constant 14 : index
    %c2_45 = arith.constant 2 : index
    %c0_46 = arith.constant 0 : index
    %42 = vector.load %arg2[%c0_43, %c14_44, %c2_45, %c0_46] : memref<2x24x24x128xbf16, #tpu.memory_space<vmem>>, vector<2x8x8x128xbf16>
    %43 = vector.shape_cast %42 : vector<2x8x8x128xbf16> to vector<128x128xbf16>
    %c0_47 = arith.constant 0 : index
    %c768 = arith.constant 768 : index
    %44 = vector.load %arg15[%c0_47, %c768] : memref<128x1152xbf16, #tpu.memory_space<vmem>>, vector<128x128xbf16>
    tpu.vector_store %arg15[%c0_47, %c768], %43 {strides = array<i32>} : memref<128x1152xbf16, #tpu.memory_space<vmem>>, vector<128x128xbf16>,
    %c0_48 = arith.constant 0 : index
    %c14_49 = arith.constant 14 : index
    %c8_50 = arith.constant 8 : index
    %c0_51 = arith.constant 0 : index
    %45 = vector.load %arg2[%c0_48, %c14_49, %c8_50, %c0_51] : memref<2x24x24x128xbf16, #tpu.memory_space<vmem>>, vector<2x8x8x128xbf16>
    %46 = vector.shape_cast %45 : vector<2x8x8x128xbf16> to vector<128x128xbf16>
    %c0_52 = arith.constant 0 : index
    %c896 = arith.constant 896 : index
    %47 = vector.load %arg15[%c0_52, %c896] : memref<128x1152xbf16, #tpu.memory_space<vmem>>, vector<128x128xbf16>
    tpu.vector_store %arg15[%c0_52, %c896], %46 {strides = array<i32>} : memref<128x1152xbf16, #tpu.memory_space<vmem>>, vector<128x128xbf16>,
    %c0_53 = arith.constant 0 : index
    %c14_54 = arith.constant 14 : index
    %c14_55 = arith.constant 14 : index
    %c0_56 = arith.constant 0 : index
    %48 = vector.load %arg2[%c0_53, %c14_54, %c14_55, %c0_56] : memref<2x24x24x128xbf16, #tpu.memory_space<vmem>>, vector<2x8x8x128xbf16>
    %49 = vector.shape_cast %48 : vector<2x8x8x128xbf16> to vector<128x128xbf16>
    %c0_57 = arith.constant 0 : index
    %c1024 = arith.constant 1024 : index
    %50 = vector.load %arg15[%c0_57, %c1024] : memref<128x1152xbf16, #tpu.memory_space<vmem>>, vector<128x128xbf16>
    tpu.vector_store %arg15[%c0_57, %c1024], %49 {strides = array<i32>} : memref<128x1152xbf16, #tpu.memory_space<vmem>>, vector<128x128xbf16>,
    %c0_58 = arith.constant 0 : index
    %c0_59 = arith.constant 0 : index
    %51 = vector.load %arg15[%c0_58, %c0_59] : memref<128x1152xbf16, #tpu.memory_space<vmem>>, vector<128x1152xbf16>
    %c0_60 = arith.constant 0 : index
    %c0_61 = arith.constant 0 : index
    %c0_62 = arith.constant 0 : index
    %52 = vector.load %arg5[%c0_60, %c0_61, %c0_62] : memref<1x1152x256xbf16, #tpu.memory_space<vmem>>, vector<1x1152x256xbf16>
    %53 = vector.shape_cast %52 : vector<1x1152x256xbf16> to vector<1152x256xbf16>
    %cst_63 = arith.constant dense<0.000000e+00> : vector<128x256xf32>
    %54 = tpu.matmul %51, %53, %cst_63 {dimension_numbers = #tpu.dot_dimension_numbers<[1], [0], [0], [1], [0, 0, 1, 1], [], []>} : vector<128x1152xbf16>, vector<1152x256xbf16>, vector<128x256xf32> -> vector<128x256xf32>
    %55 = vector.extract_strided_slice %2 {offsets = [1, 0], sizes = [1, 256], strides = [1, 1]} : vector<6x256xf32> to vector<1x256xf32>
    %56 = vector.shape_cast %55 : vector<1x256xf32> to vector<256xf32>
    %57 = vector.shape_cast %56 : vector<256xf32> to vector<1x256xf32>
    %58 = vector.broadcast %57 : vector<1x256xf32> to vector<128x256xf32>
    %59 = arith.mulf %54, %58 : vector<128x256xf32>
    %60 = vector.extract_strided_slice %4 {offsets = [1, 0], sizes = [1, 256], strides = [1, 1]} : vector<6x256xf32> to vector<1x256xf32>
    %61 = vector.shape_cast %60 : vector<1x256xf32> to vector<256xf32>
    %62 = vector.shape_cast %61 : vector<256xf32> to vector<1x256xf32>
    %63 = vector.broadcast %62 : vector<1x256xf32> to vector<128x256xf32>
    %64 = arith.addf %59, %63 : vector<128x256xf32>
    %cst_64 = arith.constant 0.000000e+00 : f32
    %65 = vector.broadcast %cst_64 : f32 to vector<128x256xf32>
    %66 = arith.maximumf %64, %65 : vector<128x256xf32>
    %67 = arith.truncf %66 : vector<128x256xf32> to vector<128x256xbf16>
    %c0_65 = arith.constant 0 : index
    %c256_66 = arith.constant 256 : index
    %c0_67 = arith.constant 0 : index
    %68 = vector.load %arg9[%c0_65, %c256_66, %c0_67] : memref<1x1280x256xbf16, #tpu.memory_space<vmem>>, vector<1x256x256xbf16>
    %69 = vector.shape_cast %68 : vector<1x256x256xbf16> to vector<256x256xbf16>
    %cst_68 = arith.constant dense<0.000000e+00> : vector<128x256xf32>
    %70 = tpu.matmul %67, %69, %cst_68 {dimension_numbers = #tpu.dot_dimension_numbers<[1], [0], [0], [1], [0, 0, 1, 1], [], []>} : vector<128x256xbf16>, vector<256x256xbf16>, vector<128x256xf32> -> vector<128x256xf32>
    %71 = arith.addf %23, %70 : vector<128x256xf32>
    %c0_69 = arith.constant 0 : index
    %c0_70 = arith.constant 0 : index
    %c0_71 = arith.constant 0 : index
    %72 = vector.load %arg6[%c0_69, %c0_70, %c0_71] : memref<1x128x256xbf16, #tpu.memory_space<vmem>>, vector<1x128x256xbf16>
    %73 = vector.shape_cast %72 : vector<1x128x256xbf16> to vector<128x256xbf16>
    %cst_72 = arith.constant dense<0.000000e+00> : vector<128x256xf32>
    %74 = tpu.matmul %0, %73, %cst_72 {dimension_numbers = #tpu.dot_dimension_numbers<[1], [0], [0], [1], [0, 0, 1, 1], [], []>} : vector<128x128xbf16>, vector<128x256xbf16>, vector<128x256xf32> -> vector<128x256xf32>
    %75 = vector.extract_strided_slice %2 {offsets = [2, 0], sizes = [1, 256], strides = [1, 1]} : vector<6x256xf32> to vector<1x256xf32>
    %76 = vector.shape_cast %75 : vector<1x256xf32> to vector<256xf32>
    %77 = vector.shape_cast %76 : vector<256xf32> to vector<1x256xf32>
    %78 = vector.broadcast %77 : vector<1x256xf32> to vector<128x256xf32>
    %79 = arith.mulf %74, %78 : vector<128x256xf32>
    %80 = vector.extract_strided_slice %4 {offsets = [2, 0], sizes = [1, 256], strides = [1, 1]} : vector<6x256xf32> to vector<1x256xf32>
    %81 = vector.shape_cast %80 : vector<1x256xf32> to vector<256xf32>
    %82 = vector.shape_cast %81 : vector<256xf32> to vector<1x256xf32>
    %83 = vector.broadcast %82 : vector<1x256xf32> to vector<128x256xf32>
    %84 = arith.addf %79, %83 : vector<128x256xf32>
    %cst_73 = arith.constant 0.000000e+00 : f32
    %85 = vector.broadcast %cst_73 : f32 to vector<128x256xf32>
    %86 = arith.maximumf %84, %85 : vector<128x256xf32>
    %87 = arith.truncf %86 : vector<128x256xf32> to vector<128x256xbf16>
    %c0_74 = arith.constant 0 : index
    %c512_75 = arith.constant 512 : index
    %c0_76 = arith.constant 0 : index
    %88 = vector.load %arg9[%c0_74, %c512_75, %c0_76] : memref<1x1280x256xbf16, #tpu.memory_space<vmem>>, vector<1x256x256xbf16>
    %89 = vector.shape_cast %88 : vector<1x256x256xbf16> to vector<256x256xbf16>
    %cst_77 = arith.constant dense<0.000000e+00> : vector<128x256xf32>
    %90 = tpu.matmul %87, %89, %cst_77 {dimension_numbers = #tpu.dot_dimension_numbers<[1], [0], [0], [1], [0, 0, 1, 1], [], []>} : vector<128x256xbf16>, vector<256x256xbf16>, vector<128x256xf32> -> vector<128x256xf32>
    %91 = arith.addf %71, %90 : vector<128x256xf32>
    %c0_78 = arith.constant 0 : index
    %c0_79 = arith.constant 0 : index
    %c0_80 = arith.constant 0 : index
    %92 = vector.load %arg7[%c0_78, %c0_79, %c0_80] : memref<1x128x256xbf16, #tpu.memory_space<vmem>>, vector<1x128x256xbf16>
    %93 = vector.shape_cast %92 : vector<1x128x256xbf16> to vector<128x256xbf16>
    %cst_81 = arith.constant dense<0.000000e+00> : vector<128x256xf32>
    %94 = tpu.matmul %0, %93, %cst_81 {dimension_numbers = #tpu.dot_dimension_numbers<[1], [0], [0], [1], [0, 0, 1, 1], [], []>} : vector<128x128xbf16>, vector<128x256xbf16>, vector<128x256xf32> -> vector<128x256xf32>
    %95 = vector.extract_strided_slice %2 {offsets = [3, 0], sizes = [1, 256], strides = [1, 1]} : vector<6x256xf32> to vector<1x256xf32>
    %96 = vector.shape_cast %95 : vector<1x256xf32> to vector<256xf32>
    %97 = vector.shape_cast %96 : vector<256xf32> to vector<1x256xf32>
    %98 = vector.broadcast %97 : vector<1x256xf32> to vector<128x256xf32>
    %99 = arith.mulf %94, %98 : vector<128x256xf32>
    %100 = vector.extract_strided_slice %4 {offsets = [3, 0], sizes = [1, 256], strides = [1, 1]} : vector<6x256xf32> to vector<1x256xf32>
    %101 = vector.shape_cast %100 : vector<1x256xf32> to vector<256xf32>
    %102 = vector.shape_cast %101 : vector<256xf32> to vector<1x256xf32>
    %103 = vector.broadcast %102 : vector<1x256xf32> to vector<128x256xf32>
    %104 = arith.addf %99, %103 : vector<128x256xf32>
    %cst_82 = arith.constant 0.000000e+00 : f32
    %105 = vector.broadcast %cst_82 : f32 to vector<128x256xf32>
    %106 = arith.maximumf %104, %105 : vector<128x256xf32>
    %107 = arith.truncf %106 : vector<128x256xf32> to vector<128x256xbf16>
    %c0_83 = arith.constant 0 : index
    %c768_84 = arith.constant 768 : index
    %c0_85 = arith.constant 0 : index
    %108 = vector.load %arg9[%c0_83, %c768_84, %c0_85] : memref<1x1280x256xbf16, #tpu.memory_space<vmem>>, vector<1x256x256xbf16>
    %109 = vector.shape_cast %108 : vector<1x256x256xbf16> to vector<256x256xbf16>
    %cst_86 = arith.constant dense<0.000000e+00> : vector<128x256xf32>
    %110 = tpu.matmul %107, %109, %cst_86 {dimension_numbers = #tpu.dot_dimension_numbers<[1], [0], [0], [1], [0, 0, 1, 1], [], []>} : vector<128x256xbf16>, vector<256x256xbf16>, vector<128x256xf32> -> vector<128x256xf32>
    %111 = arith.addf %91, %110 : vector<128x256xf32>
    %c0_87 = arith.constant 0 : index
    %c0_88 = arith.constant 0 : index
    %c0_89 = arith.constant 0 : index
    %112 = vector.load %arg3[%c0_87, %c0_88, %c0_89] : memref<2x1x128xbf16, #tpu.memory_space<vmem>>, vector<2x1x128xbf16>
    %113 = vector.shape_cast %112 : vector<2x1x128xbf16> to vector<2x128xbf16>
    %c0_90 = arith.constant 0 : index
    %c0_91 = arith.constant 0 : index
    %c0_92 = arith.constant 0 : index
    %114 = vector.load %arg8[%c0_90, %c0_91, %c0_92] : memref<1x128x256xbf16, #tpu.memory_space<vmem>>, vector<1x128x256xbf16>
    %115 = vector.shape_cast %114 : vector<1x128x256xbf16> to vector<128x256xbf16>
    %cst_93 = arith.constant dense<0.000000e+00> : vector<2x256xf32>
    %116 = tpu.matmul %113, %115, %cst_93 {dimension_numbers = #tpu.dot_dimension_numbers<[1], [0], [0], [1], [0, 0, 1, 1], [], []>} : vector<2x128xbf16>, vector<128x256xbf16>, vector<2x256xf32> -> vector<2x256xf32>
    %117 = vector.extract_strided_slice %2 {offsets = [4, 0], sizes = [1, 256], strides = [1, 1]} : vector<6x256xf32> to vector<1x256xf32>
    %118 = vector.shape_cast %117 : vector<1x256xf32> to vector<256xf32>
    %119 = vector.shape_cast %118 : vector<256xf32> to vector<1x256xf32>
    %120 = vector.broadcast %119 : vector<1x256xf32> to vector<2x256xf32>
    %121 = arith.mulf %116, %120 : vector<2x256xf32>
    %122 = vector.extract_strided_slice %4 {offsets = [4, 0], sizes = [1, 256], strides = [1, 1]} : vector<6x256xf32> to vector<1x256xf32>
    %123 = vector.shape_cast %122 : vector<1x256xf32> to vector<256xf32>
    %124 = vector.shape_cast %123 : vector<256xf32> to vector<1x256xf32>
    %125 = vector.broadcast %124 : vector<1x256xf32> to vector<2x256xf32>
    %126 = arith.addf %121, %125 : vector<2x256xf32>
    %cst_94 = arith.constant 0.000000e+00 : f32
    %127 = vector.broadcast %cst_94 : f32 to vector<2x256xf32>
    %128 = arith.maximumf %126, %127 : vector<2x256xf32>
    %129 = arith.truncf %128 : vector<2x256xf32> to vector<2x256xbf16>
    %c0_95 = arith.constant 0 : index
    %c1024_96 = arith.constant 1024 : index
    %c0_97 = arith.constant 0 : index
    %130 = vector.load %arg9[%c0_95, %c1024_96, %c0_97] : memref<1x1280x256xbf16, #tpu.memory_space<vmem>>, vector<1x256x256xbf16>
    %131 = vector.shape_cast %130 : vector<1x256x256xbf16> to vector<256x256xbf16>
    %cst_98 = arith.constant dense<0.000000e+00> : vector<2x256xf32>
    %132 = tpu.matmul %129, %131, %cst_98 {dimension_numbers = #tpu.dot_dimension_numbers<[1], [0], [0], [1], [0, 0, 1, 1], [], []>} : vector<2x256xbf16>, vector<256x256xbf16>, vector<2x256xf32> -> vector<2x256xf32>
    %133 = vector.shape_cast %111 : vector<128x256xf32> to vector<2x64x256xf32>
    %134 = vector.shape_cast %132 : vector<2x256xf32> to vector<2x1x256xf32>
    %135 = vector.broadcast %134 : vector<2x1x256xf32> to vector<2x64x256xf32>
    %136 = arith.addf %133, %135 : vector<2x64x256xf32>
    %137 = vector.shape_cast %136 : vector<2x64x256xf32> to vector<128x256xf32>
    %138 = vector.extract_strided_slice %2 {offsets = [5, 0], sizes = [1, 256], strides = [1, 1]} : vector<6x256xf32> to vector<1x256xf32>
    %139 = vector.shape_cast %138 : vector<1x256xf32> to vector<256xf32>
    %140 = vector.shape_cast %139 : vector<256xf32> to vector<1x256xf32>
    %141 = vector.broadcast %140 : vector<1x256xf32> to vector<128x256xf32>
    %142 = arith.mulf %137, %141 : vector<128x256xf32>
    %143 = vector.extract_strided_slice %4 {offsets = [5, 0], sizes = [1, 256], strides = [1, 1]} : vector<6x256xf32> to vector<1x256xf32>
    %144 = vector.shape_cast %143 : vector<1x256xf32> to vector<256xf32>
    %145 = vector.shape_cast %144 : vector<256xf32> to vector<1x256xf32>
    %146 = vector.broadcast %145 : vector<1x256xf32> to vector<128x256xf32>
    %147 = arith.addf %142, %146 : vector<128x256xf32>
    %cst_99 = arith.constant 0.000000e+00 : f32
    %148 = vector.broadcast %cst_99 : f32 to vector<128x256xf32>
    %149 = arith.maximumf %147, %148 : vector<128x256xf32>
    %150 = arith.truncf %149 : vector<128x256xf32> to vector<128x256xbf16>
    %c0_100 = arith.constant 0 : index
    %c0_101 = arith.constant 0 : index
    %c0_102 = arith.constant 0 : index
    %151 = vector.load %arg10[%c0_100, %c0_101, %c0_102] : memref<1x256x128xbf16, #tpu.memory_space<vmem>>, vector<1x256x128xbf16>
    %152 = vector.shape_cast %151 : vector<1x256x128xbf16> to vector<256x128xbf16>
    %cst_103 = arith.constant dense<0.000000e+00> : vector<128x128xf32>
    %153 = tpu.matmul %150, %152, %cst_103 {dimension_numbers = #tpu.dot_dimension_numbers<[1], [0], [0], [1], [0, 0, 1, 1], [], []>} : vector<128x256xbf16>, vector<256x128xbf16>, vector<128x128xf32> -> vector<128x128xf32>
    %c0_104 = arith.constant 0 : index
    %c0_105 = arith.constant 0 : index
    %c0_106 = arith.constant 0 : index
    %154 = vector.load %arg13[%c0_104, %c0_105, %c0_106] : memref<1x1x128xf32, #tpu.memory_space<vmem>>, vector<1x1x128xf32>
    %155 = vector.shape_cast %154 : vector<1x1x128xf32> to vector<1x128xf32>
    %156 = vector.broadcast %155 : vector<1x128xf32> to vector<128x128xf32>
    %157 = arith.addf %153, %156 : vector<128x128xf32>
    %158 = arith.truncf %157 : vector<128x128xf32> to vector<128x128xbf16>
    %c0_107 = arith.constant 0 : index
    %c0_108 = arith.constant 0 : index
    %c0_109 = arith.constant 0 : index
    %159 = vector.load %arg14[%c0_107, %c0_108, %c0_109] : memref<1x128x128xbf16, #tpu.memory_space<vmem>>, vector<1x128x128xbf16>
    %160 = vector.shape_cast %159 : vector<1x128x128xbf16> to vector<128x128xbf16>
    %161 = vector.shape_cast %158 : vector<128x128xbf16> to vector<1x128x128xbf16>
    tpu.vector_store %arg14[%c0_107, %c0_108, %c0_109], %161 {strides = array<i32>} : memref<1x128x128xbf16, #tpu.memory_space<vmem>>, vector<1x128x128xbf16>,
    return
  }
  func.func @transform_0(%arg0: i32) -> (i32, i32) {
    %c0_i32 = arith.constant 0 : i32
    %c0_i32_0 = arith.constant 0 : i32
    %c0_i32_1 = arith.constant 0 : i32
    return %c0_i32, %c0_i32_0 : i32, i32
  }
  func.func @transform_1(%arg0: i32) -> (i32, i32, i32, i32) {
    %c0_i32 = arith.constant 0 : i32
    %c0_i32_0 = arith.constant 0 : i32
    %c0_i32_1 = arith.constant 0 : i32
    %c0_i32_2 = arith.constant 0 : i32
    %c0_i32_3 = arith.constant 0 : i32
    return %c0_i32, %c0_i32_0, %c0_i32_1, %c0_i32_2 : i32, i32, i32, i32
  }
  func.func @transform_2(%arg0: i32) -> (i32, i32, i32) {
    %c0_i32 = arith.constant 0 : i32
    %c0_i32_0 = arith.constant 0 : i32
    %c0_i32_1 = arith.constant 0 : i32
    %c0_i32_2 = arith.constant 0 : i32
    return %c0_i32, %c0_i32_0, %c0_i32_1 : i32, i32, i32
  }
  func.func @transform_3(%arg0: i32) -> (i32, i32, i32) {
    %c0_i32 = arith.constant 0 : i32
    %c0_i32_0 = arith.constant 0 : i32
    %c0_i32_1 = arith.constant 0 : i32
    return %arg0, %c0_i32, %c0_i32_0 : i32, i32, i32
  }
  func.func @transform_4(%arg0: i32) -> (i32, i32, i32) {
    %c0_i32 = arith.constant 0 : i32
    %c0_i32_0 = arith.constant 0 : i32
    %c0_i32_1 = arith.constant 0 : i32
    return %arg0, %c0_i32, %c0_i32_0 : i32, i32, i32
  }
  func.func @transform_5(%arg0: i32) -> (i32, i32, i32) {
    %c0_i32 = arith.constant 0 : i32
    %c0_i32_0 = arith.constant 0 : i32
    %c0_i32_1 = arith.constant 0 : i32
    return %arg0, %c0_i32, %c0_i32_0 : i32, i32, i32
  }
  func.func @transform_6(%arg0: i32) -> (i32, i32, i32) {
    %c0_i32 = arith.constant 0 : i32
    %c0_i32_0 = arith.constant 0 : i32
    %c0_i32_1 = arith.constant 0 : i32
    return %arg0, %c0_i32, %c0_i32_0 : i32, i32, i32
  }
  func.func @transform_7(%arg0: i32) -> (i32, i32, i32) {
    %c0_i32 = arith.constant 0 : i32
    %c0_i32_0 = arith.constant 0 : i32
    %c0_i32_1 = arith.constant 0 : i32
    return %arg0, %c0_i32, %c0_i32_0 : i32, i32, i32
  }
  func.func @transform_8(%arg0: i32) -> (i32, i32, i32) {
    %c0_i32 = arith.constant 0 : i32
    %c0_i32_0 = arith.constant 0 : i32
    %c0_i32_1 = arith.constant 0 : i32
    return %arg0, %c0_i32, %c0_i32_0 : i32, i32, i32
  }
  func.func @transform_9(%arg0: i32) -> (i32, i32, i32) {
    %c0_i32 = arith.constant 0 : i32
    %c0_i32_0 = arith.constant 0 : i32
    %c0_i32_1 = arith.constant 0 : i32
    return %arg0, %c0_i32, %c0_i32_0 : i32, i32, i32
  }
  func.func @transform_10(%arg0: i32) -> (i32, i32, i32) {
    %c0_i32 = arith.constant 0 : i32
    %c0_i32_0 = arith.constant 0 : i32
    %c0_i32_1 = arith.constant 0 : i32
    return %arg0, %c0_i32, %c0_i32_0 : i32, i32, i32
  }
  func.func @transform_11(%arg0: i32) -> (i32, i32, i32) {
    %c0_i32 = arith.constant 0 : i32
    %c0_i32_0 = arith.constant 0 : i32
    %c0_i32_1 = arith.constant 0 : i32
    return %arg0, %c0_i32, %c0_i32_0 : i32, i32, i32
  }
  func.func @transform_12(%arg0: i32) -> (i32, i32, i32) {
    %c0_i32 = arith.constant 0 : i32
    %c0_i32_0 = arith.constant 0 : i32
    %c0_i32_1 = arith.constant 0 : i32
    return %arg0, %c0_i32, %c0_i32_0 : i32, i32, i32
  }
  func.func @transform_13(%arg0: i32) -> (i32, i32, i32) {
    %c0_i32 = arith.constant 0 : i32
    %c0_i32_0 = arith.constant 0 : i32
    %c0_i32_1 = arith.constant 0 : i32
    return %arg0, %c0_i32, %c0_i32_0 : i32, i32, i32
  }
}

</mosaic_0001>

<bundles_post_ra>
// kernel: dist_network_forward.4
= control target key start
LH: loop header
LB: loop body
LE: loop exit
PB: predicated region body
PF: predicated region fallthrough
CT: control target
= control target key end

     0   :  { %s1370_s18 = smov 0   ;;  %s1535_s0 = inlined_call_operand.vmem [shape: bf16[2,64,576], index: 0, kind: input, shape index: {}]   ;;  %s1536_s1 = inlined_call_operand.vmem [shape: bf16[576,128], index: 1, kind: input, shape index: {}]   ;;  %s1537_s2 = inlined_call_operand.vmem [shape: f32[1,128], index: 2, kind: input, shape index: {}]   ;;  %s1538_s3 = inlined_call_operand.vmem [shape: f32[1,128], index: 3, kind: input, shape index: {}]   ;;  %s1539_s4 = inlined_call_operand.vmem [shape: bf16[2,64,128], index: 4, kind: output, shape index: {0}]   ;;  %s1540_s5 = inlined_call_operand.vmem [shape: bf16[2,1,128], index: 5, kind: output, shape index: {1}]  }
   0x1 LB: > { %s1035_s19 = sadd.s32 4294967295, %s1338_s18   ;;  %p1039_p0 = scmp.ge.s32.totalorder %s1338_s18, 1  ;;  %s1338_s18 = sphi %s1370_s18, %s16_s18  }
   0x2   : > { %p190_p1 = scmp.lt.s32.totalorder %s1338_s18, 3 }
   0x4   : > { %p191_p2 = pnand %p1039_p0, %p190_p1 }
   0x5   : > { %v1268_v0 = vld [vmem:[%s1536_s1 + $0x40] sm:$0xff] (!%p191_p2)   ;;  %v1272_v4 = vld [vmem:[%s1536_s1 + $0x48] sm:$0xff] (!%p191_p2)   ;;  %v1276_v8 = vld [vmem:[%s1536_s1 + $0x50] sm:$0xff] (!%p191_p2)   ;;  %p221_p3 = scmp.lt.s32.totalorder (!%p191_p2), %s1035_s19, 1  ;;  %vm647_vm0 = vcmask (!%p191_p2), 523264   ;;  %vm949_vm1 = vcmask (!%p191_p2), 1040384  }
   0x6   : > { %194 = sbr.rel (%p191_p2) target bundleno = 326 (0x146), region = 36  ;;  %v1269_v1 = vld [vmem:[%s1536_s1 + $0xc0] sm:$0xff] (!%p191_p2)   ;;  %1147 = vmatprep.subr.bf16.mxu0 (!%p191_p2), %v1268_v0  ;;  %v1273_v5 = vld [vmem:[%s1536_s1 + $0xc8] sm:$0xff] (!%p191_p2)   ;;  %v1277_v9 = vld [vmem:[%s1536_s1 + $0xd0] sm:$0xff] (!%p191_p2)   ;;  %vm950_vm2 = vsmask.f32 (!%p191_p2), 256 }
   0x7   : > { %v1270_v2 = vld [vmem:[%s1536_s1] sm:$0xff] (!%p191_p2)   ;;  %1187 = vmatprep.subr.bf16.mxu1 (!%p191_p2), %v1269_v1  ;;  %v1274_v6 = vld [vmem:[%s1536_s1 + $0x8] sm:$0xff] (!%p191_p2)   ;;  %v1278_v10 = vld [vmem:[%s1536_s1 + $0x10] sm:$0xff] (!%p191_p2)  }
   0x8   : > { %v1271_v3 = vld [vmem:[%s1536_s1 + $0x80] sm:$0xff] (!%p191_p2)   ;;  %1148 = vmatpush3.bf16.msra.mxu0 (!%p191_p2), %v1270_v2  ;;  %v1275_v7 = vld [vmem:[%s1536_s1 + $0x88] sm:$0xff] (!%p191_p2)   ;;  %v1279_v11 = vld [vmem:[%s1536_s1 + $0x90] sm:$0xff] (!%p191_p2)  }
   0x9   : > { %1188 = vmatpush3.bf16.msra.mxu1 (!%p191_p2), %v1271_v3  ;;  %1149 = vmatprep.subr.bf16.mxu0 (!%p191_p2), %v1272_v4  ;;  %v1280_v12 = vld [vmem:[%s1536_s1 + $0x58] sm:$0xff] (!%p191_p2)   ;;  %v1284_v16 = vld [vmem:[%s1536_s1 + $0x60] sm:$0xff] (!%p191_p2)   ;;  %v1288_v20 = vld [vmem:[%s1536_s1 + $0x68] sm:$0xff] (!%p191_p2)  }
   0xa   : > { %1189 = vmatprep.subr.bf16.mxu1 (!%p191_p2), %v1273_v5  ;;  %v1281_v13 = vld [vmem:[%s1536_s1 + $0xd8] sm:$0xff] (!%p191_p2)   ;;  %v1285_v17 = vld [vmem:[%s1536_s1 + $0xe0] sm:$0xff] (!%p191_p2)   ;;  %v1289_v21 = vld [vmem:[%s1536_s1 + $0xe8] sm:$0xff] (!%p191_p2)  }
   0xb   : > { %v1282_v14 = vld [vmem:[%s1536_s1 + $0x18] sm:$0xff] (!%p191_p2)   ;;  %v1286_v18 = vld [vmem:[%s1536_s1 + $0x20] sm:$0xff] (!%p191_p2)   ;;  %v1290_v22 = vld [vmem:[%s1536_s1 + $0x28] sm:$0xff] (!%p191_p2)  }
   0xc   : > { %1150 = vmatpush3.bf16.msra.mxu0 (!%p191_p2), %v1274_v6  ;;  %v1283_v15 = vld [vmem:[%s1536_s1 + $0x98] sm:$0xff] (!%p191_p2)   ;;  %v1287_v19 = vld [vmem:[%s1536_s1 + $0xa0] sm:$0xff] (!%p191_p2)   ;;  %v1291_v23 = vld [vmem:[%s1536_s1 + $0xa8] sm:$0xff] (!%p191_p2)  }
   0xd   : > { %1190 = vmatpush3.bf16.msra.mxu1 %v1275_v7  ;;  %1151 = vmatprep.subr.bf16.mxu0 %v1276_v8  ;;  %s1542_s19 = smov (!%p221_p3, %s1035_s19), 1  ;;  %v1292_v24 = vld [vmem:[%s1536_s1 + $0x70] sm:$0xff]   ;;  %v1296_v28 = vld [vmem:[%s1536_s1 + $0x78] sm:$0xff]   ;;  %v1306_v36 = vld [vmem:[%s1536_s1 + $0x100] sm:$0xff]  }
   0xe   : > { %1191 = vmatprep.subr.bf16.mxu1 %v1277_v9  ;;  %v1293_v25 = vld [vmem:[%s1536_s1 + $0xf0] sm:$0xff]   ;;  %s1259_s26 = smul.u32 160, %s1542_s19  ;;  %v1297_v29 = vld [vmem:[%s1536_s1 + $0xf8] sm:$0xff]   ;;  %v1313_v39 = vld [vmem:[%s1536_s1 + $0x108] sm:$0xff]   ;;  %s1115_s6 = sshll.u32 %s1542_s19, 5 }
   0xf   : > { %v1294_v26 = vld [vmem:[%s1536_s1 + $0x30] sm:$0xff]   ;;  %v1298_v30 = vld [vmem:[%s1536_s1 + $0x38] sm:$0xff]   ;;  %s230_s9 = scalar_lea.vmem %s1539_s4, %s1115_s6  ;;  %vm951_vm3 = vmand %vm949_vm1, %vm950_vm2 }
  0x10   : > { %1152 = vmatpush3.bf16.msra.mxu0 %v1278_v10  ;;  %v1295_v27 = vld [vmem:[%s1536_s1 + $0xb0] sm:$0xff]   ;;  %s1478_s12 = scalar_lea.vmem %s1535_s0, %s1259_s26  ;;  %v1299_v31 = vld [vmem:[%s1536_s1 + $0xb8] sm:$0xff]  }
  0x11   : > { %1192 = vmatpush3.bf16.msra.mxu1 %v1279_v11  ;;  %1153 = vmatprep.subr.bf16.mxu0 %v1280_v12  ;;  %v1300_v32 = vld [vmem:[%s1478_s12] ss:$20 sps:$4 sm:$0xff]   ;;  %v1302_v33 = vld [vmem:[%s1478_s12 + $0x4] ss:$20 sps:$4 sm:$0xff]   ;;  %v1303_v34 = vld [vmem:[%s1478_s12 + $0x8] ss:$20 sps:$4 sm:$0xff]  }
  0x12   : > { %1193 = vmatprep.subr.bf16.mxu1 %v1281_v13  ;;  %v1305_v35 = vld [vmem:[%s1478_s12 + $0xc] ss:$20 sps:$4 sm:$0xff]   ;;  %692 = vmatprep.mubr.bf16.mxu0 %v1302_v33  ;;  %v1309_v38 = vld [vmem:[%s1478_s12 + $0x34] ss:$20 sps:$4 sm:$0xff]   ;;  %v1312_v41 = vld [vmem:[%s1478_s12 + $0x30] ss:$20 sps:$4 sm:$0xff]  }
  0x13   : > { %757 = vmatprep.mubr.bf16.mxu1 %v1305_v35  ;;  %v1307_v37 = vld [vmem:[%s1478_s12 + $0x2c] ss:$20 sps:$4 sm:$0xff]   ;;  %v1311_v40 = vld [vmem:[%s1478_s12 + $0x28] ss:$20 sps:$4 sm:$0xff]   ;;  %v1320_v44 = vld [vmem:[%s1536_s1 + $0x110] sm:$0xff]  }
  0x14   : > { %1154 = vmatpush3.bf16.msra.mxu0 %v1282_v14  ;;  %v1314_v42 = vld [vmem:[%s1478_s12 + $0x54] ss:$20 sps:$4 sm:$0xff]   ;;  %v1316_v43 = vld [vmem:[%s1478_s12 + $0x5c] ss:$20 sps:$4 sm:$0xff]   ;;  %v1319_v47 = vld [vmem:[%s1478_s12 + $0x58] ss:$20 sps:$4 sm:$0xff]  }
  0x15   : > { %1194 = vmatpush3.bf16.msra.mxu1 %v1283_v15  ;;  %1155 = vmatprep.subr.bf16.mxu0 %v1284_v16  ;;  %v1327_v45 = vld [vmem:[%s1536_s1 + $0x118] sm:$0xff]   ;;  %v1318_v46 = vld [vmem:[%s1478_s12 + $0x50] ss:$20 sps:$4 sm:$0xff]   ;;  %v1326_v51 = vld [vmem:[%s1478_s12 + $0x80] ss:$20 sps:$4 sm:$0xff]  }
  0x16   : > { %1195 = vmatprep.subr.bf16.mxu1 %v1285_v17  ;;  %v1321_v48 = vld [vmem:[%s1478_s12 + $0x7c] ss:$20 sps:$4 sm:$0xff]   ;;  %v1323_v49 = vld [vmem:[%s1478_s12 + $0x84] ss:$20 sps:$4 sm:$0xff]   ;;  %v1329_v53 = vld [vmem:[%s1478_s12 + $0x60] ss:$20 sps:$4 sm:$0xff]  }
  0x17   : > { %v1325_v50 = vld [vmem:[%s1478_s12 + $0x78] ss:$20 sps:$4 sm:$0xff]   ;;  %v1328_v52 = vld [vmem:[%s1478_s12 + $0x10] ss:$20 sps:$4 sm:$0xff]   ;;  %v1331_v55 = vld [vmem:[%s1478_s12 + $0x88] ss:$20 sps:$4 sm:$0xff]  }
  0x18   : > { %1156 = vmatpush3.bf16.msra.mxu0 %v1286_v18  ;;  %v1330_v54 = vld [vmem:[%s1478_s12 + $0x38] ss:$20 sps:$4 sm:$0xff]   ;;  %s233_s12 = scalar_lea.vmem %s1540_s5, %s1542_s19 }
  0x19   : > { %1196 = vmatpush3.bf16.msra.mxu1 %v1287_v19  ;;  %1157 = vmatprep.subr.bf16.mxu0 %v1288_v20 }
  0x1a   : > { %1197 = vmatprep.subr.bf16.mxu1 %v1289_v21 }
  0x1c   : > { %1158 = vmatpush3.bf16.msra.mxu0 %v1290_v22 }
  0x1d   : > { %1198 = vmatpush3.bf16.msra.mxu1 %v1291_v23  ;;  %1159 = vmatprep.subr.bf16.mxu0 %v1292_v24 }
  0x1e   : > { %1199 = vmatprep.subr.bf16.mxu1 %v1293_v25 }
  0x20   : > { %1160 = vmatpush3.bf16.msra.mxu0 %v1294_v26 }
  0x21   : > { %1200 = vmatpush3.bf16.msra.mxu1 %v1295_v27  ;;  %1161 = vmatprep.subr.bf16.mxu0 %v1296_v28 }
  0x22   : > { %1201 = vmatprep.subr.bf16.mxu1 %v1297_v29 }
  0x24   : > { %1162 = vmatpush3.bf16.msra.mxu0 %v1298_v30 }
  0x25   : > { %1202 = vmatpush3.bf16.msra.mxu1 %v1299_v31  ;;  %1235 = vmatprep.subr.bf16.mxu0 %v1306_v36 }
  0x26   : > { %1251 = vmatprep.subr.bf16.mxu1 %v1306_v36 }
  0x27   : > { %693 = vmatmul.mubr.bf16.vlgmr.msra.gmra.mrb[0].mxu0 %v1300_v32 }
  0x28   : > { %758 = vmatmul.mubr.bf16.vlgmr.msra.gmra.mrb[0].mxu1 %v1303_v34  ;;  %1236 = vmatpush3.bf16.msra.mxu0 %v1306_v36 }
  0x29   : > { %700 = vmatprep.mubr.bf16.mxu0 %v1307_v37  ;;  %765 = vmatprep.mubr.bf16.mxu1 %v1309_v38 }
  0x2a   : > { %1255 = vmatpush3.bf16.msra.mxu1 %v1306_v36  ;;  %1237 = vmatprep.subr.bf16.mxu0 %v1313_v39 }
  0x2b   : > { %1252 = vmatprep.subr.bf16.mxu1 %v1313_v39 }
  0x2c   : > { %1238 = vmatpush3.bf16.msra.mxu0 %v1313_v39 }
  0x2d   : > { %1239 = vmatprep.subr.bf16.mxu0 %v1320_v44 }
  0x2e   : > { %1256 = vmatpush3.bf16.msra.mxu1 %v1313_v39 }
  0x2f   : > { %701 = vmatmul.mubr.bf16.gmra.mrb[4].mxu0 %v1311_v40  ;;  %1253 = vmatprep.subr.bf16.mxu1 %v1320_v44 }
  0x30   : > { %766 = vmatmul.mubr.bf16.gmra.mrb[4].mxu1 %v1312_v41  ;;  %708 = vmatprep.mubr.bf16.mxu0 %v1314_v42 }
  0x31   : > { %773 = vmatprep.mubr.bf16.mxu1 %v1316_v43  ;;  %1240 = vmatpush3.bf16.msra.mxu0 %v1320_v44 }
  0x32   : > { %1241 = vmatprep.subr.bf16.mxu0 %v1327_v45  ;;  %1257 = vmatpush3.bf16.msra.mxu1 %v1320_v44 }
  0x33   : > { %1254 = vmatprep.subr.bf16.mxu1 %v1327_v45 }
  0x35   : > { %1242 = vmatpush3.bf16.msra.mxu0 %v1327_v45 }
  0x36   : > { %1258 = vmatpush3.bf16.msra.mxu1 %v1327_v45 }
  0x37   : > { %709 = vmatmul.mubr.bf16.gmra.mrb[8].mxu0 %v1318_v46 }
  0x38   : > { %774 = vmatmul.mubr.bf16.gmra.mrb[8].mxu1 %v1319_v47  ;;  %716 = vmatprep.mubr.bf16.mxu0 %v1321_v48 }
  0x39   : > { %781 = vmatprep.mubr.bf16.mxu1 %v1323_v49  ;;  %v1103_v49 = vld [vmem:[%s1537_s2] ss:$0 sm:$0xff] }
  0x3f   : > { %717 = vmatmul.mubr.bf16.gmra.mrb[12].mxu0 %v1325_v50 }
  0x40   : > { %782 = vmatmul.mubr.bf16.gmra.mrb[12].mxu1 %v1326_v51  ;;  %1243 = vmatprep.mubr.msk.bf16.mxu0 %vm647_vm0, %v1328_v52 }
  0x41   : > { %1247 = vmatprep.mubr.msk.bf16.mxu1 %vm647_vm0, %v1329_v53  ;;  %v1104_v53 = vld [vmem:[%s1538_s3] ss:$0 sm:$0xff] }
  0x47   : > { %1244 = vmatmul.mubr.msk.bf16.vlgmr.msra.gmra.mrb[16].mxu0 %vm647_vm0, %v1330_v54 }
  0x48   : > { %1248 = vmatmul.mubr.msk.bf16.vlgmr.msra.gmra.mrb[16].mxu1 %vm647_vm0, %v1331_v55 }
  0xfa   : > { %v1163_v56 = vpop.f32.mrb[0].mxu0 }
  0xfb   : > { %v1203_v57 = vpop.f32.mrb[0].mxu1  ;;  %v1164_v58 = vpop.f32.mrb[1].mxu0 }
  0xfc   : > { %v1165_v59 = vadd.f32 %v1164_v58, %v1163_v56  ;;  %v1204_v60 = vpop.f32.mrb[1].mxu1  ;;  %v1166_v61 = vpop.f32.mrb[2].mxu0 }
  0xfd   : > { %v1205_v62 = vadd.f32 %v1204_v60, %v1203_v57  ;;  %v1206_v63 = vpop.f32.mrb[2].mxu1  ;;  %v1167_v0 = vpop.f32.mrb[3].mxu0 }
  0xfe   : > { %v1168_v1 = vadd.f32 %v1167_v0, %v1166_v61  ;;  %v1207_v2 = vpop.f32.mrb[3].mxu1 }
  0xff   : > { %v1208_v3 = vadd.f32 %v1207_v2, %v1206_v63  ;;  %v760_v4 = vadd.f32 %v1205_v62, %v1165_v59 }
 0x101   : > { %v763_v5 = vadd.f32 %v1208_v3, %v1168_v1 }
 0x102   : > { %v1169_v6 = vpop.f32.mrb[4].mxu0 }
 0x103   : > { %v1209_v7 = vpop.f32.mrb[4].mxu1  ;;  %v1170_v8 = vpop.f32.mrb[5].mxu0 }
 0x104   : > { %v1171_v9 = vadd.f32 %v1170_v8, %v1169_v6  ;;  %v1210_v10 = vpop.f32.mrb[5].mxu1  ;;  %v1172_v11 = vpop.f32.mrb[6].mxu0 }
 0x105   : > { %v1211_v12 = vadd.f32 %v1210_v10, %v1209_v7  ;;  %v1212_v13 = vpop.f32.mrb[6].mxu1  ;;  %v1173_v14 = vpop.f32.mrb[7].mxu0 }
 0x106   : > { %v1174_v15 = vadd.f32 %v1173_v14, %v1172_v11  ;;  %v1213_v16 = vpop.f32.mrb[7].mxu1 }
 0x107   : > { %v1214_v17 = vadd.f32 %v1213_v16, %v1212_v13  ;;  %v768_v18 = vadd.f32 %v1211_v12, %v1171_v9 }
 0x109   : > { %v771_v19 = vadd.f32 %v1214_v17, %v1174_v15 }
 0x10a   : > { %v1175_v20 = vpop.f32.mrb[8].mxu0 }
 0x10b   : > { %v1215_v21 = vpop.f32.mrb[8].mxu1  ;;  %v1176_v22 = vpop.f32.mrb[9].mxu0 }
 0x10c   : > { %v1177_v23 = vadd.f32 %v1176_v22, %v1175_v20  ;;  %v1216_v24 = vpop.f32.mrb[9].mxu1  ;;  %v1178_v25 = vpop.f32.mrb[10].mxu0 }
 0x10d   : > { %v1217_v26 = vadd.f32 %v1216_v24, %v1215_v21  ;;  %v1218_v27 = vpop.f32.mrb[10].mxu1  ;;  %v1179_v28 = vpop.f32.mrb[11].mxu0 }
 0x10e   : > { %v1180_v29 = vadd.f32 %v1179_v28, %v1178_v25  ;;  %v1219_v30 = vpop.f32.mrb[11].mxu1 }
 0x10f   : > { %v1220_v31 = vadd.f32 %v1219_v30, %v1218_v27  ;;  %v776_v32 = vadd.f32 %v1217_v26, %v1177_v23 }
 0x111   : > { %v779_v33 = vadd.f32 %v1220_v31, %v1180_v29 }
 0x112   : > { %v1181_v34 = vpop.f32.mrb[12].mxu0 }
 0x113   : > { %v1221_v35 = vpop.f32.mrb[12].mxu1  ;;  %v1182_v36 = vpop.f32.mrb[13].mxu0 }
 0x114   : > { %v1183_v37 = vadd.f32 %v1182_v36, %v1181_v34  ;;  %v1222_v38 = vpop.f32.mrb[13].mxu1  ;;  %v1184_v39 = vpop.f32.mrb[14].mxu0 }
 0x115   : > { %v1223_v40 = vadd.f32 %v1222_v38, %v1221_v35  ;;  %v1224_v41 = vpop.f32.mrb[14].mxu1  ;;  %v1185_v42 = vpop.f32.mrb[15].mxu0 }
 0x116   : > { %v1186_v43 = vadd.f32 %v1185_v42, %v1184_v39  ;;  %v1225_v44 = vpop.f32.mrb[15].mxu1 }
 0x117   : > { %v1226_v45 = vadd.f32 %v1225_v44, %v1224_v41  ;;  %v784_v46 = vadd.f32 %v1223_v40, %v1183_v37  ;;  %v952_v44 = vld [vmem:[%s233_s12] sm:$0x1] }
 0x119   : > { %v787_v47 = vadd.f32 %v1226_v45, %v1186_v43 }
 0x11a   : > { %v1245_v48 = vpop.f32.mrb[16].mxu0 }
 0x11b   : > { %v833_v50 = vadd.f32 %v1245_v48, %v768_v18  ;;  %v1249_v51 = vpop.f32.mrb[16].mxu1  ;;  %v824_v52 = vpop.f32.mrb[17].mxu0 }
 0x11c   : > { %v849_v54 = vadd.f32 %v1249_v51, %v784_v46  ;;  %v825_v55 = vadd.f32 %v824_v52, %v760_v4  ;;  %v840_v56 = vpop.f32.mrb[17].mxu1  ;;  %v1246_v57 = vpop.f32.mrb[18].mxu0 }
 0x11d   : > { %v864_v58 = vmul.f32 %v1103_v49, %v833_v50  ;;  %v841_v59 = vadd.f32 %v840_v56, %v776_v32  ;;  %v836_v60 = vadd.f32 %v1246_v57, %v771_v19  ;;  %v1250_v61 = vpop.f32.mrb[18].mxu1  ;;  %v827_v62 = vpop.f32.mrb[19].mxu0 }
 0x11e   : > { %v868_v63 = vmul.f32 %v1103_v49, %v849_v54  ;;  %v862_v0 = vmul.f32 %v1103_v49, %v825_v55  ;;  %v852_v1 = vadd.f32 %v1250_v61, %v787_v47  ;;  %v828_v2 = vadd.f32 %v827_v62, %v763_v5  ;;  %v843_v3 = vpop.f32.mrb[19].mxu1 }
 0x11f   : > { %v879_v6 = vadd.f32 %v1104_v53, %v864_v58  ;;  %v866_v7 = vmul.f32 %v1103_v49, %v841_v59  ;;  %v865_v8 = vmul.f32 %v1103_v49, %v836_v60  ;;  %v844_v9 = vadd.f32 %v843_v3, %v779_v33 }
 0x120   : > { %v883_v10 = vadd.f32 %v1104_v53, %v868_v63  ;;  %v877_v11 = vadd.f32 %v1104_v53, %v862_v0  ;;  %v869_v4 = vmul.f32 %v1103_v49, %v852_v1  ;;  %v863_v12 = vmul.f32 %v1103_v49, %v828_v2 }
 0x121   : > { %v881_v13 = vadd.f32 %v1104_v53, %v866_v7  ;;  %v880_v14 = vadd.f32 %v1104_v53, %v865_v8  ;;  %v867_v15 = vmul.f32 %v1103_v49, %v844_v9  ;;  %v887_v18 = vmax.f32 %v879_v6, 0.0 }
 0x122   : > { %v884_v16 = vadd.f32 %v1104_v53, %v869_v4  ;;  %v878_v17 = vadd.f32 %v1104_v53, %v863_v12  ;;  %v891_v21 = vmax.f32 %v883_v10, 0.0  ;;  %v885_v5 = vmax.f32 %v877_v11, 0.0 }
 0x123   : > { %v888_v19 = vmax.f32 %v880_v14, 0.0  ;;  %v882_v20 = vadd.f32 %v1104_v53, %v867_v15  ;;  %v889_v24 = vmax.f32 %v881_v13, 0.0 }
 0x124   : > { %v892_v22 = vmax.f32 %v884_v16, 0.0  ;;  %v886_v23 = vmax.f32 %v878_v17, 0.0 }
 0x125   : > { %v1132_v25 = vpack.c.bf16 %v888_v19, %v887_v18  ;;  %v890_v26 = vmax.f32 %v882_v20, 0.0 }
 0x126   : > { %v1142_v27 = vpack.c.bf16 %v892_v22, %v891_v21  ;;  %v1127_v28 = vpack.c.bf16 %v886_v23, %v885_v5  ;;  %v933_v29 = vadd.f32 %v886_v23, %v885_v5 }
 0x127   : > { %1144 = vst [vmem:[%s230_s9 + $0x8] sm:$0xff] %v1132_v25   ;;  %v1137_v30 = vpack.c.bf16 %v890_v26, %v889_v24 }
 0x128   : > { %1146 = vst [vmem:[%s230_s9 + $0x18] sm:$0xff] %v1142_v27   ;;  %1128 = vst [vmem:[%s230_s9] sm:$0xff] %v1127_v28   ;;  %v934_v31 = vadd.f32 %v933_v29, %v887_v18 }
 0x129   : > { %1145 = vst [vmem:[%s230_s9 + $0x10] sm:$0xff] %v1137_v30  }
 0x12a   : > { %v935_v32 = vadd.f32 %v934_v31, %v888_v19 }
 0x12c   : > { %v936_v33 = vadd.f32 %v935_v32, %v889_v24 }
 0x12e   : > { %v937_v34 = vadd.f32 %v936_v33, %v890_v26 }
 0x130   : > { %v938_v35 = vadd.f32 %v937_v34, %v891_v21 }
 0x132   : > { %v939_v36 = vadd.f32 %v938_v35, %v892_v22 }
 0x134   : > { %v940_v37 = vrot.slane %v939_v36, 4 }
 0x136   : > { %v941_v38 = vadd.f32 %v940_v37, %v939_v36 }
 0x138   : > { %v942_v39 = vrot.slane %v941_v38, 2 }
 0x13a   : > { %v943_v40 = vadd.f32 %v942_v39, %v941_v38 }
 0x13c   : > { %v944_v41 = vrot.slane %v943_v40, 1 }
 0x13e   : > { %v945_v42 = vadd.f32 %v944_v41, %v943_v40 }
 0x140   : > { %v947_v43 = vmul.f32 0.015625, %v945_v42 }
 0x142   : > { %v948_v45 = vpack.c.bf16 %v947_v43, %v947_v43 }
 0x144   : > { %v953_v46 = vsel %vm951_vm3, %v948_v45, %v952_v44 }
 0x145   : > { %954 = vst [vmem:[%s233_s12] sm:$0x1] %v953_v46 }
 0x146 PF: > { %s16_s18 = sadd.s32 1, %s1338_s18  }
 0x147   : > { %p13_p4 = scmp.ge.s32.totalorder %s16_s18, 4  }
 0x149   :  { %15 = sbr.rel (!%p13_p4) target bundleno = 1 (0x1), region = 78 }

// kernel: dist_network_forward.3
= control target key start
LH: loop header
LB: loop body
LE: loop exit
PB: predicated region body
PF: predicated region fallthrough
CT: control target
= control target key end

     0   :  { %s5299_s24 = smov 0   ;;  %s6815_s0 = inlined_call_operand.vmem [shape: bf16[2,256,32], index: 0, kind: input, shape index: {}]   ;;  %s6816_s1 = inlined_call_operand.vmem [shape: bf16[32,64], index: 1, kind: input, shape index: {}]   ;;  %s6817_s2 = inlined_call_operand.vmem [shape: f32[1,64], index: 2, kind: input, shape index: {}]   ;;  %s6818_s3 = inlined_call_operand.vmem [shape: f32[1,64], index: 3, kind: input, shape index: {}]   ;;  %s6819_s4 = inlined_call_operand.vmem [shape: bf16[576,64], index: 4, kind: input, shape index: {}]   ;;  %s6820_s5 = inlined_call_operand.vmem [shape: f32[1,64], index: 5, kind: input, shape index: {}]   ;;  %s6821_s6 = inlined_call_operand.vmem [shape: f32[1,64], index: 6, kind: input, shape index: {}]   ;;  %s6822_s7 = inlined_call_operand.vmem [shape: bf16[2,256,64], index: 7, kind: output, shape index: {}]  }
   0x1 LB: > { %s4669_s25 = sadd.s32 4294967295, %s5255_s24   ;;  %p4673_p0 = scmp.ge.s32.totalorder %s5255_s24, 1  ;;  %s5255_s24 = sphi %s5299_s24, %s17_s24  }
   0x2   : > { %p237_p1 = scmp.lt.s32.totalorder %s5255_s24, 3 }
   0x4   : > { %p238_p2 = pnand %p4673_p0, %p237_p1 }
   0x6   : > { %241 = sbr.rel (%p238_p2) target bundleno = 838 (0x346), region = 48 }
   0xd   : > { %v5192_v0 = vld [vmem:[%s6816_s1] sm:$0xff]   ;;  %p269_p3 = scmp.lt.s32.totalorder %s4669_s25, 1  ;;  %v5193_v1 = vld [vmem:[%s6816_s1 + $0x8] sm:$0xff]   ;;  %vm408_vm0 = vcmask 261120   ;;  %vm728_vm1 = vcmask 523264   ;;  %v5257_v18 = vmov 0  }
   0xe   : > { %5098 = vmatprep.subr.bf16.mxu0 %v5192_v0  ;;  %733 = vst.msk [vmem:[#allocation2 + $0x20] sm:$0xff] %vm728_vm1, %v5257_v18  ;;  %734 = vst.msk [vmem:[#allocation2 + $0x28] sm:$0xff] %vm728_vm1, %v5257_v18  ;;  %v5394_v19 = vld [vmem:[%s6817_s2] ss:$0 sm:$0xff]  ;;  %vm830_vm2 = vcmask 523268   ;;  %vm832_vm3 = vcmask 519168  }
   0xf   : > { %s6934_s25 = smov (!%p269_p3, %s4669_s25), 1  ;;  %5099 = vmatpush3.bf16.msra.mxu0 %v5192_v0  ;;  %729 = vst.msk [vmem:[#allocation2] sm:$0xff] %vm728_vm1, %v5257_v18  ;;  %730 = vst.msk [vmem:[#allocation2 + $0x8] sm:$0xff] %vm728_vm1, %v5257_v18  ;;  %v5399_v21 = vld [vmem:[%s6818_s3] ss:$0 sm:$0xff]  ;;  %vm1265_vm4 = vcmask 1043456  }
  0x10   : > { %5100 = vmatprep.subr.bf16.mxu0 %v5193_v1  ;;  %s4802_s30 = sshll.u32 %s6934_s25, 7  ;;  %731 = vst.msk [vmem:[#allocation2 + $0x10] sm:$0xff] %vm728_vm1, %v5257_v18  ;;  %732 = vst.msk [vmem:[#allocation2 + $0x18] sm:$0xff] %vm728_vm1, %v5257_v18  ;;  %vm896_vm5 = vsmask.f32 4352  ;;  %s5258_s17 = smov 64  }
  0x11   : > { %s5321_s10 = scalar_lea.vmem %s6815_s0, %s4802_s30  ;;  %735 = vst.msk [vmem:[#allocation2 + $0x30] sm:$0xff] %vm728_vm1, %v5257_v18  ;;  %736 = vst.msk [vmem:[#allocation2 + $0x38] sm:$0xff] %vm728_vm1, %v5257_v18  ;;  %vm1411_vm6 = vsmask.f32 3328  ;;  %vm1362_vm7 = vcmask 1048064   ;;  %s6643_s23 = scalar_lea.vmem %s6822_s7, %s4802_s30 }
  0x12   : > { %v5194_v2 = vld [vmem:[%s5321_s10] sm:$0xff]   ;;  %v5195_v3 = vld [vmem:[%s5321_s10 + $0x8] sm:$0xff]   ;;  %v5196_v4 = vld [vmem:[%s5321_s10 + $0x10] sm:$0xff]   ;;  %737 = vst.msk [vmem:[#allocation2 + $0x40] sm:$0xff] %vm728_vm1, %v5257_v18 }
  0x13   : > { %5101 = vmatpush3.bf16.msra.mxu0 %v5193_v1  ;;  %5102 = vmatprep.mubr.msk.bf16.mxu0 %vm408_vm0, %v5194_v2  ;;  %v5197_v5 = vld [vmem:[%s5321_s10 + $0x18] sm:$0xff]   ;;  %v5198_v6 = vld [vmem:[%s5321_s10 + $0x20] sm:$0xff]   ;;  %v5199_v7 = vld [vmem:[%s5321_s10 + $0x28] sm:$0xff]   ;;  %738 = vst.msk [vmem:[#allocation2 + $0x48] sm:$0xff] %vm728_vm1, %v5257_v18 }
  0x14   : > { %v5200_v8 = vld [vmem:[%s5321_s10 + $0x30] sm:$0xff]   ;;  %v5201_v9 = vld [vmem:[%s5321_s10 + $0x38] sm:$0xff]   ;;  %v5202_v10 = vld [vmem:[%s5321_s10 + $0x40] sm:$0xff]   ;;  %739 = vst.msk [vmem:[#allocation2 + $0x50] sm:$0xff] %vm728_vm1, %v5257_v18 }
  0x15   : > { %v5203_v11 = vld [vmem:[%s5321_s10 + $0x48] sm:$0xff]   ;;  %v5204_v12 = vld [vmem:[%s5321_s10 + $0x50] sm:$0xff]   ;;  %v5205_v13 = vld [vmem:[%s5321_s10 + $0x58] sm:$0xff]   ;;  %740 = vst.msk [vmem:[#allocation2 + $0x58] sm:$0xff] %vm728_vm1, %v5257_v18 }
  0x16   : > { %5103 = vmatmul.mubr.msk.bf16.vlgmr.msra.gmra.mrb[0].mxu0 %vm408_vm0, %v5195_v3  ;;  %v5206_v14 = vld [vmem:[%s5321_s10 + $0x60] sm:$0xff]   ;;  %v5207_v15 = vld [vmem:[%s5321_s10 + $0x68] sm:$0xff]   ;;  %v5208_v16 = vld [vmem:[%s5321_s10 + $0x70] sm:$0xff]   ;;  %741 = vst.msk [vmem:[#allocation2 + $0x60] sm:$0xff] %vm728_vm1, %v5257_v18 }
  0x17   : > { %5106 = vmatprep.mubr.msk.bf16.mxu0 %vm408_vm0, %v5196_v4  ;;  %v5209_v17 = vld [vmem:[%s5321_s10 + $0x78] sm:$0xff]   ;;  %742 = vst.msk [vmem:[#allocation2 + $0x68] sm:$0xff] %vm728_vm1, %v5257_v18  ;;  %743 = vst.msk [vmem:[#allocation2 + $0x70] sm:$0xff] %vm728_vm1, %v5257_v18  ;;  %v1201_v55 = vld [vmem:[#allocation2] sm:$0xf0] }
  0x18   : > { %744 = vst.msk [vmem:[#allocation2 + $0x78] sm:$0xff] %vm728_vm1, %v5257_v18  ;;  %745 = vst.msk [vmem:[#allocation2 + $0x80] sm:$0xff] %vm728_vm1, %v5257_v18  ;;  %v1202_v56 = vld [vmem:[#allocation2 + $0x8] sm:$0xf]  ;;  %v1266_v63 = vrot.slane %v1201_v55, 4 }
  0x19   : > { %746 = vst.msk [vmem:[#allocation2 + $0x88] sm:$0xff] %vm728_vm1, %v5257_v18  ;;  %747 = vst.msk [vmem:[#allocation2 + $0x90] sm:$0xff] %vm728_vm1, %v5257_v18  ;;  %v1267_v0 = vrot.slane %v1202_v56, 4 }
  0x1a   : > { %748 = vst.msk [vmem:[#allocation2 + $0x98] sm:$0xff] %vm728_vm1, %v5257_v18  ;;  %749 = vst.msk [vmem:[#allocation2 + $0xa0] sm:$0xff] %vm728_vm1, %v5257_v18 }
  0x1b   : > { %750 = vst.msk [vmem:[#allocation2 + $0xa8] sm:$0xff] %vm728_vm1, %v5257_v18  ;;  %751 = vst.msk [vmem:[#allocation2 + $0xb0] sm:$0xff] %vm728_vm1, %v5257_v18 }
  0x1c   : > { %752 = vst.msk [vmem:[#allocation2 + $0xb8] sm:$0xff] %vm728_vm1, %v5257_v18  ;;  %753 = vst.msk [vmem:[#allocation2 + $0xc0] sm:$0xff] %vm728_vm1, %v5257_v18 }
  0x1d   : > { %754 = vst.msk [vmem:[#allocation2 + $0xc8] sm:$0xff] %vm728_vm1, %v5257_v18  ;;  %755 = vst.msk [vmem:[#allocation2 + $0xd0] sm:$0xff] %vm728_vm1, %v5257_v18 }
  0x1e   : > { %5107 = vmatmul.mubr.msk.bf16.gmra.mrb[4].mxu0 %vm408_vm0, %v5197_v5  ;;  %756 = vst.msk [vmem:[#allocation2 + $0xd8] sm:$0xff] %vm728_vm1, %v5257_v18  ;;  %757 = vst.msk [vmem:[#allocation2 + $0xe0] sm:$0xff] %vm728_vm1, %v5257_v18 }
  0x1f   : > { %5110 = vmatprep.mubr.msk.bf16.mxu0 %vm408_vm0, %v5198_v6  ;;  %758 = vst.msk [vmem:[#allocation2 + $0xe8] sm:$0xff] %vm728_vm1, %v5257_v18  ;;  %759 = vst.msk [vmem:[#allocation2 + $0xf0] sm:$0xff] %vm728_vm1, %v5257_v18 }
  0x20   : > { %760 = vst.msk [vmem:[#allocation2 + $0xf8] sm:$0xff] %vm728_vm1, %v5257_v18  ;;  %761 = vst.msk [vmem:[#allocation2 + $0x100] sm:$0xff] %vm728_vm1, %v5257_v18 }
  0x21   : > { %762 = vst.msk [vmem:[#allocation2 + $0x108] sm:$0xff] %vm728_vm1, %v5257_v18  ;;  %763 = vst.msk [vmem:[#allocation2 + $0x110] sm:$0xff] %vm728_vm1, %v5257_v18 }
  0x22   : > { %764 = vst.msk [vmem:[#allocation2 + $0x118] sm:$0xff] %vm728_vm1, %v5257_v18 }
  0x26   : > { %5111 = vmatmul.mubr.msk.bf16.gmra.mrb[8].mxu0 %vm408_vm0, %v5199_v7 }
  0x27   : > { %5114 = vmatprep.mubr.msk.bf16.mxu0 %vm408_vm0, %v5200_v8 }
  0x2e   : > { %5115 = vmatmul.mubr.msk.bf16.gmra.mrb[12].mxu0 %vm408_vm0, %v5201_v9 }
  0x2f   : > { %5118 = vmatprep.mubr.msk.bf16.mxu0 %vm408_vm0, %v5202_v10 }
  0x36   : > { %5119 = vmatmul.mubr.msk.bf16.gmra.mrb[16].mxu0 %vm408_vm0, %v5203_v11 }
  0x37   : > { %5122 = vmatprep.mubr.msk.bf16.mxu0 %vm408_vm0, %v5204_v12 }
  0x3e   : > { %5123 = vmatmul.mubr.msk.bf16.gmra.mrb[20].mxu0 %vm408_vm0, %v5205_v13 }
  0x3f   : > { %5126 = vmatprep.mubr.msk.bf16.mxu0 %vm408_vm0, %v5206_v14 }
  0x46   : > { %5127 = vmatmul.mubr.msk.bf16.gmra.mrb[24].mxu0 %vm408_vm0, %v5207_v15 }
  0x47   : > { %5130 = vmatprep.mubr.msk.bf16.mxu0 %vm408_vm0, %v5208_v16  ;;  %v5436_v16 = vsel %vm1265_vm4, %v1266_v63, %v1267_v0 }
  0x4e   : > { %5131 = vmatmul.mubr.msk.bf16.gmra.mrb[28].mxu0 %vm408_vm0, %v5209_v17 }
  0xe9   : > { %v5104_v20 = vpop.f32.mrb[0].mxu0 }
  0xea   : > { %v627_v22 = vmul.f32 %v5104_v20, %v5394_v19  ;;  %v491_v23 = vpop.f32.mrb[1].mxu0 }
  0xeb   : > { %v625_v24 = vmul.f32 %v5394_v19, %v491_v23  ;;  %v5105_v25 = vpop.f32.mrb[2].mxu0 }
  0xec   : > { %v666_v26 = vadd.f32 %v5399_v21, %v627_v22  ;;  %v628_v27 = vmul.f32 %v5105_v25, %v5394_v19  ;;  %v494_v28 = vpop.f32.mrb[3].mxu0 }
  0xed   : > { %v664_v29 = vadd.f32 %v5399_v21, %v625_v24  ;;  %v626_v30 = vmul.f32 %v5394_v19, %v494_v28 }
  0xee   : > { %v667_v31 = vadd.f32 %v5399_v21, %v628_v27  ;;  %v698_v33 = vmax.f32 %v666_v26, 0.0 }
  0xef   : > { %v665_v32 = vadd.f32 %v5399_v21, %v626_v30  ;;  %v696_v35 = vmax.f32 %v664_v29, 0.0 }
  0xf0   : > { %v699_v34 = vmax.f32 %v667_v31, 0.0 }
  0xf1   : > { %v697_v36 = vmax.f32 %v665_v32, 0.0  ;;  %v5108_v37 = vpop.f32.mrb[4].mxu0 }
  0xf2   : > { %v766_v38 = vpack.c.bf16 %v699_v34, %v698_v33  ;;  %v631_v39 = vmul.f32 %v5108_v37, %v5394_v19  ;;  %v507_v40 = vpop.f32.mrb[5].mxu0  ;;  %v5210_v34 = vld [vmem:[%s6819_s4 + $0x40] sm:$0xff]  }
  0xf3   : > { %v765_v41 = vpack.c.bf16 %v697_v36, %v696_v35  ;;  %v629_v42 = vmul.f32 %v5394_v19, %v507_v40  ;;  %v5109_v43 = vpop.f32.mrb[6].mxu0  ;;  %4854 = vmatprep.subr.bf16.mxu1 %v5210_v34 }
  0xf4   : > { %v798_v44 = vrot.slane %v766_v38, 4  ;;  %v670_v45 = vadd.f32 %v5399_v21, %v631_v39  ;;  %v632_v46 = vmul.f32 %v5109_v43, %v5394_v19  ;;  %v510_v47 = vpop.f32.mrb[7].mxu0 }
  0xf5   : > { %v797_v48 = vrot.slane %v765_v41, 4  ;;  %v668_v49 = vadd.f32 %v5399_v21, %v629_v42  ;;  %v630_v50 = vmul.f32 %v5394_v19, %v510_v47 }
  0xf6   : > { %834 = vst.msk [vmem:[#allocation2 + $0x20] sm:$0xf0] %vm830_vm2, %v798_v44  ;;  %v702_v51 = vmax.f32 %v670_v45, 0.0  ;;  %v671_v52 = vadd.f32 %v5399_v21, %v632_v46 }
  0xf7   : > { %835 = vst.msk [vmem:[#allocation2 + $0x28] sm:$0xf] %vm832_vm3, %v798_v44  ;;  %833 = vst.msk [vmem:[#allocation2 + $0x18] sm:$0xf] %vm832_vm3, %v797_v48  ;;  %v700_v53 = vmax.f32 %v668_v49, 0.0  ;;  %v669_v54 = vadd.f32 %v5399_v21, %v630_v50 }
  0xf8   : > { %831 = vst.msk [vmem:[#allocation2 + $0x10] sm:$0xf0] %vm830_vm2, %v797_v48  ;;  %v703_v57 = vmax.f32 %v671_v52, 0.0 }
  0xf9   : > { %v701_v58 = vmax.f32 %v669_v54, 0.0  ;;  %v5112_v59 = vpop.f32.mrb[8].mxu0 }
  0xfa   : > { %v768_v60 = vpack.c.bf16 %v703_v57, %v702_v51  ;;  %v635_v61 = vmul.f32 %v5112_v59, %v5394_v19  ;;  %v523_v62 = vpop.f32.mrb[9].mxu0 }
  0xfb   : > { %v767_v1 = vpack.c.bf16 %v701_v58, %v700_v53  ;;  %v633_v2 = vmul.f32 %v5394_v19, %v523_v62  ;;  %v5113_v3 = vpop.f32.mrb[10].mxu0 }
  0xfc   : > { %v800_v4 = vrot.slane %v768_v60, 4  ;;  %v674_v5 = vadd.f32 %v5399_v21, %v635_v61  ;;  %v636_v6 = vmul.f32 %v5113_v3, %v5394_v19  ;;  %v526_v7 = vpop.f32.mrb[11].mxu0 }
  0xfd   : > { %v5425_v8 = vld [vmem:[#allocation2 + $0x20] sm:$0xf0]  ;;  %v799_v9 = vrot.slane %v767_v1, 4  ;;  %v672_v10 = vadd.f32 %v5399_v21, %v633_v2  ;;  %v634_v11 = vmul.f32 %v5394_v19, %v526_v7 }
  0xfe   : > { %v5429_v12 = vld [vmem:[#allocation2 + $0x28] sm:$0x1f]  ;;  %838 = vst.msk [vmem:[#allocation2 + $0x40] sm:$0xf0] %vm830_vm2, %v800_v4  ;;  %v1718_v15 = vld [vmem:[#allocation2 + $0x20] sm:$0xf8]  ;;  %v675_v20 = vadd.f32 %v5399_v21, %v636_v6 }
  0xff   : > { %839 = vst.msk [vmem:[#allocation2 + $0x48] sm:$0xf] %vm832_vm3, %v800_v4  ;;  %837 = vst.msk [vmem:[#allocation2 + $0x38] sm:$0xf] %vm832_vm3, %v799_v9  ;;  %v706_v17 = vmax.f32 %v674_v5, 0.0  ;;  %v704_v18 = vmax.f32 %v672_v10, 0.0  ;;  %v673_v22 = vadd.f32 %v5399_v21, %v634_v11 }
 0x100   : > { %836 = vst.msk [vmem:[#allocation2 + $0x30] sm:$0xf0] %vm830_vm2, %v799_v9  ;;  %v1719_v23 = vld [vmem:[#allocation2 + $0x28] sm:$0xf]  ;;  %v1716_v24 = vld [vmem:[#allocation2 + $0x10] sm:$0xf8] }
 0x101   : > { %v1766_v25 = vshrl.u32 %v1718_v15, 16  ;;  %v1769_v26 = vshll.u32 %v1718_v15, 16  ;;  %v1774_v27 = vshrl.u32 %v1719_v23, 16  ;;  %v1777_v28 = vshll.u32 %v1719_v23, 16  ;;  %v5116_v33 = vpop.f32.mrb[12].mxu0 }
 0x102   : > { %v707_v31 = vmax.f32 %v675_v20, 0.0  ;;  %v705_v32 = vmax.f32 %v673_v22, 0.0  ;;  %v639_v35 = vmul.f32 %v5116_v33, %v5394_v19  ;;  %v539_v36 = vpop.f32.mrb[13].mxu0  ;;  %v1749_v39 = vshrl.u32 %v1716_v24, 16  ;;  %v1717_v6 = vld [vmem:[#allocation2 + $0x18] sm:$0xf] }
 0x103   : > { %v1768_v37 = vrot.slane %v1766_v25, 3  ;;  %v1771_v38 = vrot.slane %v1769_v26, 4  ;;  %v637_v42 = vmul.f32 %v5394_v19, %v539_v36  ;;  %v5117_v43 = vpop.f32.mrb[14].mxu0  ;;  %v1752_v44 = vshll.u32 %v1716_v24, 16  ;;  %v1203_v15 = vld [vmem:[#allocation2 + $0x10] sm:$0xf0] }
 0x104   : > { %v770_v40 = vpack.c.bf16 %v707_v31, %v706_v17  ;;  %v769_v41 = vpack.c.bf16 %v705_v32, %v704_v18  ;;  %v678_v45 = vadd.f32 %v5399_v21, %v639_v35  ;;  %v640_v46 = vmul.f32 %v5117_v43, %v5394_v19  ;;  %v542_v47 = vpop.f32.mrb[15].mxu0  ;;  %v1204_v24 = vld [vmem:[#allocation2 + $0x18] sm:$0xf]  ;;  %v5480_v31 = vld [vmem:[#allocation2 + $0x20] sm:$0xf0] }
 0x105   : > { %v1776_v48 = vrot.slane %v1774_v27, 3  ;;  %v1779_v49 = vrot.slane %v1777_v28, 4  ;;  %v5451_v50 = vld [vmem:[#allocation2 + $0x40] sm:$0xf0]  ;;  %v676_v53 = vadd.f32 %v5399_v21, %v637_v42  ;;  %v638_v54 = vmul.f32 %v5394_v19, %v542_v47  ;;  %v1206_v47 = vld [vmem:[#allocation2 + $0x28] sm:$0xf] }
 0x106   : > { %v802_v51 = vrot.slane %v770_v40, 4  ;;  %v801_v52 = vrot.slane %v769_v41, 4  ;;  %v1772_v58 = vor.u32 %v1771_v38, %v1768_v37  ;;  %v5457_v59 = vrot.slane %v1749_v39, 3  ;;  %v3112_v60 = vld [vmem:[#allocation2 + $0x38] sm:$0x1f]  ;;  %v5211_v43 = vld [vmem:[%s6819_s4] sm:$0xff]  }
 0x107   : > { %v3111_v57 = vld [vmem:[#allocation2 + $0x30] sm:$0xf0]  ;;  %v710_v63 = vmax.f32 %v678_v45, 0.0  ;;  %v708_v0 = vmax.f32 %v676_v53, 0.0  ;;  %v5463_v1 = vld [vmem:[#allocation2 + $0x48] sm:$0x1f]  ;;  %v679_v4 = vadd.f32 %v5399_v21, %v640_v46  ;;  %v677_v5 = vadd.f32 %v5399_v21, %v638_v54  ;;  %4855 = vmatpush3.bf16.msra.mxu1 %v5211_v43 }
 0x108   : > { %v3159_v61 = vshrl.u32 %v3111_v57, 16  ;;  %v3162_v62 = vshll.u32 %v3111_v57, 16  ;;  %842 = vst.msk [vmem:[#allocation2 + $0x60] sm:$0xf0] %vm830_vm2, %v802_v51  ;;  %840 = vst.msk [vmem:[#allocation2 + $0x50] sm:$0xf0] %vm830_vm2, %v801_v52  ;;  %v1780_v10 = vor.u32 %v1779_v49, %v1776_v48 }
 0x109   : > { %843 = vst.msk [vmem:[#allocation2 + $0x68] sm:$0xf] %vm832_vm3, %v802_v51  ;;  %841 = vst.msk [vmem:[#allocation2 + $0x58] sm:$0xf] %vm832_vm3, %v801_v52  ;;  %v3167_v2 = vshrl.u32 %v3112_v60, 16  ;;  %v3170_v3 = vshll.u32 %v3112_v60, 16 }
 0x10a   : > { %v5467_v7 = vrot.slane %v3159_v61, 4  ;;  %v5469_v9 = vrot.slane %v3162_v62, 5  ;;  %v5471_v11 = vrot.slane %v1752_v44, 4  ;;  %v5120_v17 = vpop.f32.mrb[16].mxu0  ;;  %v711_v22 = vmax.f32 %v679_v4, 0.0 }
 0x10b   : > { %v5473_v18 = vrot.slane %v3167_v2, 4  ;;  %v5475_v20 = vrot.slane %v3170_v3, 5  ;;  %v709_v23 = vmax.f32 %v677_v5, 0.0  ;;  %v1781_v27 = vsel %vm896_vm5, %v1772_v58, %v1780_v10  ;;  %v555_v32 = vpop.f32.mrb[17].mxu0 }
 0x10c   : > { %6849 = vst [vmem:[#allocation4_spill] sm:$0xff] %v5467_v7  ;;  %6850 = vst [vmem:[#allocation5_spill] sm:$0xff] %v5469_v9  ;;  %v1757_v28 = vshrl.u32 %v1717_v6, 16  ;;  %v772_v34 = vpack.c.bf16 %v711_v22, %v710_v63  ;;  %2022 = vrot.lane.b32.xlu1 %v1781_v27, %s5258_s17  ;;  %v1755_v36 = vor.u32 %v5471_v11, %v5457_v59  ;;  %v5121_v37 = vpop.f32.mrb[18].mxu0  ;;  %v1760_v39 = vshll.u32 %v1717_v6, 16 }
 0x10d   : > { %v771_v35 = vpack.c.bf16 %v709_v23, %v708_v0  ;;  %v1269_v40 = vrot.slane %v1203_v15, 4  ;;  %v1270_v41 = vrot.slane %v1204_v24, 4  ;;  %v558_v42 = vpop.f32.mrb[19].mxu0  ;;  %v1272_v48 = vrot.slane %v5480_v31, 4  ;;  %v1720_v0 = vld [vmem:[#allocation2 + $0x30] sm:$0xf8] }
 0x10e   : > { %v1759_v46 = vrot.slane %v1757_v28, 3  ;;  %v643_v49 = vmul.f32 %v5120_v17, %v5394_v19  ;;  %v5497_v51 = vmul.f32 %v5394_v19, %v555_v32  ;;  %v5504_v58 = vmul.f32 %v5121_v37, %v5394_v19  ;;  %v1721_v6 = vld [vmem:[#allocation2 + $0x38] sm:$0xf]  ;;  %v1207_v23 = vld [vmem:[#allocation2 + $0x30] sm:$0xf0] }
 0x10f   : > { %v5492_v44 = vld [vmem:[#allocation2 + $0x60] sm:$0xf0]  ;;  %v3115_v45 = vld [vmem:[#allocation2 + $0x50] sm:$0xf0]  ;;  %v5507_v59 = vmul.f32 %v5394_v19, %v558_v42  ;;  %v804_v2 = vrot.slane %v772_v34, 4  ;;  %v803_v3 = vrot.slane %v771_v35, 4  ;;  %v1271_v5 = vsel %vm1265_vm4, %v1269_v40, %v1270_v41 }
 0x110   : > { %v5499_v52 = vld [vmem:[#allocation2 + $0x68] sm:$0x1f]  ;;  %v3116_v57 = vld [vmem:[#allocation2 + $0x58] sm:$0x1f]  ;;  %v3193_v60 = vshrl.u32 %v3115_v45, 16  ;;  %v3196_v61 = vshll.u32 %v3115_v45, 16  ;;  %1316 = vrot.lane.b32.xlu1 %v1271_v5, %s5258_s17 }
 0x111   : > { %v3201_v62 = vshrl.u32 %v3116_v57, 16  ;;  %v3204_v63 = vshll.u32 %v3116_v57, 16  ;;  %v1762_v4 = vrot.slane %v1760_v39, 4  ;;  %v5510_v10 = vpop.f32.mrb[20].mxu0  ;;  %846 = vst.msk [vmem:[#allocation2 + $0x80] sm:$0xf0] %vm830_vm2, %v804_v2 }
 0x112   : > { %v5514_v17 = vrot.slane %v3193_v60, 4  ;;  %v5516_v22 = vrot.slane %v3196_v61, 5  ;;  %847 = vst.msk [vmem:[#allocation2 + $0x88] sm:$0xf] %vm832_vm3, %v804_v2  ;;  %845 = vst.msk [vmem:[#allocation2 + $0x78] sm:$0xf] %vm832_vm3, %v803_v3 }
 0x113   : > { %844 = vst.msk [vmem:[#allocation2 + $0x70] sm:$0xf0] %vm830_vm2, %v803_v3  ;;  %v1763_v24 = vor.u32 %v1762_v4, %v1759_v46  ;;  %v1273_v27 = vrot.slane %v1206_v47, 4  ;;  %v1783_v28 = vshrl.u32 %v1720_v0, 16  ;;  %v1786_v31 = vshll.u32 %v1720_v0, 16  ;;  %v5523_v34 = vpop.f32.mrb[21].mxu0 }
 0x114   : > { %v1208_v32 = vld [vmem:[#allocation2 + $0x38] sm:$0xf]  ;;  %v5525_v35 = vrot.slane %v3201_v62, 4  ;;  %v5527_v37 = vrot.slane %v3204_v63, 5  ;;  %v1791_v39 = vshrl.u32 %v1721_v6, 16  ;;  %v1794_v40 = vshll.u32 %v1721_v6, 16 }
 0x115   : > { %v1722_v41 = vld [vmem:[#allocation2 + $0x40] sm:$0xf8]  ;;  %v1764_v42 = vsel %vm896_vm5, %v1755_v36, %v1763_v24  ;;  %v1274_v43 = vsel %vm1265_vm4, %v1272_v48, %v1273_v27  ;;  %v1785_v45 = vrot.slane %v1783_v28, 3  ;;  %v1788_v57 = vrot.slane %v1786_v31, 4  ;;  %v1723_v46 = vld [vmem:[#allocation2 + $0x48] sm:$0xf] }
 0x116   : > { %2020 = vrot.lane.b32.xlu0 %v1764_v42, %s5258_s17  ;;  %1318 = vrot.lane.b32.xlu1 %v1274_v43, %s5258_s17  ;;  %v1793_v47 = vrot.slane %v1791_v39, 3  ;;  %v1796_v60 = vrot.slane %v1794_v40, 4  ;;  %v1275_v61 = vrot.slane %v1207_v23, 4  ;;  %v1276_v62 = vrot.slane %v1208_v32, 4  ;;  %v5535_v6 = vpop.f32.mrb[22].mxu0  ;;  %v5212_v24 = vld [vmem:[%s6819_s4 + $0x48] sm:$0xff]  }
 0x117   : > { %v1789_v63 = vor.u32 %v1788_v57, %v1785_v45  ;;  %v682_v0 = vadd.f32 %v5399_v21, %v643_v49  ;;  %v1800_v2 = vshrl.u32 %v1722_v41, 16  ;;  %v1803_v3 = vshll.u32 %v1722_v41, 16  ;;  %v1209_v49 = vld [vmem:[#allocation2 + $0x40] sm:$0xf0]  ;;  %v1210_v32 = vld [vmem:[#allocation2 + $0x48] sm:$0xf]  ;;  %4856 = vmatprep.subr.bf16.mxu1 %v5212_v24 }
 0x118   : > { %v1797_v4 = vor.u32 %v1796_v60, %v1793_v47  ;;  %v1277_v36 = vsel %vm1265_vm4, %v1275_v61, %v1276_v62  ;;  %v1808_v48 = vshrl.u32 %v1723_v46, 16  ;;  %v1811_v5 = vshll.u32 %v1723_v46, 16  ;;  %v5542_v39 = vpop.f32.mrb[23].mxu0  ;;  %v5544_v40 = vld [vmem:[#allocation2 + $0x80] sm:$0xf0] }
 0x119   : > { %v714_v27 = vmax.f32 %v682_v0, 0.0  ;;  %v1802_v28 = vrot.slane %v1800_v2, 3  ;;  %v1805_v23 = vrot.slane %v1803_v3, 4  ;;  %v680_v31 = vadd.f32 %v5399_v21, %v5497_v51  ;;  %v5546_v41 = vld [vmem:[#allocation2 + $0x88] sm:$0x1f]  ;;  %v5568_v33 = vpop.f32.mrb[24].mxu0 }
 0x11a   : > { %v5548_v42 = vld [vmem:[#allocation2 + $0x70] sm:$0xf0]  ;;  %1314 = vrot.lane.b32.xlu0 %v5436_v16, %s5258_s17  ;;  %v1798_v43 = vsel %vm896_vm5, %v1789_v63, %v1797_v4  ;;  %1320 = vrot.lane.b32.xlu1 %v1277_v36, %s5258_s17  ;;  %v683_v51 = vadd.f32 %v5399_v21, %v5504_v58  ;;  %v681_v45 = vadd.f32 %v5399_v21, %v5507_v59  ;;  %v5562_v16 = vld [vmem:[#allocation2 + $0x78] sm:$0x1f]  ;;  %v1810_v3 = vrot.slane %v1808_v48, 3  ;;  %v5571_v59 = vpop.f32.mrb[25].mxu0 }
 0x11b   : > { %v1724_v57 = vld [vmem:[#allocation2 + $0x50] sm:$0xf8]  ;;  %v1725_v0 = vld [vmem:[#allocation2 + $0x58] sm:$0xf]  ;;  %v1806_v2 = vor.u32 %v1805_v23, %v1802_v28  ;;  %v1813_v4 = vrot.slane %v1811_v5, 4  ;;  %v712_v36 = vmax.f32 %v680_v31, 0.0 }
 0x11c   : > { %v715_v38 = vmax.f32 %v683_v51, 0.0  ;;  %v713_v30 = vmax.f32 %v681_v45, 0.0  ;;  %v1278_v24 = vrot.slane %v1209_v49, 4  ;;  %v1279_v29 = vrot.slane %v1210_v32, 4  ;;  %v1211_v47 = vld [vmem:[#allocation2 + $0x50] sm:$0xf0] }
 0x11d   : > { %v1814_v14 = vor.u32 %v1813_v4, %v1810_v3  ;;  %v1817_v13 = vshrl.u32 %v1724_v57, 16  ;;  %v1820_v61 = vshll.u32 %v1724_v57, 16  ;;  %v1825_v60 = vshrl.u32 %v1725_v0, 16  ;;  %v2933_v46 = vld [vmem:[#allocation2 + $0x20] sm:$0xf0] }
 0x11e   : > { %2024 = vrot.lane.b32.xlu0 %v1798_v43, %s5258_s17  ;;  %v774_v28 = vpack.c.bf16 %v715_v38, %v714_v27  ;;  %v773_v48 = vpack.c.bf16 %v713_v30, %v712_v36  ;;  %v1280_v5 = vsel %vm1265_vm4, %v1278_v24, %v1279_v29  ;;  %v1828_v23 = vshll.u32 %v1725_v0, 16  ;;  %v1212_v31 = vld [vmem:[#allocation2 + $0x58] sm:$0xf]  ;;  %v1726_v58 = vld [vmem:[#allocation2 + $0x60] sm:$0xf8]  ;;  %v5574_v43 = vpop.f32.mrb[26].mxu0 }
 0x11f   : > { %v1815_v49 = vsel %vm896_vm5, %v1806_v2, %v1814_v14  ;;  %1322 = vrot.lane.b32.xlu1 %v1280_v5, %s5258_s17  ;;  %v1819_v32 = vrot.slane %v1817_v13, 3  ;;  %v1822_v51 = vrot.slane %v1820_v61, 4  ;;  %v1827_v45 = vrot.slane %v1825_v60, 3  ;;  %v1727_v57 = vld [vmem:[#allocation2 + $0x68] sm:$0xf]  ;;  %v5578_v3 = vpop.f32.mrb[27].mxu0 }
 0x120   : > { %v806_v30 = vrot.slane %v774_v28, 4  ;;  %v805_v38 = vrot.slane %v773_v48, 4  ;;  %v1830_v29 = vrot.slane %v1828_v23, 4  ;;  %v1281_v27 = vrot.slane %v1211_v47, 4  ;;  %v2934_v0 = vld [vmem:[#allocation2 + $0x28] sm:$0xf] }
 0x121   : > { %v1823_v4 = vor.u32 %v1822_v51, %v1819_v32  ;;  %v1282_v36 = vrot.slane %v1212_v31, 4  ;;  %v1834_v24 = vshrl.u32 %v1726_v58, 16  ;;  %v1837_v63 = vshll.u32 %v1726_v58, 16  ;;  %v1728_v14 = vld [vmem:[#allocation2 + $0x70] sm:$0xf8]  ;;  %v5581_v2 = vpop.f32.mrb[28].mxu0 }
 0x122   : > { %2026 = vrot.lane.b32.xlu0 %v1815_v49, %s5258_s17  ;;  %850 = vst.msk [vmem:[#allocation2 + $0xa0] sm:$0xf0] %vm830_vm2, %v806_v30  ;;  %848 = vst.msk [vmem:[#allocation2 + $0x90] sm:$0xf0] %vm830_vm2, %v805_v38  ;;  %v1831_v13 = vor.u32 %v1830_v29, %v1827_v45  ;;  %v1842_v60 = vshrl.u32 %v1727_v57, 16  ;;  %v1845_v61 = vshll.u32 %v1727_v57, 16 }
 0x123   : > { %851 = vst.msk [vmem:[#allocation2 + $0xa8] sm:$0xf] %vm832_vm3, %v806_v30  ;;  %849 = vst.msk [vmem:[#allocation2 + $0x98] sm:$0xf] %vm832_vm3, %v805_v38  ;;  %v2997_v47 = vrot.slane %v2933_v46, 4  ;;  %v5587_v48 = vpop.f32.mrb[29].mxu0  ;;  %v1283_v58 = vsel %vm1265_vm4, %v1281_v27, %v1282_v36 }
 0x124   : > { %v1729_v28 = vld [vmem:[#allocation2 + $0x78] sm:$0xf]  ;;  %v1836_v5 = vrot.slane %v1834_v24, 3  ;;  %v1839_v23 = vrot.slane %v1837_v63, 4  ;;  %v2998_v31 = vrot.slane %v2934_v0, 4  ;;  %v5590_v32 = vpop.f32.mrb[30].mxu0  ;;  %v1832_v51 = vsel %vm896_vm5, %v1823_v4, %v1831_v13  ;;  %1324 = vrot.lane.b32.xlu1 %v1283_v58, %s5258_s17 }
 0x125   : > { %v2228_v49 = vld [vmem:[#allocation2 + $0x10] sm:$0xf0]  ;;  %v1844_v30 = vrot.slane %v1842_v60, 3  ;;  %v1847_v45 = vrot.slane %v1845_v61, 4  ;;  %v1851_v38 = vshrl.u32 %v1728_v14, 16  ;;  %v5594_v46 = vpop.f32.mrb[31].mxu0 }
 0x126   : > { %v2229_v57 = vld [vmem:[#allocation2 + $0x18] sm:$0x1f]  ;;  %2028 = vrot.lane.b32.xlu0 %v1832_v51, %s5258_s17  ;;  %v1840_v29 = vor.u32 %v1839_v23, %v1836_v5  ;;  %v2999_v27 = vsel %vm1265_vm4, %v2997_v47, %v2998_v31  ;;  %v1854_v63 = vshll.u32 %v1728_v14, 16  ;;  %v1859_v0 = vshrl.u32 %v1729_v28, 16  ;;  %v5213_v13 = vld [vmem:[%s6819_s4 + $0x8] sm:$0xff]  }
 0x127   : > { %v1848_v36 = vor.u32 %v1847_v45, %v1844_v30  ;;  %v1853_v24 = vrot.slane %v1851_v38, 3  ;;  %v1862_v62 = vshll.u32 %v1729_v28, 16  ;;  %v2261_v4 = vshrl.u32 %v2228_v49, 16  ;;  %4857 = vmatpush3.bf16.msra.mxu1 %v5213_v13  ;;  %v5214_v28 = vld [vmem:[%s6819_s4 + $0x50] sm:$0xff]   ;;  %v2936_v13 = vld [vmem:[#allocation2 + $0x38] sm:$0xf] }
 0x128   : > { %v1856_v60 = vrot.slane %v1854_v63, 4  ;;  %v1861_v61 = vrot.slane %v1859_v0, 3  ;;  %v2264_v58 = vshll.u32 %v2228_v49, 16  ;;  %v2269_v15 = vshrl.u32 %v2229_v57, 16  ;;  %3045 = vrot.lane.b32.xlu1 %v2999_v27, %s5258_s17  ;;  %v1213_v63 = vld [vmem:[#allocation2 + $0x60] sm:$0xf0]  ;;  %4858 = vmatprep.subr.bf16.mxu1 %v5214_v28 }
 0x129   : > { %v1849_v51 = vsel %vm896_vm5, %v1840_v29, %v1848_v36  ;;  %v1864_v47 = vrot.slane %v1862_v62, 4  ;;  %v2263_v14 = vrot.slane %v2261_v4, 4  ;;  %v2272_v5 = vshll.u32 %v2229_v57, 16  ;;  %v5610_v49 = vld [vmem:[#allocation2 + $0xa0] sm:$0xf0] }
 0x12a   : > { %v5612_v30 = vld [vmem:[#allocation2 + $0xa8] sm:$0x1f]  ;;  %v5614_v45 = vld [vmem:[#allocation2 + $0x90] sm:$0xf0]  ;;  %2030 = vrot.lane.b32.xlu0 %v1849_v51, %s5258_s17  ;;  %v647_v62 = vmul.f32 %v5510_v10, %v5394_v19  ;;  %v645_v38 = vmul.f32 %v5394_v19, %v5523_v34  ;;  %v1857_v27 = vor.u32 %v1856_v60, %v1853_v24  ;;  %v648_v36 = vmul.f32 %v5535_v6, %v5394_v19  ;;  %v2242_v56 = vld [vmem:[#allocation2 + $0x80] sm:$0xf0] }
 0x12b   : > { %v1214_v0 = vld [vmem:[#allocation2 + $0x68] sm:$0xf]  ;;  %v1865_v34 = vor.u32 %v1864_v47, %v1861_v61  ;;  %v2266_v11 = vrot.slane %v2264_v58, 5  ;;  %v2271_v57 = vrot.slane %v2269_v15, 4  ;;  %v2274_v54 = vrot.slane %v2272_v5, 5  ;;  %v5215_v24 = vld [vmem:[%s6819_s4 + $0x10] sm:$0xff]  }
 0x12c   : > { %v686_v60 = vadd.f32 %v5399_v21, %v647_v62  ;;  %v1284_v6 = vrot.slane %v1213_v63, 4  ;;  %v1285_v28 = vrot.slane %v1214_v0, 4  ;;  %v684_v4 = vadd.f32 %v5399_v21, %v645_v38  ;;  %v2935_v29 = vld [vmem:[#allocation2 + $0x30] sm:$0xf0]  ;;  %v1730_v15 = vld [vmem:[#allocation2 + $0x80] sm:$0xf8]  ;;  %4859 = vmatpush3.bf16.msra.mxu1 %v5215_v24 }
 0x12d   : > { %v1866_v10 = vsel %vm896_vm5, %v1857_v27, %v1865_v34  ;;  %v2267_v53 = vor.u32 %v2266_v11, %v2263_v14  ;;  %v2275_v51 = vor.u32 %v2274_v54, %v2271_v57  ;;  %v687_v61 = vadd.f32 %v5399_v21, %v648_v36  ;;  %v1731_v58 = vld [vmem:[#allocation2 + $0x88] sm:$0xf]  ;;  %v2230_v63 = vld [vmem:[#allocation2 + $0x20] sm:$0xf0]  ;;  %v5216_v14 = vld [vmem:[%s6819_s4 + $0x58] sm:$0xff]  }
 0x12e   : > { %2032 = vrot.lane.b32.xlu0 %v1866_v10, %s5258_s17  ;;  %v718_v47 = vmax.f32 %v686_v60, 0.0  ;;  %v1286_v5 = vsel %vm1265_vm4, %v1284_v6, %v1285_v28  ;;  %v716_v62 = vmax.f32 %v684_v4, 0.0  ;;  %v646_v38 = vmul.f32 %v5394_v19, %v5542_v39  ;;  %v2231_v34 = vld [vmem:[#allocation2 + $0x28] sm:$0x1f]  ;;  %v5217_v39 = vld [vmem:[%s6819_s4 + $0x18] sm:$0xff]   ;;  %4860 = vmatprep.subr.bf16.mxu1 %v5216_v14 }
 0x12f   : > { %v2276_v0 = vsel %vm1411_vm6, %v2267_v53, %v2275_v51  ;;  %v719_v27 = vmax.f32 %v687_v61, 0.0  ;;  %v3000_v11 = vrot.slane %v2935_v29, 4  ;;  %v3001_v54 = vrot.slane %v2936_v13, 4  ;;  %v1215_v24 = vld [vmem:[#allocation2 + $0x70] sm:$0xf0] }
 0x130   : > { %2532 = vrot.lane.b32.xlu1 %v2276_v0, %s5258_s17  ;;  %v685_v57 = vadd.f32 %v5399_v21, %v646_v38  ;;  %v1868_v36 = vshrl.u32 %v1730_v15, 16  ;;  %v1871_v10 = vshll.u32 %v1730_v15, 16  ;;  %v1876_v4 = vshrl.u32 %v1731_v58, 16  ;;  %v1216_v60 = vld [vmem:[#allocation2 + $0x78] sm:$0xf]  ;;  %4861 = vmatpush3.bf16.msra.mxu1 %v5217_v39 }
 0x131   : > { %v776_v53 = vpack.c.bf16 %v719_v27, %v718_v47  ;;  %v3002_v29 = vsel %vm1265_vm4, %v3000_v11, %v3001_v54  ;;  %v1879_v13 = vshll.u32 %v1731_v58, 16  ;;  %v2278_v51 = vshrl.u32 %v2230_v63, 16  ;;  %v5651_v38 = vld [vmem:[#allocation2 + $0x40] sm:$0xf0]  ;;  %v5653_v0 = vld [vmem:[#allocation2 + $0x98] sm:$0x1f] }
 0x132   : > { %1326 = vrot.lane.b32.xlu0 %v1286_v5, %s5258_s17  ;;  %v717_v6 = vmax.f32 %v685_v57, 0.0  ;;  %v1870_v28 = vrot.slane %v1868_v36, 3  ;;  %v1873_v61 = vrot.slane %v1871_v10, 4  ;;  %v1878_v15 = vrot.slane %v1876_v4, 3  ;;  %v2938_v5 = vld [vmem:[#allocation2 + $0x48] sm:$0xf] }
 0x133   : > { %v808_v23 = vrot.slane %v776_v53, 4  ;;  %v1881_v47 = vrot.slane %v1879_v13, 4  ;;  %v2280_v27 = vrot.slane %v2278_v51, 4  ;;  %v2281_v11 = vshll.u32 %v2230_v63, 16  ;;  %v1732_v57 = vld [vmem:[#allocation2 + $0x90] sm:$0xf8] }
 0x134   : > { %v775_v58 = vpack.c.bf16 %v717_v6, %v716_v62  ;;  %3047 = vrot.lane.b32.xlu1 %v3002_v29, %s5258_s17  ;;  %v1874_v54 = vor.u32 %v1873_v61, %v1870_v28  ;;  %v2286_v14 = vshrl.u32 %v2231_v34, 16  ;;  %v2289_v31 = vshll.u32 %v2231_v34, 16  ;;  %v1733_v53 = vld [vmem:[#allocation2 + $0x98] sm:$0xf]  ;;  %v5218_v62 = vld [vmem:[%s6819_s4 + $0x60] sm:$0xff]  }
 0x135   : > { %854 = vst.msk [vmem:[#allocation2 + $0xc0] sm:$0xf0] %vm830_vm2, %v808_v23  ;;  %v1882_v36 = vor.u32 %v1881_v47, %v1878_v15  ;;  %v2283_v10 = vrot.slane %v2281_v11, 5  ;;  %v1287_v4 = vrot.slane %v1215_v24, 4  ;;  %v1288_v39 = vrot.slane %v1216_v60, 4  ;;  %4862 = vmatprep.subr.bf16.mxu1 %v5218_v62  ;;  %v5219_v24 = vld [vmem:[%s6819_s4 + $0xc0] sm:$0xff]  }
 0x136   : > { %855 = vst.msk [vmem:[#allocation2 + $0xc8] sm:$0xf] %vm832_vm3, %v808_v23  ;;  %v807_v29 = vrot.slane %v775_v58, 4  ;;  %v2288_v13 = vrot.slane %v2286_v14, 4  ;;  %v2291_v34 = vrot.slane %v2289_v31, 5  ;;  %v3003_v23 = vrot.slane %v5651_v38, 4  ;;  %4966 = vmatprep.subr.bf16.mxu0 %v5219_v24 }
 0x137   : > { %v2232_v51 = vld [vmem:[#allocation2 + $0x30] sm:$0xf0]  ;;  %v1883_v6 = vsel %vm896_vm5, %v1874_v54, %v1882_v36  ;;  %v2284_v28 = vor.u32 %v2283_v10, %v2280_v27  ;;  %v3004_v61 = vrot.slane %v2938_v5, 4  ;;  %v1885_v31 = vshrl.u32 %v1732_v57, 16  ;;  %v2233_v11 = vld [vmem:[#allocation2 + $0x38] sm:$0x1f] }
 0x138   : > { %852 = vst.msk [vmem:[#allocation2 + $0xb0] sm:$0xf0] %vm830_vm2, %v807_v29  ;;  %2034 = vrot.lane.b32.xlu0 %v1883_v6, %s5258_s17  ;;  %v2292_v60 = vor.u32 %v2291_v34, %v2288_v13  ;;  %v1888_v15 = vshll.u32 %v1732_v57, 16  ;;  %v1893_v47 = vshrl.u32 %v1733_v53, 16  ;;  %v5220_v38 = vld [vmem:[%s6819_s4 + $0x20] sm:$0xff]   ;;  %v1289_v27 = vsel %vm1265_vm4, %v1287_v4, %v1288_v39  ;;  %v5222_v13 = vld [vmem:[%s6819_s4 + $0x68] sm:$0xff]  }
 0x139   : > { %853 = vst.msk [vmem:[#allocation2 + $0xb8] sm:$0xf] %vm832_vm3, %v807_v29  ;;  %v1896_v58 = vshll.u32 %v1733_v53, 16  ;;  %v2295_v54 = vshrl.u32 %v2232_v51, 16  ;;  %v2298_v14 = vshll.u32 %v2232_v51, 16  ;;  %v5221_v5 = vld [vmem:[%s6819_s4 + $0x80] sm:$0xff]   ;;  %4863 = vmatpush3.bf16.msra.mxu1 %v5220_v38 }
 0x13a   : > { %v2293_v36 = vsel %vm1411_vm6, %v2284_v28, %v2292_v60  ;;  %v1887_v10 = vrot.slane %v1885_v31, 3  ;;  %v1890_v57 = vrot.slane %v1888_v15, 4  ;;  %v1895_v62 = vrot.slane %v1893_v47, 3  ;;  %v1217_v29 = vld [vmem:[#allocation2 + $0x80] sm:$0xf0]  ;;  %4967 = vmatpush3.bf16.msra.mxu0 %v5221_v5  ;;  %4864 = vmatprep.subr.bf16.mxu1 %v5222_v13 }
 0x13b   : > { %2534 = vrot.lane.b32.xlu1 %v2293_v36, %s5258_s17  ;;  %v1898_v4 = vrot.slane %v1896_v58, 4  ;;  %v2297_v39 = vrot.slane %v2295_v54, 4  ;;  %v2300_v53 = vrot.slane %v2298_v14, 5  ;;  %v2303_v34 = vshrl.u32 %v2233_v11, 16  ;;  %v1218_v31 = vld [vmem:[#allocation2 + $0x88] sm:$0xf] }
 0x13c   : > { %v5683_v6 = vld [vmem:[#allocation2 + $0xc0] sm:$0xf0]  ;;  %1328 = vrot.lane.b32.xlu0 %v1289_v27, %s5258_s17  ;;  %v3005_v28 = vsel %vm1265_vm4, %v3003_v23, %v3004_v61  ;;  %v2306_v24 = vshll.u32 %v2233_v11, 16  ;;  %v651_v60 = vmul.f32 %v5568_v33, %v5394_v19  ;;  %v1891_v58 = vor.u32 %v1890_v57, %v1887_v10  ;;  %v2939_v51 = vld [vmem:[#allocation2 + $0x50] sm:$0xf0]  ;;  %v5223_v57 = vld [vmem:[%s6819_s4 + $0x28] sm:$0xff]  }
 0x13d   : > { %6851 = vst [vmem:[#allocation6_spill] sm:$0xff] %v5683_v6  ;;  %v5689_v15 = vld [vmem:[#allocation2 + $0xc8] sm:$0x1f]  ;;  %v1290_v54 = vrot.slane %v1217_v29, 4  ;;  %v1899_v14 = vor.u32 %v1898_v4, %v1895_v62  ;;  %v2301_v5 = vor.u32 %v2300_v53, %v2297_v39  ;;  %v2305_v36 = vrot.slane %v2303_v34, 4  ;;  %4865 = vmatpush3.bf16.msra.mxu1 %v5223_v57  ;;  %v5228_v62 = vld [vmem:[%s6819_s4 + $0x78] sm:$0xff]  }
 0x13e   : > { %6852 = vst [vmem:[#allocation7_spill] sm:$0xff] %v5689_v15  ;;  %v2308_v27 = vrot.slane %v2306_v24, 5  ;;  %v690_v33 = vadd.f32 %v5399_v21, %v651_v60  ;;  %v1291_v61 = vrot.slane %v1218_v31, 4  ;;  %v649_v11 = vmul.f32 %v5394_v19, %v5571_v59  ;;  %v2940_v10 = vld [vmem:[#allocation2 + $0x58] sm:$0xf]  ;;  %v5224_v24 = vld [vmem:[%s6819_s4 + $0x70] sm:$0xff]  }
 0x13f   : > { %v5693_v23 = vld [vmem:[#allocation2 + $0xb0] sm:$0xf0]  ;;  %3049 = vrot.lane.b32.xlu1 %v3005_v28, %s5258_s17  ;;  %v652_v13 = vmul.f32 %v5574_v43, %v5394_v19  ;;  %v1734_v53 = vld [vmem:[#allocation2 + $0xa0] sm:$0xf8]  ;;  %v1900_v34 = vsel %vm896_vm5, %v1891_v58, %v1899_v14  ;;  %v1735_v43 = vld [vmem:[#allocation2 + $0xa8] sm:$0xf]  ;;  %4866 = vmatprep.subr.bf16.mxu1 %v5224_v24 }
 0x140   : > { %6853 = vst [vmem:[#allocation8_spill] sm:$0xff] %v5693_v23  ;;  %v2309_v59 = vor.u32 %v2308_v27, %v2305_v36  ;;  %v722_v28 = vmax.f32 %v690_v33, 0.0  ;;  %v1292_v19 = vsel %vm1265_vm4, %v1290_v54, %v1291_v61  ;;  %2036 = vrot.lane.b32.xlu0 %v1900_v34, %s5258_s17  ;;  %v688_v60 = vadd.f32 %v5399_v21, %v649_v11  ;;  %v5719_v58 = vld [vmem:[%s6817_s2] ss:$0 sm:$0xff]  ;;  %v2234_v36 = vld [vmem:[#allocation2 + $0x40] sm:$0xf0] }
 0x141   : > { %v691_v31 = vadd.f32 %v5399_v21, %v652_v13  ;;  %v650_v54 = vmul.f32 %v5719_v58, %v5578_v3  ;;  %v3006_v14 = vrot.slane %v2939_v51, 4  ;;  %v5225_v27 = vld [vmem:[%s6819_s4 + $0xc8] sm:$0xff]   ;;  %v3007_v61 = vrot.slane %v2940_v10, 4  ;;  %v5226_v13 = vld [vmem:[%s6819_s4 + $0x30] sm:$0xff]   ;;  %v5734_v34 = vld [vmem:[%s6818_s3] ss:$0 sm:$0xff] }
 0x142   : > { %v2310_v33 = vsel %vm1411_vm6, %v2301_v5, %v2309_v59  ;;  %v1902_v11 = vshrl.u32 %v1734_v53, 16  ;;  %v1905_v57 = vshll.u32 %v1734_v53, 16  ;;  %v2235_v21 = vld [vmem:[#allocation2 + $0x48] sm:$0x1f]  ;;  %v720_v3 = vmax.f32 %v688_v60, 0.0  ;;  %4968 = vmatprep.subr.bf16.mxu0 %v5225_v27  ;;  %4867 = vmatpush3.bf16.msra.mxu1 %v5226_v13 }
 0x143   : > { %2536 = vrot.lane.b32.xlu1 %v2310_v33, %s5258_s17  ;;  %v723_v51 = vmax.f32 %v691_v31, 0.0  ;;  %v689_v5 = vadd.f32 %v5734_v34, %v650_v54  ;;  %v1910_v10 = vshrl.u32 %v1735_v43, 16  ;;  %v5737_v59 = vld [vmem:[#allocation2 + $0x90] sm:$0xf0]  ;;  %v5227_v53 = vld [vmem:[%s6819_s4 + $0x88] sm:$0xff]   ;;  %v3008_v24 = vsel %vm1265_vm4, %v3006_v14, %v3007_v61  ;;  %v5229_v14 = vld [vmem:[%s6819_s4 + $0x38] sm:$0xff]   ;;  %4868 = vmatprep.subr.bf16.mxu1 %v5228_v62 }
 0x144   : > { %v1904_v33 = vrot.slane %v1902_v11, 3  ;;  %v1907_v60 = vrot.slane %v1905_v57, 4  ;;  %v1913_v31 = vshll.u32 %v1735_v43, 16  ;;  %v1220_v29 = vld [vmem:[#allocation2 + $0x98] sm:$0xf]  ;;  %1330 = vrot.lane.b32.xlu0 %v1292_v19, %s5258_s17  ;;  %v2312_v47 = vshrl.u32 %v2234_v36, 16  ;;  %4969 = vmatpush3.bf16.msra.mxu0 %v5227_v53 }
 0x145   : > { %v778_v54 = vpack.c.bf16 %v723_v51, %v722_v28  ;;  %v721_v38 = vmax.f32 %v689_v5, 0.0  ;;  %v1912_v27 = vrot.slane %v1910_v10, 3  ;;  %v5747_v39 = vld [vmem:[#allocation2 + $0x60] sm:$0xf0]  ;;  %v5752_v43 = vld [vmem:[#allocation2 + $0xb8] sm:$0x1f] }
 0x146   : > { %6854 = vst [vmem:[#allocation9_spill] sm:$0xff] %v5752_v43  ;;  %v1908_v61 = vor.u32 %v1907_v60, %v1904_v33  ;;  %v1915_v11 = vrot.slane %v1913_v31, 4  ;;  %v2315_v57 = vshll.u32 %v2234_v36, 16  ;;  %v2320_v13 = vshrl.u32 %v2235_v21, 16  ;;  %v5754_v4 = vld [vmem:[#allocation2 + $0x68] sm:$0xf]  ;;  %4869 = vmatpush3.bf16.msra.mxu1 %v5229_v14 }
 0x147   : > { %v5230_v28 = vld [vmem:[%s6819_s4 + $0xd0] sm:$0xff]   ;;  %v810_v19 = vrot.slane %v778_v54, 4  ;;  %v777_v51 = vpack.c.bf16 %v721_v38, %v720_v3  ;;  %3051 = vrot.lane.b32.xlu1 %v3008_v24, %s5258_s17  ;;  %v2314_v5 = vrot.slane %v2312_v47, 4  ;;  %v2323_v10 = vshll.u32 %v2235_v21, 16  ;;  %v5763_v33 = vld [vmem:[%s6819_s4 + $0x100] sm:$0xff]  }
 0x148   : > { %v1736_v53 = vld [vmem:[#allocation2 + $0xb0] sm:$0xf8]  ;;  %v1916_v36 = vor.u32 %v1915_v11, %v1912_v27  ;;  %v2317_v60 = vrot.slane %v2315_v57, 5  ;;  %v2322_v31 = vrot.slane %v2320_v13, 4  ;;  %v1293_v62 = vrot.slane %v5737_v59, 4  ;;  %4970 = vmatprep.subr.bf16.mxu0 %v5230_v28  ;;  %5174 = vmatprep.subr.bf16.mxu1 %v5763_v33 }
 0x149   : > { %v1737_v63 = vld [vmem:[#allocation2 + $0xb8] sm:$0xf]  ;;  %v5232_v38 = vld [vmem:[%s6819_s4 + $0x90] sm:$0xff]   ;;  %858 = vst.msk [vmem:[#allocation2 + $0xe0] sm:$0xf0] %vm830_vm2, %v810_v19  ;;  %v809_v21 = vrot.slane %v777_v51, 4 }
 0x14a   : > { %859 = vst.msk [vmem:[#allocation2 + $0xe8] sm:$0xf] %vm832_vm3, %v810_v19  ;;  %v2325_v3 = vrot.slane %v2323_v10, 5  ;;  %v1294_v24 = vrot.slane %v1220_v29, 4  ;;  %v2236_v54 = vld [vmem:[#allocation2 + $0x50] sm:$0xf0]  ;;  %v1917_v59 = vsel %vm896_vm5, %v1908_v61, %v1916_v36  ;;  %v2318_v27 = vor.u32 %v2317_v60, %v2314_v5  ;;  %4971 = vmatpush3.bf16.msra.mxu0 %v5232_v38 }
 0x14b   : > { %v3009_v14 = vrot.slane %v5747_v39, 4  ;;  %v1919_v11 = vshrl.u32 %v1736_v53, 16  ;;  %856 = vst.msk [vmem:[#allocation2 + $0xd0] sm:$0xf0] %vm830_vm2, %v809_v21  ;;  %2038 = vrot.lane.b32.xlu0 %v1917_v59, %s5258_s17  ;;  %v3010_v13 = vrot.slane %v5754_v4, 4  ;;  %v1922_v29 = vshll.u32 %v1736_v53, 16 }
 0x14c   : > { %857 = vst.msk [vmem:[#allocation2 + $0xd8] sm:$0xf] %vm832_vm3, %v809_v21  ;;  %v2326_v57 = vor.u32 %v2325_v3, %v2322_v31  ;;  %v1927_v28 = vshrl.u32 %v1737_v63, 16  ;;  %v2237_v19 = vld [vmem:[#allocation2 + $0x58] sm:$0x1f]  ;;  %v1295_v51 = vsel %vm1265_vm4, %v1293_v62, %v1294_v24  ;;  %v1930_v5 = vshll.u32 %v1737_v63, 16 }
 0x14d   : > { %v1921_v61 = vrot.slane %v1919_v11, 3  ;;  %v2329_v10 = vshrl.u32 %v2236_v54, 16  ;;  %v5233_v39 = vld [vmem:[%s6819_s4 + $0xd8] sm:$0xff]   ;;  %v1924_v60 = vrot.slane %v1922_v29, 4  ;;  %v2332_v21 = vshll.u32 %v2236_v54, 16 }
 0x14e   : > { %v2327_v36 = vsel %vm1411_vm6, %v2318_v27, %v2326_v57  ;;  %v1929_v38 = vrot.slane %v1927_v28, 3  ;;  %v5234_v4 = vld [vmem:[%s6819_s4 + $0x98] sm:$0xff]   ;;  %v1932_v53 = vrot.slane %v1930_v5, 4  ;;  %v2337_v62 = vshrl.u32 %v2237_v19, 16  ;;  %v1221_v3 = vld [vmem:[#allocation2 + $0xa0] sm:$0xf0]  ;;  %4972 = vmatprep.subr.bf16.mxu0 %v5233_v39 }
 0x14f   : > { %2538 = vrot.lane.b32.xlu1 %v2327_v36, %s5258_s17  ;;  %v2331_v31 = vrot.slane %v2329_v10, 4  ;;  %v2340_v63 = vshll.u32 %v2237_v19, 16  ;;  %1332 = vrot.lane.b32.xlu0 %v1295_v51, %s5258_s17  ;;  %v1925_v59 = vor.u32 %v1924_v60, %v1921_v61  ;;  %v2334_v27 = vrot.slane %v2332_v21, 5  ;;  %v1222_v39 = vld [vmem:[#allocation2 + $0xa8] sm:$0xf] }
 0x150   : > { %v655_v54 = vmul.f32 %v5719_v58, %v5581_v2  ;;  %4973 = vmatpush3.bf16.msra.mxu0 %v5234_v4  ;;  %v5792_v11 = vld [vmem:[#allocation2 + $0xe0] sm:$0xf0]  ;;  %v1933_v29 = vor.u32 %v1932_v53, %v1929_v38  ;;  %v2339_v28 = vrot.slane %v2337_v62, 4  ;;  %v653_v19 = vmul.f32 %v5719_v58, %v5587_v48  ;;  %v2943_v53 = vld [vmem:[#allocation2 + $0x70] sm:$0xf0] }
 0x151   : > { %6855 = vst [vmem:[#allocation10_spill] sm:$0xff] %v5792_v11  ;;  %v5794_v57 = vld [vmem:[#allocation2 + $0xe8] sm:$0x1f]  ;;  %v2342_v5 = vrot.slane %v2340_v63, 5  ;;  %v3011_v61 = vsel %vm1265_vm4, %v3009_v14, %v3010_v13  ;;  %v1296_v36 = vrot.slane %v1221_v3, 4  ;;  %v2335_v38 = vor.u32 %v2334_v27, %v2331_v31 }
 0x152   : > { %6856 = vst [vmem:[#allocation11_spill] sm:$0xff] %v5794_v57  ;;  %v5801_v2 = vld [vmem:[#allocation2 + $0xd0] sm:$0xf0]  ;;  %v1934_v60 = vsel %vm896_vm5, %v1925_v59, %v1933_v29  ;;  %v694_v4 = vadd.f32 %v5734_v34, %v655_v54  ;;  %v2944_v48 = vld [vmem:[#allocation2 + $0x78] sm:$0xf]  ;;  %v1297_v31 = vrot.slane %v1222_v39, 4  ;;  %v692_v27 = vadd.f32 %v5734_v34, %v653_v19 }
 0x153   : > { %6857 = vst [vmem:[#allocation12_spill] sm:$0xff] %v5801_v2  ;;  %3053 = vrot.lane.b32.xlu1 %v3011_v61, %s5258_s17  ;;  %v2343_v21 = vor.u32 %v2342_v5, %v2339_v28  ;;  %2040 = vrot.lane.b32.xlu0 %v1934_v60, %s5258_s17  ;;  %v1738_v3 = vld [vmem:[#allocation2 + $0xc0] sm:$0xf8]  ;;  %v1739_v54 = vld [vmem:[#allocation2 + $0xc8] sm:$0xf]  ;;  %v656_v29 = vmul.f32 %v5719_v58, %v5590_v32  ;;  %v3012_v5 = vrot.slane %v2943_v53, 4 }
 0x154   : > { %v726_v59 = vmax.f32 %v694_v4, 0.0  ;;  %v654_v28 = vmul.f32 %v5719_v58, %v5594_v46  ;;  %v3013_v63 = vrot.slane %v2944_v48, 4  ;;  %v2238_v62 = vld [vmem:[#allocation2 + $0x60] sm:$0xf0]  ;;  %v1298_v60 = vsel %vm1265_vm4, %v1296_v36, %v1297_v31  ;;  %v2239_v4 = vld [vmem:[#allocation2 + $0x68] sm:$0x1f] }
 0x155   : > { %v2344_v61 = vsel %vm1411_vm6, %v2335_v38, %v2343_v21  ;;  %v724_v51 = vmax.f32 %v692_v27, 0.0  ;;  %v1936_v38 = vshrl.u32 %v1738_v3, 16  ;;  %v1939_v21 = vshll.u32 %v1738_v3, 16  ;;  %v5235_v19 = vld [vmem:[%s6819_s4 + $0xe0] sm:$0xff]   ;;  %v1223_v31 = vld [vmem:[#allocation2 + $0xb0] sm:$0xf0] }
 0x156   : > { %v695_v32 = vadd.f32 %v5734_v34, %v656_v29  ;;  %v693_v46 = vadd.f32 %v5734_v34, %v654_v28  ;;  %v3014_v58 = vsel %vm1265_vm4, %v3012_v5, %v3013_v63  ;;  %v1944_v39 = vshrl.u32 %v1739_v54, 16  ;;  %v5236_v36 = vld [vmem:[%s6819_s4 + $0xa0] sm:$0xff]   ;;  %4974 = vmatprep.subr.bf16.mxu0 %v5235_v19  ;;  %v1224_v13 = vld [vmem:[#allocation2 + $0xb8] sm:$0xf]  ;;  %v866_v11 = vld [vmem:[#allocation2 + $0x10] sm:$0xf8] }
 0x157   : > { %2540 = vrot.lane.b32.xlu1 %v2344_v61, %s5258_s17  ;;  %1334 = vrot.lane.b32.xlu0 %v1298_v60, %s5258_s17  ;;  %v1938_v53 = vrot.slane %v1936_v38, 3  ;;  %v1941_v48 = vrot.slane %v1939_v21, 4  ;;  %v1947_v3 = vshll.u32 %v1739_v54, 16  ;;  %v2346_v61 = vshrl.u32 %v2238_v62, 16  ;;  %v5830_v14 = vld [vmem:[#allocation2 + $0x80] sm:$0xf0] }
 0x158   : > { %v727_v27 = vmax.f32 %v695_v32, 0.0  ;;  %v725_v60 = vmax.f32 %v693_v46, 0.0  ;;  %v1946_v10 = vrot.slane %v1944_v39, 3  ;;  %v2349_v29 = vshll.u32 %v2238_v62, 16  ;;  %4975 = vmatpush3.bf16.msra.mxu0 %v5236_v36  ;;  %v5237_v54 = vld [vmem:[%s6819_s4 + $0xe8] sm:$0xff]  }
 0x159   : > { %v1942_v34 = vor.u32 %v1941_v48, %v1938_v53  ;;  %v1949_v63 = vrot.slane %v1947_v3, 4  ;;  %v2348_v28 = vrot.slane %v2346_v61, 4  ;;  %v2354_v5 = vshrl.u32 %v2239_v4, 16  ;;  %v5835_v38 = vld [vmem:[#allocation2 + $0xd8] sm:$0x1f]  ;;  %4976 = vmatprep.subr.bf16.mxu0 %v5237_v54  ;;  %v5238_v61 = vld [vmem:[%s6819_s4 + $0xa8] sm:$0xff]  }
 0x15a   : > { %6858 = vst [vmem:[#allocation13_spill] sm:$0xff] %v5835_v38  ;;  %v780_v21 = vpack.c.bf16 %v727_v27, %v726_v59  ;;  %v779_v19 = vpack.c.bf16 %v725_v60, %v724_v51  ;;  %v2351_v32 = vrot.slane %v2349_v29, 5  ;;  %v2357_v62 = vshll.u32 %v2239_v4, 16  ;;  %v2946_v46 = vld [vmem:[#allocation2 + $0x88] sm:$0xf]  ;;  %v5239_v51 = vld [vmem:[%s6819_s4 + $0xf0] sm:$0xff]  }
 0x15b   : > { %3055 = vrot.lane.b32.xlu1 %v3014_v58, %s5258_s17  ;;  %v1740_v39 = vld [vmem:[#allocation2 + $0xd0] sm:$0xf8]  ;;  %v1950_v36 = vor.u32 %v1949_v63, %v1946_v10  ;;  %v2356_v58 = vrot.slane %v2354_v5, 4  ;;  %v1299_v53 = vrot.slane %v1223_v31, 4  ;;  %v1300_v48 = vrot.slane %v1224_v13, 4 }
 0x15c   : > { %v1741_v3 = vld [vmem:[#allocation2 + $0xd8] sm:$0xf]  ;;  %v812_v24 = vrot.slane %v780_v21, 4  ;;  %v811_v47 = vrot.slane %v779_v19, 4  ;;  %v2352_v26 = vor.u32 %v2351_v32, %v2348_v28  ;;  %v2359_v25 = vrot.slane %v2357_v62, 5  ;;  %4977 = vmatpush3.bf16.msra.mxu0 %v5238_v61 }
 0x15d   : > { %v2240_v59 = vld [vmem:[#allocation2 + $0x70] sm:$0xf0]  ;;  %v1951_v4 = vsel %vm896_vm5, %v1942_v34, %v1950_v36  ;;  %v1301_v13 = vsel %vm1265_vm4, %v1299_v53, %v1300_v48  ;;  %v3015_v31 = vrot.slane %v5830_v14, 4  ;;  %v2241_v27 = vld [vmem:[#allocation2 + $0x78] sm:$0x1f]  ;;  %v1953_v63 = vshrl.u32 %v1740_v39, 16  ;;  %4978 = vmatprep.subr.bf16.mxu0 %v5239_v51 }
 0x15e   : > { %v1225_v60 = vld [vmem:[#allocation2 + $0xc0] sm:$0xf0]  ;;  %862 = vst.msk [vmem:[#allocation2 + $0x100] sm:$0xf0] %vm830_vm2, %v812_v24  ;;  %860 = vst.msk [vmem:[#allocation2 + $0xf0] sm:$0xf0] %vm830_vm2, %v811_v47  ;;  %2042 = vrot.lane.b32.xlu0 %v1951_v4, %s5258_s17  ;;  %v2360_v29 = vor.u32 %v2359_v25, %v2356_v58 }
 0x15f   : > { %863 = vst.msk [vmem:[#allocation2 + $0x108] sm:$0xf] %vm832_vm3, %v812_v24  ;;  %861 = vst.msk [vmem:[#allocation2 + $0xf8] sm:$0xf] %vm832_vm3, %v811_v47  ;;  %v1956_v34 = vshll.u32 %v1740_v39, 16  ;;  %v1961_v28 = vshrl.u32 %v1741_v3, 16 }
 0x160   : > { %v1226_v5 = vld [vmem:[#allocation2 + $0xc8] sm:$0xf]  ;;  %v5240_v14 = vld [vmem:[%s6819_s4 + $0xb0] sm:$0xff]   ;;  %v3016_v54 = vrot.slane %v2946_v46, 4  ;;  %v1964_v21 = vshll.u32 %v1741_v3, 16  ;;  %v2363_v19 = vshrl.u32 %v2240_v59, 16  ;;  %v2361_v25 = vsel %vm1411_vm6, %v2352_v26, %v2360_v29 }
 0x161   : > { %v2366_v24 = vshll.u32 %v2240_v59, 16  ;;  %v2947_v32 = vld [vmem:[#allocation2 + $0x90] sm:$0xf0]  ;;  %v2948_v62 = vld [vmem:[#allocation2 + $0x98] sm:$0xf]  ;;  %v1955_v39 = vrot.slane %v1953_v63, 3  ;;  %2542 = vrot.lane.b32.xlu1 %v2361_v25, %s5258_s17  ;;  %4979 = vmatpush3.bf16.msra.mxu0 %v5240_v14 }
 0x162   : > { %v5241_v47 = vld [vmem:[%s6819_s4 + $0xf8] sm:$0xff]   ;;  %v1958_v36 = vrot.slane %v1956_v34, 4  ;;  %v1963_v58 = vrot.slane %v1961_v28, 3  ;;  %v1742_v53 = vld [vmem:[#allocation2 + $0xe0] sm:$0xf8]  ;;  %v1966_v48 = vrot.slane %v1964_v21, 4  ;;  %1336 = vrot.lane.b32.xlu0 %v1301_v13, %s5258_s17  ;;  %v3017_v34 = vsel %vm1265_vm4, %v3015_v31, %v3016_v54 }
 0x163   : > { %v2365_v61 = vrot.slane %v2363_v19, 4  ;;  %v2368_v46 = vrot.slane %v2366_v24, 5  ;;  %v2371_v3 = vshrl.u32 %v2241_v27, 16  ;;  %v5242_v59 = vld [vmem:[%s6819_s4 + $0xb8] sm:$0xff]   ;;  %v2374_v4 = vshll.u32 %v2241_v27, 16  ;;  %4980 = vmatprep.subr.bf16.mxu0 %v5241_v47 }
 0x164   : > { %v1959_v51 = vor.u32 %v1958_v36, %v1955_v39  ;;  %v1302_v26 = vrot.slane %v1225_v60, 4  ;;  %v1303_v29 = vrot.slane %v1226_v5, 4  ;;  %v1967_v28 = vor.u32 %v1966_v48, %v1963_v58  ;;  %v1743_v25 = vld [vmem:[#allocation2 + $0xe8] sm:$0xf]  ;;  %v1228_v48 = vld [vmem:[#allocation2 + $0xd8] sm:$0xf] }
 0x165   : > { %v2373_v21 = vrot.slane %v2371_v3, 4  ;;  %v2376_v19 = vrot.slane %v2374_v4, 5  ;;  %v3018_v24 = vrot.slane %v2947_v32, 4  ;;  %v3019_v14 = vrot.slane %v2948_v62, 4  ;;  %v5866_v55 = vld [vmem:[#allocation2 + $0x100] sm:$0xf0]  ;;  %3057 = vrot.lane.b32.xlu1 %v3017_v34, %s5258_s17  ;;  %4981 = vmatpush3.bf16.msra.mxu0 %v5242_v59 }
 0x166   : > { %v1970_v10 = vshrl.u32 %v1742_v53, 16  ;;  %6859 = vst [vmem:[#allocation14_spill] sm:$0xff] %v5866_v55  ;;  %v5868_v13 = vld [vmem:[#allocation2 + $0x108] sm:$0x1f]  ;;  %v5870_v27 = vld [vmem:[#allocation2 + $0xf0] sm:$0xf0]  ;;  %v1968_v60 = vsel %vm896_vm5, %v1959_v51, %v1967_v28  ;;  %v2369_v5 = vor.u32 %v2368_v46, %v2365_v61  ;;  %v1304_v31 = vsel %vm1265_vm4, %v1302_v26, %v1303_v29  ;;  %5134 = vmatprep.subr.bf16.mxu0 %v5763_v33 }
 0x167   : > { %6860 = vst [vmem:[#allocation15_spill] sm:$0xff] %v5868_v13  ;;  %6861 = vst [vmem:[#allocation16_spill] sm:$0xff] %v5870_v27  ;;  %v5879_v39 = vld [vmem:[#allocation2 + $0xf8] sm:$0x1f]  ;;  %2044 = vrot.lane.b32.xlu0 %v1968_v60, %s5258_s17  ;;  %v2243_v46 = vld [vmem:[#allocation2 + $0x88] sm:$0x1f]  ;;  %v2377_v3 = vor.u32 %v2376_v19, %v2373_v21  ;;  %v3020_v59 = vsel %vm1265_vm4, %v3018_v24, %v3019_v14 }
 0x168   : > { %6862 = vst [vmem:[#allocation17_spill] sm:$0xff] %v5879_v39  ;;  %v1972_v51 = vrot.slane %v1970_v10, 3  ;;  %v1973_v4 = vshll.u32 %v1742_v53, 16  ;;  %v2949_v26 = vld [vmem:[#allocation2 + $0xa0] sm:$0xf0]  ;;  %v1978_v29 = vshrl.u32 %v1743_v25, 16 }
 0x169   : > { %v1981_v34 = vshll.u32 %v1743_v25, 16  ;;  %v2380_v28 = vshrl.u32 %v2242_v56, 16  ;;  %v2383_v60 = vshll.u32 %v2242_v56, 16  ;;  %v1227_v33 = vld [vmem:[#allocation2 + $0xd0] sm:$0xf0]  ;;  %v2378_v62 = vsel %vm1411_vm6, %v2369_v5, %v2377_v3 }
 0x16a   : > { %v2950_v47 = vld [vmem:[#allocation2 + $0xa8] sm:$0xf]  ;;  %v1975_v32 = vrot.slane %v1973_v4, 4  ;;  %v2388_v54 = vshrl.u32 %v2243_v46, 16  ;;  %v2391_v61 = vshll.u32 %v2243_v46, 16  ;;  %2544 = vrot.lane.b32.xlu1 %v2378_v62, %s5258_s17  ;;  %v1980_v21 = vrot.slane %v1978_v29, 3 }
 0x16b   : > { %1338 = vrot.lane.b32.xlu0 %v1304_v31, %s5258_s17  ;;  %v1983_v10 = vrot.slane %v1981_v34, 4  ;;  %v2382_v53 = vrot.slane %v2380_v28, 4  ;;  %v2385_v19 = vrot.slane %v2383_v60, 5  ;;  %v1744_v24 = vld [vmem:[#allocation2 + $0xf0] sm:$0xf8]  ;;  %v1305_v58 = vrot.slane %v1227_v33, 4 }
 0x16c   : > { %v1976_v14 = vor.u32 %v1975_v32, %v1972_v51  ;;  %v2390_v25 = vrot.slane %v2388_v54, 4  ;;  %v2393_v56 = vrot.slane %v2391_v61, 5  ;;  %v1745_v36 = vld [vmem:[#allocation2 + $0xf8] sm:$0xf]  ;;  %v1306_v3 = vrot.slane %v1228_v48, 4 }
 0x16d   : > { %v1984_v63 = vor.u32 %v1983_v10, %v1980_v21  ;;  %v2386_v5 = vor.u32 %v2385_v19, %v2382_v53  ;;  %v3021_v31 = vrot.slane %v2949_v26, 4  ;;  %v3022_v13 = vrot.slane %v2950_v47, 4  ;;  %v2244_v39 = vld [vmem:[#allocation2 + $0x90] sm:$0xf0]  ;;  %v2245_v61 = vld [vmem:[#allocation2 + $0x98] sm:$0x1f] }
 0x16e   : > { %v2394_v4 = vor.u32 %v2393_v56, %v2390_v25  ;;  %v1987_v46 = vshrl.u32 %v1744_v24, 16  ;;  %v1990_v55 = vshll.u32 %v1744_v24, 16  ;;  %3059 = vrot.lane.b32.xlu1 %v3020_v59, %s5258_s17  ;;  %v1307_v29 = vsel %vm1265_vm4, %v1305_v58, %v1306_v3  ;;  %v1229_v51 = vld [vmem:[#allocation2 + $0xe0] sm:$0xf0]  ;;  %v1230_v28 = vld [vmem:[#allocation2 + $0xe8] sm:$0xf] }
 0x16f   : > { %v1985_v62 = vsel %vm896_vm5, %v1976_v14, %v1984_v63  ;;  %v1995_v32 = vshrl.u32 %v1745_v36, 16  ;;  %v1998_v54 = vshll.u32 %v1745_v36, 16  ;;  %v3023_v26 = vsel %vm1265_vm4, %v3021_v31, %v3022_v13  ;;  %v2951_v60 = vld [vmem:[#allocation2 + $0xb0] sm:$0xf0]  ;;  %v2952_v10 = vld [vmem:[#allocation2 + $0xb8] sm:$0xf] }
 0x170   : > { %2046 = vrot.lane.b32.xlu0 %v1985_v62, %s5258_s17  ;;  %v2395_v48 = vsel %vm1411_vm6, %v2386_v5, %v2394_v4  ;;  %v1989_v47 = vrot.slane %v1987_v46, 3  ;;  %v1992_v34 = vrot.slane %v1990_v55, 4  ;;  %v2397_v21 = vshrl.u32 %v2244_v39, 16  ;;  %v1746_v24 = vld [vmem:[#allocation2 + $0x100] sm:$0xf8] }
 0x171   : > { %v1997_v33 = vrot.slane %v1995_v32, 3  ;;  %v2000_v59 = vrot.slane %v1998_v54, 4  ;;  %v2400_v63 = vshll.u32 %v2244_v39, 16  ;;  %v2405_v53 = vshrl.u32 %v2245_v61, 16  ;;  %v1747_v5 = vld [vmem:[#allocation2 + $0x108] sm:$0xf] }
 0x172   : > { %v1993_v58 = vor.u32 %v1992_v34, %v1989_v47  ;;  %v2408_v36 = vshll.u32 %v2245_v61, 16  ;;  %v1308_v19 = vrot.slane %v1229_v51, 4  ;;  %2546 = vrot.lane.b32.xlu1 %v2395_v48, %s5258_s17  ;;  %v2399_v25 = vrot.slane %v2397_v21, 4  ;;  %v2246_v39 = vld [vmem:[#allocation2 + $0xa0] sm:$0xf0] }
 0x173   : > { %v2001_v14 = vor.u32 %v2000_v59, %v1997_v33  ;;  %v2402_v56 = vrot.slane %v2400_v63, 5  ;;  %v1309_v13 = vrot.slane %v1230_v28, 4  ;;  %v2407_v55 = vrot.slane %v2405_v53, 4  ;;  %v2247_v61 = vld [vmem:[#allocation2 + $0xa8] sm:$0x1f] }
 0x174   : > { %1340 = vrot.lane.b32.xlu0 %v1307_v29, %s5258_s17  ;;  %v2410_v3 = vrot.slane %v2408_v36, 5  ;;  %v3024_v31 = vrot.slane %v2951_v60, 4  ;;  %v3025_v4 = vrot.slane %v2952_v10, 4  ;;  %v2004_v54 = vshrl.u32 %v1746_v24, 16  ;;  %v1231_v28 = vld [vmem:[#allocation2 + $0xf0] sm:$0xf0] }
 0x175   : > { %v2002_v46 = vsel %vm896_vm5, %v1993_v58, %v2001_v14  ;;  %v2403_v62 = vor.u32 %v2402_v56, %v2399_v25  ;;  %v1310_v32 = vsel %vm1265_vm4, %v1308_v19, %v1309_v13  ;;  %v2007_v47 = vshll.u32 %v1746_v24, 16  ;;  %v1232_v21 = vld [vmem:[#allocation2 + $0xf8] sm:$0xf]  ;;  %v2248_v36 = vld [vmem:[#allocation2 + $0xb0] sm:$0xf0] }
 0x176   : > { %v2411_v51 = vor.u32 %v2410_v3, %v2407_v55  ;;  %v3026_v48 = vsel %vm1265_vm4, %v3024_v31, %v3025_v4  ;;  %v2012_v34 = vshrl.u32 %v1747_v5, 16  ;;  %3061 = vrot.lane.b32.xlu1 %v3023_v26, %s5258_s17  ;;  %v2006_v29 = vrot.slane %v2004_v54, 3  ;;  %v2249_v56 = vld [vmem:[#allocation2 + $0xb8] sm:$0x1f]  ;;  %v2953_v31 = vld [vmem:[#allocation2 + $0xc0] sm:$0xf0] }
 0x177   : > { %v2015_v33 = vshll.u32 %v1747_v5, 16  ;;  %v2414_v60 = vshrl.u32 %v2246_v39, 16  ;;  %v2417_v59 = vshll.u32 %v2246_v39, 16  ;;  %v2009_v10 = vrot.slane %v2007_v47, 4  ;;  %v2954_v54 = vld [vmem:[#allocation2 + $0xc8] sm:$0xf] }
 0x178   : > { %2048 = vrot.lane.b32.xlu0 %v2002_v46, %s5258_s17  ;;  %v2412_v63 = vsel %vm1411_vm6, %v2403_v62, %v2411_v51  ;;  %v2014_v58 = vrot.slane %v2012_v34, 3  ;;  %v2422_v53 = vshrl.u32 %v2247_v61, 16  ;;  %v2425_v25 = vshll.u32 %v2247_v61, 16  ;;  %v2250_v51 = vld [vmem:[#allocation2 + $0xc0] sm:$0xf0] }
 0x179   : > { %v2017_v19 = vrot.slane %v2015_v33, 4  ;;  %v2416_v14 = vrot.slane %v2414_v60, 4  ;;  %v2419_v24 = vrot.slane %v2417_v59, 5  ;;  %v2010_v26 = vor.u32 %v2009_v10, %v2006_v29  ;;  %v2251_v29 = vld [vmem:[#allocation2 + $0xc8] sm:$0x1f] }
 0x17a   : > { %v2424_v5 = vrot.slane %v2422_v53, 4  ;;  %v1311_v55 = vrot.slane %v1231_v28, 4  ;;  %v1312_v3 = vrot.slane %v1232_v21, 4  ;;  %2548 = vrot.lane.b32.xlu1 %v2412_v63, %s5258_s17  ;;  %v2427_v46 = vrot.slane %v2425_v25, 5  ;;  %v2955_v63 = vld [vmem:[#allocation2 + $0xd0] sm:$0xf0] }
 0x17b   : > { %v2018_v4 = vor.u32 %v2017_v19, %v2014_v58  ;;  %v2420_v39 = vor.u32 %v2419_v24, %v2416_v14  ;;  %v2431_v62 = vshrl.u32 %v2248_v36, 16  ;;  %v2434_v47 = vshll.u32 %v2248_v36, 16  ;;  %v2956_v14 = vld [vmem:[#allocation2 + $0xd8] sm:$0xf]  ;;  %v864_v38 = vld [vmem:[#allocation2] sm:$0xf8] }
 0x17c   : > { %1342 = vrot.lane.b32.xlu0 %v1310_v32, %s5258_s17  ;;  %v1313_v61 = vsel %vm1265_vm4, %v1311_v55, %v1312_v3  ;;  %v2439_v34 = vshrl.u32 %v2249_v56, 16  ;;  %v2442_v33 = vshll.u32 %v2249_v56, 16  ;;  %v2428_v60 = vor.u32 %v2427_v46, %v2424_v5  ;;  %v2252_v56 = vld [vmem:[#allocation2 + $0xd0] sm:$0xf0]  ;;  %v867_v27 = vld [vmem:[#allocation2 + $0x18] sm:$0xf] }
 0x17d   : > { %v2019_v28 = vsel %vm896_vm5, %v2010_v26, %v2018_v4  ;;  %v2433_v59 = vrot.slane %v2431_v62, 4  ;;  %v3027_v21 = vrot.slane %v2953_v31, 4  ;;  %v2436_v10 = vrot.slane %v2434_v47, 5  ;;  %v2253_v4 = vld [vmem:[#allocation2 + $0xd8] sm:$0x1f] }
 0x17e   : > { %v5905_v13 = vpop.permute.xlu1 %2022  ;;  %v2441_v58 = vrot.slane %v2439_v34, 4  ;;  %v2444_v53 = vrot.slane %v2442_v33, 5  ;;  %v3028_v19 = vrot.slane %v2954_v54, 4  ;;  %3063 = vrot.lane.b32.xlu1 %v3026_v48, %s5258_s17  ;;  %v2429_v32 = vsel %vm1411_vm6, %v2420_v39, %v2428_v60  ;;  %v2957_v47 = vld [vmem:[#allocation2 + $0xe0] sm:$0xf0] }
 0x17f   : > { %v2448_v24 = vshrl.u32 %v2250_v51, 16  ;;  %v2451_v36 = vshll.u32 %v2250_v51, 16  ;;  %v2456_v25 = vshrl.u32 %v2251_v29, 16  ;;  %v2437_v26 = vor.u32 %v2436_v10, %v2433_v59  ;;  %v2958_v60 = vld [vmem:[#allocation2 + $0xe8] sm:$0xf] }
 0x180   : > { %2050 = vrot.lane.b32.xlu0 %v2019_v28, %s5258_s17  ;;  %v2445_v5 = vor.u32 %v2444_v53, %v2441_v58  ;;  %v3029_v3 = vsel %vm1265_vm4, %v3027_v21, %v3028_v19  ;;  %v2459_v31 = vshll.u32 %v2251_v29, 16  ;;  %v3030_v48 = vrot.slane %v2955_v63, 4  ;;  %v1381_v21 = vld [vmem:[#allocation2 + $0x10] sm:$0xf0] }
 0x181   : > { %v2450_v46 = vrot.slane %v2448_v24, 4  ;;  %v2453_v62 = vrot.slane %v2451_v36, 5  ;;  %v2458_v54 = vrot.slane %v2456_v25, 4  ;;  %v3031_v34 = vrot.slane %v2956_v14, 4  ;;  %v1382_v36 = vld [vmem:[#allocation2 + $0x18] sm:$0x1f] }
 0x182   : > { %v5913_v55 = vpop.permute.xlu1 %1316  ;;  %v2446_v39 = vsel %vm1411_vm6, %v2437_v26, %v2445_v5  ;;  %v2461_v51 = vrot.slane %v2459_v31, 5  ;;  %v2465_v33 = vshrl.u32 %v2252_v56, 16  ;;  %2550 = vrot.lane.b32.xlu1 %v2429_v32, %s5258_s17  ;;  %v2468_v59 = vshll.u32 %v2252_v56, 16  ;;  %v1379_v56 = vld [vmem:[#allocation2] sm:$0xf0] }
 0x183   : > { %v2454_v28 = vor.u32 %v2453_v62, %v2450_v46  ;;  %v2473_v10 = vshrl.u32 %v2253_v4, 16  ;;  %v2476_v58 = vshll.u32 %v2253_v4, 16  ;;  %v3032_v19 = vsel %vm1265_vm4, %v3030_v48, %v3031_v34  ;;  %v1380_v62 = vld [vmem:[#allocation2 + $0x8] sm:$0x1f]  ;;  %v874_v15 = vld [vmem:[#allocation2 + $0x50] sm:$0xf8] }
 0x184   : > { %1344 = vrot.lane.b32.xlu0 %v1313_v61, %s5258_s17  ;;  %v2462_v63 = vor.u32 %v2461_v51, %v2458_v54  ;;  %v2467_v24 = vrot.slane %v2465_v33, 4  ;;  %v3033_v14 = vrot.slane %v2957_v47, 4  ;;  %v2470_v25 = vrot.slane %v2468_v59, 5  ;;  %v2599_v9 = vld [vmem:[#allocation2 + $0x30] sm:$0xf8] }
 0x185   : > { %v2475_v26 = vrot.slane %v2473_v10, 4  ;;  %v2478_v32 = vrot.slane %v2476_v58, 5  ;;  %v3034_v5 = vrot.slane %v2958_v60, 4  ;;  %v1430_v4 = vshrl.u32 %v1381_v21, 16 }
 0x186   : > { %v2463_v31 = vsel %vm1411_vm6, %v2454_v28, %v2462_v63  ;;  %v1433_v46 = vshll.u32 %v1381_v21, 16  ;;  %2552 = vrot.lane.b32.xlu1 %v2446_v39, %s5258_s17  ;;  %v2471_v61 = vor.u32 %v2470_v25, %v2467_v24  ;;  %v1438_v51 = vshrl.u32 %v1382_v36, 16  ;;  %v2254_v28 = vld [vmem:[#allocation2 + $0xe0] sm:$0xf0]  ;;  %v2255_v24 = vld [vmem:[#allocation2 + $0xe8] sm:$0x1f] }
 0x187   : > { %v2479_v54 = vor.u32 %v2478_v32, %v2475_v26  ;;  %v3035_v48 = vsel %vm1265_vm4, %v3033_v14, %v3034_v5  ;;  %v1432_v34 = vrot.slane %v1430_v4, 4  ;;  %v1441_v60 = vshll.u32 %v1382_v36, 16  ;;  %v2959_v5 = vld [vmem:[#allocation2 + $0xf0] sm:$0xf0] }
 0x188   : > { %v5919_v29 = vpop.permute.xlu0 %2020  ;;  %v5921_v53 = vpop.permute.xlu1 %1318  ;;  %3065 = vrot.lane.b32.xlu0 %v3029_v3, %s5258_s17  ;;  %v1435_v33 = vrot.slane %v1433_v46, 5  ;;  %v1413_v59 = vshrl.u32 %v1379_v56, 16  ;;  %v1440_v21 = vrot.slane %v1438_v51, 4  ;;  %v1416_v39 = vshll.u32 %v1379_v56, 16 }
 0x189   : > { %v2480_v58 = vsel %vm1411_vm6, %v2471_v61, %v2479_v54  ;;  %v1421_v63 = vshrl.u32 %v1380_v62, 16  ;;  %v1443_v14 = vrot.slane %v1441_v60, 5  ;;  %v1424_v32 = vshll.u32 %v1380_v62, 16 }
 0x18a   : > { %v1436_v25 = vor.u32 %v1435_v33, %v1432_v34  ;;  %v1415_v26 = vrot.slane %v1413_v59, 4  ;;  %2554 = vrot.lane.b32.xlu1 %v2463_v31, %s5258_s17  ;;  %v1418_v3 = vrot.slane %v1416_v39, 5  ;;  %v2482_v36 = vshrl.u32 %v2254_v28, 16  ;;  %v2960_v34 = vld [vmem:[#allocation2 + $0xf8] sm:$0xf] }
 0x18b   : > { %v1423_v4 = vrot.slane %v1421_v63, 4  ;;  %v2485_v46 = vshll.u32 %v2254_v28, 16  ;;  %v1444_v61 = vor.u32 %v1443_v14, %v1440_v21  ;;  %v1426_v56 = vrot.slane %v1424_v32, 5 }
 0x18c   : > { %v5928_v47 = vpop.permute.xlu0 %1314  ;;  %v5931_v10 = vpop.permute.xlu1 %1320  ;;  %3067 = vrot.lane.b32.xlu0 %v3032_v19, %s5258_s17  ;;  %v2490_v54 = vshrl.u32 %v2255_v24, 16  ;;  %v2493_v51 = vshll.u32 %v2255_v24, 16  ;;  %v1419_v33 = vor.u32 %v1418_v3, %v1415_v26  ;;  %v2484_v60 = vrot.slane %v2482_v36, 4 }
 0x18d   : > { %v2487_v62 = vrot.slane %v2485_v46, 5  ;;  %v3036_v59 = vrot.slane %v2959_v5, 4  ;;  %v1445_v31 = vsel %vm1411_vm6, %v1436_v25, %v1444_v61  ;;  %v1427_v39 = vor.u32 %v1426_v56, %v1423_v4  ;;  %v865_v4 = vld [vmem:[#allocation2 + $0x8] sm:$0xf]  ;;  %v2256_v61 = vld [vmem:[#allocation2 + $0xf0] sm:$0xf0] }
 0x18e   : > { %v2492_v63 = vrot.slane %v2490_v54, 4  ;;  %v2495_v28 = vrot.slane %v2493_v51, 5  ;;  %2556 = vrot.lane.b32.xlu1 %v2480_v58, %s5258_s17  ;;  %1701 = vst.msk [vmem:[#allocation3 + $0x30] sm:$0xff] %vm728_vm1, %v1445_v31  ;;  %v3037_v21 = vrot.slane %v2960_v34, 4  ;;  %v923_v24 = vshrl.u32 %v867_v27, 16 }
 0x18f   : > { %v2488_v19 = vor.u32 %v2487_v62, %v2484_v60  ;;  %v926_v14 = vshll.u32 %v867_v27, 16  ;;  %2069 = vst.msk [vmem:[#allocation3 + $0x30] sm:$0xff] %vm1362_vm7, %v5905_v13  ;;  %v1428_v25 = vsel %vm1411_vm6, %v1419_v33, %v1427_v39  ;;  %v915_v5 = vshrl.u32 %v866_v11, 16  ;;  %v2257_v51 = vld [vmem:[#allocation2 + $0xf8] sm:$0x1f] }
 0x190   : > { %v5935_v57 = vpop.permute.xlu0 %2024  ;;  %3069 = vrot.lane.b32.xlu0 %v3035_v48, %s5258_s17  ;;  %v2496_v32 = vor.u32 %v2495_v28, %v2492_v63  ;;  %v918_v3 = vshll.u32 %v866_v11, 16  ;;  %1700 = vst.msk [vmem:[#allocation3 + $0x8] sm:$0xff] %vm728_vm1, %v1428_v25  ;;  %v3038_v58 = vsel %vm1265_vm4, %v3036_v59, %v3037_v21  ;;  %v925_v36 = vrot.slane %v923_v24, 3  ;;  %v868_v62 = vld [vmem:[#allocation2 + $0x20] sm:$0xf8] }
 0x191   : > { %v5939_v2 = vpop.permute.xlu1 %1322  ;;  %v928_v46 = vrot.slane %v926_v14, 4  ;;  %v898_v27 = vshrl.u32 %v864_v38, 16  ;;  %2068 = vst.msk [vmem:[#allocation3 + $0x8] sm:$0xff] %vm1362_vm7, %v5919_v29  ;;  %v917_v13 = vrot.slane %v915_v5, 3  ;;  %v901_v54 = vshll.u32 %v864_v38, 16 }
 0x192   : > { %v2497_v48 = vsel %vm1411_vm6, %v2488_v19, %v2496_v32  ;;  %v920_v56 = vrot.slane %v918_v3, 4  ;;  %v906_v33 = vshrl.u32 %v865_v4, 16  ;;  %v909_v60 = vshll.u32 %v865_v4, 16  ;;  %v2961_v29 = vld [vmem:[#allocation2 + $0x100] sm:$0xf0] }
 0x193   : > { %2558 = vrot.lane.b32.xlu1 %v2497_v48, %s5258_s17  ;;  %v929_v11 = vor.u32 %v928_v46, %v925_v36  ;;  %v900_v34 = vrot.slane %v898_v27, 3  ;;  %v903_v31 = vrot.slane %v901_v54, 4  ;;  %v2499_v39 = vshrl.u32 %v2256_v61, 16  ;;  %v2962_v25 = vld [vmem:[#allocation2 + $0x108] sm:$0xf] }
 0x194   : > { %v5943_v26 = vpop.permute.xlu0 %2026  ;;  %3071 = vrot.lane.b32.xlu0 %v3038_v58, %s5258_s17  ;;  %v921_v59 = vor.u32 %v920_v56, %v917_v13  ;;  %v2502_v63 = vshll.u32 %v2256_v61, 16  ;;  %v908_v38 = vrot.slane %v906_v33, 3  ;;  %v911_v21 = vrot.slane %v909_v60, 4  ;;  %v869_v58 = vld [vmem:[#allocation2 + $0x28] sm:$0xf] }
 0x195   : > { %v2507_v24 = vshrl.u32 %v2257_v51, 16  ;;  %v2510_v14 = vshll.u32 %v2257_v51, 16  ;;  %v904_v5 = vor.u32 %v903_v31, %v900_v34  ;;  %v2501_v3 = vrot.slane %v2499_v39, 4  ;;  %v1383_v48 = vld [vmem:[#allocation2 + $0x20] sm:$0xf0] }
 0x196   : > { %v5958_v19 = vpop.permute.xlu1 %1324  ;;  %v930_v32 = vsel %vm896_vm5, %v921_v59, %v929_v11  ;;  %v2504_v4 = vrot.slane %v2502_v63, 5  ;;  %v912_v36 = vor.u32 %v911_v21, %v908_v38  ;;  %v3039_v61 = vrot.slane %v2961_v29, 4  ;;  %v1384_v31 = vld [vmem:[#allocation2 + $0x28] sm:$0x1f]  ;;  %v2258_v21 = vld [vmem:[#allocation2 + $0x100] sm:$0xf0] }
 0x197   : > { %1186 = vst.msk [vmem:[#allocation3 + $0x28] sm:$0xff] %vm728_vm1, %v930_v32  ;;  %v2509_v46 = vrot.slane %v2507_v24, 4  ;;  %v2512_v27 = vrot.slane %v2510_v14, 5  ;;  %v3040_v56 = vrot.slane %v2962_v25, 4  ;;  %v932_v54 = vshrl.u32 %v868_v62, 16 }
 0x198   : > { %v5956_v28 = vpop.permute.xlu0 %2028  ;;  %1364 = vst.msk [vmem:[#allocation3 + $0x28] sm:$0xff] %vm1362_vm7, %v5913_v55  ;;  %v2505_v13 = vor.u32 %v2504_v4, %v2501_v3  ;;  %v935_v51 = vshll.u32 %v868_v62, 16  ;;  %v913_v11 = vsel %vm896_vm5, %v904_v5, %v912_v36  ;;  %v940_v60 = vshrl.u32 %v869_v58, 16  ;;  %v3446_v39 = vld [vmem:[#allocation3 + $0x8] sm:$0xff] }
 0x199   : > { %v2513_v34 = vor.u32 %v2512_v27, %v2509_v46  ;;  %v943_v59 = vshll.u32 %v869_v58, 16  ;;  %1185 = vst.msk [vmem:[#allocation3] sm:$0xff] %vm728_vm1, %v913_v11  ;;  %v3041_v63 = vsel %vm1265_vm4, %v3039_v61, %v3040_v56  ;;  %v934_v29 = vrot.slane %v932_v54, 3  ;;  %3893 = vmatprep.mubr.bf16.mxu1 %v3446_v39  ;;  %v2259_v5 = vld [vmem:[#allocation2 + $0x108] sm:$0x1f] }
 0x19a   : > { %v937_v38 = vrot.slane %v935_v51, 4  ;;  %v1447_v55 = vshrl.u32 %v1383_v48, 16  ;;  %v5969_v24 = vpop.permute.xlu1 %3045  ;;  %1363 = vst.msk [vmem:[#allocation3] sm:$0xff] %vm1362_vm7, %v5928_v47  ;;  %3073 = vrot.lane.b32.xlu0 %v3041_v63, %s5258_s17  ;;  %v942_v14 = vrot.slane %v940_v60, 3  ;;  %v1450_v32 = vshll.u32 %v1383_v48, 16 }
 0x19b   : > { %v2514_v62 = vsel %vm1411_vm6, %v2505_v13, %v2513_v34  ;;  %v945_v25 = vrot.slane %v943_v59, 4  ;;  %v1455_v58 = vshrl.u32 %v1384_v31, 16  ;;  %v1458_v36 = vshll.u32 %v1384_v31, 16  ;;  %v871_v54 = vld [vmem:[#allocation2 + $0x38] sm:$0xf] }
 0x19c   : > { %v5964_v33 = vpop.permute.xlu0 %2030  ;;  %2560 = vrot.lane.b32.xlu1 %v2514_v62, %s5258_s17  ;;  %v938_v3 = vor.u32 %v937_v38, %v934_v29  ;;  %v1449_v4 = vrot.slane %v1447_v55, 4  ;;  %v1452_v27 = vrot.slane %v1450_v32, 5  ;;  %v2516_v61 = vshrl.u32 %v2258_v21, 16  ;;  %v870_v34 = vld [vmem:[#allocation2 + $0x30] sm:$0xf8] }
 0x19d   : > { %v946_v46 = vor.u32 %v945_v25, %v942_v14  ;;  %v2519_v56 = vshll.u32 %v2258_v21, 16  ;;  %v1457_v47 = vrot.slane %v1455_v58, 4  ;;  %v1460_v51 = vrot.slane %v1458_v36, 5  ;;  %v1386_v29 = vld [vmem:[#allocation2 + $0x38] sm:$0x1f]  ;;  %v5987_v58 = vld [vmem:[%s6819_s4 + $0x108] sm:$0xff]  }
 0x19e   : > { %v2524_v13 = vshrl.u32 %v2259_v5, 16  ;;  %v2527_v11 = vshll.u32 %v2259_v5, 16  ;;  %v1453_v59 = vor.u32 %v1452_v27, %v1449_v4  ;;  %v2518_v39 = vrot.slane %v2516_v61, 4  ;;  %v1385_v62 = vld [vmem:[#allocation2 + $0x30] sm:$0xf0] }
 0x19f   : > { %v947_v48 = vsel %vm896_vm5, %v938_v3, %v946_v46  ;;  %v2521_v63 = vrot.slane %v2519_v56, 5  ;;  %v1461_v31 = vor.u32 %v1460_v51, %v1457_v47  ;;  %v957_v21 = vshrl.u32 %v871_v54, 16  ;;  %v872_v4 = vld [vmem:[#allocation2 + $0x40] sm:$0xf8]  ;;  %v873_v47 = vld [vmem:[#allocation2 + $0x48] sm:$0xf] }
 0x1a0   : > { %v5976_v60 = vpop.permute.xlu0 %2032  ;;  %1187 = vst.msk [vmem:[#allocation3 + $0x50] sm:$0xff] %vm728_vm1, %v947_v48  ;;  %v2526_v38 = vrot.slane %v2524_v13, 4  ;;  %v2529_v55 = vrot.slane %v2527_v11, 5  ;;  %v960_v32 = vshll.u32 %v871_v54, 16  ;;  %v949_v5 = vshrl.u32 %v870_v34, 16 }
 0x1a1   : > { %1365 = vst.msk [vmem:[#allocation3 + $0x50] sm:$0xff] %vm1362_vm7, %v5921_v53  ;;  %v2522_v25 = vor.u32 %v2521_v63, %v2518_v39  ;;  %v952_v3 = vshll.u32 %v870_v34, 16  ;;  %v1462_v36 = vsel %vm1411_vm6, %v1453_v59, %v1461_v31  ;;  %v959_v27 = vrot.slane %v957_v21, 3  ;;  %v3445_v56 = vld [vmem:[#allocation3] sm:$0xff]  ;;  %v3451_v34 = vld [vmem:[#allocation3 + $0x30] sm:$0xff] }
 0x1a2   : > { %v5980_v14 = vpop.permute.xlu1 %2532  ;;  %v2530_v46 = vor.u32 %v2529_v55, %v2526_v38  ;;  %v1472_v61 = vshrl.u32 %v1386_v29, 16  ;;  %1702 = vst.msk [vmem:[#allocation3 + $0x58] sm:$0xff] %vm728_vm1, %v1462_v36  ;;  %v962_v53 = vrot.slane %v960_v32, 4  ;;  %v951_v54 = vrot.slane %v949_v5, 3  ;;  %3894 = vmatmul.mubr.bf16.vlgmr.msra.gmra.mrb[0].mxu1 %v3445_v56  ;;  %v5999_v31 = vld [vmem:[%s6819_s4 + $0x100] sm:$0xff]  }
 0x1a3   : > { %v954_v13 = vrot.slane %v952_v3, 4  ;;  %v1475_v11 = vshll.u32 %v1386_v29, 16  ;;  %2070 = vst.msk [vmem:[#allocation3 + $0x58] sm:$0xff] %vm1362_vm7, %v5935_v57  ;;  %v1464_v39 = vshrl.u32 %v1385_v62, 16  ;;  %v1467_v63 = vshll.u32 %v1385_v62, 16  ;;  %5178 = vmatpush3.bf16.msra.mxu1 %v5999_v31  ;;  %3901 = vmatprep.mubr.bf16.mxu1 %v3451_v34  ;;  %v6009_v62 = vld [vmem:[%s6819_s4 + $0x110] sm:$0xff]  }
 0x1a4   : > { %v5990_v51 = vpop.permute.xlu0 %1326  ;;  %v2531_v48 = vsel %vm1411_vm6, %v2522_v25, %v2530_v46  ;;  %v1474_v59 = vrot.slane %v1472_v61, 4  ;;  %v963_v29 = vor.u32 %v962_v53, %v959_v27  ;;  %v966_v21 = vshrl.u32 %v872_v4, 16  ;;  %v1387_v57 = vld [vmem:[#allocation2 + $0x40] sm:$0xf0]  ;;  %5175 = vmatprep.subr.bf16.mxu1 %v5987_v58  ;;  %v1388_v46 = vld [vmem:[#allocation2 + $0x48] sm:$0x1f] }
 0x1a5   : > { %2562 = vrot.lane.b32.xlu1 %v2531_v48, %s5258_s17  ;;  %v955_v38 = vor.u32 %v954_v13, %v951_v54  ;;  %v1477_v55 = vrot.slane %v1475_v11, 5  ;;  %v1466_v25 = vrot.slane %v1464_v39, 4  ;;  %v1469_v5 = vrot.slane %v1467_v63, 5  ;;  %v875_v54 = vld [vmem:[#allocation2 + $0x58] sm:$0xf] }
 0x1a6   : > { %v6003_v32 = vpop.permute.xlu1 %3047  ;;  %v969_v3 = vshll.u32 %v872_v4, 16  ;;  %v974_v36 = vshrl.u32 %v873_v47, 16  ;;  %v968_v56 = vrot.slane %v966_v21, 3  ;;  %v977_v53 = vshll.u32 %v873_v47, 16  ;;  %v6022_v47 = vld [vmem:[%s6819_s4 + $0x118] sm:$0xff]  }
 0x1a7   : > { %v964_v27 = vsel %vm896_vm5, %v955_v38, %v963_v29  ;;  %v1478_v61 = vor.u32 %v1477_v55, %v1474_v59  ;;  %v1470_v13 = vor.u32 %v1469_v5, %v1466_v25  ;;  %v1481_v48 = vshrl.u32 %v1387_v57, 16  ;;  %5179 = vmatpush3.bf16.msra.mxu1 %v5987_v58  ;;  %v1390_v25 = vld [vmem:[#allocation2 + $0x58] sm:$0x1f]  ;;  %v3450_v5 = vld [vmem:[#allocation3 + $0x28] sm:$0xff] }
 0x1a8   : > { %1188 = vst.msk [vmem:[#allocation3 + $0x78] sm:$0xff] %vm728_vm1, %v964_v27  ;;  %v971_v11 = vrot.slane %v969_v3, 4  ;;  %v976_v34 = vrot.slane %v974_v36, 3  ;;  %v979_v4 = vrot.slane %v977_v53, 4  ;;  %v1484_v39 = vshll.u32 %v1387_v57, 16  ;;  %5176 = vmatprep.subr.bf16.mxu1 %v6009_v62 }
 0x1a9   : > { %1366 = vst.msk [vmem:[#allocation3 + $0x78] sm:$0xff] %vm1362_vm7, %v5931_v10  ;;  %v1489_v59 = vshrl.u32 %v1388_v46, 16  ;;  %v1492_v63 = vshll.u32 %v1388_v46, 16  ;;  %v1479_v29 = vsel %vm1411_vm6, %v1470_v13, %v1478_v61  ;;  %v1483_v55 = vrot.slane %v1481_v48, 4 }
 0x1aa   : > { %v6013_v6 = vpop.permute.xlu0 %2034  ;;  %v972_v38 = vor.u32 %v971_v11, %v968_v56  ;;  %v991_v21 = vshrl.u32 %v875_v54, 16  ;;  %1703 = vst.msk [vmem:[#allocation3 + $0x80] sm:$0xff] %vm728_vm1, %v1479_v29  ;;  %v980_v10 = vor.u32 %v979_v4, %v976_v34  ;;  %v1486_v57 = vrot.slane %v1484_v39, 5  ;;  %3902 = vmatmul.mubr.bf16.gmra.mrb[4].mxu1 %v3450_v5  ;;  %v3456_v46 = vld [vmem:[#allocation3 + $0x58] sm:$0xff]  ;;  %v1389_v11 = vld [vmem:[#allocation2 + $0x50] sm:$0xf0] }
 0x1ab   : > { %v1491_v3 = vrot.slane %v1489_v59, 4  ;;  %v1494_v36 = vrot.slane %v1492_v63, 5  ;;  %2071 = vst.msk [vmem:[#allocation3 + $0x80] sm:$0xff] %vm1362_vm7, %v5943_v26  ;;  %v994_v61 = vshll.u32 %v875_v54, 16  ;;  %v983_v56 = vshrl.u32 %v874_v15, 16  ;;  %3909 = vmatprep.mubr.bf16.mxu1 %v3456_v46  ;;  %5180 = vmatpush3.bf16.msra.mxu1 %v6009_v62 }
 0x1ac   : > { %v993_v53 = vrot.slane %v991_v21, 3  ;;  %v986_v13 = vshll.u32 %v874_v15, 16  ;;  %v981_v34 = vsel %vm896_vm5, %v972_v38, %v980_v10  ;;  %v1487_v4 = vor.u32 %v1486_v57, %v1483_v55  ;;  %v2597_v63 = vld [vmem:[#allocation2 + $0x20] sm:$0xf8]  ;;  %5177 = vmatprep.subr.bf16.mxu1 %v6022_v47  ;;  %v2598_v21 = vld [vmem:[#allocation2 + $0x28] sm:$0xf] }
 0x1ad   : > { %v6026_v27 = vpop.permute.xlu1 %2534  ;;  %v1495_v39 = vor.u32 %v1494_v36, %v1491_v3  ;;  %v1506_v59 = vshrl.u32 %v1390_v25, 16  ;;  %1189 = vst.msk [vmem:[#allocation3 + $0xa0] sm:$0xff] %vm728_vm1, %v981_v34  ;;  %v996_v26 = vrot.slane %v994_v61, 4  ;;  %v985_v54 = vrot.slane %v983_v56, 3  ;;  %v1391_v56 = vld [vmem:[#allocation2 + $0x60] sm:$0xf0] }
 0x1ae   : > { %v6030_v48 = vpop.permute.xlu0 %1328  ;;  %v988_v29 = vrot.slane %v986_v13, 4  ;;  %v1509_v15 = vshll.u32 %v1390_v25, 16  ;;  %1367 = vst.msk [vmem:[#allocation3 + $0xa0] sm:$0xff] %vm1362_vm7, %v5939_v2  ;;  %v1498_v38 = vshrl.u32 %v1389_v11, 16  ;;  %v1501_v55 = vshll.u32 %v1389_v11, 16 }
 0x1af   : > { %v1496_v5 = vsel %vm1411_vm6, %v1487_v4, %v1495_v39  ;;  %v1508_v46 = vrot.slane %v1506_v59, 4  ;;  %v997_v57 = vor.u32 %v996_v26, %v993_v53  ;;  %v2630_v61 = vshrl.u32 %v2597_v63, 16  ;;  %v1392_v13 = vld [vmem:[#allocation2 + $0x68] sm:$0x1f]  ;;  %5181 = vmatpush3.bf16.msra.mxu1 %v6022_v47  ;;  %v2084_v11 = vld [vmem:[#allocation2 + $0x10] sm:$0xf0] }
 0x1b0   : > { %1704 = vst.msk [vmem:[#allocation3 + $0xa8] sm:$0xff] %vm728_vm1, %v1496_v5  ;;  %v989_v3 = vor.u32 %v988_v29, %v985_v54  ;;  %v1511_v36 = vrot.slane %v1509_v15, 5  ;;  %v1500_v2 = vrot.slane %v1498_v38, 4  ;;  %v1503_v25 = vrot.slane %v1501_v55, 5  ;;  %v2085_v26 = vld [vmem:[#allocation2 + $0x18] sm:$0xf] }
 0x1b1   : > { %v6039_v10 = vpop.permute.xlu1 %3049  ;;  %2072 = vst.msk [vmem:[#allocation3 + $0xa8] sm:$0xff] %vm1362_vm7, %v5956_v28  ;;  %v2633_v34 = vshll.u32 %v2597_v63, 16  ;;  %v2638_v4 = vshrl.u32 %v2598_v21, 16  ;;  %v2632_v5 = vrot.slane %v2630_v61, 3  ;;  %v2641_v53 = vshll.u32 %v2598_v21, 16  ;;  %v3455_v54 = vld [vmem:[#allocation3 + $0x50] sm:$0xff] }
 0x1b2   : > { %v998_v39 = vsel %vm896_vm5, %v989_v3, %v997_v57  ;;  %v1512_v59 = vor.u32 %v1511_v36, %v1508_v46  ;;  %v6046_v29 = vpop.permute.xlu0 %2036  ;;  %v1504_v15 = vor.u32 %v1503_v25, %v1500_v2  ;;  %v1515_v28 = vshrl.u32 %v1391_v56, 16  ;;  %v876_v38 = vld [vmem:[#allocation2 + $0x60] sm:$0xf8]  ;;  %3910 = vmatmul.mubr.bf16.gmra.mrb[8].mxu1 %v3455_v54  ;;  %v877_v3 = vld [vmem:[#allocation2 + $0x68] sm:$0xf] }
 0x1b3   : > { %1190 = vst.msk [vmem:[#allocation3 + $0xc8] sm:$0xff] %vm728_vm1, %v998_v39  ;;  %v2635_v43 = vrot.slane %v2633_v34, 4  ;;  %v2640_v23 = vrot.slane %v2638_v4, 3  ;;  %v3461_v63 = vld [vmem:[#allocation3 + $0x80] sm:$0xff]  ;;  %v2643_v55 = vrot.slane %v2641_v53, 4  ;;  %v1518_v46 = vshll.u32 %v1391_v56, 16 }
 0x1b4   : > { %1368 = vst.msk [vmem:[#allocation3 + $0xc8] sm:$0xff] %vm1362_vm7, %v5958_v19  ;;  %v1523_v57 = vshrl.u32 %v1392_v13, 16  ;;  %v1526_v21 = vshll.u32 %v1392_v13, 16  ;;  %3917 = vmatprep.mubr.bf16.mxu1 %v3461_v63  ;;  %v1513_v61 = vsel %vm1411_vm6, %v1504_v15, %v1512_v59  ;;  %v1517_v25 = vrot.slane %v1515_v28, 4  ;;  %v2600_v15 = vld [vmem:[#allocation2 + $0x38] sm:$0xf] }
 0x1b5   : > { %v6051_v36 = vpop.permute.xlu1 %2536  ;;  %v2636_v2 = vor.u32 %v2635_v43, %v2632_v5  ;;  %v2148_v34 = vrot.slane %v2084_v11, 4  ;;  %1705 = vst.msk [vmem:[#allocation3 + $0xd0] sm:$0xff] %vm728_vm1, %v1513_v61  ;;  %v2644_v4 = vor.u32 %v2643_v55, %v2640_v23  ;;  %v1520_v39 = vrot.slane %v1518_v46, 5  ;;  %v1394_v23 = vld [vmem:[#allocation2 + $0x78] sm:$0x1f] }
 0x1b6   : > { %v1525_v54 = vrot.slane %v1523_v57, 4  ;;  %v1528_v7 = vrot.slane %v1526_v21, 5  ;;  %v6055_v19 = vpop.permute.xlu0 %1330  ;;  %2073 = vst.msk [vmem:[#allocation3 + $0xd0] sm:$0xff] %vm1362_vm7, %v5964_v33  ;;  %v2149_v56 = vrot.slane %v2085_v26, 4  ;;  %v1000_v13 = vshrl.u32 %v876_v38, 16 }
 0x1b7   : > { %v1003_v53 = vshll.u32 %v876_v38, 16  ;;  %v1008_v63 = vshrl.u32 %v877_v3, 16  ;;  %v2645_v43 = vsel %vm896_vm5, %v2636_v2, %v2644_v4  ;;  %v1521_v59 = vor.u32 %v1520_v39, %v1517_v25  ;;  %v1393_v33 = vld [vmem:[#allocation2 + $0x70] sm:$0xf0]  ;;  %v3460_v25 = vld [vmem:[#allocation3 + $0x78] sm:$0xff] }
 0x1b8   : > { %v1529_v11 = vor.u32 %v1528_v7, %v1525_v54  ;;  %v1011_v5 = vshll.u32 %v877_v3, 16  ;;  %2917 = vst.msk [vmem:[#allocation3 + $0x18] sm:$0xff] %vm728_vm1, %v2645_v43  ;;  %v2150_v28 = vsel %vm1265_vm4, %v2148_v34, %v2149_v56  ;;  %v1002_v55 = vrot.slane %v1000_v13, 3  ;;  %v3466_v26 = vld [vmem:[#allocation3 + $0xa8] sm:$0xff]  ;;  %v2963_v2 = vld [vmem:[#allocation2 + $0x110] sm:$0xf0] }
 0x1b9   : > { %v1005_v46 = vrot.slane %v1003_v53, 4  ;;  %v1010_v57 = vrot.slane %v1008_v63, 3  ;;  %v6062_v21 = vpop.permute.xlu1 %3051  ;;  %3093 = vst.msk [vmem:[#allocation3 + $0x18] sm:$0xff] %vm1362_vm7, %v5969_v24  ;;  %v2647_v3 = vshrl.u32 %v2599_v9, 16  ;;  %v2650_v61 = vshll.u32 %v2599_v9, 16 }
 0x1ba   : > { %v1530_v38 = vsel %vm1411_vm6, %v1521_v59, %v1529_v11  ;;  %2212 = vst.msk [vmem:[#allocation3 + $0x10] sm:$0xff] %vm728_vm1, %v2150_v28  ;;  %v1013_v7 = vrot.slane %v1011_v5, 4  ;;  %v2655_v4 = vshrl.u32 %v2600_v15, 16  ;;  %v2658_v39 = vshll.u32 %v2600_v15, 16  ;;  %v2964_v56 = vld [vmem:[#allocation2 + $0x118] sm:$0xf]  ;;  %3918 = vmatmul.mubr.bf16.gmra.mrb[12].mxu1 %v3460_v25 }
 0x1bb   : > { %1706 = vst.msk [vmem:[#allocation3 + $0xf8] sm:$0xff] %vm728_vm1, %v1530_v38  ;;  %v1006_v34 = vor.u32 %v1005_v46, %v1002_v55  ;;  %v1540_v54 = vshrl.u32 %v1394_v23, 16  ;;  %v2649_v13 = vrot.slane %v2647_v3, 3  ;;  %v2652_v53 = vrot.slane %v2650_v61, 4  ;;  %v2086_v63 = vld [vmem:[#allocation2 + $0x20] sm:$0xf0]  ;;  %3925 = vmatprep.mubr.bf16.mxu1 %v3466_v26 }
 0x1bc   : > { %2580 = vst.msk [vmem:[#allocation3 + $0x10] sm:$0xff] %vm1362_vm7, %v5980_v14  ;;  %2074 = vst.msk [vmem:[#allocation3 + $0xf8] sm:$0xff] %vm1362_vm7, %v5976_v60  ;;  %v1014_v24 = vor.u32 %v1013_v7, %v1010_v57  ;;  %v1543_v9 = vshll.u32 %v1394_v23, 16  ;;  %v2657_v59 = vrot.slane %v2655_v4, 3  ;;  %v2660_v11 = vrot.slane %v2658_v39, 4 }
 0x1bd   : > { %v6073_v43 = vpop.permute.xlu0 %2038  ;;  %v1542_v14 = vrot.slane %v1540_v54, 4  ;;  %v1532_v5 = vshrl.u32 %v1393_v33, 16  ;;  %v2087_v28 = vld [vmem:[#allocation2 + $0x28] sm:$0xf]  ;;  %v2653_v55 = vor.u32 %v2652_v53, %v2649_v13  ;;  %v1535_v38 = vshll.u32 %v1393_v33, 16 }
 0x1be   : > { %v1015_v15 = vsel %vm896_vm5, %v1006_v34, %v1014_v24  ;;  %v1545_v46 = vrot.slane %v1543_v9, 5  ;;  %v879_v25 = vld [vmem:[#allocation2 + $0x78] sm:$0xf]  ;;  %v878_v60 = vld [vmem:[#allocation2 + $0x70] sm:$0xf8]  ;;  %v2661_v57 = vor.u32 %v2660_v11, %v2657_v59  ;;  %v3042_v7 = vrot.slane %v2963_v2, 4 }
 0x1bf   : > { %1191 = vst.msk [vmem:[#allocation3 + $0xf0] sm:$0xff] %vm728_vm1, %v1015_v15  ;;  %v1534_v23 = vrot.slane %v1532_v5, 4  ;;  %v3043_v26 = vrot.slane %v2964_v56, 4  ;;  %v2601_v3 = vld [vmem:[#allocation2 + $0x40] sm:$0xf8]  ;;  %v1537_v39 = vrot.slane %v1535_v38, 5 }
 0x1c0   : > { %1369 = vst.msk [vmem:[#allocation3 + $0xf0] sm:$0xff] %vm1362_vm7, %v5990_v51  ;;  %v1546_v4 = vor.u32 %v1545_v46, %v1542_v14  ;;  %v2151_v34 = vrot.slane %v2086_v63, 4  ;;  %v2152_v54 = vrot.slane %v2087_v28, 4  ;;  %v2602_v24 = vld [vmem:[#allocation2 + $0x48] sm:$0xf]  ;;  %v2662_v13 = vsel %vm896_vm5, %v2653_v55, %v2661_v57  ;;  %v3448_v53 = vld [vmem:[#allocation3 + $0x18] sm:$0xff] }
 0x1c1   : > { %v6077_v61 = vpop.permute.xlu1 %2538  ;;  %v6081_v33 = vpop.permute.xlu0 %1332  ;;  %v3044_v9 = vsel %vm1265_vm4, %v3042_v7, %v3043_v26  ;;  %v1025_v2 = vshrl.u32 %v879_v25, 16  ;;  %v1028_v56 = vshll.u32 %v879_v25, 16  ;;  %v1395_v59 = vld [vmem:[#allocation2 + $0x80] sm:$0xf0]  ;;  %2918 = vst.msk [vmem:[#allocation3 + $0x40] sm:$0xff] %vm728_vm1, %v2662_v13  ;;  %4054 = vmatprep.mubr.bf16.mxu0 %v3448_v53  ;;  %v1538_v11 = vor.u32 %v1537_v39, %v1534_v23  ;;  %v3471_v57 = vld [vmem:[#allocation3 + $0xd0] sm:$0xff] }
 0x1c2   : > { %3075 = vrot.lane.b32.xlu0 %v3044_v9, %s5258_s17  ;;  %v2153_v51 = vsel %vm1265_vm4, %v2151_v34, %v2152_v54  ;;  %v1017_v14 = vshrl.u32 %v878_v60, 16  ;;  %v1020_v5 = vshll.u32 %v878_v60, 16  ;;  %v1396_v28 = vld [vmem:[#allocation2 + $0x88] sm:$0x1f]  ;;  %v3465_v15 = vld [vmem:[#allocation3 + $0xa0] sm:$0xff]  ;;  %3094 = vst.msk [vmem:[#allocation3 + $0x40] sm:$0xff] %vm1362_vm7, %v6003_v32 }
 0x1c3   : > { %v3447_v63 = vld [vmem:[#allocation3 + $0x10] sm:$0xff]  ;;  %2213 = vst.msk [vmem:[#allocation3 + $0x38] sm:$0xff] %vm728_vm1, %v2153_v51  ;;  %v1027_v55 = vrot.slane %v1025_v2, 3  ;;  %v1030_v46 = vrot.slane %v1028_v56, 4  ;;  %v2664_v38 = vshrl.u32 %v2601_v3, 16  ;;  %v2667_v25 = vshll.u32 %v2601_v3, 16  ;;  %3926 = vmatmul.mubr.bf16.gmra.mrb[16].mxu1 %v3465_v15 }
 0x1c4   : > { %4055 = vmatmul.mubr.bf16.vlgmr.msra.gmra.mrb[32].mxu0 %v3447_v63  ;;  %v1547_v7 = vsel %vm1411_vm6, %v1538_v11, %v1546_v4  ;;  %2581 = vst.msk [vmem:[#allocation3 + $0x38] sm:$0xff] %vm1362_vm7, %v6026_v27  ;;  %v1019_v60 = vrot.slane %v1017_v14, 3  ;;  %v1022_v26 = vrot.slane %v1020_v5, 4  ;;  %v2672_v39 = vshrl.u32 %v2602_v24, 16  ;;  %v2088_v32 = vld [vmem:[#allocation2 + $0x30] sm:$0xf0]  ;;  %3933 = vmatprep.mubr.bf16.mxu1 %v3471_v57 }
 0x1c5   : > { %v6091_v23 = vpop.permute.xlu1 %3053  ;;  %v6096_v34 = vpop.permute.xlu0 %2040  ;;  %5135 = vmatpush3.bf16.msra.mxu0 %v5999_v31  ;;  %1707 = vst.msk [vmem:[#allocation3 + $0x120] sm:$0xff] %vm728_vm1, %v1547_v7  ;;  %v1031_v3 = vor.u32 %v1030_v46, %v1027_v55  ;;  %v2666_v54 = vrot.slane %v2664_v38, 3  ;;  %v2669_v13 = vrot.slane %v2667_v25, 4  ;;  %v2675_v53 = vshll.u32 %v2602_v24, 16  ;;  %v2089_v9 = vld [vmem:[#allocation2 + $0x38] sm:$0xf] }
 0x1c6   : > { %5136 = vmatprep.subr.bf16.mxu0 %v5987_v58  ;;  %2075 = vst.msk [vmem:[#allocation3 + $0x120] sm:$0xff] %vm1362_vm7, %v6013_v6  ;;  %v1023_v27 = vor.u32 %v1022_v26, %v1019_v60  ;;  %v2674_v4 = vrot.slane %v2672_v39, 3  ;;  %v1549_v2 = vshrl.u32 %v1395_v59, 16  ;;  %v1552_v56 = vshll.u32 %v1395_v59, 16  ;;  %v880_v11 = vld [vmem:[#allocation2 + $0x80] sm:$0xf8] }
 0x1c7   : > { %v2670_v51 = vor.u32 %v2669_v13, %v2666_v54  ;;  %v2677_v63 = vrot.slane %v2675_v53, 4  ;;  %v1557_v31 = vshrl.u32 %v1396_v28, 16  ;;  %v1560_v14 = vshll.u32 %v1396_v28, 16  ;;  %v881_v5 = vld [vmem:[#allocation2 + $0x88] sm:$0xf]  ;;  %v3476_v26 = vld [vmem:[#allocation3 + $0xf8] sm:$0xff] }
 0x1c8   : > { %v1032_v24 = vsel %vm896_vm5, %v1023_v27, %v1031_v3  ;;  %v1551_v55 = vrot.slane %v1549_v2, 4  ;;  %v1554_v46 = vrot.slane %v1552_v56, 5  ;;  %v2154_v38 = vrot.slane %v2088_v32, 4  ;;  %v2603_v25 = vld [vmem:[#allocation2 + $0x50] sm:$0xf8]  ;;  %v3470_v13 = vld [vmem:[#allocation3 + $0xc8] sm:$0xff] }
 0x1c9   : > { %v6103_v15 = vpop.permute.xlu1 %2540  ;;  %5137 = vmatpush3.bf16.msra.mxu0 %v5987_v58  ;;  %1192 = vst.msk [vmem:[#allocation3 + $0x118] sm:$0xff] %vm728_vm1, %v1032_v24  ;;  %v2678_v6 = vor.u32 %v2677_v63, %v2674_v4  ;;  %v1559_v59 = vrot.slane %v1557_v31, 4  ;;  %v1562_v57 = vrot.slane %v1560_v14, 5  ;;  %v2155_v7 = vrot.slane %v2089_v9, 4  ;;  %v2604_v60 = vld [vmem:[#allocation2 + $0x58] sm:$0xf]  ;;  %v6111_v58 = vpop.permute.xlu0 %1334 }
 0x1ca   : > { %5138 = vmatprep.subr.bf16.mxu0 %v6009_v62  ;;  %1370 = vst.msk [vmem:[#allocation3 + $0x118] sm:$0xff] %vm1362_vm7, %v6030_v48  ;;  %v3453_v28 = vld [vmem:[#allocation3 + $0x40] sm:$0xff]  ;;  %v1555_v39 = vor.u32 %v1554_v46, %v1551_v55  ;;  %v1034_v3 = vshrl.u32 %v880_v11, 16  ;;  %v1037_v32 = vshll.u32 %v880_v11, 16  ;;  %v1042_v54 = vshrl.u32 %v881_v5, 16 }
 0x1cb   : > { %v2679_v53 = vsel %vm896_vm5, %v2670_v51, %v2678_v6  ;;  %4062 = vmatprep.mubr.bf16.mxu0 %v3453_v28  ;;  %v1563_v27 = vor.u32 %v1562_v57, %v1559_v59  ;;  %v2156_v9 = vsel %vm1265_vm4, %v2154_v38, %v2155_v7  ;;  %v3452_v4 = vld [vmem:[#allocation3 + $0x38] sm:$0xff]  ;;  %v1045_v2 = vshll.u32 %v881_v5, 16  ;;  %3934 = vmatmul.mubr.bf16.gmra.mrb[20].mxu1 %v3470_v13  ;;  %v1397_v14 = vld [vmem:[#allocation2 + $0x90] sm:$0xf0]  ;;  %v2090_v46 = vld [vmem:[#allocation2 + $0x40] sm:$0xf0] }
 0x1cc   : > { %v1398_v56 = vld [vmem:[#allocation2 + $0x98] sm:$0x1f]  ;;  %2919 = vst.msk [vmem:[#allocation3 + $0x68] sm:$0xff] %vm728_vm1, %v2679_v53  ;;  %2214 = vst.msk [vmem:[#allocation3 + $0x60] sm:$0xff] %vm728_vm1, %v2156_v9  ;;  %4063 = vmatmul.mubr.bf16.gmra.mrb[36].mxu0 %v3452_v4  ;;  %v1036_v48 = vrot.slane %v1034_v3, 3  ;;  %v1039_v11 = vrot.slane %v1037_v32, 4  ;;  %3941 = vmatprep.mubr.bf16.mxu1 %v3476_v26 }
 0x1cd   : > { %v1044_v63 = vrot.slane %v1042_v54, 3  ;;  %v2681_v31 = vshrl.u32 %v2603_v25, 16  ;;  %3095 = vst.msk [vmem:[#allocation3 + $0x68] sm:$0xff] %vm1362_vm7, %v6039_v10  ;;  %v1564_v51 = vsel %vm1411_vm6, %v1555_v39, %v1563_v27  ;;  %2582 = vst.msk [vmem:[#allocation3 + $0x60] sm:$0xff] %vm1362_vm7, %v6051_v36  ;;  %v1047_v5 = vrot.slane %v1045_v2, 4  ;;  %v6122_v38 = vpop.permute.xlu1 %3055  ;;  %5139 = vmatpush3.bf16.msra.mxu0 %v6009_v62 }
 0x1ce   : > { %v2684_v24 = vshll.u32 %v2603_v25, 16  ;;  %v2689_v55 = vshrl.u32 %v2604_v60, 16  ;;  %1708 = vst.msk [vmem:[#allocation3 + $0x148] sm:$0xff] %vm728_vm1, %v1564_v51  ;;  %v1040_v6 = vor.u32 %v1039_v11, %v1036_v48  ;;  %v2692_v57 = vshll.u32 %v2604_v60, 16  ;;  %v2091_v10 = vld [vmem:[#allocation2 + $0x48] sm:$0xf]  ;;  %5140 = vmatprep.subr.bf16.mxu0 %v6022_v47 }
 0x1cf   : > { %v2683_v59 = vrot.slane %v2681_v31, 3  ;;  %v1574_v7 = vshrl.u32 %v1398_v56, 16  ;;  %2076 = vst.msk [vmem:[#allocation3 + $0x148] sm:$0xff] %vm1362_vm7, %v6046_v29  ;;  %v1048_v36 = vor.u32 %v1047_v5, %v1044_v63  ;;  %v1577_v28 = vshll.u32 %v1398_v56, 16  ;;  %v883_v39 = vld [vmem:[#allocation2 + $0x98] sm:$0xf] }
 0x1d0   : > { %v2686_v25 = vrot.slane %v2684_v24, 4  ;;  %v2691_v26 = vrot.slane %v2689_v55, 3  ;;  %v2694_v3 = vrot.slane %v2692_v57, 4  ;;  %v1566_v62 = vshrl.u32 %v1397_v14, 16  ;;  %v882_v13 = vld [vmem:[#allocation2 + $0x90] sm:$0xf8]  ;;  %v6129_v53 = vpop.permute.xlu0 %2042 }
 0x1d1   : > { %v1576_v32 = vrot.slane %v1574_v7, 4  ;;  %v1569_v54 = vshll.u32 %v1397_v14, 16  ;;  %v1049_v60 = vsel %vm896_vm5, %v1040_v6, %v1048_v36  ;;  %v1579_v9 = vrot.slane %v1577_v28, 5  ;;  %v2605_v2 = vld [vmem:[#allocation2 + $0x60] sm:$0xf8]  ;;  %5141 = vmatpush3.bf16.msra.mxu0 %v6022_v47  ;;  %v3475_v31 = vld [vmem:[#allocation3 + $0xf0] sm:$0xff] }
 0x1d2   : > { %v2687_v27 = vor.u32 %v2686_v25, %v2683_v59  ;;  %v2157_v4 = vrot.slane %v2090_v46, 4  ;;  %1193 = vst.msk [vmem:[#allocation3 + $0x140] sm:$0xff] %vm728_vm1, %v1049_v60  ;;  %v2695_v29 = vor.u32 %v2694_v3, %v2691_v26  ;;  %v1568_v56 = vrot.slane %v1566_v62, 4  ;;  %v2606_v63 = vld [vmem:[#allocation2 + $0x68] sm:$0xf]  ;;  %v3481_v46 = vld [vmem:[#allocation3 + $0x120] sm:$0xff] }
 0x1d3   : > { %v1571_v48 = vrot.slane %v1569_v54, 5  ;;  %v2158_v11 = vrot.slane %v2091_v10, 4  ;;  %1371 = vst.msk [vmem:[#allocation3 + $0x140] sm:$0xff] %vm1362_vm7, %v6055_v19  ;;  %v1580_v14 = vor.u32 %v1579_v9, %v1576_v32  ;;  %v1059_v51 = vshrl.u32 %v883_v39, 16  ;;  %v1399_v55 = vld [vmem:[#allocation2 + $0xa0] sm:$0xf0]  ;;  %3942 = vmatmul.mubr.bf16.gmra.mrb[24].mxu1 %v3475_v31  ;;  %v6136_v6 = vpop.permute.xlu1 %2542 }
 0x1d4   : > { %v1062_v5 = vshll.u32 %v883_v39, 16  ;;  %v1051_v24 = vshrl.u32 %v882_v13, 16  ;;  %v2696_v47 = vsel %vm896_vm5, %v2687_v27, %v2695_v29  ;;  %v3458_v59 = vld [vmem:[#allocation3 + $0x68] sm:$0xff]  ;;  %v3457_v10 = vld [vmem:[#allocation3 + $0x60] sm:$0xff]  ;;  %v1054_v36 = vshll.u32 %v882_v13, 16  ;;  %3949 = vmatprep.mubr.bf16.mxu1 %v3481_v46  ;;  %v6140_v19 = vpop.permute.xlu0 %1336 }
 0x1d5   : > { %v1572_v57 = vor.u32 %v1571_v48, %v1568_v56  ;;  %v2159_v7 = vsel %vm1265_vm4, %v2157_v4, %v2158_v11  ;;  %v1400_v25 = vld [vmem:[#allocation2 + $0xa8] sm:$0x1f]  ;;  %2920 = vst.msk [vmem:[#allocation3 + $0x90] sm:$0xff] %vm728_vm1, %v2696_v47  ;;  %4070 = vmatprep.mubr.bf16.mxu0 %v3458_v59  ;;  %v1061_v26 = vrot.slane %v1059_v51, 3  ;;  %v2698_v3 = vshrl.u32 %v2605_v2, 16 }
 0x1d6   : > { %2215 = vst.msk [vmem:[#allocation3 + $0x88] sm:$0xff] %vm728_vm1, %v2159_v7  ;;  %v1064_v28 = vrot.slane %v1062_v5, 4  ;;  %v1053_v39 = vrot.slane %v1051_v24, 3  ;;  %v2092_v32 = vld [vmem:[#allocation2 + $0x50] sm:$0xf0]  ;;  %4071 = vmatmul.mubr.bf16.gmra.mrb[40].mxu0 %v3457_v10  ;;  %v1056_v54 = vrot.slane %v1054_v36, 4 }
 0x1d7   : > { %3096 = vst.msk [vmem:[#allocation3 + $0x90] sm:$0xff] %vm1362_vm7, %v6062_v21  ;;  %v1581_v62 = vsel %vm1411_vm6, %v1572_v57, %v1580_v14  ;;  %2583 = vst.msk [vmem:[#allocation3 + $0x88] sm:$0xff] %vm1362_vm7, %v6077_v61  ;;  %v2701_v13 = vshll.u32 %v2605_v2, 16  ;;  %v2706_v60 = vshrl.u32 %v2606_v63, 16  ;;  %v2093_v27 = vld [vmem:[#allocation2 + $0x58] sm:$0xf]  ;;  %v6150_v11 = vpop.permute.xlu1 %3057 }
 0x1d8   : > { %1709 = vst.msk [vmem:[#allocation3 + $0x170] sm:$0xff] %vm728_vm1, %v1581_v62  ;;  %v1065_v9 = vor.u32 %v1064_v28, %v1061_v26  ;;  %v2700_v4 = vrot.slane %v2698_v3, 3  ;;  %v2709_v29 = vshll.u32 %v2606_v63, 16  ;;  %v1583_v56 = vshrl.u32 %v1399_v55, 16  ;;  %v884_v48 = vld [vmem:[#allocation2 + $0xa0] sm:$0xf8] }
 0x1d9   : > { %2077 = vst.msk [vmem:[#allocation3 + $0x170] sm:$0xff] %vm1362_vm7, %v6073_v43  ;;  %v1057_v21 = vor.u32 %v1056_v54, %v1053_v39  ;;  %v2703_v31 = vrot.slane %v2701_v13, 4  ;;  %v2708_v61 = vrot.slane %v2706_v60, 3  ;;  %v1586_v14 = vshll.u32 %v1399_v55, 16  ;;  %v885_v51 = vld [vmem:[#allocation2 + $0xa8] sm:$0xf]  ;;  %v6154_v2 = vpop.permute.xlu0 %2044 }
 0x1da   : > { %v2711_v5 = vrot.slane %v2709_v29, 4  ;;  %v1585_v24 = vrot.slane %v1583_v56, 4  ;;  %v1591_v46 = vshrl.u32 %v1400_v25, 16  ;;  %v1594_v47 = vshll.u32 %v1400_v25, 16  ;;  %v3486_v59 = vld [vmem:[#allocation3 + $0x148] sm:$0xff]  ;;  %v3480_v26 = vld [vmem:[#allocation3 + $0x118] sm:$0xff] }
 0x1db   : > { %v1066_v63 = vsel %vm896_vm5, %v1057_v21, %v1065_v9  ;;  %v2704_v57 = vor.u32 %v2703_v31, %v2700_v4  ;;  %v1588_v7 = vrot.slane %v1586_v14, 5  ;;  %v2160_v10 = vrot.slane %v2092_v32, 4  ;;  %v2608_v36 = vld [vmem:[#allocation2 + $0x78] sm:$0xf]  ;;  %v2607_v3 = vld [vmem:[#allocation2 + $0x70] sm:$0xf8]  ;;  %3950 = vmatmul.mubr.bf16.gmra.mrb[28].mxu1 %v3480_v26 }
 0x1dc   : > { %1194 = vst.msk [vmem:[#allocation3 + $0x168] sm:$0xff] %vm728_vm1, %v1066_v63  ;;  %v2712_v43 = vor.u32 %v2711_v5, %v2708_v61  ;;  %v1593_v28 = vrot.slane %v1591_v46, 4  ;;  %v1596_v55 = vrot.slane %v1594_v47, 5  ;;  %v2161_v39 = vrot.slane %v2093_v27, 4  ;;  %v1402_v60 = vld [vmem:[#allocation2 + $0xb8] sm:$0x1f]  ;;  %3957 = vmatprep.mubr.bf16.mxu1 %v3486_v59  ;;  %v6162_v31 = vpop.permute.xlu1 %2544 }
 0x1dd   : > { %1372 = vst.msk [vmem:[#allocation3 + $0x168] sm:$0xff] %vm1362_vm7, %v6081_v33  ;;  %v1589_v25 = vor.u32 %v1588_v7, %v1585_v24  ;;  %v1068_v62 = vshrl.u32 %v884_v48, 16  ;;  %v1071_v54 = vshll.u32 %v884_v48, 16  ;;  %v1076_v13 = vshrl.u32 %v885_v51, 16  ;;  %v1401_v27 = vld [vmem:[#allocation2 + $0xb0] sm:$0xf0]  ;;  %v6166_v24 = vpop.permute.xlu0 %1338 }
 0x1de   : > { %v2713_v32 = vsel %vm896_vm5, %v2704_v57, %v2712_v43  ;;  %v3463_v9 = vld [vmem:[#allocation3 + $0x90] sm:$0xff]  ;;  %v1597_v4 = vor.u32 %v1596_v55, %v1593_v28  ;;  %v2162_v29 = vsel %vm1265_vm4, %v2160_v10, %v2161_v39  ;;  %v3462_v56 = vld [vmem:[#allocation3 + $0x88] sm:$0xff]  ;;  %v1079_v21 = vshll.u32 %v885_v51, 16  ;;  %v2094_v5 = vld [vmem:[#allocation2 + $0x60] sm:$0xf0] }
 0x1df   : > { %2921 = vst.msk [vmem:[#allocation3 + $0xb8] sm:$0xff] %vm728_vm1, %v2713_v32  ;;  %4078 = vmatprep.mubr.bf16.mxu0 %v3463_v9  ;;  %2216 = vst.msk [vmem:[#allocation3 + $0xb0] sm:$0xff] %vm728_vm1, %v2162_v29  ;;  %v1070_v33 = vrot.slane %v1068_v62, 3  ;;  %v1073_v48 = vrot.slane %v1071_v54, 4  ;;  %v1078_v61 = vrot.slane %v1076_v13, 3  ;;  %v2723_v14 = vshrl.u32 %v2608_v36, 16 }
 0x1e0   : > { %3097 = vst.msk [vmem:[#allocation3 + $0xb8] sm:$0xff] %vm1362_vm7, %v6091_v23  ;;  %v1598_v51 = vsel %vm1411_vm6, %v1589_v25, %v1597_v4  ;;  %2584 = vst.msk [vmem:[#allocation3 + $0xb0] sm:$0xff] %vm1362_vm7, %v6103_v15  ;;  %4079 = vmatmul.mubr.bf16.gmra.mrb[44].mxu0 %v3462_v56  ;;  %v1081_v46 = vrot.slane %v1079_v21, 4  ;;  %v2726_v47 = vshll.u32 %v2608_v36, 16  ;;  %v2715_v59 = vshrl.u32 %v2607_v3, 16  ;;  %v6176_v25 = vpop.permute.xlu1 %3059  ;;  %v3485_v32 = vld [vmem:[#allocation3 + $0x140] sm:$0xff] }
 0x1e1   : > { %v2095_v63 = vld [vmem:[#allocation2 + $0x68] sm:$0xf]  ;;  %1710 = vst.msk [vmem:[#allocation3 + $0x198] sm:$0xff] %vm728_vm1, %v1598_v51  ;;  %v1074_v57 = vor.u32 %v1073_v48, %v1070_v33  ;;  %v2725_v7 = vrot.slane %v2723_v14, 3  ;;  %v2718_v10 = vshll.u32 %v2607_v3, 16  ;;  %v1608_v26 = vshrl.u32 %v1402_v60, 16 }
 0x1e2   : > { %v887_v43 = vld [vmem:[#allocation2 + $0xb8] sm:$0xf]  ;;  %2078 = vst.msk [vmem:[#allocation3 + $0x198] sm:$0xff] %vm1362_vm7, %v6096_v34  ;;  %v1082_v23 = vor.u32 %v1081_v46, %v1078_v61  ;;  %v2728_v28 = vrot.slane %v2726_v47, 4  ;;  %v2717_v55 = vrot.slane %v2715_v59, 3  ;;  %v1611_v39 = vshll.u32 %v1402_v60, 16  ;;  %v6180_v61 = vpop.permute.xlu0 %2046 }
 0x1e3   : > { %v886_v15 = vld [vmem:[#allocation2 + $0xb0] sm:$0xf8]  ;;  %v2720_v36 = vrot.slane %v2718_v10, 4  ;;  %v1610_v62 = vrot.slane %v1608_v26, 4  ;;  %v1600_v54 = vshrl.u32 %v1401_v27, 16  ;;  %v1603_v13 = vshll.u32 %v1401_v27, 16  ;;  %3958 = vmatmul.mubr.bf16.gmra.mrb[32].mxu1 %v3485_v32 }
 0x1e4   : > { %v1083_v9 = vsel %vm896_vm5, %v1074_v57, %v1082_v23  ;;  %v2729_v3 = vor.u32 %v2728_v28, %v2725_v7  ;;  %v1613_v4 = vrot.slane %v1611_v39, 5  ;;  %v2163_v29 = vrot.slane %v2094_v5, 4  ;;  %v3491_v56 = vld [vmem:[#allocation3 + $0x170] sm:$0xff]  ;;  %v2609_v48 = vld [vmem:[#allocation2 + $0x80] sm:$0xf8]  ;;  %v6184_v47 = vpop.permute.xlu1 %2546 }
 0x1e5   : > { %1195 = vst.msk [vmem:[#allocation3 + $0x190] sm:$0xff] %vm728_vm1, %v1083_v9  ;;  %v2721_v34 = vor.u32 %v2720_v36, %v2717_v55  ;;  %v1602_v21 = vrot.slane %v1600_v54, 4  ;;  %v1605_v60 = vrot.slane %v1603_v13, 5  ;;  %v2164_v33 = vrot.slane %v2095_v63, 4  ;;  %3965 = vmatprep.mubr.bf16.mxu1 %v3491_v56  ;;  %v2610_v5 = vld [vmem:[#allocation2 + $0x88] sm:$0xf] }
 0x1e6   : > { %1373 = vst.msk [vmem:[#allocation3 + $0x190] sm:$0xff] %vm1362_vm7, %v6111_v58  ;;  %v1614_v27 = vor.u32 %v1613_v4, %v1610_v62  ;;  %v1093_v14 = vshrl.u32 %v887_v43, 16  ;;  %v1096_v51 = vshll.u32 %v887_v43, 16  ;;  %v1085_v46 = vshrl.u32 %v886_v15, 16  ;;  %v1403_v23 = vld [vmem:[#allocation2 + $0xc0] sm:$0xf0] }
 0x1e7   : > { %v2730_v59 = vsel %vm896_vm5, %v2721_v34, %v2729_v3  ;;  %v3468_v57 = vld [vmem:[#allocation3 + $0xb8] sm:$0xff]  ;;  %v1606_v7 = vor.u32 %v1605_v60, %v1602_v21  ;;  %v2165_v63 = vsel %vm1265_vm4, %v2163_v29, %v2164_v33  ;;  %v3467_v10 = vld [vmem:[#allocation3 + $0xb0] sm:$0xff]  ;;  %v1088_v26 = vshll.u32 %v886_v15, 16  ;;  %v1404_v39 = vld [vmem:[#allocation2 + $0xc8] sm:$0x1f] }
 0x1e8   : > { %2922 = vst.msk [vmem:[#allocation3 + $0xe0] sm:$0xff] %vm728_vm1, %v2730_v59  ;;  %4086 = vmatprep.mubr.bf16.mxu0 %v3468_v57  ;;  %2217 = vst.msk [vmem:[#allocation3 + $0xd8] sm:$0xff] %vm728_vm1, %v2165_v63  ;;  %v1095_v58 = vrot.slane %v1093_v14, 3  ;;  %v1098_v43 = vrot.slane %v1096_v51, 4  ;;  %v1087_v28 = vrot.slane %v1085_v46, 3  ;;  %v2732_v55 = vshrl.u32 %v2609_v48, 16  ;;  %v6196_v34 = vpop.permute.xlu1 %3061 }
 0x1e9   : > { %3098 = vst.msk [vmem:[#allocation3 + $0xe0] sm:$0xff] %vm1362_vm7, %v6122_v38  ;;  %v1615_v36 = vsel %vm1411_vm6, %v1606_v7, %v1614_v27  ;;  %2585 = vst.msk [vmem:[#allocation3 + $0xd8] sm:$0xff] %vm1362_vm7, %v6136_v6  ;;  %4087 = vmatmul.mubr.bf16.gmra.mrb[48].mxu0 %v3467_v10  ;;  %v1090_v15 = vrot.slane %v1088_v26, 4  ;;  %v2735_v62 = vshll.u32 %v2609_v48, 16  ;;  %v2740_v54 = vshrl.u32 %v2610_v5, 16  ;;  %v3496_v56 = vld [vmem:[#allocation3 + $0x198] sm:$0xff]  ;;  %v6200_v48 = vpop.permute.xlu0 %1340 }
 0x1ea   : > { %v2097_v13 = vld [vmem:[#allocation2 + $0x78] sm:$0xf]  ;;  %1711 = vst.msk [vmem:[#allocation3 + $0x1c0] sm:$0xff] %vm728_vm1, %v1615_v36  ;;  %v1099_v32 = vor.u32 %v1098_v43, %v1095_v58  ;;  %v2734_v9 = vrot.slane %v2732_v55, 3  ;;  %v2743_v3 = vshll.u32 %v2610_v5, 16  ;;  %v1617_v4 = vshrl.u32 %v1403_v23, 16 }
 0x1eb   : > { %v2096_v29 = vld [vmem:[#allocation2 + $0x70] sm:$0xf0]  ;;  %2079 = vst.msk [vmem:[#allocation3 + $0x1c0] sm:$0xff] %vm1362_vm7, %v6129_v53  ;;  %v1091_v38 = vor.u32 %v1090_v15, %v1087_v28  ;;  %v2737_v6 = vrot.slane %v2735_v62, 4  ;;  %v2742_v21 = vrot.slane %v2740_v54, 3  ;;  %v1620_v60 = vshll.u32 %v1403_v23, 16 }
 0x1ec   : > { %v888_v33 = vld [vmem:[#allocation2 + $0xc0] sm:$0xf8]  ;;  %v3490_v27 = vld [vmem:[#allocation3 + $0x168] sm:$0xff]  ;;  %v2745_v14 = vrot.slane %v2743_v3, 4  ;;  %v1619_v51 = vrot.slane %v1617_v4, 4  ;;  %v1625_v46 = vshrl.u32 %v1404_v39, 16  ;;  %v6206_v62 = vpop.permute.xlu1 %2548 }
 0x1ed   : > { %v1628_v5 = vshll.u32 %v1404_v39, 16  ;;  %v889_v59 = vld [vmem:[#allocation2 + $0xc8] sm:$0xf]  ;;  %3966 = vmatmul.mubr.bf16.gmra.mrb[36].mxu1 %v3490_v27  ;;  %v1100_v57 = vsel %vm896_vm5, %v1091_v38, %v1099_v32  ;;  %v2738_v7 = vor.u32 %v2737_v6, %v2734_v9  ;;  %v1622_v63 = vrot.slane %v1620_v60, 5  ;;  %v2612_v43 = vld [vmem:[#allocation2 + $0x98] sm:$0xf]  ;;  %v6212_v60 = vpop.permute.xlu0 %2048 }
 0x1ee   : > { %v2167_v10 = vrot.slane %v2097_v13, 4  ;;  %3973 = vmatprep.mubr.bf16.mxu1 %v3496_v56  ;;  %1196 = vst.msk [vmem:[#allocation3 + $0x1b8] sm:$0xff] %vm728_vm1, %v1100_v57  ;;  %v2746_v53 = vor.u32 %v2745_v14, %v2742_v21  ;;  %v1627_v26 = vrot.slane %v1625_v46, 4  ;;  %v2166_v58 = vrot.slane %v2096_v29, 4  ;;  %v2611_v15 = vld [vmem:[#allocation2 + $0x90] sm:$0xf8] }
 0x1ef   : > { %v1630_v23 = vrot.slane %v1628_v5, 5  ;;  %1374 = vst.msk [vmem:[#allocation3 + $0x1b8] sm:$0xff] %vm1362_vm7, %v6140_v19  ;;  %v1623_v28 = vor.u32 %v1622_v63, %v1619_v51  ;;  %v1102_v55 = vshrl.u32 %v888_v33, 16  ;;  %v1105_v39 = vshll.u32 %v888_v33, 16  ;;  %v1406_v29 = vld [vmem:[#allocation2 + $0xd8] sm:$0x1f] }
 0x1f0   : > { %v1110_v36 = vshrl.u32 %v889_v59, 16  ;;  %v2747_v54 = vsel %vm896_vm5, %v2738_v7, %v2746_v53  ;;  %v3473_v13 = vld [vmem:[#allocation3 + $0xe0] sm:$0xff]  ;;  %v2168_v9 = vsel %vm1265_vm4, %v2166_v58, %v2167_v10  ;;  %v3472_v3 = vld [vmem:[#allocation3 + $0xd8] sm:$0xff]  ;;  %v1113_v4 = vshll.u32 %v889_v59, 16  ;;  %v1405_v21 = vld [vmem:[#allocation2 + $0xd0] sm:$0xf0] }
 0x1f1   : > { %v1631_v32 = vor.u32 %v1630_v23, %v1627_v26  ;;  %2923 = vst.msk [vmem:[#allocation3 + $0x108] sm:$0xff] %vm728_vm1, %v2747_v54  ;;  %4094 = vmatprep.mubr.bf16.mxu0 %v3473_v13  ;;  %2218 = vst.msk [vmem:[#allocation3 + $0x100] sm:$0xff] %vm728_vm1, %v2168_v9  ;;  %v1104_v19 = vrot.slane %v1102_v55, 3  ;;  %v1107_v56 = vrot.slane %v1105_v39, 4  ;;  %v2757_v6 = vshrl.u32 %v2612_v43, 16  ;;  %v3495_v10 = vld [vmem:[#allocation3 + $0x190] sm:$0xff] }
 0x1f2   : > { %v1112_v38 = vrot.slane %v1110_v36, 3  ;;  %3099 = vst.msk [vmem:[#allocation3 + $0x108] sm:$0xff] %vm1362_vm7, %v6150_v11  ;;  %2586 = vst.msk [vmem:[#allocation3 + $0x100] sm:$0xff] %vm1362_vm7, %v6162_v31  ;;  %4095 = vmatmul.mubr.bf16.gmra.mrb[52].mxu0 %v3472_v3  ;;  %v1115_v27 = vrot.slane %v1113_v4, 4  ;;  %v2760_v14 = vshll.u32 %v2612_v43, 16  ;;  %v2749_v51 = vshrl.u32 %v2611_v15, 16 }
 0x1f3   : > { %v1632_v33 = vsel %vm1411_vm6, %v1623_v28, %v1631_v32  ;;  %v2098_v46 = vld [vmem:[#allocation2 + $0x80] sm:$0xf0]  ;;  %v1108_v5 = vor.u32 %v1107_v56, %v1104_v19  ;;  %v2759_v59 = vrot.slane %v2757_v6, 3  ;;  %v2752_v57 = vshll.u32 %v2611_v15, 16  ;;  %v2099_v63 = vld [vmem:[#allocation2 + $0x88] sm:$0xf]  ;;  %v6222_v15 = vpop.permute.xlu1 %3063 }
 0x1f4   : > { %1712 = vst.msk [vmem:[#allocation3 + $0x1e8] sm:$0xff] %vm728_vm1, %v1632_v33  ;;  %v1642_v7 = vshrl.u32 %v1406_v29, 16  ;;  %v1116_v11 = vor.u32 %v1115_v27, %v1112_v38  ;;  %v2762_v53 = vrot.slane %v2760_v14, 4  ;;  %v2751_v26 = vrot.slane %v2749_v51, 3  ;;  %v891_v23 = vld [vmem:[#allocation2 + $0xd8] sm:$0xf]  ;;  %v6226_v38 = vpop.permute.xlu0 %1342 }
 0x1f5   : > { %2080 = vst.msk [vmem:[#allocation3 + $0x1e8] sm:$0xff] %vm1362_vm7, %v6154_v2  ;;  %v1645_v31 = vshll.u32 %v1406_v29, 16  ;;  %3974 = vmatmul.mubr.bf16.gmra.mrb[40].mxu1 %v3495_v10  ;;  %v3501_v58 = vld [vmem:[#allocation3 + $0x1c0] sm:$0xff]  ;;  %v2754_v43 = vrot.slane %v2752_v57, 4  ;;  %v1634_v55 = vshrl.u32 %v1405_v21, 16  ;;  %v1637_v39 = vshll.u32 %v1405_v21, 16 }
 0x1f6   : > { %v1644_v28 = vrot.slane %v1642_v7, 4  ;;  %v890_v36 = vld [vmem:[#allocation2 + $0xd0] sm:$0xf8]  ;;  %3981 = vmatprep.mubr.bf16.mxu1 %v3501_v58  ;;  %v1117_v54 = vsel %vm896_vm5, %v1108_v5, %v1116_v11  ;;  %v2763_v13 = vor.u32 %v2762_v53, %v2759_v59  ;;  %v2169_v2 = vrot.slane %v2098_v46, 4  ;;  %v2613_v9 = vld [vmem:[#allocation2 + $0xa0] sm:$0xf8] }
 0x1f7   : > { %v1647_v32 = vrot.slane %v1645_v31, 5  ;;  %1197 = vst.msk [vmem:[#allocation3 + $0x1e0] sm:$0xff] %vm728_vm1, %v1117_v54  ;;  %v2755_v3 = vor.u32 %v2754_v43, %v2751_v26  ;;  %v1636_v4 = vrot.slane %v1634_v55, 4  ;;  %v1639_v29 = vrot.slane %v1637_v39, 5  ;;  %v2614_v56 = vld [vmem:[#allocation2 + $0xa8] sm:$0xf] }
 0x1f8   : > { %v2170_v19 = vrot.slane %v2099_v63, 4  ;;  %1375 = vst.msk [vmem:[#allocation3 + $0x1e0] sm:$0xff] %vm1362_vm7, %v6166_v24  ;;  %v1127_v21 = vshrl.u32 %v891_v23, 16  ;;  %v1130_v33 = vshll.u32 %v891_v23, 16  ;;  %v1119_v27 = vshrl.u32 %v890_v36, 16  ;;  %v3500_v55 = vld [vmem:[#allocation3 + $0x1b8] sm:$0xff] }
 0x1f9   : > { %v1648_v6 = vor.u32 %v1647_v32, %v1644_v28  ;;  %v1407_v14 = vld [vmem:[#allocation2 + $0xe0] sm:$0xf0]  ;;  %v2764_v51 = vsel %vm896_vm5, %v2755_v3, %v2763_v13  ;;  %v3478_v46 = vld [vmem:[#allocation3 + $0x108] sm:$0xff]  ;;  %v1640_v5 = vor.u32 %v1639_v29, %v1636_v4  ;;  %v1122_v7 = vshll.u32 %v890_v36, 16  ;;  %v2101_v26 = vld [vmem:[#allocation2 + $0x98] sm:$0xf]  ;;  %v6239_v28 = vpop.permute.xlu1 %2550  ;;  %v6244_v29 = vpop.permute.xlu0 %2050 }
 0x1fa   : > { %v2171_v59 = vsel %vm1265_vm4, %v2169_v2, %v2170_v19  ;;  %v3477_v57 = vld [vmem:[#allocation3 + $0x100] sm:$0xff]  ;;  %v1408_v63 = vld [vmem:[#allocation2 + $0xe8] sm:$0x1f]  ;;  %2924 = vst.msk [vmem:[#allocation3 + $0x130] sm:$0xff] %vm728_vm1, %v2764_v51  ;;  %4102 = vmatprep.mubr.bf16.mxu0 %v3478_v46  ;;  %v1129_v24 = vrot.slane %v1127_v21, 3  ;;  %v1132_v10 = vrot.slane %v1130_v33, 4 }
 0x1fb   : > { %2219 = vst.msk [vmem:[#allocation3 + $0x128] sm:$0xff] %vm728_vm1, %v2171_v59  ;;  %v1121_v11 = vrot.slane %v1119_v27, 3  ;;  %v2766_v53 = vshrl.u32 %v2613_v9, 16  ;;  %v1649_v31 = vsel %vm1411_vm6, %v1640_v5, %v1648_v6  ;;  %4103 = vmatmul.mubr.bf16.gmra.mrb[56].mxu0 %v3477_v57  ;;  %v1124_v23 = vrot.slane %v1122_v7, 4  ;;  %v892_v4 = vld [vmem:[#allocation2 + $0xe0] sm:$0xf8] }
 0x1fc   : > { %3100 = vst.msk [vmem:[#allocation3 + $0x130] sm:$0xff] %vm1362_vm7, %v6176_v25  ;;  %2587 = vst.msk [vmem:[#allocation3 + $0x128] sm:$0xff] %vm1362_vm7, %v6184_v47  ;;  %v2769_v58 = vshll.u32 %v2613_v9, 16  ;;  %v2774_v43 = vshrl.u32 %v2614_v56, 16  ;;  %v3506_v39 = vld [vmem:[#allocation3 + $0x1e8] sm:$0xff]  ;;  %v1133_v36 = vor.u32 %v1132_v10, %v1129_v24  ;;  %v2777_v13 = vshll.u32 %v2614_v56, 16 }
 0x1fd   : > { %1713 = vst.msk [vmem:[#allocation3 + $0x210] sm:$0xff] %vm728_vm1, %v1649_v31  ;;  %v2768_v54 = vrot.slane %v2766_v53, 3  ;;  %v1651_v32 = vshrl.u32 %v1407_v14, 16  ;;  %v2100_v25 = vld [vmem:[#allocation2 + $0x90] sm:$0xf0]  ;;  %3982 = vmatmul.mubr.bf16.gmra.mrb[44].mxu1 %v3500_v55  ;;  %v1125_v47 = vor.u32 %v1124_v23, %v1121_v11  ;;  %v1654_v9 = vshll.u32 %v1407_v14, 16  ;;  %v6250_v23 = vpop.permute.xlu1 %2552 }
 0x1fe   : > { %2081 = vst.msk [vmem:[#allocation3 + $0x210] sm:$0xff] %vm1362_vm7, %v6180_v61  ;;  %v2771_v2 = vrot.slane %v2769_v58, 4  ;;  %v2776_v3 = vrot.slane %v2774_v43, 3  ;;  %3989 = vmatprep.mubr.bf16.mxu1 %v3506_v39  ;;  %v2779_v19 = vrot.slane %v2777_v13, 4  ;;  %v1659_v21 = vshrl.u32 %v1408_v63, 16 }
 0x1ff   : > { %v1653_v6 = vrot.slane %v1651_v32, 4  ;;  %v1662_v33 = vshll.u32 %v1408_v63, 16  ;;  %v893_v27 = vld [vmem:[#allocation2 + $0xe8] sm:$0xf]  ;;  %v1134_v56 = vsel %vm896_vm5, %v1125_v47, %v1133_v36  ;;  %v1656_v46 = vrot.slane %v1654_v9, 5 }
 0x200   : > { %v2772_v51 = vor.u32 %v2771_v2, %v2768_v54  ;;  %v2173_v5 = vrot.slane %v2101_v26, 4  ;;  %v2616_v59 = vld [vmem:[#allocation2 + $0xb8] sm:$0xf]  ;;  %1198 = vst.msk [vmem:[#allocation3 + $0x208] sm:$0xff] %vm728_vm1, %v1134_v56  ;;  %v2780_v61 = vor.u32 %v2779_v19, %v2776_v3  ;;  %v1661_v57 = vrot.slane %v1659_v21, 4  ;;  %v6256_v2 = vpop.permute.xlu0 %1344  ;;  %v3505_v3 = vld [vmem:[#allocation3 + $0x1e0] sm:$0xff] }
 0x201   : > { %v1664_v14 = vrot.slane %v1662_v33, 5  ;;  %v2172_v7 = vrot.slane %v2100_v25, 4  ;;  %v2615_v24 = vld [vmem:[#allocation2 + $0xb0] sm:$0xf8]  ;;  %1376 = vst.msk [vmem:[#allocation3 + $0x208] sm:$0xff] %vm1362_vm7, %v6200_v48  ;;  %v1657_v10 = vor.u32 %v1656_v46, %v1653_v6  ;;  %v1136_v11 = vshrl.u32 %v892_v4, 16 }
 0x202   : > { %v1139_v63 = vshll.u32 %v892_v4, 16  ;;  %v1144_v53 = vshrl.u32 %v893_v27, 16  ;;  %v1410_v31 = vld [vmem:[#allocation2 + $0xf8] sm:$0x1f]  ;;  %v2781_v26 = vsel %vm896_vm5, %v2772_v51, %v2780_v61  ;;  %v1147_v36 = vshll.u32 %v893_v27, 16 }
 0x203   : > { %v3483_v58 = vld [vmem:[#allocation3 + $0x130] sm:$0xff]  ;;  %v1665_v43 = vor.u32 %v1664_v14, %v1661_v57  ;;  %v2174_v55 = vsel %vm1265_vm4, %v2172_v7, %v2173_v5  ;;  %v3482_v39 = vld [vmem:[#allocation3 + $0x128] sm:$0xff]  ;;  %2925 = vst.msk [vmem:[#allocation3 + $0x158] sm:$0xff] %vm728_vm1, %v2781_v26  ;;  %v1138_v48 = vrot.slane %v1136_v11, 3  ;;  %v2791_v25 = vshrl.u32 %v2616_v59, 16 }
 0x204   : > { %v1409_v54 = vld [vmem:[#allocation2 + $0xf0] sm:$0xf0]  ;;  %4110 = vmatprep.mubr.bf16.mxu0 %v3483_v58  ;;  %2220 = vst.msk [vmem:[#allocation3 + $0x150] sm:$0xff] %vm728_vm1, %v2174_v55  ;;  %v1141_v13 = vrot.slane %v1139_v63, 4  ;;  %v1146_v32 = vrot.slane %v1144_v53, 3  ;;  %v1149_v4 = vrot.slane %v1147_v36, 4  ;;  %v6266_v53 = vpop.permute.xlu1 %2554 }
 0x205   : > { %v2102_v47 = vld [vmem:[#allocation2 + $0xa0] sm:$0xf0]  ;;  %3101 = vst.msk [vmem:[#allocation3 + $0x158] sm:$0xff] %vm1362_vm7, %v6196_v34  ;;  %v1666_v9 = vsel %vm1411_vm6, %v1657_v10, %v1665_v43  ;;  %2588 = vst.msk [vmem:[#allocation3 + $0x150] sm:$0xff] %vm1362_vm7, %v6206_v62  ;;  %4111 = vmatmul.mubr.bf16.gmra.mrb[60].mxu0 %v3482_v39  ;;  %v2794_v19 = vshll.u32 %v2616_v59, 16  ;;  %v2783_v6 = vshrl.u32 %v2615_v24, 16  ;;  %3990 = vmatmul.mubr.bf16.gmra.mrb[48].mxu1 %v3505_v3 }
 0x206   : > { %v2103_v21 = vld [vmem:[#allocation2 + $0xa8] sm:$0xf]  ;;  %v3511_v33 = vld [vmem:[#allocation3 + $0x210] sm:$0xff]  ;;  %1714 = vst.msk [vmem:[#allocation3 + $0x238] sm:$0xff] %vm728_vm1, %v1666_v9  ;;  %v1142_v27 = vor.u32 %v1141_v13, %v1138_v48  ;;  %v2793_v56 = vrot.slane %v2791_v25, 3  ;;  %v2786_v51 = vshll.u32 %v2615_v24, 16  ;;  %v1150_v34 = vor.u32 %v1149_v4, %v1146_v32  ;;  %v6270_v32 = vpop.permute.xlu0 %3065 }
 0x207   : > { %v1676_v46 = vshrl.u32 %v1410_v31, 16  ;;  %v895_v5 = vld [vmem:[#allocation2 + $0xf8] sm:$0xf]  ;;  %3997 = vmatprep.mubr.bf16.mxu1 %v3511_v33  ;;  %2082 = vst.msk [vmem:[#allocation3 + $0x238] sm:$0xff] %vm1362_vm7, %v6212_v60  ;;  %v2796_v62 = vrot.slane %v2794_v19, 4  ;;  %v2785_v61 = vrot.slane %v2783_v6, 3 }
 0x208   : > { %v1679_v57 = vshll.u32 %v1410_v31, 16  ;;  %v894_v59 = vld [vmem:[#allocation2 + $0xf0] sm:$0xf8]  ;;  %v2788_v14 = vrot.slane %v2786_v51, 4  ;;  %v1668_v10 = vshrl.u32 %v1409_v54, 16  ;;  %v1671_v11 = vshll.u32 %v1409_v54, 16 }
 0x209   : > { %v1678_v7 = vrot.slane %v1676_v46, 4  ;;  %v2105_v63 = vld [vmem:[#allocation2 + $0xb8] sm:$0xf]  ;;  %v1151_v24 = vsel %vm896_vm5, %v1142_v27, %v1150_v34  ;;  %v2797_v26 = vor.u32 %v2796_v62, %v2793_v56  ;;  %v2175_v43 = vrot.slane %v2102_v47, 4  ;;  %v2104_v55 = vld [vmem:[#allocation2 + $0xb0] sm:$0xf0] }
 0x20a   : > { %v1681_v58 = vrot.slane %v1679_v57, 5  ;;  %v2617_v39 = vld [vmem:[#allocation2 + $0xc0] sm:$0xf8]  ;;  %1199 = vst.msk [vmem:[#allocation3 + $0x230] sm:$0xff] %vm728_vm1, %v1151_v24  ;;  %v2789_v60 = vor.u32 %v2788_v14, %v2785_v61  ;;  %v1670_v36 = vrot.slane %v1668_v10, 4  ;;  %v1673_v31 = vrot.slane %v1671_v11, 5 }
 0x20b   : > { %v2176_v48 = vrot.slane %v2103_v21, 4  ;;  %v2618_v13 = vld [vmem:[#allocation2 + $0xc8] sm:$0xf]  ;;  %1377 = vst.msk [vmem:[#allocation3 + $0x230] sm:$0xff] %vm1362_vm7, %v6226_v38  ;;  %v1161_v25 = vshrl.u32 %v895_v5, 16  ;;  %v1164_v3 = vshll.u32 %v895_v5, 16 }
 0x20c   : > { %v1682_v54 = vor.u32 %v1681_v58, %v1678_v7  ;;  %v1153_v9 = vshrl.u32 %v894_v59, 16  ;;  %v2106_v4 = vld [vmem:[#allocation2 + $0xc0] sm:$0xf0]  ;;  %v2798_v47 = vsel %vm896_vm5, %v2789_v60, %v2797_v26  ;;  %v3488_v19 = vld [vmem:[#allocation3 + $0x158] sm:$0xff]  ;;  %v1674_v6 = vor.u32 %v1673_v31, %v1670_v36  ;;  %v3487_v27 = vld [vmem:[#allocation3 + $0x150] sm:$0xff]  ;;  %v6283_v7 = vpop.permute.xlu1 %2556  ;;  %v6289_v60 = vpop.permute.xlu0 %3067 }
 0x20d   : > { %v2177_v33 = vsel %vm1265_vm4, %v2175_v43, %v2176_v48  ;;  %v1156_v56 = vshll.u32 %v894_v59, 16  ;;  %v3510_v21 = vld [vmem:[#allocation3 + $0x208] sm:$0xff]  ;;  %2926 = vst.msk [vmem:[#allocation3 + $0x180] sm:$0xff] %vm728_vm1, %v2798_v47  ;;  %4118 = vmatprep.mubr.bf16.mxu0 %v3488_v19  ;;  %v1163_v38 = vrot.slane %v1161_v25, 3  ;;  %v1166_v51 = vrot.slane %v1164_v3, 4 }
 0x20e   : > { %2221 = vst.msk [vmem:[#allocation3 + $0x178] sm:$0xff] %vm728_vm1, %v2177_v33  ;;  %v1155_v46 = vrot.slane %v1153_v9, 3  ;;  %v2179_v5 = vrot.slane %v2105_v63, 4  ;;  %v2107_v34 = vld [vmem:[#allocation2 + $0xc8] sm:$0xf]  ;;  %3998 = vmatmul.mubr.bf16.gmra.mrb[52].mxu1 %v3510_v21  ;;  %v1683_v62 = vsel %vm1411_vm6, %v1674_v6, %v1682_v54  ;;  %4119 = vmatmul.mubr.bf16.gmra.mrb[64].mxu0 %v3487_v27  ;;  %v2178_v57 = vrot.slane %v2104_v55, 4 }
 0x20f   : > { %3102 = vst.msk [vmem:[#allocation3 + $0x180] sm:$0xff] %vm1362_vm7, %v6222_v15  ;;  %2589 = vst.msk [vmem:[#allocation3 + $0x178] sm:$0xff] %vm1362_vm7, %v6239_v28  ;;  %v1158_v61 = vrot.slane %v1156_v56, 4  ;;  %v2800_v59 = vshrl.u32 %v2617_v39, 16  ;;  %v2619_v14 = vld [vmem:[#allocation2 + $0xd0] sm:$0xf8]  ;;  %v1167_v11 = vor.u32 %v1166_v51, %v1163_v38 }
 0x210   : > { %v3516_v10 = vld [vmem:[#allocation3 + $0x238] sm:$0xff]  ;;  %1715 = vst.msk [vmem:[#allocation3 + $0x260] sm:$0xff] %vm728_vm1, %v1683_v62  ;;  %v2803_v63 = vshll.u32 %v2617_v39, 16  ;;  %v2808_v24 = vshrl.u32 %v2618_v13, 16  ;;  %v2811_v26 = vshll.u32 %v2618_v13, 16  ;;  %v2180_v58 = vsel %vm1265_vm4, %v2178_v57, %v2179_v5  ;;  %v2559_v5 = vpop.permute.xlu1 %2558 }
 0x211   : > { %v2620_v15 = vld [vmem:[#allocation2 + $0xd8] sm:$0xf]  ;;  %4005 = vmatprep.mubr.bf16.mxu1 %v3516_v10  ;;  %2083 = vst.msk [vmem:[#allocation3 + $0x260] sm:$0xff] %vm1362_vm7, %v6244_v29  ;;  %v1159_v28 = vor.u32 %v1158_v61, %v1155_v46  ;;  %v2802_v43 = vrot.slane %v2800_v59, 3  ;;  %v2181_v55 = vrot.slane %v2106_v4, 4  ;;  %v2182_v13 = vrot.slane %v2107_v34, 4 }
 0x212   : > { %v2109_v36 = vld [vmem:[#allocation2 + $0xd8] sm:$0xf]  ;;  %v2108_v31 = vld [vmem:[#allocation2 + $0xd0] sm:$0xf0]  ;;  %2222 = vst.msk [vmem:[#allocation3 + $0x1a0] sm:$0xff] %vm728_vm1, %v2180_v58  ;;  %v2805_v48 = vrot.slane %v2803_v63, 4 }
 0x213   : > { %v2810_v39 = vrot.slane %v2808_v24, 3  ;;  %v2813_v54 = vrot.slane %v2811_v26, 4  ;;  %v2621_v25 = vld [vmem:[#allocation2 + $0xe0] sm:$0xf8]  ;;  %v1168_v3 = vsel %vm896_vm5, %v1159_v28, %v1167_v11  ;;  %2590 = vst.msk [vmem:[#allocation3 + $0x1a0] sm:$0xff] %vm1362_vm7, %v6250_v23  ;;  %v2817_v29 = vshrl.u32 %v2619_v14, 16 }
 0x214   : > { %v2820_v9 = vshll.u32 %v2619_v14, 16  ;;  %v2825_v47 = vshrl.u32 %v2620_v15, 16  ;;  %v2622_v4 = vld [vmem:[#allocation2 + $0xe8] sm:$0xf]  ;;  %1200 = vst.msk [vmem:[#allocation3 + $0x258] sm:$0xff] %vm728_vm1, %v1168_v3  ;;  %v2806_v19 = vor.u32 %v2805_v48, %v2802_v43  ;;  %v2183_v33 = vsel %vm1265_vm4, %v2181_v55, %v2182_v13  ;;  %v3515_v62 = vld [vmem:[#allocation3 + $0x230] sm:$0xff] }
 0x215   : > { %v2814_v6 = vor.u32 %v2813_v54, %v2810_v39  ;;  %v2828_v27 = vshll.u32 %v2620_v15, 16  ;;  %v2110_v56 = vld [vmem:[#allocation2 + $0xe0] sm:$0xf0]  ;;  %v2111_v21 = vld [vmem:[#allocation2 + $0xe8] sm:$0xf]  ;;  %1378 = vst.msk [vmem:[#allocation3 + $0x258] sm:$0xff] %vm1362_vm7, %v6256_v2  ;;  %v3070_v15 = vpop.permute.xlu0 %3069 }
 0x216   : > { %2223 = vst.msk [vmem:[#allocation3 + $0x1c8] sm:$0xff] %vm728_vm1, %v2183_v33  ;;  %v2819_v38 = vrot.slane %v2817_v29, 3  ;;  %v2822_v23 = vrot.slane %v2820_v9, 4  ;;  %v2827_v51 = vrot.slane %v2825_v47, 3  ;;  %v2185_v46 = vrot.slane %v2109_v36, 4  ;;  %v3493_v61 = vld [vmem:[#allocation3 + $0x180] sm:$0xff]  ;;  %4006 = vmatmul.mubr.bf16.gmra.mrb[56].mxu1 %v3515_v62 }
 0x217   : > { %v2623_v34 = vld [vmem:[#allocation2 + $0xf0] sm:$0xf8]  ;;  %v2815_v57 = vsel %vm896_vm5, %v2806_v19, %v2814_v6  ;;  %2591 = vst.msk [vmem:[#allocation3 + $0x1c8] sm:$0xff] %vm1362_vm7, %v6266_v53  ;;  %v3492_v59 = vld [vmem:[#allocation3 + $0x178] sm:$0xff]  ;;  %v2830_v14 = vrot.slane %v2828_v27, 4  ;;  %v2184_v10 = vrot.slane %v2108_v31, 4  ;;  %4126 = vmatprep.mubr.bf16.mxu0 %v3493_v61  ;;  %v2561_v27 = vpop.permute.xlu1 %2560 }
 0x218   : > { %v2834_v11 = vshrl.u32 %v2621_v25, 16  ;;  %2927 = vst.msk [vmem:[#allocation3 + $0x1a8] sm:$0xff] %vm728_vm1, %v2815_v57  ;;  %v2823_v2 = vor.u32 %v2822_v23, %v2819_v38  ;;  %v2837_v63 = vshll.u32 %v2621_v25, 16  ;;  %v2842_v24 = vshrl.u32 %v2622_v4, 16  ;;  %v2624_v28 = vld [vmem:[#allocation2 + $0xf8] sm:$0xf]  ;;  %4127 = vmatmul.mubr.bf16.gmra.mrb[68].mxu0 %v3492_v59 }
 0x219   : > { %v2845_v26 = vshll.u32 %v2622_v4, 16  ;;  %3103 = vst.msk [vmem:[#allocation3 + $0x1a8] sm:$0xff] %vm1362_vm7, %v6270_v32  ;;  %v2831_v58 = vor.u32 %v2830_v14, %v2827_v51  ;;  %v2186_v53 = vsel %vm1265_vm4, %v2184_v10, %v2185_v46  ;;  %v2187_v55 = vrot.slane %v2110_v56, 4  ;;  %v2113_v36 = vld [vmem:[#allocation2 + $0xf8] sm:$0xf]  ;;  %v3521_v31 = vld [vmem:[#allocation3 + $0x260] sm:$0xff]  ;;  %v3072_v62 = vpop.permute.xlu0 %3071 }
 0x21a   : > { %v2836_v43 = vrot.slane %v2834_v11, 3  ;;  %2224 = vst.msk [vmem:[#allocation3 + $0x1f0] sm:$0xff] %vm728_vm1, %v2186_v53  ;;  %v2839_v48 = vrot.slane %v2837_v63, 4  ;;  %v2844_v39 = vrot.slane %v2842_v24, 3  ;;  %v2188_v13 = vrot.slane %v2111_v21, 4  ;;  %4013 = vmatprep.mubr.bf16.mxu1 %v3521_v31 }
 0x21b   : > { %v2847_v54 = vrot.slane %v2845_v26, 4  ;;  %v2112_v25 = vld [vmem:[#allocation2 + $0xf0] sm:$0xf0]  ;;  %v2832_v3 = vsel %vm896_vm5, %v2823_v2, %v2831_v58  ;;  %2592 = vst.msk [vmem:[#allocation3 + $0x1f0] sm:$0xff] %vm1362_vm7, %v6283_v7  ;;  %v2851_v32 = vshrl.u32 %v2623_v34, 16  ;;  %v2854_v29 = vshll.u32 %v2623_v34, 16 }
 0x21c   : > { %v2859_v9 = vshrl.u32 %v2624_v28, 16  ;;  %v2625_v47 = vld [vmem:[#allocation2 + $0x100] sm:$0xf8]  ;;  %2928 = vst.msk [vmem:[#allocation3 + $0x1d0] sm:$0xff] %vm728_vm1, %v2832_v3  ;;  %v2840_v4 = vor.u32 %v2839_v48, %v2836_v43  ;;  %v2189_v6 = vsel %vm1265_vm4, %v2187_v55, %v2188_v13  ;;  %v2862_v33 = vshll.u32 %v2624_v28, 16  ;;  %v3520_v14 = vld [vmem:[#allocation3 + $0x258] sm:$0xff] }
 0x21d   : > { %v2848_v19 = vor.u32 %v2847_v54, %v2844_v39  ;;  %v2626_v56 = vld [vmem:[#allocation2 + $0x108] sm:$0xf]  ;;  %3104 = vst.msk [vmem:[#allocation3 + $0x1d0] sm:$0xff] %vm1362_vm7, %v6289_v60  ;;  %v2853_v21 = vrot.slane %v2851_v32, 3  ;;  %v2856_v7 = vrot.slane %v2854_v29, 4  ;;  %v2191_v23 = vrot.slane %v2113_v36, 4 }
 0x21e   : > { %2225 = vst.msk [vmem:[#allocation3 + $0x218] sm:$0xff] %vm728_vm1, %v2189_v6  ;;  %v2861_v38 = vrot.slane %v2859_v9, 3  ;;  %v2114_v51 = vld [vmem:[#allocation2 + $0x100] sm:$0xf0]  ;;  %v2864_v34 = vrot.slane %v2862_v33, 4  ;;  %v2190_v61 = vrot.slane %v2112_v25, 4  ;;  %4014 = vmatmul.mubr.bf16.gmra.mrb[60].mxu1 %v3520_v14 }
 0x21f   : > { %v2849_v46 = vsel %vm896_vm5, %v2840_v4, %v2848_v19  ;;  %2593 = vst.msk [vmem:[#allocation3 + $0x218] sm:$0xff] %vm1362_vm7, %v2559_v5  ;;  %v2868_v57 = vshrl.u32 %v2625_v47, 16  ;;  %v2115_v59 = vld [vmem:[#allocation2 + $0x108] sm:$0xf]  ;;  %v2857_v60 = vor.u32 %v2856_v7, %v2853_v21  ;;  %v2871_v10 = vshll.u32 %v2625_v47, 16  ;;  %v3497_v58 = vld [vmem:[#allocation3 + $0x1a0] sm:$0xff] }
 0x220   : > { %2929 = vst.msk [vmem:[#allocation3 + $0x1f8] sm:$0xff] %vm728_vm1, %v2849_v46  ;;  %v2876_v11 = vshrl.u32 %v2626_v56, 16  ;;  %v2879_v2 = vshll.u32 %v2626_v56, 16  ;;  %v3498_v63 = vld [vmem:[#allocation3 + $0x1a8] sm:$0xff]  ;;  %v2865_v24 = vor.u32 %v2864_v34, %v2861_v38  ;;  %v2192_v26 = vsel %vm1265_vm4, %v2190_v61, %v2191_v23  ;;  %v2627_v19 = vld [vmem:[#allocation2 + $0x110] sm:$0xf8] }
 0x221   : > { %3105 = vst.msk [vmem:[#allocation3 + $0x1f8] sm:$0xff] %vm1362_vm7, %v3070_v15  ;;  %v2870_v5 = vrot.slane %v2868_v57, 3  ;;  %v2193_v28 = vrot.slane %v2114_v51, 4  ;;  %4134 = vmatprep.mubr.bf16.mxu0 %v3498_v63  ;;  %v2873_v53 = vrot.slane %v2871_v10, 4  ;;  %v2194_v36 = vrot.slane %v2115_v59, 4  ;;  %v2563_v15 = vpop.permute.xlu1 %2562 }
 0x222   : > { %2226 = vst.msk [vmem:[#allocation3 + $0x240] sm:$0xff] %vm728_vm1, %v2192_v26  ;;  %v2878_v43 = vrot.slane %v2876_v11, 3  ;;  %v2881_v55 = vrot.slane %v2879_v2, 4  ;;  %4135 = vmatmul.mubr.bf16.gmra.mrb[72].mxu0 %v3497_v58  ;;  %v2866_v31 = vsel %vm896_vm5, %v2857_v60, %v2865_v24  ;;  %v6863_v48 = vshrl.u32 %v5451_v50, 16  ;;  %v2628_v6 = vld [vmem:[#allocation2 + $0x118] sm:$0xf] }
 0x223   : > { %2594 = vst.msk [vmem:[#allocation3 + $0x240] sm:$0xff] %vm1362_vm7, %v2561_v27  ;;  %v6864_v54 = vshll.u32 %v5451_v50, 16  ;;  %v6865_v25 = vshrl.u32 %v5463_v1, 16  ;;  %v2874_v32 = vor.u32 %v2873_v53, %v2870_v5  ;;  %v2195_v9 = vsel %vm1265_vm4, %v2193_v28, %v2194_v36  ;;  %v3074_v27 = vpop.permute.xlu0 %3073  ;;  %v3502_v5 = vld [vmem:[#allocation3 + $0x1c8] sm:$0xff] }
 0x224   : > { %v3178_v39 = vrot.slane %v6863_v48, 4  ;;  %2930 = vst.msk [vmem:[#allocation3 + $0x220] sm:$0xff] %vm728_vm1, %v2866_v31  ;;  %v2882_v29 = vor.u32 %v2881_v55, %v2878_v43  ;;  %v6866_v47 = vshll.u32 %v5463_v1, 16  ;;  %v3503_v33 = vld [vmem:[#allocation3 + $0x1d0] sm:$0xff]  ;;  %2227 = vst.msk [vmem:[#allocation3 + $0x268] sm:$0xff] %vm728_vm1, %v2195_v9  ;;  %v6867_v56 = vor.u32 %v5527_v37, %v5525_v35 }
 0x225   : > { %v3181_v13 = vrot.slane %v6864_v54, 5  ;;  %v3186_v3 = vrot.slane %v6865_v25, 4  ;;  %3106 = vst.msk [vmem:[#allocation3 + $0x220] sm:$0xff] %vm1362_vm7, %v3072_v62  ;;  %v6868_v21 = vor.u32 %v5516_v22, %v5514_v17  ;;  %v6869_v1 = vshrl.u32 %v5492_v44, 16  ;;  %4142 = vmatprep.mubr.bf16.mxu0 %v3503_v33  ;;  %2595 = vst.msk [vmem:[#allocation3 + $0x268] sm:$0xff] %vm1362_vm7, %v2563_v15 }
 0x226   : > { %v3189_v4 = vrot.slane %v6866_v47, 5  ;;  %v6870_v23 = vshll.u32 %v5492_v44, 16  ;;  %v2883_v46 = vsel %vm896_vm5, %v2874_v32, %v2882_v29  ;;  %v6871_v35 = vshrl.u32 %v5499_v52, 16 }
 0x227   : > { %v3182_v50 = vor.u32 %v3181_v13, %v3178_v39  ;;  %v3208_v7 = vsel %vm1411_vm6, %v6868_v21, %v6867_v56  ;;  %v3212_v38 = vrot.slane %v6869_v1, 4  ;;  %v6872_v17 = vshll.u32 %v5499_v52, 16  ;;  %2931 = vst.msk [vmem:[#allocation3 + $0x248] sm:$0xff] %vm728_vm1, %v2883_v46 }
 0x228   : > { %v3215_v51 = vrot.slane %v6870_v23, 5  ;;  %v3190_v34 = vor.u32 %v3189_v4, %v3186_v3  ;;  %3432 = vst.msk [vmem:[#allocation3 + $0x98] sm:$0xff] %vm728_vm1, %v3208_v7  ;;  %v3220_v37 = vrot.slane %v6871_v35, 4  ;;  %v2885_v61 = vshrl.u32 %v2627_v19, 16  ;;  %v3508_v31 = vld [vmem:[#allocation3 + $0x1f8] sm:$0xff] }
 0x229   : > { %v3223_v22 = vrot.slane %v6872_v17, 5  ;;  %v2888_v44 = vshll.u32 %v2627_v19, 16  ;;  %v2893_v57 = vshrl.u32 %v2628_v6, 16  ;;  %3107 = vst.msk [vmem:[#allocation3 + $0x248] sm:$0xff] %vm1362_vm7, %v3074_v27  ;;  %v2896_v60 = vshll.u32 %v2628_v6, 16 }
 0x22a   : > { %v3216_v62 = vor.u32 %v3215_v51, %v3212_v38  ;;  %v3191_v59 = vsel %vm1411_vm6, %v3182_v50, %v3190_v34  ;;  %v6873_v10 = vshrl.u32 %v5548_v42, 16  ;;  %v2887_v2 = vrot.slane %v2885_v61, 3  ;;  %4143 = vmatmul.mubr.bf16.gmra.mrb[76].mxu0 %v3502_v5  ;;  %v6895_v5 = vld [vmem:[#allocation4_spill] sm:$0xff] }
 0x22b   : > { %v3224_v14 = vor.u32 %v3223_v22, %v3220_v37  ;;  %3431 = vst.msk [vmem:[#allocation3 + $0x70] sm:$0xff] %vm728_vm1, %v3191_v59  ;;  %v2890_v52 = vrot.slane %v2888_v44, 4  ;;  %v2895_v63 = vrot.slane %v2893_v57, 3  ;;  %v6874_v24 = vshll.u32 %v5548_v42, 16  ;;  %4150 = vmatprep.mubr.bf16.mxu0 %v3508_v31  ;;  %v6900_v31 = vld [vmem:[#allocation9_spill] sm:$0xff] }
 0x22c   : > { %v3229_v11 = vrot.slane %v6873_v10, 4  ;;  %v2898_v58 = vrot.slane %v2896_v60, 4  ;;  %v6875_v53 = vshrl.u32 %v5562_v16, 16  ;;  %v6876_v55 = vshll.u32 %v5562_v16, 16 }
 0x22d   : > { %v3232_v26 = vrot.slane %v6874_v24, 5  ;;  %v3225_v28 = vsel %vm1411_vm6, %v3216_v62, %v3224_v14  ;;  %v2891_v15 = vor.u32 %v2890_v52, %v2887_v2  ;;  %v6877_v39 = vshrl.u32 %v5544_v40, 16 }
 0x22e   : > { %v3237_v43 = vrot.slane %v6875_v53, 4  ;;  %v3240_v36 = vrot.slane %v6876_v55, 5  ;;  %3433 = vst.msk [vmem:[#allocation3 + $0xc0] sm:$0xff] %vm728_vm1, %v3225_v28  ;;  %v6878_v54 = vshll.u32 %v5544_v40, 16  ;;  %v2899_v25 = vor.u32 %v2898_v58, %v2895_v63  ;;  %v6897_v58 = vld [vmem:[#allocation8_spill] sm:$0xff] }
 0x22f   : > { %v3233_v48 = vor.u32 %v3232_v26, %v3229_v11  ;;  %v3246_v42 = vrot.slane %v6877_v39, 4  ;;  %v6879_v32 = vshrl.u32 %v5546_v41, 16  ;;  %v6880_v16 = vshll.u32 %v5546_v41, 16  ;;  %v3464_v44 = vld [vmem:[#allocation3 + $0x98] sm:$0xff]  ;;  %v6894_v26 = vld [vmem:[#allocation5_spill] sm:$0xff] }
 0x230   : > { %v3249_v13 = vrot.slane %v6878_v54, 5  ;;  %v3241_v3 = vor.u32 %v3240_v36, %v3237_v43  ;;  %v6881_v4 = vshrl.u32 %v5425_v8, 16  ;;  %v6882_v6 = vshll.u32 %v5425_v8, 16 }
 0x231   : > { %v3254_v29 = vrot.slane %v6879_v32, 4  ;;  %v3257_v9 = vrot.slane %v6880_v16, 5  ;;  %v6883_v27 = vshrl.u32 %v5429_v12, 16  ;;  %v2900_v50 = vsel %vm896_vm5, %v2891_v15, %v2899_v25 }
 0x232   : > { %v3250_v47 = vor.u32 %v3249_v13, %v3246_v42  ;;  %v3144_v19 = vrot.slane %v6881_v4, 4  ;;  %v3147_v33 = vrot.slane %v6882_v6, 5  ;;  %v3242_v56 = vsel %vm1411_vm6, %v3233_v48, %v3241_v3  ;;  %2932 = vst.msk [vmem:[#allocation3 + $0x270] sm:$0xff] %vm728_vm1, %v2900_v50  ;;  %v3459_v35 = vld [vmem:[#allocation3 + $0x70] sm:$0xff]  ;;  %v6909_v50 = vld [vmem:[#allocation12_spill] sm:$0xff] }
 0x233   : > { %v3152_v40 = vrot.slane %v6883_v27, 4  ;;  %v3258_v21 = vor.u32 %v3257_v9, %v3254_v29  ;;  %v6884_v7 = vshll.u32 %v5429_v12, 16  ;;  %3434 = vst.msk [vmem:[#allocation3 + $0xe8] sm:$0xff] %vm728_vm1, %v3242_v56  ;;  %v6885_v38 = vshrl.u32 %v5614_v45, 16  ;;  %5146 = vmatprep.mubr.msk.bf16.mxu1 %vm728_vm1, %v3459_v35  ;;  %v6903_v13 = vld [vmem:[#allocation6_spill] sm:$0xff] }
 0x234   : > { %v3148_v41 = vor.u32 %v3147_v33, %v3144_v19  ;;  %v6886_v23 = vshll.u32 %v5614_v45, 16  ;;  %v6887_v46 = vshrl.u32 %v5653_v0, 16  ;;  %v6888_v12 = vshll.u32 %v5653_v0, 16  ;;  %v3507_v0 = vld [vmem:[#allocation3 + $0x1f0] sm:$0xff]  ;;  %5147 = vmatmul.mubr.msk.bf16.vlgmr.msra.gmra.mrb[64].mxu1 %vm728_vm1, %v3464_v44 }
 0x235   : > { %v3155_v1 = vrot.slane %v6884_v7, 5  ;;  %v3263_v8 = vrot.slane %v6885_v38, 4  ;;  %v3259_v37 = vsel %vm1411_vm6, %v3250_v47, %v3258_v21  ;;  %v6889_v62 = vshrl.u32 %v5610_v49, 16  ;;  %v3469_v2 = vld [vmem:[#allocation3 + $0xc0] sm:$0xff]  ;;  %4151 = vmatmul.mubr.bf16.gmra.mrb[80].mxu0 %v3507_v0  ;;  %v6906_v47 = vld [vmem:[#allocation7_spill] sm:$0xff]  ;;  %v6912_v38 = vld [vmem:[#allocation13_spill] sm:$0xff] }
 0x236   : > { %v3266_v51 = vrot.slane %v6886_v23, 5  ;;  %v3271_v34 = vrot.slane %v6887_v46, 4  ;;  %v3274_v22 = vrot.slane %v6888_v12, 5  ;;  %3435 = vst.msk [vmem:[#allocation3 + $0x110] sm:$0xff] %vm728_vm1, %v3259_v37  ;;  %v6890_v57 = vshll.u32 %v5610_v49, 16  ;;  %5150 = vmatprep.mubr.msk.bf16.mxu1 %vm728_vm1, %v3469_v2  ;;  %v6921_v0 = vld [vmem:[#allocation16_spill] sm:$0xff] }
 0x237   : > { %v3156_v17 = vor.u32 %v3155_v1, %v3152_v40  ;;  %v3280_v61 = vrot.slane %v6889_v62, 4  ;;  %v6891_v14 = vshrl.u32 %v5612_v30, 16  ;;  %v6892_v10 = vshll.u32 %v5612_v30, 16  ;;  %v3513_v30 = vld [vmem:[#allocation3 + $0x220] sm:$0xff] }
 0x238   : > { %v3267_v45 = vor.u32 %v3266_v51, %v3263_v8  ;;  %v3283_v59 = vrot.slane %v6890_v57, 5  ;;  %v3275_v63 = vor.u32 %v3274_v22, %v3271_v34  ;;  %v6893_v24 = vor.u32 %v5475_v20, %v5473_v18  ;;  %4158 = vmatprep.mubr.bf16.mxu0 %v3513_v30  ;;  %v6915_v34 = vld [vmem:[#allocation10_spill] sm:$0xff]  ;;  %v3076_v57 = vpop.permute.xlu0 %3075 }
 0x239   : > { %v3288_v60 = vrot.slane %v6891_v14, 4  ;;  %v3291_v11 = vrot.slane %v6892_v10, 5  ;;  %v3157_v52 = vsel %vm1411_vm6, %v3148_v41, %v3156_v17  ;;  %v6896_v49 = vor.u32 %v6894_v26, %v6895_v5  ;;  %3108 = vst.msk [vmem:[#allocation3 + $0x270] sm:$0xff] %vm1362_vm7, %v3076_v57 }
 0x23a   : > { %v6898_v53 = vshrl.u32 %v6897_v58, 16  ;;  %3429 = vst.msk [vmem:[#allocation3 + $0x20] sm:$0xff] %vm728_vm1, %v3157_v52  ;;  %v3284_v55 = vor.u32 %v3283_v59, %v3280_v61  ;;  %v6899_v18 = vshll.u32 %v6897_v58, 16  ;;  %v6901_v15 = vshrl.u32 %v6900_v31, 16  ;;  %v6918_v61 = vld [vmem:[#allocation11_spill] sm:$0xff]  ;;  %v3474_v59 = vld [vmem:[#allocation3 + $0xe8] sm:$0xff] }
 0x23b   : > { %v3174_v28 = vsel %vm1411_vm6, %v6896_v49, %v6893_v24  ;;  %v3292_v36 = vor.u32 %v3291_v11, %v3288_v60  ;;  %v3276_v39 = vsel %vm1411_vm6, %v3267_v45, %v3275_v63  ;;  %v6902_v42 = vshll.u32 %v6900_v31, 16  ;;  %v3139_v63 = vld [vmem:[#allocation2 + $0x110] sm:$0xf0]  ;;  %v3512_v24 = vld [vmem:[#allocation3 + $0x218] sm:$0xff]  ;;  %v6924_v58 = vld [vmem:[#allocation17_spill] sm:$0xff] }
 0x23c   : > { %v3297_v43 = vrot.slane %v6898_v53, 4  ;;  %3430 = vst.msk [vmem:[#allocation3 + $0x48] sm:$0xff] %vm728_vm1, %v3174_v28  ;;  %v3300_v20 = vrot.slane %v6899_v18, 5  ;;  %v3305_v48 = vrot.slane %v6901_v15, 4  ;;  %v6904_v25 = vshrl.u32 %v6903_v13, 16  ;;  %3436 = vst.msk [vmem:[#allocation3 + $0x138] sm:$0xff] %vm728_vm1, %v3276_v39  ;;  %5151 = vmatmul.mubr.msk.bf16.gmra.mrb[68].mxu1 %vm728_vm1, %v3474_v59 }
 0x23d   : > { %v3308_v54 = vrot.slane %v6902_v42, 5  ;;  %v6905_v32 = vshll.u32 %v6903_v13, 16  ;;  %v3293_v16 = vsel %vm1411_vm6, %v3284_v55, %v3292_v36  ;;  %v6907_v4 = vshrl.u32 %v6906_v47, 16  ;;  %v3479_v26 = vld [vmem:[#allocation3 + $0x110] sm:$0xff]  ;;  %4159 = vmatmul.mubr.bf16.gmra.mrb[84].mxu0 %v3512_v24  ;;  %v3518_v36 = vld [vmem:[#allocation3 + $0x248] sm:$0xff] }
 0x23e   : > { %v3314_v3 = vrot.slane %v6904_v25, 4  ;;  %v3301_v9 = vor.u32 %v3300_v20, %v3297_v43  ;;  %v6908_v6 = vshll.u32 %v6906_v47, 16  ;;  %3437 = vst.msk [vmem:[#allocation3 + $0x160] sm:$0xff] %vm728_vm1, %v3293_v16  ;;  %v6910_v56 = vshrl.u32 %v6909_v50, 16  ;;  %5154 = vmatprep.mubr.msk.bf16.mxu1 %vm728_vm1, %v3479_v26  ;;  %v6927_v31 = vld [vmem:[#allocation14_spill] sm:$0xff]  ;;  %4166 = vmatprep.mubr.bf16.mxu0 %v3518_v36 }
 0x23f   : > { %v3317_v29 = vrot.slane %v6905_v32, 5  ;;  %v3322_v19 = vrot.slane %v6907_v4, 4  ;;  %v3309_v27 = vor.u32 %v3308_v54, %v3305_v48  ;;  %v6911_v7 = vshll.u32 %v6909_v50, 16  ;;  %v3140_v54 = vld [vmem:[#allocation2 + $0x118] sm:$0x1f] }
 0x240   : > { %v3325_v33 = vrot.slane %v6908_v6, 5  ;;  %v3331_v21 = vrot.slane %v6910_v56, 4  ;;  %v6913_v8 = vshrl.u32 %v6912_v38, 16  ;;  %v6914_v51 = vshll.u32 %v6912_v38, 16  ;;  %v3523_v38 = vld [vmem:[#allocation3 + $0x270] sm:$0xff] }
 0x241   : > { %v3318_v40 = vor.u32 %v3317_v29, %v3314_v3  ;;  %v3334_v1 = vrot.slane %v6911_v7, 5  ;;  %v6916_v35 = vshrl.u32 %v6915_v34, 16  ;;  %v3310_v17 = vsel %vm1411_vm6, %v3301_v9, %v3309_v27  ;;  %v6930_v3 = vld [vmem:[#allocation15_spill] sm:$0xff] }
 0x242   : > { %v3326_v41 = vor.u32 %v3325_v33, %v3322_v19  ;;  %v3339_v23 = vrot.slane %v6913_v8, 4  ;;  %v3342_v46 = vrot.slane %v6914_v51, 5  ;;  %v6917_v22 = vshll.u32 %v6915_v34, 16  ;;  %3438 = vst.msk [vmem:[#allocation3 + $0x188] sm:$0xff] %vm728_vm1, %v3310_v17  ;;  %v3517_v51 = vld [vmem:[#allocation3 + $0x240] sm:$0xff]  ;;  %v3522_v17 = vld [vmem:[#allocation3 + $0x268] sm:$0xff] }
 0x243   : > { %v3348_v37 = vrot.slane %v6916_v35, 4  ;;  %v3335_v12 = vor.u32 %v3334_v1, %v3331_v21  ;;  %v6919_v44 = vshrl.u32 %v6918_v61, 16  ;;  %v6920_v10 = vshll.u32 %v6918_v61, 16  ;;  %v3484_v8 = vld [vmem:[#allocation3 + $0x138] sm:$0xff]  ;;  %v3454_v61 = vld [vmem:[#allocation3 + $0x48] sm:$0xff] }
 0x244   : > { %v3351_v62 = vrot.slane %v6917_v22, 5  ;;  %v3327_v14 = vsel %vm1411_vm6, %v3318_v40, %v3326_v41  ;;  %v3343_v60 = vor.u32 %v3342_v46, %v3339_v23  ;;  %v6922_v2 = vshrl.u32 %v6921_v0, 16  ;;  %5155 = vmatmul.mubr.msk.bf16.gmra.mrb[72].mxu1 %vm728_vm1, %v3484_v8  ;;  %v3449_v22 = vld [vmem:[#allocation3 + $0x20] sm:$0xff] }
 0x245   : > { %v3356_v45 = vrot.slane %v6919_v44, 4  ;;  %v3359_v11 = vrot.slane %v6920_v10, 5  ;;  %3439 = vst.msk [vmem:[#allocation3 + $0x1b0] sm:$0xff] %vm728_vm1, %v3327_v14  ;;  %v6923_v49 = vshll.u32 %v6921_v0, 16  ;;  %v6925_v53 = vshrl.u32 %v6924_v58, 16  ;;  %v3489_v46 = vld [vmem:[#allocation3 + $0x160] sm:$0xff]  ;;  %4167 = vmatmul.mubr.bf16.gmra.mrb[88].mxu0 %v3517_v51 }
 0x246   : > { %v3365_v52 = vrot.slane %v6922_v2, 4  ;;  %v3352_v5 = vor.u32 %v3351_v62, %v3348_v37  ;;  %v6926_v30 = vshll.u32 %v6924_v58, 16  ;;  %v3344_v18 = vsel %vm1411_vm6, %v3335_v12, %v3343_v60  ;;  %5158 = vmatprep.mubr.msk.bf16.mxu1 %vm728_vm1, %v3489_v46  ;;  %4174 = vmatprep.mubr.bf16.mxu0 %v3523_v38 }
 0x247   : > { %v3368_v28 = vrot.slane %v6923_v49, 5  ;;  %v3373_v43 = vrot.slane %v6925_v53, 4  ;;  %v3360_v20 = vor.u32 %v3359_v11, %v3356_v45  ;;  %v6928_v15 = vshrl.u32 %v6927_v31, 16  ;;  %3440 = vst.msk [vmem:[#allocation3 + $0x1d8] sm:$0xff] %vm728_vm1, %v3344_v18 }
 0x248   : > { %v3376_v55 = vrot.slane %v6926_v30, 5  ;;  %v6929_v39 = vshll.u32 %v6927_v31, 16  ;;  %v6931_v32 = vshrl.u32 %v6930_v3, 16  ;;  %v6932_v16 = vshll.u32 %v6930_v3, 16 }
 0x249   : > { %v3382_v48 = vrot.slane %v6928_v15, 4  ;;  %v3369_v13 = vor.u32 %v3368_v28, %v3365_v52  ;;  %v3361_v47 = vsel %vm1411_vm6, %v3352_v5, %v3360_v20  ;;  %v3397_v19 = vshrl.u32 %v3139_v63, 16  ;;  %v3494_v37 = vld [vmem:[#allocation3 + $0x188] sm:$0xff] }
 0x24a   : > { %v3385_v42 = vrot.slane %v6929_v39, 5  ;;  %v3377_v25 = vor.u32 %v3376_v55, %v3373_v43  ;;  %v3390_v29 = vrot.slane %v6931_v32, 4  ;;  %v3393_v9 = vrot.slane %v6932_v16, 5  ;;  %3441 = vst.msk [vmem:[#allocation3 + $0x200] sm:$0xff] %vm728_vm1, %v3361_v47 }
 0x24b   : > { %v3400_v6 = vshll.u32 %v3139_v63, 16  ;;  %v3405_v40 = vshrl.u32 %v3140_v54, 16  ;;  %v3408_v50 = vshll.u32 %v3140_v54, 16  ;;  %v3399_v56 = vrot.slane %v3397_v19, 4 }
 0x24c   : > { %v3386_v4 = vor.u32 %v3385_v42, %v3382_v48  ;;  %v3378_v33 = vsel %vm1411_vm6, %v3369_v13, %v3377_v25  ;;  %v3394_v27 = vor.u32 %v3393_v9, %v3390_v29  ;;  %5159 = vmatmul.mubr.msk.bf16.gmra.mrb[76].mxu1 %vm728_vm1, %v3494_v37  ;;  %v3499_v12 = vld [vmem:[#allocation3 + $0x1b0] sm:$0xff] }
 0x24d   : > { %3442 = vst.msk [vmem:[#allocation3 + $0x228] sm:$0xff] %vm728_vm1, %v3378_v33  ;;  %v3402_v21 = vrot.slane %v3400_v6, 5  ;;  %v3407_v1 = vrot.slane %v3405_v40, 4  ;;  %v3410_v41 = vrot.slane %v3408_v50, 5  ;;  %4175 = vmatmul.mubr.bf16.gmra.mrb[92].mxu0 %v3522_v17  ;;  %5162 = vmatprep.mubr.msk.bf16.mxu1 %vm728_vm1, %v3499_v12 }
 0x24e   : > { %v3395_v7 = vsel %vm1411_vm6, %v3386_v4, %v3394_v27  ;;  %5142 = vmatprep.mubr.msk.bf16.mxu0 %vm728_vm1, %v3449_v22  ;;  %v3504_v62 = vld [vmem:[#allocation3 + $0x1d8] sm:$0xff] }
 0x24f   : > { %3443 = vst.msk [vmem:[#allocation3 + $0x250] sm:$0xff] %vm728_vm1, %v3395_v7  ;;  %v3403_v23 = vor.u32 %v3402_v21, %v3399_v56  ;;  %v3411_v34 = vor.u32 %v3410_v41, %v3407_v1 }
 0x251   : > { %v3412_v35 = vsel %vm1411_vm6, %v3403_v23, %v3411_v34  ;;  %v3509_v44 = vld [vmem:[#allocation3 + $0x200] sm:$0xff] }
 0x252   : > { %3444 = vst.msk [vmem:[#allocation3 + $0x278] sm:$0xff] %vm728_vm1, %v3412_v35 }
 0x254   : > { %5163 = vmatmul.mubr.msk.bf16.gmra.mrb[80].mxu1 %vm728_vm1, %v3504_v62  ;;  %v3514_v45 = vld [vmem:[#allocation3 + $0x228] sm:$0xff] }
 0x255   : > { %5143 = vmatmul.mubr.msk.bf16.vlgmr.msra.gmra.mrb[96].mxu0 %vm728_vm1, %v3454_v61  ;;  %5166 = vmatprep.mubr.msk.bf16.mxu1 %vm728_vm1, %v3509_v44 }
 0x256   : > { %v3519_v57 = vld [vmem:[#allocation3 + $0x250] sm:$0xff] }
 0x259   : > { %v3524_v59 = vld [vmem:[#allocation3 + $0x278] sm:$0xff] }
 0x25c   : > { %5167 = vmatmul.mubr.msk.bf16.gmra.mrb[84].mxu1 %vm728_vm1, %v3514_v45 }
 0x25d   : > { %5170 = vmatprep.mubr.msk.bf16.mxu1 %vm728_vm1, %v3519_v57 }
 0x264   : > { %5171 = vmatmul.mubr.msk.bf16.gmra.mrb[88].mxu1 %vm728_vm1, %v3524_v59 }
 0x275   : > { %v4870_v14 = vpop.f32.mrb[0].mxu1 }
 0x276   : > { %v4871_v60 = vpop.f32.mrb[1].mxu1 }
 0x277   : > { %v4872_v10 = vadd.f32 %v4871_v60, %v4870_v14  ;;  %v4873_v11 = vpop.f32.mrb[2].mxu1 }
 0x278   : > { %v4874_v0 = vpop.f32.mrb[3].mxu1 }
 0x279   : > { %v4875_v2 = vadd.f32 %v4874_v0, %v4873_v11 }
 0x27d   : > { %v4876_v52 = vpop.f32.mrb[4].mxu1 }
 0x27e   : > { %v4877_v63 = vpop.f32.mrb[5].mxu1 }
 0x27f   : > { %v4878_v24 = vadd.f32 %v4877_v63, %v4876_v52  ;;  %v4879_v26 = vpop.f32.mrb[6].mxu1 }
 0x280   : > { %v4880_v5 = vpop.f32.mrb[7].mxu1 }
 0x281   : > { %v4881_v49 = vadd.f32 %v4880_v5, %v4879_v26 }
 0x285   : > { %v4882_v28 = vpop.f32.mrb[8].mxu1 }
 0x286   : > { %v4883_v58 = vpop.f32.mrb[9].mxu1 }
 0x287   : > { %v4884_v53 = vadd.f32 %v4883_v58, %v4882_v28  ;;  %v4885_v43 = vpop.f32.mrb[10].mxu1 }
 0x288   : > { %v4886_v30 = vpop.f32.mrb[11].mxu1 }
 0x289   : > { %v4887_v55 = vadd.f32 %v4886_v30, %v4885_v43 }
 0x28d   : > { %v4888_v36 = vpop.f32.mrb[12].mxu1 }
 0x28e   : > { %v4889_v18 = vpop.f32.mrb[13].mxu1 }
 0x28f   : > { %v4890_v20 = vadd.f32 %v4889_v18, %v4888_v36  ;;  %v4891_v31 = vpop.f32.mrb[14].mxu1 }
 0x290   : > { %v4892_v15 = vpop.f32.mrb[15].mxu1 }
 0x291   : > { %v4893_v48 = vadd.f32 %v4892_v15, %v4891_v31 }
 0x296   : > { %v4894_v42 = vpop.f32.mrb[16].mxu1 }
 0x297   : > { %v4982_v39 = vpop.f32.mrb[32].mxu0  ;;  %v4895_v13 = vpop.f32.mrb[17].mxu1 }
 0x298   : > { %v4983_v54 = vpop.f32.mrb[33].mxu0  ;;  %v6499_v32 = vadd.f32 %v4895_v13, %v4894_v42  ;;  %v4897_v29 = vpop.f32.mrb[18].mxu1 }
 0x299   : > { %v4984_v25 = vadd.f32 %v4983_v54, %v4982_v39  ;;  %v4985_v3 = vpop.f32.mrb[34].mxu0  ;;  %v4898_v9 = vpop.f32.mrb[19].mxu1 }
 0x29a   : > { %v4986_v16 = vpop.f32.mrb[35].mxu0  ;;  %v6501_v4 = vadd.f32 %v4898_v9, %v4897_v29 }
 0x29b   : > { %v4987_v47 = vadd.f32 %v4986_v16, %v4985_v3  ;;  %v6513_v44 = vadd.f32 %v4984_v25, %v4872_v10 }
 0x29d   : > { %v6519_v60 = vadd.f32 %v4987_v47, %v4875_v2 }
 0x29e   : > { %v4900_v19 = vpop.f32.mrb[20].mxu1 }
 0x29f   : > { %v4988_v6 = vpop.f32.mrb[36].mxu0  ;;  %v4901_v33 = vpop.f32.mrb[21].mxu1 }
 0x2a0   : > { %v4989_v27 = vpop.f32.mrb[37].mxu0  ;;  %v6503_v40 = vadd.f32 %v4901_v33, %v4900_v19  ;;  %v4903_v50 = vpop.f32.mrb[22].mxu1 }
 0x2a1   : > { %v4990_v56 = vadd.f32 %v4989_v27, %v4988_v6  ;;  %v4991_v21 = vpop.f32.mrb[38].mxu0  ;;  %v4904_v7 = vpop.f32.mrb[23].mxu1 }
 0x2a2   : > { %v4992_v1 = vpop.f32.mrb[39].mxu0  ;;  %v6505_v41 = vadd.f32 %v4904_v7, %v4903_v50 }
 0x2a3   : > { %v4993_v38 = vadd.f32 %v4992_v1, %v4991_v21  ;;  %v6507_v8 = vadd.f32 %v4990_v56, %v4878_v24 }
 0x2a5   : > { %v6517_v59 = vadd.f32 %v4993_v38, %v4881_v49 }
 0x2a6   : > { %v4906_v23 = vpop.f32.mrb[24].mxu1 }
 0x2a7   : > { %v4907_v51 = vpop.f32.mrb[25].mxu1 }
 0x2a8   : > { %v6509_v46 = vadd.f32 %v4907_v51, %v4906_v23  ;;  %v4909_v34 = vpop.f32.mrb[26].mxu1 }
 0x2a9   : > { %v4994_v35 = vpop.f32.mrb[40].mxu0  ;;  %v4910_v37 = vpop.f32.mrb[27].mxu1 }
 0x2aa   : > { %v4995_v17 = vpop.f32.mrb[41].mxu0  ;;  %v6511_v12 = vadd.f32 %v4910_v37, %v4909_v34 }
 0x2ab   : > { %v4996_v22 = vadd.f32 %v4995_v17, %v4994_v35  ;;  %v4997_v62 = vpop.f32.mrb[42].mxu0 }
 0x2ac   : > { %v4998_v61 = vpop.f32.mrb[43].mxu0 }
 0x2ad   : > { %v4999_v45 = vadd.f32 %v4998_v61, %v4997_v62  ;;  %v6515_v57 = vadd.f32 %v4996_v22, %v4884_v53 }
 0x2ae   : > { %v4912_v14 = vpop.f32.mrb[28].mxu1 }
 0x2af   : > { %v4913_v11 = vpop.f32.mrb[29].mxu1  ;;  %v6521_v0 = vadd.f32 %v4999_v45, %v4887_v55 }
 0x2b0   : > { %v6523_v52 = vadd.f32 %v4913_v11, %v4912_v14  ;;  %v4915_v63 = vpop.f32.mrb[30].mxu1 }
 0x2b1   : > { %v4916_v24 = vpop.f32.mrb[31].mxu1 }
 0x2b2   : > { %v6525_v5 = vadd.f32 %v4916_v24, %v4915_v63 }
 0x2b3   : > { %v5000_v26 = vpop.f32.mrb[44].mxu0 }
 0x2b4   : > { %v5001_v10 = vpop.f32.mrb[45].mxu0 }
 0x2b5   : > { %v5002_v28 = vadd.f32 %v5001_v10, %v5000_v26  ;;  %v5003_v58 = vpop.f32.mrb[46].mxu0 }
 0x2b6   : > { %v5004_v53 = vpop.f32.mrb[47].mxu0  ;;  %v4918_v49 = vpop.f32.mrb[32].mxu1 }
 0x2b7   : > { %v5005_v43 = vadd.f32 %v5004_v53, %v5003_v58  ;;  %v6527_v30 = vadd.f32 %v5002_v28, %v4890_v20  ;;  %v4919_v2 = vpop.f32.mrb[33].mxu1 }
 0x2b8   : > { %v6529_v36 = vadd.f32 %v4919_v2, %v4918_v49  ;;  %v4921_v55 = vpop.f32.mrb[34].mxu1 }
 0x2b9   : > { %v6531_v18 = vadd.f32 %v5005_v43, %v4893_v48  ;;  %v4922_v31 = vpop.f32.mrb[35].mxu1 }
 0x2ba   : > { %v6533_v15 = vadd.f32 %v4922_v31, %v4921_v55 }
 0x2bc   : > { %v5006_v39 = vpop.f32.mrb[48].mxu0 }
 0x2bd   : > { %v5007_v42 = vpop.f32.mrb[49].mxu0 }
 0x2be   : > { %v5008_v54 = vadd.f32 %v5007_v42, %v5006_v39  ;;  %v5009_v13 = vpop.f32.mrb[50].mxu0 }
 0x2bf   : > { %v5010_v25 = vpop.f32.mrb[51].mxu0 }
 0x2c0   : > { %v4924_v3 = vpop.f32.mrb[36].mxu1  ;;  %v5011_v29 = vadd.f32 %v5010_v25, %v5009_v13  ;;  %v6536_v20 = vadd.f32 %v5008_v54, %v6499_v32 }
 0x2c1   : > { %v4925_v16 = vpop.f32.mrb[37].mxu1 }
 0x2c2   : > { %v6538_v9 = vadd.f32 %v4925_v16, %v4924_v3  ;;  %v4927_v47 = vpop.f32.mrb[38].mxu1  ;;  %v6541_v48 = vadd.f32 %v5011_v29, %v6501_v4 }
 0x2c3   : > { %v4928_v19 = vpop.f32.mrb[39].mxu1 }
 0x2c4   : > { %v6543_v6 = vadd.f32 %v4928_v19, %v4927_v47 }
 0x2c5   : > { %v5012_v33 = vpop.f32.mrb[52].mxu0 }
 0x2c6   : > { %v5013_v27 = vpop.f32.mrb[53].mxu0 }
 0x2c7   : > { %v5014_v50 = vadd.f32 %v5013_v27, %v5012_v33  ;;  %v5015_v56 = vpop.f32.mrb[54].mxu0 }
 0x2c8   : > { %v4930_v21 = vpop.f32.mrb[40].mxu1  ;;  %v5016_v7 = vpop.f32.mrb[55].mxu0 }
 0x2c9   : > { %v4931_v1 = vpop.f32.mrb[41].mxu1  ;;  %v5017_v38 = vadd.f32 %v5016_v7, %v5015_v56  ;;  %v6548_v51 = vadd.f32 %v5014_v50, %v6503_v40 }
 0x2ca   : > { %v6545_v23 = vadd.f32 %v4931_v1, %v4930_v21  ;;  %v4933_v32 = vpop.f32.mrb[42].mxu1 }
 0x2cb   : > { %v4934_v34 = vpop.f32.mrb[43].mxu1  ;;  %v6553_v4 = vadd.f32 %v5017_v38, %v6505_v41 }
 0x2cc   : > { %v6550_v35 = vadd.f32 %v4934_v34, %v4933_v32 }
 0x2ce   : > { %v5018_v37 = vpop.f32.mrb[56].mxu0 }
 0x2cf   : > { %v5019_v17 = vpop.f32.mrb[57].mxu0 }
 0x2d0   : > { %v4936_v22 = vpop.f32.mrb[44].mxu1  ;;  %v5020_v62 = vadd.f32 %v5019_v17, %v5018_v37  ;;  %v5021_v61 = vpop.f32.mrb[58].mxu0 }
 0x2d1   : > { %v4937_v45 = vpop.f32.mrb[45].mxu1  ;;  %v5022_v14 = vpop.f32.mrb[59].mxu0 }
 0x2d2   : > { %v6555_v11 = vadd.f32 %v4937_v45, %v4936_v22  ;;  %v4939_v63 = vpop.f32.mrb[46].mxu1  ;;  %v5023_v24 = vadd.f32 %v5022_v14, %v5021_v61  ;;  %v6558_v40 = vadd.f32 %v5020_v62, %v6509_v46 }
 0x2d3   : > { %v4940_v26 = vpop.f32.mrb[47].mxu1 }
 0x2d4   : > { %v6560_v10 = vadd.f32 %v4940_v26, %v4939_v63  ;;  %v6563_v41 = vadd.f32 %v5023_v24, %v6511_v12 }
 0x2d8   : > { %v5024_v28 = vpop.f32.mrb[60].mxu0  ;;  %v4942_v58 = vpop.f32.mrb[48].mxu1 }
 0x2d9   : > { %v5025_v53 = vpop.f32.mrb[61].mxu0  ;;  %v4943_v43 = vpop.f32.mrb[49].mxu1 }
 0x2da   : > { %v5026_v49 = vadd.f32 %v5025_v53, %v5024_v28  ;;  %v5027_v2 = vpop.f32.mrb[62].mxu0  ;;  %v6565_v55 = vadd.f32 %v4943_v43, %v4942_v58  ;;  %v4945_v31 = vpop.f32.mrb[50].mxu1 }
 0x2db   : > { %v5028_v39 = vpop.f32.mrb[63].mxu0  ;;  %v4946_v42 = vpop.f32.mrb[51].mxu1 }
 0x2dc   : > { %v5029_v54 = vadd.f32 %v5028_v39, %v5027_v2  ;;  %v6567_v13 = vadd.f32 %v4946_v42, %v4945_v31  ;;  %v6570_v46 = vadd.f32 %v5026_v49, %v6523_v52 }
 0x2de   : > { %v6573_v12 = vadd.f32 %v5029_v54, %v6525_v5 }
 0x2e1   : > { %v4948_v25 = vpop.f32.mrb[52].mxu1  ;;  %v5030_v3 = vpop.f32.mrb[64].mxu0 }
 0x2e2   : > { %v4949_v29 = vpop.f32.mrb[53].mxu1  ;;  %v5031_v16 = vpop.f32.mrb[65].mxu0 }
 0x2e3   : > { %v6575_v47 = vadd.f32 %v4949_v29, %v4948_v25  ;;  %v4951_v19 = vpop.f32.mrb[54].mxu1  ;;  %v5032_v33 = vadd.f32 %v5031_v16, %v5030_v3  ;;  %v5033_v27 = vpop.f32.mrb[66].mxu0 }
 0x2e4   : > { %v4952_v50 = vpop.f32.mrb[55].mxu1  ;;  %v5034_v56 = vpop.f32.mrb[67].mxu0 }
 0x2e5   : > { %v6577_v21 = vadd.f32 %v4952_v50, %v4951_v19  ;;  %v5035_v7 = vadd.f32 %v5034_v56, %v5033_v27  ;;  %v6580_v52 = vadd.f32 %v5032_v33, %v6529_v36 }
 0x2e7   : > { %v6583_v5 = vadd.f32 %v5035_v7, %v6533_v15 }
 0x2e9   : > { %v4954_v1 = vpop.f32.mrb[56].mxu1 }
 0x2ea   : > { %v4955_v38 = vpop.f32.mrb[57].mxu1 }
 0x2eb   : > { %v5036_v32 = vpop.f32.mrb[68].mxu0  ;;  %v6585_v34 = vadd.f32 %v4955_v38, %v4954_v1  ;;  %v4957_v37 = vpop.f32.mrb[58].mxu1 }
 0x2ec   : > { %v5037_v17 = vpop.f32.mrb[69].mxu0  ;;  %v4958_v22 = vpop.f32.mrb[59].mxu1 }
 0x2ed   : > { %v5038_v62 = vadd.f32 %v5037_v17, %v5036_v32  ;;  %v5039_v61 = vpop.f32.mrb[70].mxu0  ;;  %v6587_v45 = vadd.f32 %v4958_v22, %v4957_v37  ;;  %v6620_v32 = vld [vmem:[%s6821_s6] ss:$0 sm:$0xff] }
 0x2ee   : > { %v5040_v14 = vpop.f32.mrb[71].mxu0 }
 0x2ef   : > { %v5041_v63 = vadd.f32 %v5040_v14, %v5039_v61  ;;  %v6590_v36 = vadd.f32 %v5038_v62, %v6538_v9 }
 0x2f1   : > { %v4960_v24 = vpop.f32.mrb[60].mxu1  ;;  %v6593_v15 = vadd.f32 %v5041_v63, %v6543_v6 }
 0x2f2   : > { %v4961_v26 = vpop.f32.mrb[61].mxu1 }
 0x2f3   : > { %v6595_v28 = vadd.f32 %v4961_v26, %v4960_v24  ;;  %v4963_v58 = vpop.f32.mrb[62].mxu1 }
 0x2f4   : > { %v4964_v43 = vpop.f32.mrb[63].mxu1 }
 0x2f5   : > { %v5042_v53 = vpop.f32.mrb[72].mxu0  ;;  %v6597_v2 = vadd.f32 %v4964_v43, %v4963_v58 }
 0x2f6   : > { %v5043_v49 = vpop.f32.mrb[73].mxu0 }
 0x2f7   : > { %v5044_v31 = vadd.f32 %v5043_v49, %v5042_v53  ;;  %v5045_v39 = vpop.f32.mrb[74].mxu0 }
 0x2f8   : > { %v5046_v42 = vpop.f32.mrb[75].mxu0 }
 0x2f9   : > { %v5047_v54 = vadd.f32 %v5046_v42, %v5045_v39  ;;  %v6600_v9 = vadd.f32 %v5044_v31, %v6545_v23  ;;  %v6614_v23 = vld [vmem:[%s6820_s5] ss:$0 sm:$0xff] }
 0x2fb   : > { %v6603_v25 = vadd.f32 %v5047_v54, %v6550_v35 }
 0x2fd   : > { %v5048_v6 = vpop.f32.mrb[76].mxu0 }
 0x2fe   : > { %v5049_v3 = vpop.f32.mrb[77].mxu0 }
 0x2ff   : > { %v5050_v29 = vadd.f32 %v5049_v3, %v5048_v6  ;;  %v5051_v16 = vpop.f32.mrb[78].mxu0 }
 0x300   : > { %v5052_v19 = vpop.f32.mrb[79].mxu0 }
 0x301   : > { %v5053_v33 = vadd.f32 %v5052_v19, %v5051_v16  ;;  %v6606_v27 = vadd.f32 %v5050_v29, %v6555_v11 }
 0x303   : > { %v6609_v50 = vadd.f32 %v5053_v33, %v6560_v10 }
 0x307   : > { %v5148_v56 = vpop.f32.mrb[64].mxu1 }
 0x308   : > { %v5054_v35 = vpop.f32.mrb[80].mxu0  ;;  %v4242_v7 = vadd.f32 %v5148_v56, %v6527_v30  ;;  %v4233_v1 = vpop.f32.mrb[65].mxu1 }
 0x309   : > { %v5055_v38 = vpop.f32.mrb[81].mxu0  ;;  %v4234_v11 = vadd.f32 %v4233_v1, %v6515_v57  ;;  %v5149_v10 = vpop.f32.mrb[66].mxu1 }
 0x30a   : > { %v5056_v37 = vadd.f32 %v5055_v38, %v5054_v35  ;;  %v5057_v17 = vpop.f32.mrb[82].mxu0  ;;  %v4357_v22 = vmul.f32 %v6614_v23, %v4242_v7  ;;  %v4245_v62 = vadd.f32 %v5149_v10, %v6531_v18  ;;  %v4236_v61 = vpop.f32.mrb[67].mxu1 }
 0x30b   : > { %v5058_v14 = vpop.f32.mrb[83].mxu0  ;;  %v4355_v30 = vmul.f32 %v6614_v23, %v4234_v11  ;;  %v4237_v63 = vadd.f32 %v4236_v61, %v6521_v0 }
 0x30c   : > { %v5059_v24 = vadd.f32 %v5058_v14, %v5057_v17  ;;  %v4396_v26 = vadd.f32 %v6620_v32, %v4357_v22  ;;  %v4358_v58 = vmul.f32 %v6614_v23, %v4245_v62  ;;  %v6630_v57 = vadd.f32 %v5056_v37, %v6565_v55 }
 0x30d   : > { %v4394_v53 = vadd.f32 %v6620_v32, %v4355_v30  ;;  %v4356_v43 = vmul.f32 %v6614_v23, %v4237_v63 }
 0x30e   : > { %v4428_v49 = vmax.f32 %v4396_v26, 0.0  ;;  %v4397_v18 = vadd.f32 %v6620_v32, %v4358_v58  ;;  %v6636_v31 = vadd.f32 %v5059_v24, %v6567_v13 }
 0x30f   : > { %v4426_v0 = vmax.f32 %v4394_v53, 0.0  ;;  %v4395_v55 = vadd.f32 %v6620_v32, %v4356_v43  ;;  %v5152_v39 = vpop.f32.mrb[68].mxu1 }
 0x310   : > { %v5060_v42 = vpop.f32.mrb[84].mxu0  ;;  %v4810_v54 = vpack.c.bf16 %v4428_v49, %v4428_v49  ;;  %v4429_v6 = vmax.f32 %v4397_v18, 0.0  ;;  %v4258_v3 = vadd.f32 %v5152_v39, %v6548_v51  ;;  %v4249_v29 = vpop.f32.mrb[69].mxu1 }
 0x311   : > { %v5061_v13 = vpop.f32.mrb[85].mxu0  ;;  %v4808_v16 = vpack.c.bf16 %v4426_v0, %v4426_v0  ;;  %v4427_v19 = vmax.f32 %v4395_v55, 0.0  ;;  %v4250_v33 = vadd.f32 %v4249_v29, %v6536_v20  ;;  %v5153_v56 = vpop.f32.mrb[70].mxu1 }
 0x312   : > { %v5062_v35 = vadd.f32 %v5061_v13, %v5060_v42  ;;  %4588 = vst.msk [vmem:[%s6643_s23 + $0x18] sm:$0xf] %vm832_vm3, %v4810_v54  ;;  %v5063_v7 = vpop.f32.mrb[86].mxu0  ;;  %v4811_v1 = vpack.c.bf16 %v4429_v6, %v4429_v6  ;;  %v4361_v38 = vmul.f32 %v6614_v23, %v4258_v3  ;;  %v4261_v11 = vadd.f32 %v5153_v56, %v6553_v4  ;;  %v4252_v10 = vpop.f32.mrb[71].mxu1 }
 0x313   : > { %4586 = vst.msk [vmem:[%s6643_s23 + $0x10] sm:$0xf] %vm832_vm3, %v4808_v16  ;;  %v5064_v51 = vpop.f32.mrb[87].mxu0  ;;  %v4809_v37 = vpack.c.bf16 %v4427_v19, %v4427_v19  ;;  %v4359_v17 = vmul.f32 %v6614_v23, %v4250_v33  ;;  %v4253_v20 = vadd.f32 %v4252_v10, %v6541_v48 }
 0x314   : > { %v5065_v22 = vadd.f32 %v5064_v51, %v5063_v7  ;;  %4589 = vst.msk [vmem:[%s6643_s23 + $0x1c] sm:$0xf] %vm832_vm3, %v4811_v1  ;;  %v4400_v62 = vadd.f32 %v6620_v32, %v4361_v38  ;;  %v4362_v61 = vmul.f32 %v6614_v23, %v4261_v11  ;;  %v6661_v14 = vadd.f32 %v5062_v35, %v6575_v47 }
 0x315   : > { %4587 = vst.msk [vmem:[%s6643_s23 + $0x14] sm:$0xf] %vm832_vm3, %v4809_v37  ;;  %v4398_v4 = vadd.f32 %v6620_v32, %v4359_v17  ;;  %v4360_v30 = vmul.f32 %v6614_v23, %v4253_v20 }
 0x316   : > { %v4432_v63 = vmax.f32 %v4400_v62, 0.0  ;;  %v4401_v24 = vadd.f32 %v6620_v32, %v4362_v61  ;;  %v6669_v48 = vadd.f32 %v5065_v22, %v6577_v21 }
 0x317   : > { %v4430_v26 = vmax.f32 %v4398_v4, 0.0  ;;  %v4399_v58 = vadd.f32 %v6620_v32, %v4360_v30  ;;  %v5156_v53 = vpop.f32.mrb[72].mxu1 }
 0x318   : > { %v5066_v43 = vpop.f32.mrb[88].mxu0  ;;  %v4814_v47 = vpack.c.bf16 %v4432_v63, %v4432_v63  ;;  %v4433_v49 = vmax.f32 %v4401_v24, 0.0  ;;  %v4274_v18 = vadd.f32 %v5156_v53, %v6570_v46  ;;  %v4265_v0 = vpop.f32.mrb[73].mxu1 }
 0x319   : > { %v5067_v55 = vpop.f32.mrb[89].mxu0  ;;  %v4812_v39 = vpack.c.bf16 %v4430_v26, %v4430_v26  ;;  %v4431_v42 = vmax.f32 %v4399_v58, 0.0  ;;  %v4266_v54 = vadd.f32 %v4265_v0, %v6558_v40  ;;  %v5157_v6 = vpop.f32.mrb[74].mxu1 }
 0x31a   : > { %v5068_v21 = vadd.f32 %v5067_v55, %v5066_v43  ;;  %4592 = vst.msk [vmem:[%s6643_s23 + $0x28] sm:$0xf] %vm832_vm3, %v4814_v47  ;;  %v5069_v3 = vpop.f32.mrb[90].mxu0  ;;  %v4815_v29 = vpack.c.bf16 %v4433_v49, %v4433_v49  ;;  %v4365_v13 = vmul.f32 %v6614_v23, %v4274_v18  ;;  %v4277_v16 = vadd.f32 %v5157_v6, %v6573_v12  ;;  %v4268_v19 = vpop.f32.mrb[75].mxu1 }
 0x31b   : > { %4590 = vst.msk [vmem:[%s6643_s23 + $0x20] sm:$0xf] %vm832_vm3, %v4812_v39  ;;  %v5070_v46 = vpop.f32.mrb[91].mxu0  ;;  %v4813_v33 = vpack.c.bf16 %v4431_v42, %v4431_v42  ;;  %v4363_v56 = vmul.f32 %v6614_v23, %v4266_v54  ;;  %v4269_v40 = vadd.f32 %v4268_v19, %v6563_v41 }
 0x31c   : > { %v5071_v35 = vadd.f32 %v5070_v46, %v5069_v3  ;;  %4593 = vst.msk [vmem:[%s6643_s23 + $0x2c] sm:$0xf] %vm832_vm3, %v4815_v29  ;;  %v4404_v7 = vadd.f32 %v6620_v32, %v4365_v13  ;;  %v4366_v1 = vmul.f32 %v6614_v23, %v4277_v16  ;;  %v6687_v38 = vadd.f32 %v5068_v21, %v6585_v34 }
 0x31d   : > { %4591 = vst.msk [vmem:[%s6643_s23 + $0x24] sm:$0xf] %vm832_vm3, %v4813_v33  ;;  %v4402_v12 = vadd.f32 %v6620_v32, %v4363_v56  ;;  %v4364_v11 = vmul.f32 %v6614_v23, %v4269_v40 }
 0x31e   : > { %v4436_v10 = vmax.f32 %v4404_v7, 0.0  ;;  %v4405_v51 = vadd.f32 %v6620_v32, %v4366_v1  ;;  %v6695_v41 = vadd.f32 %v5071_v35, %v6587_v45 }
 0x31f   : > { %v4434_v37 = vmax.f32 %v4402_v12, 0.0  ;;  %v4403_v17 = vadd.f32 %v6620_v32, %v4364_v11  ;;  %v5160_v20 = vpop.f32.mrb[76].mxu1 }
 0x320   : > { %v5072_v22 = vpop.f32.mrb[92].mxu0  ;;  %v4818_v34 = vpack.c.bf16 %v4436_v10, %v4436_v10  ;;  %v4437_v62 = vmax.f32 %v4405_v51, 0.0  ;;  %v4290_v61 = vadd.f32 %v5160_v20, %v6590_v36  ;;  %v4281_v4 = vpop.f32.mrb[77].mxu1 }
 0x321   : > { %v5073_v30 = vpop.f32.mrb[93].mxu0  ;;  %v4816_v63 = vpack.c.bf16 %v4434_v37, %v4434_v37  ;;  %v4435_v24 = vmax.f32 %v4403_v17, 0.0  ;;  %v4282_v26 = vadd.f32 %v4281_v4, %v6580_v52  ;;  %v5161_v58 = vpop.f32.mrb[78].mxu1 }
 0x322   : > { %v5074_v45 = vadd.f32 %v5073_v30, %v5072_v22  ;;  %4596 = vst.msk [vmem:[%s6643_s23 + $0x38] sm:$0xf] %vm832_vm3, %v4818_v34  ;;  %v5075_v53 = vpop.f32.mrb[94].mxu0  ;;  %v4819_v43 = vpack.c.bf16 %v4437_v62, %v4437_v62  ;;  %v4369_v47 = vmul.f32 %v6614_v23, %v4290_v61  ;;  %v4293_v49 = vadd.f32 %v5161_v58, %v6593_v15  ;;  %v4284_v18 = vpop.f32.mrb[79].mxu1 }
 0x323   : > { %4594 = vst.msk [vmem:[%s6643_s23 + $0x30] sm:$0xf] %vm832_vm3, %v4816_v63  ;;  %v5076_v36 = vpop.f32.mrb[95].mxu0  ;;  %v4817_v0 = vpack.c.bf16 %v4435_v24, %v4435_v24  ;;  %v4367_v55 = vmul.f32 %v6614_v23, %v4282_v26  ;;  %v4285_v52 = vadd.f32 %v4284_v18, %v6583_v5 }
 0x324   : > { %v5077_v39 = vadd.f32 %v5076_v36, %v5075_v53  ;;  %4597 = vst.msk [vmem:[%s6643_s23 + $0x3c] sm:$0xf] %vm832_vm3, %v4819_v43  ;;  %v4408_v42 = vadd.f32 %v6620_v32, %v4369_v47  ;;  %v4370_v54 = vmul.f32 %v6614_v23, %v4293_v49  ;;  %v6713_v6 = vadd.f32 %v5074_v45, %v6595_v28 }
 0x325   : > { %4595 = vst.msk [vmem:[%s6643_s23 + $0x34] sm:$0xf] %vm832_vm3, %v4817_v0  ;;  %v4406_v15 = vadd.f32 %v6620_v32, %v4367_v55  ;;  %v4368_v21 = vmul.f32 %v6614_v23, %v4285_v52 }
 0x326   : > { %v4440_v3 = vmax.f32 %v4408_v42, 0.0  ;;  %v4409_v29 = vadd.f32 %v6620_v32, %v4370_v54  ;;  %v6721_v5 = vadd.f32 %v5077_v39, %v6597_v2 }
 0x327   : > { %v4438_v13 = vmax.f32 %v4406_v15, 0.0  ;;  %v4407_v16 = vadd.f32 %v6620_v32, %v4368_v21  ;;  %v5164_v19 = vpop.f32.mrb[80].mxu1 }
 0x328   : > { %v5144_v46 = vpop.f32.mrb[96].mxu0  ;;  %v4822_v28 = vpack.c.bf16 %v4440_v3, %v4440_v3  ;;  %v4441_v33 = vmax.f32 %v4409_v29, 0.0  ;;  %v4306_v56 = vadd.f32 %v5164_v19, %v6606_v27  ;;  %v4297_v40 = vpop.f32.mrb[81].mxu1 }
 0x329   : > { %v4226_v35 = vadd.f32 %v5144_v46, %v6507_v8  ;;  %v4217_v7 = vpop.f32.mrb[97].mxu0  ;;  %v4820_v1 = vpack.c.bf16 %v4438_v13, %v4438_v13  ;;  %v4439_v12 = vmax.f32 %v4407_v16, 0.0  ;;  %v4298_v2 = vadd.f32 %v4297_v40, %v6600_v9  ;;  %v5165_v11 = vpop.f32.mrb[82].mxu1 }
 0x32a   : > { %v4218_v10 = vadd.f32 %v4217_v7, %v6513_v44  ;;  %4600 = vst.msk [vmem:[%s6643_s23 + $0x48] sm:$0xf] %vm832_vm3, %v4822_v28  ;;  %v5145_v51 = vpop.f32.mrb[98].mxu0  ;;  %v4823_v37 = vpack.c.bf16 %v4441_v33, %v4441_v33  ;;  %v4373_v17 = vmul.f32 %v6614_v23, %v4306_v56  ;;  %v4309_v27 = vadd.f32 %v5165_v11, %v6609_v50  ;;  %v4300_v20 = vpop.f32.mrb[83].mxu1 }
 0x32b   : > { %v4353_v8 = vmul.f32 %v6614_v23, %v4226_v35  ;;  %v4229_v22 = vadd.f32 %v5145_v51, %v6517_v59  ;;  %4598 = vst.msk [vmem:[%s6643_s23 + $0x40] sm:$0xf] %vm832_vm3, %v4820_v1  ;;  %v4220_v9 = vpop.f32.mrb[99].mxu0  ;;  %v4821_v34 = vpack.c.bf16 %v4439_v12, %v4439_v12  ;;  %v4371_v44 = vmul.f32 %v6614_v23, %v4298_v2 }
 0x32c   : > { %v4351_v62 = vmul.f32 %v6614_v23, %v4218_v10  ;;  %v4221_v61 = vadd.f32 %v4220_v9, %v6519_v60  ;;  %4601 = vst.msk [vmem:[%s6643_s23 + $0x4c] sm:$0xf] %vm832_vm3, %v4823_v37  ;;  %v4412_v4 = vadd.f32 %v6620_v32, %v4373_v17  ;;  %v4374_v50 = vmul.f32 %v6614_v23, %v4309_v27 }
 0x32d   : > { %v4392_v30 = vadd.f32 %v6620_v32, %v4353_v8  ;;  %v4354_v59 = vmul.f32 %v6614_v23, %v4229_v22  ;;  %4599 = vst.msk [vmem:[%s6643_s23 + $0x44] sm:$0xf] %vm832_vm3, %v4821_v34  ;;  %v4410_v63 = vadd.f32 %v6620_v32, %v4371_v44  ;;  %v4301_v24 = vadd.f32 %v4300_v20, %v6603_v25 }
 0x32e   : > { %v4390_v26 = vadd.f32 %v6620_v32, %v4351_v62  ;;  %v4352_v60 = vmul.f32 %v6614_v23, %v4221_v61  ;;  %v4444_v58 = vmax.f32 %v4412_v4, 0.0  ;;  %v4413_v45 = vadd.f32 %v6620_v32, %v4374_v50 }
 0x32f   : > { %v4424_v53 = vmax.f32 %v4392_v30, 0.0  ;;  %v4393_v43 = vadd.f32 %v6620_v32, %v4354_v59  ;;  %v4442_v47 = vmax.f32 %v4410_v63, 0.0  ;;  %v4372_v49 = vmul.f32 %v6614_v23, %v4301_v24  ;;  %v5168_v18 = vpop.f32.mrb[84].mxu1 }
 0x330   : > { %v4422_v36 = vmax.f32 %v4390_v26, 0.0  ;;  %v4391_v0 = vadd.f32 %v6620_v32, %v4352_v60  ;;  %v4826_v25 = vpack.c.bf16 %v4444_v58, %v4444_v58  ;;  %v4445_v55 = vmax.f32 %v4413_v45, 0.0  ;;  %v4313_v52 = vpop.f32.mrb[85].mxu1 }
 0x331   : > { %v4806_v39 = vpack.c.bf16 %v4424_v53, %v4424_v53  ;;  %v4425_v42 = vmax.f32 %v4393_v43, 0.0  ;;  %v4824_v54 = vpack.c.bf16 %v4442_v47, %v4442_v47  ;;  %v4411_v15 = vadd.f32 %v6620_v32, %v4372_v49  ;;  %v5169_v21 = vpop.f32.mrb[86].mxu1 }
 0x332   : > { %v4804_v3 = vpack.c.bf16 %v4422_v36, %v4422_v36  ;;  %v4423_v29 = vmax.f32 %v4391_v0, 0.0  ;;  %4604 = vst.msk [vmem:[%s6643_s23 + $0x58] sm:$0xf] %vm832_vm3, %v4826_v25  ;;  %v4827_v13 = vpack.c.bf16 %v4445_v55, %v4445_v55  ;;  %v4322_v16 = vadd.f32 %v5168_v18, %v6661_v14  ;;  %v4316_v19 = vpop.f32.mrb[87].mxu1 }
 0x333   : > { %4584 = vst.msk [vmem:[%s6643_s23 + $0x8] sm:$0xf] %vm832_vm3, %v4806_v39  ;;  %v4807_v46 = vpack.c.bf16 %v4425_v42, %v4425_v42  ;;  %4602 = vst.msk [vmem:[%s6643_s23 + $0x50] sm:$0xf] %vm832_vm3, %v4824_v54  ;;  %v4443_v28 = vmax.f32 %v4411_v15, 0.0  ;;  %v4314_v33 = vadd.f32 %v4313_v52, %v6630_v57  ;;  %v4325_v56 = vadd.f32 %v5169_v21, %v6669_v48 }
 0x334   : > { %4582 = vst.msk [vmem:[%s6643_s23] sm:$0xf] %vm832_vm3, %v4804_v3  ;;  %v4805_v40 = vpack.c.bf16 %v4423_v29, %v4423_v29  ;;  %4605 = vst.msk [vmem:[%s6643_s23 + $0x5c] sm:$0xf] %vm832_vm3, %v4827_v13  ;;  %v4377_v14 = vmul.f32 %v6614_v23, %v4322_v16  ;;  %v4317_v35 = vadd.f32 %v4316_v19, %v6636_v31 }
 0x335   : > { %4585 = vst.msk [vmem:[%s6643_s23 + $0xc] sm:$0xf] %vm832_vm3, %v4807_v46  ;;  %v4825_v7 = vpack.c.bf16 %v4443_v28, %v4443_v28  ;;  %v4375_v1 = vmul.f32 %v6614_v23, %v4314_v33  ;;  %v4378_v12 = vmul.f32 %v6614_v23, %v4325_v56 }
 0x336   : > { %4583 = vst.msk [vmem:[%s6643_s23 + $0x4] sm:$0xf] %vm832_vm3, %v4805_v40  ;;  %v4416_v57 = vadd.f32 %v6620_v32, %v4377_v14  ;;  %v4376_v48 = vmul.f32 %v6614_v23, %v4317_v35 }
 0x337   : > { %4603 = vst.msk [vmem:[%s6643_s23 + $0x54] sm:$0xf] %vm832_vm3, %v4825_v7  ;;  %v4414_v2 = vadd.f32 %v6620_v32, %v4375_v1  ;;  %v4417_v11 = vadd.f32 %v6620_v32, %v4378_v12  ;;  %v5172_v31 = vpop.f32.mrb[88].mxu1 }
 0x338   : > { %v4448_v10 = vmax.f32 %v4416_v57, 0.0  ;;  %v4415_v51 = vadd.f32 %v6620_v32, %v4376_v48  ;;  %v4338_v37 = vadd.f32 %v5172_v31, %v6713_v6  ;;  %v4329_v17 = vpop.f32.mrb[89].mxu1 }
 0x339   : > { %v4446_v27 = vmax.f32 %v4414_v2, 0.0  ;;  %v4449_v20 = vmax.f32 %v4417_v11, 0.0  ;;  %v4330_v8 = vadd.f32 %v4329_v17, %v6687_v38  ;;  %v5173_v22 = vpop.f32.mrb[90].mxu1 }
 0x33a   : > { %v4830_v9 = vpack.c.bf16 %v4448_v10, %v4448_v10  ;;  %v4447_v34 = vmax.f32 %v4415_v51, 0.0  ;;  %v4381_v44 = vmul.f32 %v6614_v23, %v4338_v37  ;;  %v4341_v62 = vadd.f32 %v5173_v22, %v6721_v5  ;;  %v4332_v61 = vpop.f32.mrb[91].mxu1 }
 0x33b   : > { %v4828_v4 = vpack.c.bf16 %v4446_v27, %v4446_v27  ;;  %v4831_v50 = vpack.c.bf16 %v4449_v20, %v4449_v20  ;;  %v4379_v6 = vmul.f32 %v6614_v23, %v4330_v8  ;;  %v4333_v30 = vadd.f32 %v4332_v61, %v6695_v41 }
 0x33c   : > { %4608 = vst.msk [vmem:[%s6643_s23 + $0x68] sm:$0xf] %vm832_vm3, %v4830_v9  ;;  %v4829_v59 = vpack.c.bf16 %v4447_v34, %v4447_v34  ;;  %v4420_v38 = vadd.f32 %v6620_v32, %v4381_v44  ;;  %v4382_v63 = vmul.f32 %v6614_v23, %v4341_v62 }
 0x33d   : > { %4606 = vst.msk [vmem:[%s6643_s23 + $0x60] sm:$0xf] %vm832_vm3, %v4828_v4  ;;  %4609 = vst.msk [vmem:[%s6643_s23 + $0x6c] sm:$0xf] %vm832_vm3, %v4831_v50  ;;  %v4418_v5 = vadd.f32 %v6620_v32, %v4379_v6  ;;  %v4380_v24 = vmul.f32 %v6614_v23, %v4333_v30 }
 0x33e   : > { %4607 = vst.msk [vmem:[%s6643_s23 + $0x64] sm:$0xf] %vm832_vm3, %v4829_v59  ;;  %v4452_v41 = vmax.f32 %v4420_v38, 0.0  ;;  %v4421_v26 = vadd.f32 %v6620_v32, %v4382_v63 }
 0x33f   : > { %v4450_v60 = vmax.f32 %v4418_v5, 0.0  ;;  %v4419_v58 = vadd.f32 %v6620_v32, %v4380_v24 }
 0x340   : > { %v4834_v45 = vpack.c.bf16 %v4452_v41, %v4452_v41  ;;  %v4453_v53 = vmax.f32 %v4421_v26, 0.0 }
 0x341   : > { %v4832_v43 = vpack.c.bf16 %v4450_v60, %v4450_v60  ;;  %v4451_v47 = vmax.f32 %v4419_v58, 0.0 }
 0x342   : > { %4612 = vst.msk [vmem:[%s6643_s23 + $0x78] sm:$0xf] %vm832_vm3, %v4834_v45  ;;  %v4835_v49 = vpack.c.bf16 %v4453_v53, %v4453_v53 }
 0x343   : > { %4610 = vst.msk [vmem:[%s6643_s23 + $0x70] sm:$0xf] %vm832_vm3, %v4832_v43  ;;  %v4833_v18 = vpack.c.bf16 %v4451_v47, %v4451_v47 }
 0x344   : > { %4613 = vst.msk [vmem:[%s6643_s23 + $0x7c] sm:$0xf] %vm832_vm3, %v4835_v49 }
 0x345   : > { %4611 = vst.msk [vmem:[%s6643_s23 + $0x74] sm:$0xf] %vm832_vm3, %v4833_v18 }
 0x346 PF: > { %s17_s24 = sadd.s32 1, %s5255_s24  }
 0x347   : > { %p14_p4 = scmp.ge.s32.totalorder %s17_s24, 4  }
 0x349   :  { %16 = sbr.rel (!%p14_p4) target bundleno = 1 (0x1), region = 80 }

// kernel: dist_network_forward.5
= control target key start
LH: loop header
LB: loop body
LE: loop exit
PB: predicated region body
PF: predicated region fallthrough
CT: control target
= control target key end

     0   :  { %s8862_s25 = smov 0   ;;  %s10856_s0 = inlined_call_operand.vmem [shape: bf16[128,128], index: 0, kind: input, shape index: {}]   ;;  %s10857_s1 = inlined_call_operand.vmem [shape: bf16[2,24,24,128], index: 1, kind: input, shape index: {}]   ;;  %s10858_s2 = inlined_call_operand.vmem [shape: bf16[2,1,128], index: 2, kind: input, shape index: {}]   ;;  %s10859_s3 = inlined_call_operand.vmem [shape: bf16[2,128,256], index: 3, kind: input, shape index: {}]   ;;  %s10860_s4 = inlined_call_operand.vmem [shape: bf16[2,1152,256], index: 4, kind: input, shape index: {}]   ;;  %s10861_s5 = inlined_call_operand.vmem [shape: bf16[2,128,256], index: 5, kind: input, shape index: {}]   ;;  %s10862_s6 = inlined_call_operand.vmem [shape: bf16[2,128,256], index: 6, kind: input, shape index: {}]   ;;  %s10863_s7 = inlined_call_operand.vmem [shape: bf16[2,128,256], index: 7, kind: input, shape index: {}]   ;;  %s10864_s8 = inlined_call_operand.vmem [shape: bf16[2,1280,256], index: 8, kind: input, shape index: {}]   ;;  %s10865_s9 = inlined_call_operand.vmem [shape: bf16[2,256,128], index: 9, kind: input, shape index: {}]   ;;  %s10866_s10 = inlined_call_operand.vmem [shape: f32[2,6,256], index: 10, kind: input, shape index: {}]   ;;  %s10867_s11 = inlined_call_operand.vmem [shape: f32[2,6,256], index: 11, kind: input, shape index: {}]   ;;  %s10868_s12 = inlined_call_operand.vmem [shape: f32[2,1,128], index: 12, kind: input, shape index: {}]   ;;  %s10869_s13 = inlined_call_operand.vmem [shape: bf16[2,128,128], index: 13, kind: output, shape index: {}]  }
   0x1   :  { %10870 = sst [smem:[#allocation3_spill]] %s10859_s3 }
   0x2   :  { %10871 = sst [smem:[#allocation4_spill]] %s10860_s4 }
   0x3 LB: > { %s6951_s26 = sadd.s32 4294967295, %s8788_s25   ;;  %p6955_p0 = scmp.ge.s32.totalorder %s8788_s25, 1  ;;  %s8788_s25 = sphi %s8862_s25, %s23_s25  }
   0x4   : > { %p475_p1 = scmp.lt.s32.totalorder %s8788_s25, 3 }
   0x6   : > { %p476_p2 = pnand %p6955_p0, %p475_p1 }
   0x7   : > { %p562_p3 = scmp.lt.s32.totalorder (!%p476_p2), %s6951_s26, 1  ;;  %v8790_v0 = vmov (!%p476_p2), 0   ;;  %s10872_s3 = sld [smem:[#allocation3_spill]] (!%p476_p2)  ;;  %v8190_v18 = vld [vmem:[%s10856_s0] sm:$0xff] (!%p476_p2)   ;;  %v8197_v23 = vld [vmem:[%s10856_s0 + $0x8] sm:$0xff] (!%p476_p2)   ;;  %v8204_v28 = vld [vmem:[%s10856_s0 + $0x10] sm:$0xff] (!%p476_p2)  }
   0x8   : > { %479 = sbr.rel (%p476_p2) target bundleno = 1739 (0x6cb), region = 72  ;;  %812 = vmatprep.mubr.bf16.mxu1 (!%p476_p2), %v8790_v0  ;;  %s10873_s4 = sld [smem:[#allocation4_spill]] (!%p476_p2)  ;;  %v8211_v33 = vld [vmem:[%s10856_s0 + $0x18] sm:$0xff] (!%p476_p2)   ;;  %v8218_v38 = vld [vmem:[%s10856_s0 + $0x20] sm:$0xff] (!%p476_p2)   ;;  %v8225_v43 = vld [vmem:[%s10856_s0 + $0x28] sm:$0xff] (!%p476_p2)   ;;  %vm1118_vm0 = vcmask (!%p476_p2), 1042432  }
   0x9   : > { %v8232_v48 = vld [vmem:[%s10856_s0 + $0x30] sm:$0xff] (!%p476_p2)   ;;  %v6998_v53 = vld [vmem:[%s10857_s1 + $0x18] sm:$0xe] (!%p476_p2)  ;;  %v6999_v54 = vld [vmem:[%s10857_s1 + $0x1c] sm:$0x1] (!%p476_p2)  ;;  %vm1119_vm1 = vcmask (!%p476_p2), 1046532  }
   0xa   : > { %v7000_v55 = vld [vmem:[%s10857_s1 + $0x24] sm:$0xe] (!%p476_p2)  ;;  %v7001_v56 = vld [vmem:[%s10857_s1 + $0x28] sm:$0x1] (!%p476_p2)  ;;  %v8239_v57 = vld [vmem:[%s10856_s0 + $0x38] sm:$0xff] (!%p476_p2)   ;;  %v7030_v61 = vrot.slane (!%p476_p2), %v6998_v53, 9 }
   0xb   : > { %v8246_v60 = vld [vmem:[%s10857_s1 + $0x1c] ss:$12 sps:$4 sm:$0xff] (!%p476_p2)   ;;  %v1123_v62 = vrot.slane (!%p476_p2), %v6999_v54, 5  ;;  %v7031_v63 = vrot.slane (!%p476_p2), %v7000_v55, 9  ;;  %vm8981_vm2 = vmor (!%p476_p2), %vm1118_vm0, %vm1119_vm1  ;;  %v7014_v55 = vld [vmem:[%s10857_s1 + $0x138] sm:$0xe] (!%p476_p2) }
   0xc   : > { %vm1361_vm3 = vcmask (!%p476_p2), 1040384   ;;  %vm1362_vm4 = vcmask (!%p476_p2), 1044484   ;;  %vm5892_vm6 = vcmask (!%p476_p2), 1041409  }
   0xd   : > { %vm9196_vm5 = vmor (!%p476_p2), %vm1361_vm3, %vm1362_vm4 }
   0xf   : > { %s10879_s26 = smov (!%p562_p3, %s6951_s26), 1 }
  0x10   : > { %s8874_s27 = sshll.u32 %s10879_s26, 7  ;;  %s8154_s14 = smul.u32 1152, %s10879_s26 }
  0x11   : > { %s8880_s30 = scalar_lea.vmem %s10872_s3, %s8874_s27  ;;  %s7800_s24 = sshll.u32 %s10879_s26, 4 }
  0x12   : > { %v8166_v1 = vld [vmem:[%s8880_s30 + $0x4] ss:$8 sps:$4 sm:$0xff]   ;;  %v8168_v2 = vld [vmem:[%s8880_s30] ss:$8 sps:$4 sm:$0xff]   ;;  %v8169_v3 = vld [vmem:[%s8880_s30 + $0x14] ss:$8 sps:$4 sm:$0xff]   ;;  %s8893_s17 = scalar_lea.vmem %s10873_s4, %s8154_s14  ;;  %s9415_s14 = scalar_lea.vmem %s10865_s9, %s8874_s27 }
  0x13   : > { %780 = vmatprep.subr.bf16.mxu1 %v8166_v1  ;;  %v8171_v4 = vld [vmem:[%s8880_s30 + $0x10] ss:$8 sps:$4 sm:$0xff]   ;;  %v8172_v5 = vld [vmem:[%s8880_s30 + $0x24] ss:$8 sps:$4 sm:$0xff]   ;;  %v8174_v6 = vld [vmem:[%s8880_s30 + $0x20] ss:$8 sps:$4 sm:$0xff]   ;;  %s9560_s15 = scalar_lea.vmem %s10867_s11, %s7800_s24  ;;  %s10118_s20 = scalar_lea.vmem %s10861_s5, %s8874_s27 }
  0x14   : > { %781 = vmatpush1.bf16.msra.mxu1 %v8168_v2  ;;  %v8175_v7 = vld [vmem:[%s8880_s30 + $0x34] ss:$8 sps:$4 sm:$0xff]   ;;  %v8177_v8 = vld [vmem:[%s8880_s30 + $0x30] ss:$8 sps:$4 sm:$0xff]   ;;  %v8178_v9 = vld [vmem:[%s8880_s30 + $0x44] ss:$8 sps:$4 sm:$0xff]   ;;  %s10378_s18 = scalar_lea.vmem %s10862_s6, %s8874_s27 }
  0x15   : > { %782 = vmatprep.subr.bf16.mxu1 %v8169_v3  ;;  %v8180_v10 = vld [vmem:[%s8880_s30 + $0x40] ss:$8 sps:$4 sm:$0xff]   ;;  %v8181_v11 = vld [vmem:[%s8880_s30 + $0x54] ss:$8 sps:$4 sm:$0xff]   ;;  %v8183_v12 = vld [vmem:[%s8880_s30 + $0x50] ss:$8 sps:$4 sm:$0xff]  }
  0x16   : > { %v8184_v13 = vld [vmem:[%s8880_s30 + $0x64] ss:$8 sps:$4 sm:$0xff]   ;;  %v8186_v14 = vld [vmem:[%s8880_s30 + $0x60] ss:$8 sps:$4 sm:$0xff]   ;;  %v8187_v15 = vld [vmem:[%s8880_s30 + $0x74] ss:$8 sps:$4 sm:$0xff]  }
  0x17   : > { %v8189_v16 = vld [vmem:[%s8880_s30 + $0x70] ss:$8 sps:$4 sm:$0xff]   ;;  %v8193_v17 = vld [vmem:[%s8893_s17 + $0x4] ss:$8 sps:$4 sm:$0xff]   ;;  %v8191_v19 = vld [vmem:[%s8893_s17] ss:$8 sps:$4 sm:$0xff]   ;;  %s9536_s30 = scalar_lea.vmem %s10866_s10, %s7800_s24 }
  0x18   : > { %783 = vmatpush1.bf16.msra.mxu1 %v8171_v4  ;;  %v8196_v20 = vld [vmem:[%s8893_s17 + $0x14] ss:$8 sps:$4 sm:$0xff]   ;;  %v8194_v21 = vld [vmem:[%s8893_s17 + $0x10] ss:$8 sps:$4 sm:$0xff]   ;;  %v8200_v22 = vld [vmem:[%s8893_s17 + $0x24] ss:$8 sps:$4 sm:$0xff]   ;;  %v1124_v4 = vsel %vm8981_vm2, %v7030_v61, %v1123_v62 }
  0x19   : > { %784 = vmatprep.subr.bf16.mxu1 %v8172_v5  ;;  %v8198_v24 = vld [vmem:[%s8893_s17 + $0x20] ss:$8 sps:$4 sm:$0xff]   ;;  %v8203_v25 = vld [vmem:[%s8893_s17 + $0x34] ss:$8 sps:$4 sm:$0xff]   ;;  %v8201_v26 = vld [vmem:[%s8893_s17 + $0x30] ss:$8 sps:$4 sm:$0xff]  }
  0x1a   : > { %v8207_v27 = vld [vmem:[%s8893_s17 + $0x44] ss:$8 sps:$4 sm:$0xff]   ;;  %v8205_v29 = vld [vmem:[%s8893_s17 + $0x40] ss:$8 sps:$4 sm:$0xff]   ;;  %v8210_v30 = vld [vmem:[%s8893_s17 + $0x54] ss:$8 sps:$4 sm:$0xff]  }
  0x1b   : > { %v8208_v31 = vld [vmem:[%s8893_s17 + $0x50] ss:$8 sps:$4 sm:$0xff]   ;;  %v8214_v32 = vld [vmem:[%s8893_s17 + $0x64] ss:$8 sps:$4 sm:$0xff]   ;;  %v8212_v34 = vld [vmem:[%s8893_s17 + $0x60] ss:$8 sps:$4 sm:$0xff]  }
  0x1c   : > { %785 = vmatpush1.bf16.msra.mxu1 %v8174_v6  ;;  %v8217_v35 = vld [vmem:[%s8893_s17 + $0x74] ss:$8 sps:$4 sm:$0xff]   ;;  %v8215_v36 = vld [vmem:[%s8893_s17 + $0x70] ss:$8 sps:$4 sm:$0xff]   ;;  %v8221_v37 = vld [vmem:[%s8893_s17 + $0x84] ss:$8 sps:$4 sm:$0xff]  }
  0x1d   : > { %786 = vmatprep.subr.bf16.mxu1 %v8175_v7  ;;  %v8219_v39 = vld [vmem:[%s8893_s17 + $0x80] ss:$8 sps:$4 sm:$0xff]   ;;  %v8224_v40 = vld [vmem:[%s8893_s17 + $0x94] ss:$8 sps:$4 sm:$0xff]   ;;  %v8222_v41 = vld [vmem:[%s8893_s17 + $0x90] ss:$8 sps:$4 sm:$0xff]  }
  0x1e   : > { %v8228_v42 = vld [vmem:[%s8893_s17 + $0xa4] ss:$8 sps:$4 sm:$0xff]   ;;  %v8226_v44 = vld [vmem:[%s8893_s17 + $0xa0] ss:$8 sps:$4 sm:$0xff]   ;;  %v8231_v45 = vld [vmem:[%s8893_s17 + $0xb4] ss:$8 sps:$4 sm:$0xff]  }
  0x1f   : > { %v8229_v46 = vld [vmem:[%s8893_s17 + $0xb0] ss:$8 sps:$4 sm:$0xff]   ;;  %v8235_v47 = vld [vmem:[%s8893_s17 + $0xc4] ss:$8 sps:$4 sm:$0xff]   ;;  %v8233_v49 = vld [vmem:[%s8893_s17 + $0xc0] ss:$8 sps:$4 sm:$0xff]  }
  0x20   : > { %787 = vmatpush1.bf16.msra.mxu1 %v8177_v8  ;;  %v8238_v50 = vld [vmem:[%s8893_s17 + $0xd4] ss:$8 sps:$4 sm:$0xff]   ;;  %v8236_v51 = vld [vmem:[%s8893_s17 + $0xd0] ss:$8 sps:$4 sm:$0xff]   ;;  %v8242_v52 = vld [vmem:[%s8893_s17 + $0xe4] ss:$8 sps:$4 sm:$0xff]  }
  0x21   : > { %788 = vmatprep.subr.bf16.mxu1 %v8178_v9  ;;  %v8240_v58 = vld [vmem:[%s8893_s17 + $0xe0] ss:$8 sps:$4 sm:$0xff]   ;;  %v8245_v59 = vld [vmem:[%s8893_s17 + $0xf4] ss:$8 sps:$4 sm:$0xff]   ;;  %v1127_v1 = vrot.slane %v7001_v56, 5  ;;  %v7038_v62 = vrot.slane %v7014_v55, 9 }
  0x22   : > { %v8243_v3 = vld [vmem:[%s8893_s17 + $0xf0] ss:$8 sps:$4 sm:$0xff]   ;;  %v8249_v6 = vld [vmem:[%s8893_s17 + $0x104] ss:$8 sps:$4 sm:$0xff]   ;;  %v7003_v8 = vld [vmem:[%s10857_s1 + $0x34] sm:$0x1] }
  0x23   : > { %v1128_v5 = vsel %vm8981_vm2, %v7031_v63, %v1127_v1  ;;  %v7002_v7 = vld [vmem:[%s10857_s1 + $0x30] sm:$0xe]  ;;  %v7004_v9 = vld [vmem:[%s10857_s1 + $0x3c] sm:$0xe]  ;;  %v8270_v54 = vld [vmem:[%s8893_s17 + $0x164] ss:$8 sps:$4 sm:$0xff]  }
  0x24   : > { %789 = vmatpush1.bf16.msra.mxu1 %v8180_v10  ;;  %v7005_v10 = vld [vmem:[%s10857_s1 + $0x40] sm:$0x1]  ;;  %v7015_v56 = vld [vmem:[%s10857_s1 + $0x13c] sm:$0x1]  ;;  %s8155_s24 = smul.u32 1280, %s10879_s26 }
  0x25   : > { %790 = vmatprep.subr.bf16.mxu1 %v8181_v11  ;;  %v7046_v11 = vcombine.low %v1124_v4, %v1128_v5  ;;  %v8274_v61 = vld [vmem:[%s10857_s1 + $0x13c] ss:$12 sps:$4 sm:$0xff]   ;;  %v1155_v63 = vrot.slane %v7015_v56, 5  ;;  %v8271_v5 = vld [vmem:[%s8893_s17 + $0x170] ss:$8 sps:$4 sm:$0xff]  }
  0x26   : > { %v8273_v4 = vld [vmem:[%s8893_s17 + $0x174] ss:$8 sps:$4 sm:$0xff]   ;;  %s9763_s21 = scalar_lea.vmem %s10864_s8, %s8155_s24  ;;  %v7355_v2 = vld [vmem:[%s10857_s1 + $0xc8] sm:$0x7]  ;;  %s10370_s24 = scalar_lea.vmem %s10863_s7, %s8874_s27 }
  0x27   : > { %v8294_v56 = vld [vmem:[%s8893_s17 + $0x1d4] ss:$8 sps:$4 sm:$0xff]  }
  0x28   : > { %791 = vmatpush1.bf16.msra.mxu1 %v8183_v12  ;;  %v8247_v12 = vld [vmem:[%s8893_s17 + $0x100] ss:$8 sps:$4 sm:$0xff]  }
  0x29   : > { %792 = vmatprep.subr.bf16.mxu1 %v8184_v13  ;;  %v8253_v13 = vld [vmem:[%s10857_s1 + $0x34] ss:$12 sps:$4 sm:$0xff]  }
  0x2c   : > { %793 = vmatpush1.bf16.msra.mxu1 %v8186_v14  ;;  %v7032_v14 = vrot.slane %v7002_v7, 9  ;;  %v7018_v7 = vld [vmem:[%s10857_s1 + $0x150] sm:$0xe] }
  0x2d   : > { %794 = vmatprep.subr.bf16.mxu1 %v8187_v15  ;;  %v1131_v15 = vrot.slane %v7003_v8, 5  ;;  %v1156_v8 = vsel %vm8981_vm2, %v7038_v62, %v1155_v63  ;;  %v8298_v62 = vld [vmem:[%s8893_s17 + $0x1e4] ss:$8 sps:$4 sm:$0xff]   ;;  %v7078_v63 = vld [vmem:[%s10857_s1 + $0x1c] sm:$0x8] }
  0x30   : > { %795 = vmatpush1.bf16.msra.mxu1 %v8189_v16  ;;  %v7033_v16 = vrot.slane %v7004_v9, 9 }
  0x31   : > { %3222 = vmatprep.subr.bf16.mxu1 %v8193_v17  ;;  %v1135_v17 = vrot.slane %v7005_v10, 5  ;;  %v7019_v10 = vld [vmem:[%s10857_s1 + $0x154] sm:$0x1] }
  0x33   : > { %813 = vmatmul.mubr.bf16.vlgmr.msra.gmra.mrb[0].mxu1 %v8190_v18  ;;  %v8252_v18 = vld [vmem:[%s8893_s17 + $0x114] ss:$8 sps:$4 sm:$0xff]  }
  0x34   : > { %3223 = vmatpush1.bf16.msra.mxu1 %v8191_v19  ;;  %822 = vmatprep.mubr.bf16.mxu1 %v8790_v0  ;;  %v8250_v19 = vld [vmem:[%s8893_s17 + $0x110] ss:$8 sps:$4 sm:$0xff]  }
  0x35   : > { %3224 = vmatprep.subr.bf16.mxu1 %v8196_v20  ;;  %v8256_v20 = vld [vmem:[%s8893_s17 + $0x124] ss:$8 sps:$4 sm:$0xff]  }
  0x38   : > { %3225 = vmatpush1.bf16.msra.mxu1 %v8194_v21  ;;  %v7006_v21 = vld [vmem:[%s10857_s1 + $0x48] sm:$0xe] }
  0x39   : > { %3226 = vmatprep.subr.bf16.mxu1 %v8200_v22  ;;  %v1132_v22 = vsel %vm8981_vm2, %v7032_v14, %v1131_v15  ;;  %v8275_v14 = vld [vmem:[%s8893_s17 + $0x180] ss:$8 sps:$4 sm:$0xff]  }
  0x3a   : > { %v8281_v15 = vld [vmem:[%s10857_s1 + $0x154] ss:$12 sps:$4 sm:$0xff]  }
  0x3b   : > { %823 = vmatmul.mubr.bf16.gmra.mrb[4].mxu1 %v8197_v23  ;;  %v1136_v23 = vsel %vm8981_vm2, %v7033_v16, %v1135_v17  ;;  %v7040_v16 = vrot.slane %v7018_v7, 9  ;;  %v1163_v17 = vrot.slane %v7019_v10, 5  ;;  %v7139_v10 = vld [vmem:[%s10857_s1 + $0x7c] sm:$0x1] }
  0x3c   : > { %3227 = vmatpush1.bf16.msra.mxu1 %v8198_v24  ;;  %832 = vmatprep.mubr.bf16.mxu1 %v8790_v0  ;;  %v7007_v24 = vld [vmem:[%s10857_s1 + $0x4c] sm:$0x1] }
  0x3d   : > { %3228 = vmatprep.subr.bf16.mxu1 %v8203_v25  ;;  %v7008_v25 = vld [vmem:[%s10857_s1 + $0x54] sm:$0xe] }
  0x40   : > { %3229 = vmatpush1.bf16.msra.mxu1 %v8201_v26  ;;  %v7009_v26 = vld [vmem:[%s10857_s1 + $0x58] sm:$0x1] }
  0x41   : > { %3230 = vmatprep.subr.bf16.mxu1 %v8207_v27  ;;  %v7047_v27 = vcombine.low %v1132_v22, %v1136_v23  ;;  %v1164_v22 = vsel %vm8981_vm2, %v7040_v16, %v1163_v17 }
  0x43   : > { %833 = vmatmul.mubr.bf16.gmra.mrb[8].mxu1 %v8204_v28  ;;  %v8254_v28 = vld [vmem:[%s8893_s17 + $0x120] ss:$8 sps:$4 sm:$0xff]  }
  0x44   : > { %3231 = vmatpush1.bf16.msra.mxu1 %v8205_v29  ;;  %842 = vmatprep.mubr.bf16.mxu1 %v8790_v0  ;;  %v8260_v29 = vld [vmem:[%s10857_s1 + $0x4c] ss:$12 sps:$4 sm:$0xff]  }
  0x45   : > { %3232 = vmatprep.subr.bf16.mxu1 %v8210_v30  ;;  %v7034_v30 = vrot.slane %v7006_v21, 9  ;;  %v8278_v21 = vld [vmem:[%s8893_s17 + $0x190] ss:$8 sps:$4 sm:$0xff]  }
  0x48   : > { %3233 = vmatpush1.bf16.msra.mxu1 %v8208_v31  ;;  %v1139_v31 = vrot.slane %v7007_v24, 5  ;;  %v8284_v24 = vld [vmem:[%s8893_s17 + $0x1a4] ss:$8 sps:$4 sm:$0xff]  }
  0x49   : > { %3234 = vmatprep.subr.bf16.mxu1 %v8214_v32  ;;  %v7035_v32 = vrot.slane %v7008_v25, 9  ;;  %v7022_v25 = vld [vmem:[%s10857_s1 + $0x168] sm:$0xe] }
  0x4b   : > { %843 = vmatmul.mubr.bf16.gmra.mrb[12].mxu1 %v8211_v33  ;;  %v1143_v33 = vrot.slane %v7009_v26, 5  ;;  %v7023_v26 = vld [vmem:[%s10857_s1 + $0x16c] sm:$0x1] }
  0x4c   : > { %3235 = vmatpush1.bf16.msra.mxu1 %v8212_v34  ;;  %852 = vmatprep.mubr.bf16.mxu1 %v8790_v0  ;;  %v8259_v34 = vld [vmem:[%s8893_s17 + $0x134] ss:$8 sps:$4 sm:$0xff]  }
  0x4d   : > { %3236 = vmatprep.subr.bf16.mxu1 %v8217_v35  ;;  %v8257_v35 = vld [vmem:[%s8893_s17 + $0x130] ss:$8 sps:$4 sm:$0xff]  }
  0x50   : > { %3237 = vmatpush1.bf16.msra.mxu1 %v8215_v36  ;;  %v1140_v36 = vsel %vm8981_vm2, %v7034_v30, %v1139_v31  ;;  %v8282_v30 = vld [vmem:[%s8893_s17 + $0x1a0] ss:$8 sps:$4 sm:$0xff]   ;;  %v8288_v31 = vld [vmem:[%s10857_s1 + $0x16c] ss:$12 sps:$4 sm:$0xff]  }
  0x51   : > { %3238 = vmatprep.subr.bf16.mxu1 %v8221_v37  ;;  %v1144_v37 = vsel %vm8981_vm2, %v7035_v32, %v1143_v33  ;;  %v7042_v32 = vrot.slane %v7022_v25, 9  ;;  %v1171_v33 = vrot.slane %v7023_v26, 5  ;;  %v8299_v26 = vld [vmem:[%s8893_s17 + $0x1f0] ss:$8 sps:$4 sm:$0xff]  }
  0x53   : > { %853 = vmatmul.mubr.bf16.gmra.mrb[16].mxu1 %v8218_v38  ;;  %v8263_v38 = vld [vmem:[%s8893_s17 + $0x144] ss:$8 sps:$4 sm:$0xff]  }
  0x54   : > { %3239 = vmatpush1.bf16.msra.mxu1 %v8219_v39  ;;  %862 = vmatprep.mubr.bf16.mxu1 %v8790_v0  ;;  %v7010_v39 = vld [vmem:[%s10857_s1 + $0x60] sm:$0xe] }
  0x55   : > { %3240 = vmatprep.subr.bf16.mxu1 %v8224_v40  ;;  %v7011_v40 = vld [vmem:[%s10857_s1 + $0x64] sm:$0x1] }
  0x58   : > { %3241 = vmatpush1.bf16.msra.mxu1 %v8222_v41  ;;  %v7012_v41 = vld [vmem:[%s10857_s1 + $0x6c] sm:$0xe] }
  0x59   : > { %3242 = vmatprep.subr.bf16.mxu1 %v8228_v42  ;;  %v7013_v42 = vld [vmem:[%s10857_s1 + $0x70] sm:$0x1] }
  0x5b   : > { %863 = vmatmul.mubr.bf16.gmra.mrb[20].mxu1 %v8225_v43  ;;  %v7048_v43 = vcombine.low %v1140_v36, %v1144_v37  ;;  %v8287_v36 = vld [vmem:[%s8893_s17 + $0x1b4] ss:$8 sps:$4 sm:$0xff]   ;;  %v8285_v37 = vld [vmem:[%s8893_s17 + $0x1b0] ss:$8 sps:$4 sm:$0xff]  }
  0x5c   : > { %3243 = vmatpush1.bf16.msra.mxu1 %v8226_v44  ;;  %872 = vmatprep.mubr.bf16.mxu1 %v8790_v0  ;;  %v8261_v44 = vld [vmem:[%s8893_s17 + $0x140] ss:$8 sps:$4 sm:$0xff]  }
  0x5d   : > { %3244 = vmatprep.subr.bf16.mxu1 %v8231_v45  ;;  %v8267_v45 = vld [vmem:[%s10857_s1 + $0x64] ss:$12 sps:$4 sm:$0xff]  }
  0x60   : > { %3245 = vmatpush1.bf16.msra.mxu1 %v8229_v46  ;;  %v7036_v46 = vrot.slane %v7010_v39, 9  ;;  %v7026_v39 = vld [vmem:[%s10857_s1 + $0x180] sm:$0xe] }
  0x61   : > { %3246 = vmatprep.subr.bf16.mxu1 %v8235_v47  ;;  %v1147_v47 = vrot.slane %v7011_v40, 5  ;;  %v1172_v40 = vsel %vm8981_vm2, %v7042_v32, %v1171_v33  ;;  %v7085_v33 = vld [vmem:[%s10857_s1 + $0x44] sm:$0x7] }
  0x63   : > { %873 = vmatmul.mubr.bf16.gmra.mrb[24].mxu1 %v8232_v48  ;;  %v7037_v48 = vrot.slane %v7012_v41, 9 }
  0x64   : > { %3247 = vmatpush1.bf16.msra.mxu1 %v8233_v49  ;;  %882 = vmatprep.mubr.bf16.mxu1 %v8790_v0  ;;  %v1151_v49 = vrot.slane %v7013_v42, 5  ;;  %v7027_v42 = vld [vmem:[%s10857_s1 + $0x184] sm:$0x1] }
  0x65   : > { %3248 = vmatprep.subr.bf16.mxu1 %v8238_v50  ;;  %v8266_v50 = vld [vmem:[%s8893_s17 + $0x154] ss:$8 sps:$4 sm:$0xff]  }
  0x66   : > { %v1152_v53 = vsel %vm8981_vm2, %v7037_v48, %v1151_v49  ;;  %v7137_v48 = vld [vmem:[%s10857_s1 + $0x70] sm:$0x1] }
  0x68   : > { %3249 = vmatpush1.bf16.msra.mxu1 %v8236_v51  ;;  %v8264_v51 = vld [vmem:[%s8893_s17 + $0x150] ss:$8 sps:$4 sm:$0xff]  }
  0x69   : > { %3250 = vmatprep.subr.bf16.mxu1 %v8242_v52  ;;  %v1148_v52 = vsel %vm8981_vm2, %v7036_v46, %v1147_v47  ;;  %v7135_v46 = vld [vmem:[%s10857_s1 + $0x64] sm:$0x1]  ;;  %v7136_v47 = vld [vmem:[%s10857_s1 + $0x6c] sm:$0xe] }
  0x6b   : > { %883 = vmatmul.mubr.bf16.gmra.mrb[28].mxu1 %v8239_v57  ;;  %v7016_v57 = vld [vmem:[%s10857_s1 + $0x144] sm:$0xe] }
  0x6c   : > { %3251 = vmatpush1.bf16.msra.mxu1 %v8240_v58  ;;  %3254 = vmatprep.mubr.bf16.mxu1 %v8246_v60  ;;  %v7017_v58 = vld [vmem:[%s10857_s1 + $0x148] sm:$0x1]  ;;  %v7039_v1 = vrot.slane %v7016_v57, 9 }
  0x6d   : > { %3252 = vmatprep.subr.bf16.mxu1 %v8245_v59  ;;  %v7049_v59 = vcombine.low %v1148_v52, %v1152_v53  ;;  %v8268_v60 = vld [vmem:[%s8893_s17 + $0x160] ss:$8 sps:$4 sm:$0xff]   ;;  %v7044_v52 = vrot.slane %v7026_v39, 9  ;;  %v1179_v53 = vrot.slane %v7027_v42, 5 }
  0x6e   : > { %v7145_v39 = vld [vmem:[%s10857_s1 + $0xa0] sm:$0x1] }
  0x6f   : > { %v8302_v42 = vld [vmem:[%s8893_s17 + $0x200] ss:$8 sps:$4 sm:$0xff]  }
  0x70   : > { %3253 = vmatpush1.bf16.msra.mxu1 %v8243_v3  ;;  %v1159_v3 = vrot.slane %v7017_v58, 5  ;;  %v1535_v58 = vrot.slane %v7135_v46, 5  ;;  %v1378_v46 = vrot.slane %v7085_v33, 7 }
  0x71   : > { %3335 = vmatprep.subr.bf16.mxu1 %v8249_v6  ;;  %v8277_v6 = vld [vmem:[%s8893_s17 + $0x184] ss:$8 sps:$4 sm:$0xff]  }
  0x72   : > { %v1160_v9 = vsel %vm8981_vm2, %v7039_v1, %v1159_v3  ;;  %v1180_v1 = vsel %vm8981_vm2, %v7044_v52, %v1179_v53  ;;  %v8305_v52 = vld [vmem:[%s8893_s17 + $0x210] ss:$8 sps:$4 sm:$0xff]   ;;  %v7086_v53 = vld [vmem:[%s10857_s1 + $0x4c] sm:$0x8] }
  0x73   : > { %3255 = vmatmul.mubr.bf16.vlgmr.msra.gmra.mrb[32].mxu1 %v7046_v11  ;;  %v7020_v11 = vld [vmem:[%s10857_s1 + $0x15c] sm:$0xe] }
  0x74   : > { %3336 = vmatpush1.bf16.msra.mxu1 %v8247_v12  ;;  %3264 = vmatprep.mubr.bf16.mxu1 %v8253_v13  ;;  %v7021_v12 = vld [vmem:[%s10857_s1 + $0x160] sm:$0x1]  ;;  %v7050_v13 = vcombine.low %v1156_v8, %v1160_v9  ;;  %v7081_v8 = vld [vmem:[%s10857_s1 + $0x2c] sm:$0x7]  ;;  %v7138_v9 = vld [vmem:[%s10857_s1 + $0x78] sm:$0xe] }
  0x75   : > { %3337 = vmatprep.subr.bf16.mxu1 %v8252_v18  ;;  %v7041_v18 = vrot.slane %v7020_v11, 9  ;;  %v7140_v11 = vld [vmem:[%s10857_s1 + $0x84] sm:$0xe] }
  0x78   : > { %3338 = vmatpush1.bf16.msra.mxu1 %v8250_v19  ;;  %v1167_v19 = vrot.slane %v7021_v12, 5  ;;  %v7141_v12 = vld [vmem:[%s10857_s1 + $0x88] sm:$0x1] }
  0x79   : > { %3339 = vmatprep.subr.bf16.mxu1 %v8256_v20  ;;  %v8280_v20 = vld [vmem:[%s8893_s17 + $0x194] ss:$8 sps:$4 sm:$0xff]   ;;  %v1547_v25 = vrot.slane %v7141_v12, 5 }
  0x7a   : > { %v1168_v23 = vsel %vm8981_vm2, %v7041_v18, %v1167_v19  ;;  %v1370_v19 = vrot.slane %v7081_v8, 7 }
  0x7b   : > { %3265 = vmatmul.mubr.bf16.gmra.mrb[36].mxu1 %v7047_v27  ;;  %v7024_v27 = vld [vmem:[%s10857_s1 + $0x174] sm:$0xe] }
  0x7c   : > { %3340 = vmatpush1.bf16.msra.mxu1 %v8254_v28  ;;  %3274 = vmatprep.mubr.bf16.mxu1 %v8260_v29  ;;  %v7025_v28 = vld [vmem:[%s10857_s1 + $0x178] sm:$0x1]  ;;  %v7051_v29 = vcombine.low %v1164_v22, %v1168_v23  ;;  %v7168_v22 = vrot.slane %v7138_v9, 9  ;;  %v1543_v23 = vrot.slane %v7139_v10, 5 }
  0x7d   : > { %3341 = vmatprep.subr.bf16.mxu1 %v8259_v34  ;;  %v7043_v34 = vrot.slane %v7024_v27, 9  ;;  %v8304_v27 = vld [vmem:[%s8893_s17 + $0x204] ss:$8 sps:$4 sm:$0xff]  }
  0x80   : > { %3342 = vmatpush1.bf16.msra.mxu1 %v8257_v35  ;;  %v1175_v35 = vrot.slane %v7025_v28, 5  ;;  %v7082_v28 = vld [vmem:[%s10857_s1 + $0x34] sm:$0x8] }
  0x81   : > { %3343 = vmatprep.subr.bf16.mxu1 %v8263_v38  ;;  %v8291_v38 = vld [vmem:[%s8893_s17 + $0x1c4] ss:$8 sps:$4 sm:$0xff]  }
  0x82   : > { %v1176_v41 = vsel %vm8981_vm2, %v7043_v34, %v1175_v35  ;;  %v7142_v34 = vld [vmem:[%s10857_s1 + $0x90] sm:$0xe]  ;;  %v7143_v35 = vld [vmem:[%s10857_s1 + $0x94] sm:$0x1] }
  0x83   : > { %3275 = vmatmul.mubr.bf16.gmra.mrb[40].mxu1 %v7048_v43  ;;  %v7028_v43 = vld [vmem:[%s10857_s1 + $0x18c] sm:$0xe]  ;;  %v7052_v49 = vcombine.low %v1172_v40, %v1176_v41  ;;  %v7112_v41 = vrot.slane %v7082_v28, 11  ;;  %v7151_v28 = vld [vmem:[%s10857_s1 + $0x184] sm:$0x1] }
  0x84   : > { %3344 = vmatpush1.bf16.msra.mxu1 %v8261_v44  ;;  %3284 = vmatprep.mubr.bf16.mxu1 %v8267_v45  ;;  %v7029_v44 = vld [vmem:[%s10857_s1 + $0x190] sm:$0x1]  ;;  %v7134_v45 = vld [vmem:[%s10857_s1 + $0x60] sm:$0xe] }
  0x85   : > { %3345 = vmatprep.subr.bf16.mxu1 %v8266_v50  ;;  %v8289_v50 = vld [vmem:[%s8893_s17 + $0x1c0] ss:$8 sps:$4 sm:$0xff]   ;;  %v1183_v55 = vrot.slane %v7029_v44, 5  ;;  %v7166_v57 = vrot.slane %v7134_v45, 9 }
  0x88   : > { %3346 = vmatpush1.bf16.msra.mxu1 %v8264_v51  ;;  %v8295_v51 = vld [vmem:[%s10857_s1 + $0x184] ss:$12 sps:$4 sm:$0xff]  }
  0x89   : > { %3347 = vmatprep.subr.bf16.mxu1 %v8270_v54  ;;  %v7045_v54 = vrot.slane %v7028_v43, 9 }
  0x8b   : > { %3285 = vmatmul.mubr.bf16.gmra.mrb[44].mxu1 %v7049_v59  ;;  %v7167_v59 = vrot.slane %v7136_v47, 9  ;;  %v1184_v3 = vsel %vm8981_vm2, %v7045_v54, %v1183_v55  ;;  %v8307_v47 = vld [vmem:[%s8893_s17 + $0x214] ss:$8 sps:$4 sm:$0xff]   ;;  %v8310_v54 = vld [vmem:[%s8893_s17 + $0x224] ss:$8 sps:$4 sm:$0xff]  }
  0x8c   : > { %3348 = vmatpush1.bf16.msra.mxu1 %v8268_v60  ;;  %3294 = vmatprep.mubr.bf16.mxu1 %v8274_v61  ;;  %v1539_v60 = vrot.slane %v7137_v48, 5  ;;  %v8292_v61 = vld [vmem:[%s8893_s17 + $0x1d0] ss:$8 sps:$4 sm:$0xff]   ;;  %v7170_v48 = vrot.slane %v7142_v34, 9 }
  0x8d   : > { %3349 = vmatprep.subr.bf16.mxu1 %v8273_v4  ;;  %v7079_v4 = vld [vmem:[%s10857_s1 + $0x20] sm:$0x7] }
  0x8e   : > { %v1540_v7 = vsel %vm8981_vm2, %v7167_v59, %v1539_v60  ;;  %v1366_v16 = vrot.slane %v7079_v4, 7  ;;  %v7089_v59 = vld [vmem:[%s10857_s1 + $0x5c] sm:$0x7] }
  0x90   : > { %3350 = vmatpush1.bf16.msra.mxu1 %v8271_v5  ;;  %v7080_v5 = vld [vmem:[%s10857_s1 + $0x28] sm:$0x8] }
  0x91   : > { %3351 = vmatprep.subr.bf16.mxu1 %v8277_v6  ;;  %v1536_v6 = vsel %vm8981_vm2, %v7166_v57, %v1535_v58  ;;  %v7111_v17 = vrot.slane %v7080_v5, 11  ;;  %v7087_v57 = vld [vmem:[%s10857_s1 + $0x50] sm:$0x7]  ;;  %v7088_v58 = vld [vmem:[%s10857_s1 + $0x58] sm:$0x8] }
  0x92   : > { %v7182_v18 = vcombine.low %v1536_v6, %v1540_v7  ;;  %v8308_v5 = vld [vmem:[%s8893_s17 + $0x220] ss:$8 sps:$4 sm:$0xff]   ;;  %v8313_v6 = vld [vmem:[%s8893_s17 + $0x234] ss:$8 sps:$4 sm:$0xff]   ;;  %v7114_v7 = vrot.slane %v7086_v53, 11  ;;  %v1382_v8 = vrot.slane %v7087_v57, 7 }
  0x93   : > { %3295 = vmatmul.mubr.bf16.gmra.mrb[48].mxu1 %v7050_v13  ;;  %v7053_v13 = vcombine.low %v1180_v1, %v1184_v3  ;;  %v1371_v32 = vsel %vm9196_vm5, %v7111_v17, %v1370_v19  ;;  %v7148_v1 = vld [vmem:[%s10857_s1 + $0xb4] sm:$0xe]  ;;  %v7149_v3 = vld [vmem:[%s10857_s1 + $0xb8] sm:$0x1]  ;;  %v7115_v10 = vrot.slane %v7088_v58, 11 }
  0x94   : > { %3352 = vmatpush1.bf16.msra.mxu1 %v8275_v14  ;;  %3304 = vmatprep.mubr.bf16.mxu1 %v8281_v15  ;;  %v8296_v14 = vld [vmem:[%s8893_s17 + $0x1e0] ss:$8 sps:$4 sm:$0xff]   ;;  %v7110_v15 = vrot.slane %v7078_v63, 11  ;;  %v7147_v63 = vld [vmem:[%s10857_s1 + $0xac] sm:$0x1] }
  0x95   : > { %3353 = vmatprep.subr.bf16.mxu1 %v8280_v20  ;;  %v8301_v20 = vld [vmem:[%s8893_s17 + $0x1f4] ss:$8 sps:$4 sm:$0xff]   ;;  %v8316_v17 = vld [vmem:[%s8893_s17 + $0x244] ss:$8 sps:$4 sm:$0xff]   ;;  %v7091_v19 = vld [vmem:[%s10857_s1 + $0x68] sm:$0x7] }
  0x96   : > { %v1390_v34 = vrot.slane %v7091_v19, 7  ;;  %v7154_v53 = vld [vmem:[%s10857_s1 + $0x198] sm:$0xe]  ;;  %v8320_v58 = vld [vmem:[%s8893_s17 + $0x260] ss:$8 sps:$4 sm:$0xff]  }
  0x97   : > { %v7158_v19 = vld [vmem:[%s10857_s1 + $0x1b0] sm:$0xe] }
  0x98   : > { %3354 = vmatpush1.bf16.msra.mxu1 %v8278_v21  ;;  %v8483_v21 = vld [vmem:[%s9763_s21 + $0x1f4] ss:$8 sps:$4 sm:$0xff]  }
  0x99   : > { %3355 = vmatprep.subr.bf16.mxu1 %v8284_v24  ;;  %v7169_v24 = vrot.slane %v7140_v11, 9  ;;  %v1386_v11 = vrot.slane %v7089_v59, 7 }
  0x9b   : > { %3305 = vmatmul.mubr.bf16.gmra.mrb[52].mxu1 %v7051_v29  ;;  %v7083_v29 = vld [vmem:[%s10857_s1 + $0x38] sm:$0x7] }
  0x9c   : > { %3356 = vmatpush1.bf16.msra.mxu1 %v8282_v30  ;;  %3314 = vmatprep.mubr.bf16.mxu1 %v8288_v31  ;;  %v7084_v30 = vld [vmem:[%s10857_s1 + $0x40] sm:$0x8]  ;;  %v1367_v31 = vsel %vm9196_vm5, %v7110_v15, %v1366_v16  ;;  %v1374_v44 = vrot.slane %v7083_v29, 7  ;;  %v1563_v15 = vrot.slane %v7149_v3, 5  ;;  %v8311_v16 = vld [vmem:[%s8893_s17 + $0x230] ss:$8 sps:$4 sm:$0xff]  }
  0x9d   : > { %3357 = vmatprep.subr.bf16.mxu1 %v8287_v36  ;;  %v1544_v36 = vsel %vm8981_vm2, %v7168_v22, %v1543_v23  ;;  %v7126_v40 = vcombine.low %v1367_v31, %v1371_v32  ;;  %v7113_v45 = vrot.slane %v7084_v30, 11  ;;  %v1387_v22 = vsel %vm9196_vm5, %v7115_v10, %v1386_v11  ;;  %v7092_v23 = vld [vmem:[%s10857_s1 + $0x70] sm:$0x8]  ;;  %v7152_v29 = vld [vmem:[%s10857_s1 + $0x18c] sm:$0xe] }
  0x9e   : > { %v1375_v55 = vsel %vm9196_vm5, %v7112_v41, %v1374_v44  ;;  %v7153_v30 = vld [vmem:[%s10857_s1 + $0x190] sm:$0x1]  ;;  %v8314_v32 = vld [vmem:[%s8893_s17 + $0x240] ss:$8 sps:$4 sm:$0xff]   ;;  %v7175_v41 = vrot.slane %v7152_v29, 9  ;;  %v7176_v3 = vrot.slane %v7154_v53, 9 }
  0x9f   : > { %v8322_v44 = vld [vmem:[%s8893_s17 + $0x264] ss:$8 sps:$4 sm:$0xff]   ;;  %v7100_v11 = vld [vmem:[%s10857_s1 + $0x160] sm:$0x8] }
  0xa0   : > { %3358 = vmatpush1.bf16.msra.mxu1 %v8285_v37  ;;  %v1548_v37 = vsel %vm8981_vm2, %v7169_v24, %v1547_v25  ;;  %v8328_v10 = vld [vmem:[%s8893_s17 + $0x284] ss:$8 sps:$4 sm:$0xff]  }
  0xa1   : > { %3359 = vmatprep.subr.bf16.mxu1 %v8291_v38  ;;  %v7144_v38 = vld [vmem:[%s10857_s1 + $0x9c] sm:$0xe]  ;;  %v7183_v43 = vcombine.low %v1544_v36, %v1548_v37  ;;  %v7117_v36 = vrot.slane %v7092_v23, 11  ;;  %v7121_v23 = vrot.slane %v7100_v11, 11  ;;  %v7102_v29 = vld [vmem:[%s10857_s1 + $0x16c] sm:$0x8] }
  0xa3   : > { %3315 = vmatmul.mubr.bf16.gmra.mrb[56].mxu1 %v7052_v49  ;;  %v1551_v49 = vrot.slane %v7143_v35, 5 }
  0xa4   : > { %3360 = vmatpush1.bf16.msra.mxu1 %v8289_v50  ;;  %3324 = vmatprep.mubr.bf16.mxu1 %v8295_v51  ;;  %v7171_v50 = vrot.slane %v7144_v38, 9  ;;  %v1555_v51 = vrot.slane %v7145_v39, 5  ;;  %v8319_v38 = vld [vmem:[%s8893_s17 + $0x254] ss:$8 sps:$4 sm:$0xff]  }
  0xa5   : > { %3361 = vmatprep.subr.bf16.mxu1 %v8294_v56  ;;  %v1379_v56 = vsel %vm9196_vm5, %v7113_v45, %v1378_v46  ;;  %v1552_v60 = vsel %vm8981_vm2, %v7170_v48, %v1551_v49  ;;  %v7094_v45 = vld [vmem:[%s10857_s1 + $0x13c] sm:$0x8]  ;;  %v7095_v46 = vld [vmem:[%s10857_s1 + $0x140] sm:$0x7]  ;;  %v7096_v49 = vld [vmem:[%s10857_s1 + $0x148] sm:$0x8] }
  0xa6   : > { %v7127_v4 = vcombine.low %v1375_v55, %v1379_v56  ;;  %v7156_v55 = vld [vmem:[%s10857_s1 + $0x1a4] sm:$0xe]  ;;  %v7157_v56 = vld [vmem:[%s10857_s1 + $0x1a8] sm:$0x1]  ;;  %v7118_v59 = vrot.slane %v7094_v45, 11 }
  0xa8   : > { %3362 = vmatpush1.bf16.msra.mxu1 %v8292_v61  ;;  %v1556_v61 = vsel %vm8981_vm2, %v7171_v50, %v1555_v51 }
  0xa9   : > { %3363 = vmatprep.subr.bf16.mxu1 %v8298_v62  ;;  %v7146_v62 = vld [vmem:[%s10857_s1 + $0xa8] sm:$0xe]  ;;  %v7184_v9 = vcombine.low %v1552_v60, %v1556_v61  ;;  %v1398_v60 = vrot.slane %v7095_v46, 7  ;;  %v7122_v46 = vrot.slane %v7102_v29, 11 }
  0xaa   : > { %v7172_v12 = vrot.slane %v7146_v62, 9  ;;  %v7119_v62 = vrot.slane %v7096_v49, 11  ;;  %v8334_v49 = vld [vmem:[%s8893_s17 + $0x2a4] ss:$8 sps:$4 sm:$0xff]  }
  0xab   : > { %3325 = vmatmul.mubr.bf16.gmra.mrb[60].mxu1 %v7053_v13  ;;  %v1559_v13 = vrot.slane %v7147_v63, 5 }
  0xac   : > { %3364 = vmatpush1.bf16.msra.mxu1 %v8296_v14  ;;  %3367 = vmatprep.mubr.bf16.mxu1 %v7182_v18  ;;  %v7173_v14 = vrot.slane %v7148_v1, 9  ;;  %v7090_v18 = vld [vmem:[%s10857_s1 + $0x64] sm:$0x8]  ;;  %v8325_v1 = vld [vmem:[%s8893_s17 + $0x274] ss:$8 sps:$4 sm:$0xff]  }
  0xad   : > { %3365 = vmatprep.subr.bf16.mxu1 %v8301_v20  ;;  %v1383_v20 = vsel %vm9196_vm5, %v7114_v7, %v1382_v8  ;;  %v1560_v24 = vsel %vm8981_vm2, %v7172_v12, %v1559_v13  ;;  %v7116_v33 = vrot.slane %v7090_v18, 11  ;;  %v8323_v7 = vld [vmem:[%s8893_s17 + $0x270] ss:$8 sps:$4 sm:$0xff]   ;;  %v7098_v8 = vld [vmem:[%s10857_s1 + $0x154] sm:$0x8]  ;;  %v1399_v12 = vsel %vm9196_vm5, %v7118_v59, %v1398_v60 }
  0xae   : > { %v1564_v25 = vsel %vm8981_vm2, %v7173_v14, %v1563_v15  ;;  %v7128_v31 = vcombine.low %v1383_v20, %v1387_v22  ;;  %v7101_v14 = vld [vmem:[%s10857_s1 + $0x164] sm:$0x7]  ;;  %v7159_v20 = vld [vmem:[%s10857_s1 + $0x1b4] sm:$0x1]  ;;  %v8326_v22 = vld [vmem:[%s8893_s17 + $0x280] ss:$8 sps:$4 sm:$0xff]  }
  0xaf   : > { %v7185_v35 = vcombine.low %v1560_v24, %v1564_v25  ;;  %v7160_v24 = vld [vmem:[%s10857_s1 + $0x1bc] sm:$0xe]  ;;  %v7161_v25 = vld [vmem:[%s10857_s1 + $0x1c0] sm:$0x1]  ;;  %v7106_v59 = vld [vmem:[%s10857_s1 + $0x184] sm:$0x8] }
  0xb0   : > { %3366 = vmatpush1.bf16.msra.mxu1 %v8299_v26  ;;  %v7093_v26 = vld [vmem:[%s10857_s1 + $0x74] sm:$0x7]  ;;  %v7107_v60 = vld [vmem:[%s10857_s1 + $0x188] sm:$0x7] }
  0xb1   : > { %3448 = vmatprep.subr.bf16.mxu1 %v8304_v27  ;;  %v7150_v27 = vld [vmem:[%s10857_s1 + $0x180] sm:$0xe]  ;;  %v1394_v37 = vrot.slane %v7093_v26, 7  ;;  %v1422_v11 = vrot.slane %v7107_v60, 7  ;;  %v8360_v60 = vld [vmem:[%s8893_s17 + $0x324] ss:$8 sps:$4 sm:$0xff]  }
  0xb2   : > { %v7174_v39 = vrot.slane %v7150_v27, 9  ;;  %v8331_v27 = vld [vmem:[%s8893_s17 + $0x294] ss:$8 sps:$4 sm:$0xff]  }
  0xb3   : > { %3368 = vmatmul.mubr.bf16.vlgmr.msra.gmra.mrb[32].mxu1 %v7126_v40  ;;  %v1567_v40 = vrot.slane %v7151_v28, 5  ;;  %v1395_v48 = vsel %vm9196_vm5, %v7117_v36, %v1394_v37  ;;  %v1410_v28 = vrot.slane %v7101_v14, 7  ;;  %v7162_v36 = vld [vmem:[%s10857_s1 + $0x1c8] sm:$0xe]  ;;  %v7163_v37 = vld [vmem:[%s10857_s1 + $0x1cc] sm:$0x1] }
  0xb4   : > { %3449 = vmatpush1.bf16.msra.mxu1 %v8302_v42  ;;  %3377 = vmatprep.mubr.bf16.mxu1 %v7183_v43  ;;  %v1571_v42 = vrot.slane %v7153_v30, 5  ;;  %v8317_v43 = vld [vmem:[%s8893_s17 + $0x250] ss:$8 sps:$4 sm:$0xff]   ;;  %v1591_v53 = vrot.slane %v7163_v37, 5 }
  0xb5   : > { %3450 = vmatprep.subr.bf16.mxu1 %v8307_v47  ;;  %v1391_v47 = vsel %vm9196_vm5, %v7116_v33, %v1390_v34  ;;  %v1568_v50 = vsel %vm8981_vm2, %v7174_v39, %v1567_v40  ;;  %v7103_v30 = vld [vmem:[%s10857_s1 + $0x170] sm:$0x7]  ;;  %v7178_v33 = vrot.slane %v7158_v19, 9  ;;  %v1583_v34 = vrot.slane %v7159_v20, 5 }
  0xb6   : > { %v1572_v51 = vsel %vm8981_vm2, %v7175_v41, %v1571_v42  ;;  %v7129_v57 = vcombine.low %v1391_v47, %v1395_v48  ;;  %v1587_v39 = vrot.slane %v7161_v25, 5  ;;  %v1411_v41 = vsel %vm9196_vm5, %v7121_v23, %v1410_v28  ;;  %v7164_v42 = vld [vmem:[%s10857_s1 + $0x1d4] sm:$0xe]  ;;  %v8341_v25 = vld [vmem:[%s8893_s17 + $0x2d0] ss:$8 sps:$4 sm:$0xff]  }
  0xb7   : > { %v7186_v61 = vcombine.low %v1568_v50, %v1572_v51  ;;  %v1584_v45 = vsel %vm8981_vm2, %v7178_v33, %v1583_v34  ;;  %v1414_v47 = vrot.slane %v7103_v30, 7  ;;  %v8343_v23 = vld [vmem:[%s8893_s17 + $0x2d4] ss:$8 sps:$4 sm:$0xff]   ;;  %v8346_v28 = vld [vmem:[%s8893_s17 + $0x2e4] ss:$8 sps:$4 sm:$0xff]  }
  0xb8   : > { %3451 = vmatpush1.bf16.msra.mxu1 %v8305_v52  ;;  %v7097_v52 = vld [vmem:[%s10857_s1 + $0x14c] sm:$0x7]  ;;  %v7220_v33 = vld [vmem:[%s10857_s1 + $0x88] sm:$0x8] }
  0xb9   : > { %3452 = vmatprep.subr.bf16.mxu1 %v8310_v54  ;;  %v7155_v54 = vld [vmem:[%s10857_s1 + $0x19c] sm:$0x1]  ;;  %v1402_v63 = vrot.slane %v7097_v52, 7  ;;  %v7180_v52 = vrot.slane %v7162_v36, 9  ;;  %v7221_v34 = vld [vmem:[%s10857_s1 + $0x8c] sm:$0x7] }
  0xba   : > { %v8344_v36 = vld [vmem:[%s8893_s17 + $0x2e0] ss:$8 sps:$4 sm:$0xff]  }
  0xbb   : > { %3378 = vmatmul.mubr.bf16.gmra.mrb[36].mxu1 %v7127_v4  ;;  %v1575_v4 = vrot.slane %v7155_v54, 5  ;;  %v1403_v13 = vsel %vm9196_vm5, %v7119_v62, %v1402_v63  ;;  %v8332_v54 = vld [vmem:[%s8893_s17 + $0x2a0] ss:$8 sps:$4 sm:$0xff]   ;;  %v7109_v63 = vld [vmem:[%s10857_s1 + $0x194] sm:$0x7] }
  0xbc   : > { %3453 = vmatpush1.bf16.msra.mxu1 %v8308_v5  ;;  %3387 = vmatprep.mubr.bf16.mxu1 %v7184_v9  ;;  %v7177_v5 = vrot.slane %v7156_v55, 9  ;;  %v7099_v9 = vld [vmem:[%s10857_s1 + $0x158] sm:$0x7]  ;;  %v7130_v26 = vcombine.low %v1399_v12, %v1403_v13  ;;  %v7181_v55 = vrot.slane %v7164_v42, 9  ;;  %v8340_v13 = vld [vmem:[%s8893_s17 + $0x2c4] ss:$8 sps:$4 sm:$0xff]  }
  0xbd   : > { %3454 = vmatprep.subr.bf16.mxu1 %v8313_v6  ;;  %v1579_v6 = vrot.slane %v7157_v56, 5  ;;  %v1576_v15 = vsel %vm8981_vm2, %v7176_v3, %v1575_v4  ;;  %v1406_v18 = vrot.slane %v7099_v9, 7  ;;  %v7215_v3 = vld [vmem:[%s10857_s1 + $0x68] sm:$0x7]  ;;  %v1415_v4 = vsel %vm9196_vm5, %v7122_v46, %v1414_v47  ;;  %v7222_v47 = vld [vmem:[%s10857_s1 + $0x94] sm:$0x8] }
  0xbe   : > { %v1592_v9 = vsel %vm8981_vm2, %v7180_v52, %v1591_v53  ;;  %v1787_v42 = vrot.slane %v7221_v34, 7  ;;  %v8351_v52 = vld [vmem:[%s8893_s17 + $0x300] ss:$8 sps:$4 sm:$0xff]  }
  0xc0   : > { %3455 = vmatpush1.bf16.msra.mxu1 %v8311_v16  ;;  %v1580_v16 = vsel %vm8981_vm2, %v7177_v5, %v1579_v6  ;;  %v7216_v6 = vld [vmem:[%s10857_s1 + $0x70] sm:$0x8] }
  0xc1   : > { %3456 = vmatprep.subr.bf16.mxu1 %v8316_v17  ;;  %v7120_v17 = vrot.slane %v7098_v8, 11  ;;  %v8335_v8 = vld [vmem:[%s8893_s17 + $0x2b0] ss:$8 sps:$4 sm:$0xff]   ;;  %v7247_v19 = vrot.slane %v7216_v6, 11  ;;  %v893_v6 = vlaneseq }
  0xc3   : > { %3388 = vmatmul.mubr.bf16.gmra.mrb[40].mxu1 %v7128_v31  ;;  %v7104_v31 = vld [vmem:[%s10857_s1 + $0x178] sm:$0x8]  ;;  %v1407_v40 = vsel %vm9196_vm5, %v7120_v17, %v1406_v18  ;;  %v1775_v17 = vrot.slane %v7215_v3, 7  ;;  %v8338_v18 = vld [vmem:[%s8893_s17 + $0x2c0] ss:$8 sps:$4 sm:$0xff]  }
  0xc4   : > { %3457 = vmatpush1.bf16.msra.mxu1 %v8314_v32  ;;  %3397 = vmatprep.mubr.bf16.mxu1 %v7185_v35  ;;  %v7187_v32 = vcombine.low %v1576_v15, %v1580_v16  ;;  %v7105_v35 = vld [vmem:[%s10857_s1 + $0x17c] sm:$0x7]  ;;  %v7123_v48 = vrot.slane %v7104_v31, 11  ;;  %v1426_v15 = vrot.slane %v7109_v63, 7  ;;  %v7218_v31 = vld [vmem:[%s10857_s1 + $0x7c] sm:$0x8] }
  0xc5   : > { %3458 = vmatprep.subr.bf16.mxu1 %v8319_v38  ;;  %v7179_v38 = vrot.slane %v7160_v24, 9  ;;  %v1418_v51 = vrot.slane %v7105_v35, 7  ;;  %v7226_v63 = vld [vmem:[%s10857_s1 + $0xac] sm:$0x8]  ;;  %v7228_v3 = vld [vmem:[%s10857_s1 + $0xb8] sm:$0x8] }
  0xc7   : > { %v1588_v50 = vsel %vm8981_vm2, %v7179_v38, %v1587_v39  ;;  %v1419_v5 = vsel %vm9196_vm5, %v7123_v48, %v1418_v51  ;;  %v8349_v38 = vld [vmem:[%s8893_s17 + $0x2f4] ss:$8 sps:$4 sm:$0xff]   ;;  %v7248_v39 = vrot.slane %v7218_v31, 11  ;;  %v7223_v48 = vld [vmem:[%s10857_s1 + $0x98] sm:$0x7] }
  0xc8   : > { %3459 = vmatpush1.bf16.msra.mxu1 %v8317_v43  ;;  %v7165_v43 = vld [vmem:[%s10857_s1 + $0x1d8] sm:$0x1]  ;;  %v7188_v62 = vcombine.low %v1584_v45, %v1588_v50  ;;  %v7225_v50 = vld [vmem:[%s10857_s1 + $0xa4] sm:$0x7] }
  0xc9   : > { %3460 = vmatprep.subr.bf16.mxu1 %v8322_v44  ;;  %v8329_v44 = vld [vmem:[%s8893_s17 + $0x290] ss:$8 sps:$4 sm:$0xff]   ;;  %v1595_v56 = vrot.slane %v7165_v43, 5 }
  0xca   : > { %v8347_v43 = vld [vmem:[%s8893_s17 + $0x2f0] ss:$8 sps:$4 sm:$0xff]  }
  0xcb   : > { %3398 = vmatmul.mubr.bf16.gmra.mrb[44].mxu1 %v7129_v57  ;;  %v7131_v57 = vcombine.low %v1407_v40, %v1411_v41  ;;  %v1596_v14 = vsel %vm8981_vm2, %v7181_v55, %v1595_v56  ;;  %v7249_v41 = vrot.slane %v7220_v33, 11  ;;  %v8350_v51 = vld [vmem:[%s10857_s1 + $0x64] ss:$12 sps:$4 sm:$0xff]   ;;  %v7250_v55 = vrot.slane %v7222_v47, 11 }
  0xcc   : > { %3461 = vmatpush1.bf16.msra.mxu1 %v8320_v58  ;;  %3407 = vmatprep.mubr.bf16.mxu1 %v7186_v61  ;;  %v8337_v58 = vld [vmem:[%s8893_s17 + $0x2b4] ss:$8 sps:$4 sm:$0xff]   ;;  %v7108_v61 = vld [vmem:[%s10857_s1 + $0x190] sm:$0x8]  ;;  %v7189_v24 = vcombine.low %v1592_v9, %v1596_v14  ;;  %v1791_v56 = vrot.slane %v7223_v48, 7  ;;  %v9529_v14 = vshrl.u32 %v893_v6, 7 }
  0xcd   : > { %3462 = vmatprep.subr.bf16.mxu1 %v8325_v1  ;;  %v7214_v1 = vld [vmem:[%s10857_s1 + $0x64] sm:$0x8]  ;;  %v7125_v12 = vrot.slane %v7108_v61, 11  ;;  %v1788_v46 = vsel %vm9196_vm5, %v7249_v41, %v1787_v42  ;;  %v8363_v9 = vld [vmem:[%s8893_s17 + $0x334] ss:$8 sps:$4 sm:$0xff]  }
  0xce   : > { %v7246_v16 = vrot.slane %v7214_v1, 11  ;;  %v1792_v61 = vsel %vm9196_vm5, %v7250_v55, %v1791_v56  ;;  %v7227_v1 = vld [vmem:[%s10857_s1 + $0xb0] sm:$0x7]  ;;  %v7235_v41 = vld [vmem:[%s10857_s1 + $0x1a0] sm:$0x7] }
  0xcf   : > { %v7236_v42 = vld [vmem:[%s10857_s1 + $0x1a8] sm:$0x8]  ;;  %v8375_v6 = vld [vmem:[%s8893_s17 + $0x370] ss:$8 sps:$4 sm:$0xff]  }
  0xd0   : > { %3463 = vmatpush1.bf16.msra.mxu1 %v8323_v7  ;;  %v7217_v7 = vld [vmem:[%s10857_s1 + $0x74] sm:$0x7]  ;;  %v1776_v29 = vsel %vm9196_vm5, %v7246_v16, %v1775_v17  ;;  %v8367_v16 = vld [vmem:[%s8893_s17 + $0x344] ss:$8 sps:$4 sm:$0xff]   ;;  %v7257_v55 = vrot.slane %v7236_v42, 11 }
  0xd1   : > { %3464 = vmatprep.subr.bf16.mxu1 %v8328_v10  ;;  %v7124_v10 = vrot.slane %v7106_v59, 11  ;;  %v1779_v20 = vrot.slane %v7217_v7, 7  ;;  %v8354_v59 = vld [vmem:[%s8893_s17 + $0x310] ss:$8 sps:$4 sm:$0xff]   ;;  %v8358_v7 = vld [vmem:[%s8893_s17 + $0x320] ss:$8 sps:$4 sm:$0xff]  }
  0xd3   : > { %3408 = vmatmul.mubr.bf16.gmra.mrb[48].mxu1 %v7130_v26  ;;  %v1423_v26 = vsel %vm9196_vm5, %v7124_v10, %v1422_v11  ;;  %v1780_v30 = vsel %vm9196_vm5, %v7247_v19, %v1779_v20  ;;  %v7252_v10 = vrot.slane %v7226_v63, 11  ;;  %v1799_v11 = vrot.slane %v7227_v1, 7  ;;  %v7230_v19 = vld [vmem:[%s10857_s1 + $0x184] sm:$0x8]  ;;  %v7231_v20 = vld [vmem:[%s10857_s1 + $0x188] sm:$0x7] }
  0xd4   : > { %3465 = vmatpush1.bf16.msra.mxu1 %v8326_v22  ;;  %3417 = vmatprep.mubr.bf16.mxu1 %v7187_v32  ;;  %v7132_v22 = vcombine.low %v1415_v4, %v1419_v5  ;;  %v7219_v32 = vld [vmem:[%s10857_s1 + $0x80] sm:$0x7]  ;;  %v7262_v37 = vcombine.low %v1776_v29, %v1780_v30  ;;  %v7229_v4 = vld [vmem:[%s10857_s1 + $0xbc] sm:$0x7]  ;;  %v7254_v31 = vrot.slane %v7230_v19, 11 }
  0xd5   : > { %3466 = vmatprep.subr.bf16.mxu1 %v8331_v27  ;;  %v1427_v27 = vsel %vm9196_vm5, %v7125_v12, %v1426_v15  ;;  %v1783_v40 = vrot.slane %v7219_v32, 7  ;;  %v8357_v5 = vld [vmem:[%s10857_s1 + $0x7c] ss:$12 sps:$4 sm:$0xff]   ;;  %v7253_v12 = vrot.slane %v7228_v3, 11  ;;  %v8361_v15 = vld [vmem:[%s8893_s17 + $0x330] ss:$8 sps:$4 sm:$0xff]   ;;  %v1800_v17 = vsel %vm9196_vm5, %v7252_v10, %v1799_v11 }
  0xd6   : > { %v7133_v35 = vcombine.low %v1423_v26, %v1427_v27  ;;  %v8365_v26 = vld [vmem:[%s8893_s17 + $0x340] ss:$8 sps:$4 sm:$0xff]   ;;  %v8370_v30 = vld [vmem:[%s8893_s17 + $0x354] ss:$8 sps:$4 sm:$0xff]   ;;  %v1807_v32 = vrot.slane %v7231_v20, 7 }
  0xd7   : > { %v1784_v45 = vsel %vm9196_vm5, %v7248_v39, %v1783_v40  ;;  %v632_v27 = vld [vmem:[%s9536_s30] sm:$0x3f]  ;;  %v7234_v39 = vld [vmem:[%s10857_s1 + $0x19c] sm:$0x8]  ;;  %v7238_v11 = vld [vmem:[%s10857_s1 + $0x1b4] sm:$0x8] }
  0xd8   : > { %3467 = vmatpush1.bf16.msra.mxu1 %v8329_v44  ;;  %v8353_v44 = vld [vmem:[%s8893_s17 + $0x304] ss:$8 sps:$4 sm:$0xff]   ;;  %v7263_v53 = vcombine.low %v1784_v45, %v1788_v46  ;;  %v1808_v46 = vsel %vm9196_vm5, %v7254_v31, %v1807_v32  ;;  %v8377_v1 = vld [vmem:[%s8893_s17 + $0x374] ss:$8 sps:$4 sm:$0xff]   ;;  %v8379_v32 = vld [vmem:[%s8893_s17 + $0x380] ss:$8 sps:$4 sm:$0xff]  }
  0xd9   : > { %3468 = vmatprep.subr.bf16.mxu1 %v8334_v49  ;;  %v7224_v49 = vld [vmem:[%s10857_s1 + $0xa0] sm:$0x8]  ;;  %v8374_v45 = vld [vmem:[%s8893_s17 + $0x364] ss:$8 sps:$4 sm:$0xff]  }
  0xda   : > { %v8381_v10 = vld [vmem:[%s8893_s17 + $0x384] ss:$8 sps:$4 sm:$0xff]  }
  0xdb   : > { %3418 = vmatmul.mubr.bf16.gmra.mrb[52].mxu1 %v7131_v57  ;;  %v7251_v57 = vrot.slane %v7224_v49, 11 }
  0xdc   : > { %3469 = vmatpush1.bf16.msra.mxu1 %v8332_v54  ;;  %3427 = vmatprep.mubr.bf16.mxu1 %v7188_v62  ;;  %v8356_v54 = vld [vmem:[%s8893_s17 + $0x314] ss:$8 sps:$4 sm:$0xff]  }
  0xdd   : > { %3470 = vmatprep.subr.bf16.mxu1 %v8337_v58  ;;  %v1795_v58 = vrot.slane %v7225_v50, 7  ;;  %v7256_v50 = vrot.slane %v7234_v39, 11 }
  0xdf   : > { %v1796_v62 = vsel %vm9196_vm5, %v7251_v57, %v1795_v58 }
  0xe0   : > { %3471 = vmatpush1.bf16.msra.mxu1 %v8335_v8  ;;  %v7264_v8 = vcombine.low %v1792_v61, %v1796_v62 }
  0xe1   : > { %3472 = vmatprep.subr.bf16.mxu1 %v8340_v13  ;;  %v1803_v13 = vrot.slane %v7229_v4, 7 }
  0xe3   : > { %3428 = vmatmul.mubr.bf16.gmra.mrb[56].mxu1 %v7132_v22  ;;  %v7232_v22 = vld [vmem:[%s10857_s1 + $0x190] sm:$0x8] }
  0xe4   : > { %3473 = vmatpush1.bf16.msra.mxu1 %v8338_v18  ;;  %3437 = vmatprep.mubr.bf16.mxu1 %v7189_v24  ;;  %v1804_v18 = vsel %vm9196_vm5, %v7253_v12, %v1803_v13  ;;  %v8364_v24 = vld [vmem:[%s10857_s1 + $0x94] ss:$12 sps:$4 sm:$0xff]   ;;  %v7255_v33 = vrot.slane %v7232_v22, 11  ;;  %v7239_v12 = vld [vmem:[%s10857_s1 + $0x1b8] sm:$0x7] }
  0xe5   : > { %3474 = vmatprep.subr.bf16.mxu1 %v8343_v23  ;;  %v7233_v23 = vld [vmem:[%s10857_s1 + $0x194] sm:$0x7]  ;;  %v7265_v29 = vcombine.low %v1800_v17, %v1804_v18  ;;  %v7241_v17 = vld [vmem:[%s10857_s1 + $0x1c4] sm:$0x7] }
  0xe6   : > { %v1811_v34 = vrot.slane %v7233_v23, 7 }
  0xe8   : > { %3475 = vmatpush1.bf16.msra.mxu1 %v8341_v25  ;;  %v9563_v25 = vsub.s32 0, %v9529_v14  ;;  %v1812_v47 = vsel %vm9196_vm5, %v7255_v33, %v1811_v34  ;;  %v1827_v34 = vrot.slane %v7241_v17, 7 }
  0xe9   : > { %3476 = vmatprep.subr.bf16.mxu1 %v8346_v28  ;;  %v633_v28 = vld [vmem:[%s9536_s30 + $0x8] sm:$0x3f] }
  0xea   : > { %v9579_v40 = vrot.slane %v633_v28, %v9563_v25  ;;  %v7258_v28 = vrot.slane %v7238_v11, 11 }
  0xeb   : > { %3438 = vmatmul.mubr.bf16.gmra.mrb[60].mxu1 %v7133_v35  ;;  %v634_v35 = vld [vmem:[%s9560_s15] sm:$0x3f] }
  0xec   : > { %3477 = vmatpush1.bf16.msra.mxu1 %v8344_v36  ;;  %3480 = vmatprep.mubr.bf16.mxu1 %v7262_v37  ;;  %v9571_v36 = vrot.slane %v632_v27, %v9563_v25  ;;  %v635_v37 = vld [vmem:[%s9560_s15 + $0x8] sm:$0x3f]  ;;  %v8378_v27 = vld [vmem:[%s10857_s1 + $0x184] ss:$12 sps:$4 sm:$0xff]  }
  0xed   : > { %3478 = vmatprep.subr.bf16.mxu1 %v8349_v38  ;;  %v8368_v38 = vld [vmem:[%s8893_s17 + $0x350] ss:$8 sps:$4 sm:$0xff]   ;;  %v9599_v49 = vrot.slane %v635_v37, %v9563_v25 }
  0xf0   : > { %3479 = vmatpush1.bf16.msra.mxu1 %v8347_v43  ;;  %v7237_v43 = vld [vmem:[%s10857_s1 + $0x1ac] sm:$0x7] }
  0xf1   : > { %3561 = vmatprep.subr.bf16.mxu1 %v8353_v44  ;;  %v9591_v44 = vrot.slane %v634_v35, %v9563_v25  ;;  %v1819_v56 = vrot.slane %v7237_v43, 7 }
  0xf3   : > { %3481 = vmatmul.mubr.bf16.vlgmr.msra.gmra.mrb[32].mxu1 %v8350_v51 }
  0xf4   : > { %3562 = vmatpush1.bf16.msra.mxu1 %v8351_v52  ;;  %3490 = vmatprep.mubr.bf16.mxu1 %v7263_v53  ;;  %v8371_v53 = vld [vmem:[%s10857_s1 + $0xac] ss:$12 sps:$4 sm:$0xff]  }
  0xf5   : > { %3563 = vmatprep.subr.bf16.mxu1 %v8356_v54  ;;  %v1815_v54 = vrot.slane %v7235_v41, 7  ;;  %v8384_v41 = vld [vmem:[%s8893_s17 + $0x394] ss:$8 sps:$4 sm:$0xff]  }
  0xf8   : > { %3564 = vmatpush1.bf16.msra.mxu1 %v8354_v59  ;;  %v8372_v59 = vld [vmem:[%s8893_s17 + $0x360] ss:$8 sps:$4 sm:$0xff]  }
  0xf9   : > { %3565 = vmatprep.subr.bf16.mxu1 %v8360_v60  ;;  %v7266_v60 = vcombine.low %v1808_v46, %v1812_v47  ;;  %v8382_v47 = vld [vmem:[%s8893_s17 + $0x390] ss:$8 sps:$4 sm:$0xff]  }
  0xfb   : > { %3491 = vmatmul.mubr.bf16.gmra.mrb[36].mxu1 %v8357_v5 }
  0xfc   : > { %3566 = vmatpush1.bf16.msra.mxu1 %v8358_v7  ;;  %3500 = vmatprep.mubr.bf16.mxu1 %v7264_v8  ;;  %v1816_v7 = vsel %vm9196_vm5, %v7256_v50, %v1815_v54  ;;  %v1820_v8 = vsel %vm9196_vm5, %v7257_v55, %v1819_v56  ;;  %v7243_v55 = vld [vmem:[%s10857_s1 + $0x1d0] sm:$0x7]  ;;  %v7244_v56 = vld [vmem:[%s10857_s1 + $0x1d8] sm:$0x8] }
  0xfd   : > { %3567 = vmatprep.subr.bf16.mxu1 %v8363_v9  ;;  %v7267_v22 = vcombine.low %v1816_v7, %v1820_v8  ;;  %v1831_v8 = vrot.slane %v7243_v55, 7 }
 0x100   : > { %3568 = vmatpush1.bf16.msra.mxu1 %v8361_v15 }
 0x101   : > { %3569 = vmatprep.subr.bf16.mxu1 %v8367_v16  ;;  %v7240_v16 = vld [vmem:[%s10857_s1 + $0x1c0] sm:$0x8] }
 0x102   : > { %v7259_v33 = vrot.slane %v7240_v16, 11 }
 0x103   : > { %3501 = vmatmul.mubr.bf16.gmra.mrb[40].mxu1 %v8364_v24 }
 0x104   : > { %3570 = vmatpush1.bf16.msra.mxu1 %v8365_v26  ;;  %3510 = vmatprep.mubr.bf16.mxu1 %v7265_v29  ;;  %v1823_v29 = vrot.slane %v7239_v12, 7 }
 0x105   : > { %3571 = vmatprep.subr.bf16.mxu1 %v8370_v30 }
 0x106   : > { %v814_v48 = vpop.f32.mrb[0].mxu1  ;;  %v1824_v50 = vsel %vm9196_vm5, %v7258_v28, %v1823_v29 }
 0x107   : > { %v901_v51 = vmul.f32 %v9571_v36, %v814_v48  ;;  %v816_v52 = vpop.f32.mrb[1].mxu1  ;;  %v8388_v48 = vld [vmem:[%s8893_s17 + $0x3a4] ss:$8 sps:$4 sm:$0xff]  }
 0x108   : > { %v902_v57 = vmul.f32 %v9579_v40, %v816_v52  ;;  %v818_v58 = vpop.f32.mrb[2].mxu1  ;;  %3572 = vmatpush1.bf16.msra.mxu1 %v8368_v38  ;;  %v7242_v52 = vld [vmem:[%s10857_s1 + $0x1cc] sm:$0x8] }
 0x109   : > { %v941_v61 = vadd.f32 %v9591_v44, %v901_v51  ;;  %v903_v62 = vmul.f32 %v9571_v36, %v818_v58  ;;  %v820_v63 = vpop.f32.mrb[3].mxu1  ;;  %3573 = vmatprep.subr.bf16.mxu1 %v8374_v45  ;;  %v1828_v51 = vsel %vm9196_vm5, %v7259_v33, %v1827_v34  ;;  %v7260_v7 = vrot.slane %v7242_v52, 11 }
 0x10a   : > { %v942_v3 = vadd.f32 %v9599_v49, %v902_v57  ;;  %v904_v4 = vmul.f32 %v9579_v40, %v820_v63  ;;  %v8385_v63 = vld [vmem:[%s10857_s1 + $0x19c] ss:$12 sps:$4 sm:$0xff]  }
 0x10b   : > { %v943_v5 = vadd.f32 %v9591_v44, %v903_v62  ;;  %3511 = vmatmul.mubr.bf16.gmra.mrb[44].mxu1 %v8371_v53  ;;  %v973_v13 = vmax.f32 %v941_v61, 0.0  ;;  %v1832_v28 = vsel %vm9196_vm5, %v7260_v7, %v1831_v8 }
 0x10c   : > { %v944_v9 = vadd.f32 %v9599_v49, %v904_v4  ;;  %3574 = vmatpush1.bf16.msra.mxu1 %v8372_v59  ;;  %3520 = vmatprep.mubr.bf16.mxu1 %v7266_v60  ;;  %v974_v18 = vmax.f32 %v942_v3, 0.0  ;;  %v7245_v60 = vld [vmem:[%s10857_s1 + $0x1dc] sm:$0x7] }
 0x10d   : > { %v975_v15 = vmax.f32 %v943_v5, 0.0  ;;  %3575 = vmatprep.subr.bf16.mxu1 %v8377_v1  ;;  %v7268_v1 = vcombine.low %v1824_v50, %v1828_v51  ;;  %v1835_v16 = vrot.slane %v7245_v60, 7  ;;  %v8398_v50 = vld [vmem:[%s8893_s17 + $0x3d4] ss:$8 sps:$4 sm:$0xff]  }
 0x10e   : > { %v976_v19 = vmax.f32 %v944_v9, 0.0  ;;  %v824_v20 = vpop.f32.mrb[4].mxu1 }
 0x10f   : > { %v9632_v23 = vpack.c.bf16 %v975_v15, %v973_v13  ;;  %v905_v24 = vmul.f32 %v9571_v36, %v824_v20  ;;  %v826_v26 = vpop.f32.mrb[5].mxu1  ;;  %v8391_v13 = vld [vmem:[%s8893_s17 + $0x3b4] ss:$8 sps:$4 sm:$0xff]   ;;  %v7261_v15 = vrot.slane %v7244_v56, 11  ;;  %v8402_v56 = vld [vmem:[%s8893_s17 + $0x3e4] ss:$8 sps:$4 sm:$0xff]  }
 0x110   : > { %v906_v30 = vmul.f32 %v9579_v40, %v826_v26  ;;  %v828_v31 = vpop.f32.mrb[6].mxu1  ;;  %3576 = vmatpush1.bf16.msra.mxu1 %v8375_v6  ;;  %v9640_v35 = vpack.c.bf16 %v976_v19, %v974_v18  ;;  %v8386_v6 = vld [vmem:[%s8893_s17 + $0x3a0] ss:$8 sps:$4 sm:$0xff]  }
 0x111   : > { %v945_v37 = vadd.f32 %v9591_v44, %v905_v24  ;;  %v907_v38 = vmul.f32 %v9571_v36, %v828_v31  ;;  %v830_v39 = vpop.f32.mrb[7].mxu1  ;;  %3577 = vmatprep.subr.bf16.mxu1 %v8381_v10  ;;  %v1836_v29 = vsel %vm9196_vm5, %v7261_v15, %v1835_v16 }
 0x112   : > { %v946_v42 = vadd.f32 %v9599_v49, %v906_v30  ;;  %v908_v43 = vmul.f32 %v9579_v40, %v830_v39 }
 0x113   : > { %v947_v45 = vadd.f32 %v9591_v44, %v907_v38  ;;  %3521 = vmatmul.mubr.bf16.gmra.mrb[48].mxu1 %v8378_v27  ;;  %v977_v53 = vmax.f32 %v945_v37, 0.0  ;;  %v8395_v27 = vld [vmem:[%s8893_s17 + $0x3c4] ss:$8 sps:$4 sm:$0xff]   ;;  %v8392_v37 = vld [vmem:[%s10857_s1 + $0x1b4] ss:$12 sps:$4 sm:$0xff]  }
 0x114   : > { %v948_v46 = vadd.f32 %v9599_v49, %v908_v43  ;;  %3578 = vmatpush1.bf16.msra.mxu1 %v8379_v32  ;;  %3530 = vmatprep.mubr.bf16.mxu1 %v7267_v22  ;;  %v978_v57 = vmax.f32 %v946_v42, 0.0  ;;  %v8389_v22 = vld [vmem:[%s8893_s17 + $0x3b0] ss:$8 sps:$4 sm:$0xff]   ;;  %v8393_v42 = vld [vmem:[%s8893_s17 + $0x3c0] ss:$8 sps:$4 sm:$0xff]   ;;  %v7269_v43 = vcombine.low %v1832_v28, %v1836_v29 }
 0x115   : > { %v979_v54 = vmax.f32 %v947_v45, 0.0  ;;  %3579 = vmatprep.subr.bf16.mxu1 %v8384_v41  ;;  %v7275_v28 = vld [vmem:[%s10857_s1 + $0xc4] sm:$0x1] }
 0x116   : > { %v980_v58 = vmax.f32 %v948_v46, 0.0  ;;  %v834_v59 = vpop.f32.mrb[8].mxu1 }
 0x117   : > { %v909_v61 = vmul.f32 %v9571_v36, %v834_v59  ;;  %v836_v62 = vpop.f32.mrb[9].mxu1  ;;  %v9671_v3 = vpack.c.bf16 %v979_v54, %v977_v53  ;;  %v8396_v54 = vld [vmem:[%s8893_s17 + $0x3d0] ss:$8 sps:$4 sm:$0xff]  }
 0x118   : > { %v910_v4 = vmul.f32 %v9579_v40, %v836_v62  ;;  %v838_v5 = vpop.f32.mrb[10].mxu1  ;;  %3580 = vmatpush1.bf16.msra.mxu1 %v8382_v47  ;;  %v9675_v9 = vpack.c.bf16 %v980_v58, %v978_v57  ;;  %v7270_v57 = vld [vmem:[%s10857_s1 + $0xa8] sm:$0xe]  ;;  %v7271_v58 = vld [vmem:[%s10857_s1 + $0xac] sm:$0x1] }
 0x119   : > { %v949_v10 = vadd.f32 %v9591_v44, %v909_v61  ;;  %v911_v11 = vmul.f32 %v9571_v36, %v838_v5  ;;  %v840_v12 = vpop.f32.mrb[11].mxu1  ;;  %3581 = vmatprep.subr.bf16.mxu1 %v8388_v48  ;;  %v8399_v61 = vld [vmem:[%s10857_s1 + $0x1cc] ss:$12 sps:$4 sm:$0xff]   ;;  %v7272_v62 = vld [vmem:[%s10857_s1 + $0xb4] sm:$0xe] }
 0x11a   : > { %v950_v17 = vadd.f32 %v9599_v49, %v910_v4  ;;  %v912_v18 = vmul.f32 %v9579_v40, %v840_v12  ;;  %v1944_v12 = vrot.slane %v7271_v58, 5 }
 0x11b   : > { %v951_v19 = vadd.f32 %v9591_v44, %v911_v11  ;;  %3531 = vmatmul.mubr.bf16.gmra.mrb[52].mxu1 %v8385_v63  ;;  %v981_v24 = vmax.f32 %v949_v10, 0.0  ;;  %v7273_v63 = vld [vmem:[%s10857_s1 + $0xb8] sm:$0x1]  ;;  %v8405_v10 = vld [vmem:[%s8893_s17 + $0x3f4] ss:$8 sps:$4 sm:$0xff]   ;;  %v7302_v11 = vrot.slane %v7270_v57, 9 }
 0x11c   : > { %v952_v20 = vadd.f32 %v9599_v49, %v912_v18  ;;  %3582 = vmatpush1.bf16.msra.mxu1 %v8386_v6  ;;  %3540 = vmatprep.mubr.bf16.mxu1 %v7268_v1  ;;  %v982_v30 = vmax.f32 %v950_v17, 0.0  ;;  %v8400_v6 = vld [vmem:[%s8893_s17 + $0x3e0] ss:$8 sps:$4 sm:$0xff]   ;;  %v8406_v17 = vld [vmem:[%s10857_s1 + $0xac] ss:$12 sps:$4 sm:$0xff]   ;;  %v7303_v18 = vrot.slane %v7272_v62, 9 }
 0x11d   : > { %v983_v26 = vmax.f32 %v951_v19, 0.0  ;;  %3583 = vmatprep.subr.bf16.mxu1 %v8391_v13  ;;  %v1948_v19 = vrot.slane %v7273_v63, 5 }
 0x11e   : > { %v984_v31 = vmax.f32 %v952_v20, 0.0  ;;  %v844_v32 = vpop.f32.mrb[12].mxu1 }
 0x11f   : > { %v913_v33 = vmul.f32 %v9571_v36, %v844_v32  ;;  %v846_v34 = vpop.f32.mrb[13].mxu1  ;;  %v9694_v38 = vpack.c.bf16 %v983_v26, %v981_v24 }
 0x120   : > { %v914_v39 = vmul.f32 %v9579_v40, %v846_v34  ;;  %v848_v41 = vpop.f32.mrb[14].mxu1  ;;  %3584 = vmatpush1.bf16.msra.mxu1 %v8389_v22  ;;  %v9698_v45 = vpack.c.bf16 %v984_v31, %v982_v30  ;;  %v7276_v31 = vld [vmem:[%s10857_s1 + $0xcc] sm:$0xe] }
 0x121   : > { %v953_v46 = vadd.f32 %v9591_v44, %v913_v33  ;;  %v915_v47 = vmul.f32 %v9571_v36, %v848_v41  ;;  %v850_v48 = vpop.f32.mrb[15].mxu1  ;;  %3585 = vmatprep.subr.bf16.mxu1 %v8395_v27  ;;  %v7274_v27 = vld [vmem:[%s10857_s1 + $0xc0] sm:$0xe]  ;;  %v1945_v33 = vsel %vm8981_vm2, %v7302_v11, %v1944_v12  ;;  %v7277_v41 = vld [vmem:[%s10857_s1 + $0xd0] sm:$0x1] }
 0x122   : > { %v954_v51 = vadd.f32 %v9599_v49, %v914_v39  ;;  %v916_v52 = vmul.f32 %v9579_v40, %v850_v48  ;;  %v1949_v39 = vsel %vm8981_vm2, %v7303_v18, %v1948_v19  ;;  %v8443_v11 = vld [vmem:[%s9763_s21 + $0x110] ss:$8 sps:$4 sm:$0xff]   ;;  %v7279_v18 = vld [vmem:[%s10857_s1 + $0xdc] sm:$0x1]  ;;  %v8444_v19 = vld [vmem:[%s9763_s21 + $0x124] ss:$8 sps:$4 sm:$0xff]  }
 0x123   : > { %v955_v53 = vadd.f32 %v9591_v44, %v915_v47  ;;  %3541 = vmatmul.mubr.bf16.gmra.mrb[56].mxu1 %v8392_v37  ;;  %v985_v59 = vmax.f32 %v953_v46, 0.0  ;;  %v8403_v37 = vld [vmem:[%s8893_s17 + $0x3f0] ss:$8 sps:$4 sm:$0xff]   ;;  %v7318_v58 = vcombine.low %v1945_v33, %v1949_v39 }
 0x124   : > { %v956_v55 = vadd.f32 %v9599_v49, %v916_v52  ;;  %3586 = vmatpush1.bf16.msra.mxu1 %v8393_v42  ;;  %3550 = vmatprep.mubr.bf16.mxu1 %v7269_v43  ;;  %v986_v1 = vmax.f32 %v954_v51, 0.0  ;;  %v7304_v42 = vrot.slane %v7274_v27, 9  ;;  %v1952_v43 = vrot.slane %v7275_v28, 5  ;;  %v7280_v27 = vld [vmem:[%s10857_s1 + $0xe4] sm:$0xe] }
 0x125   : > { %v987_v60 = vmax.f32 %v955_v53, 0.0  ;;  %3587 = vmatprep.subr.bf16.mxu1 %v8398_v50  ;;  %v8409_v50 = vld [vmem:[%s8893_s17 + $0x404] ss:$8 sps:$4 sm:$0xff]   ;;  %v7305_v51 = vrot.slane %v7276_v31, 9  ;;  %v7281_v28 = vld [vmem:[%s10857_s1 + $0xe8] sm:$0x1] }
 0x126   : > { %v988_v4 = vmax.f32 %v956_v55, 0.0  ;;  %v854_v5 = vpop.f32.mrb[16].mxu1  ;;  %v8438_v55 = vld [vmem:[%s9763_s21 + $0x104] ss:$8 sps:$4 sm:$0xff]   ;;  %v8446_v31 = vld [vmem:[%s9763_s21 + $0x120] ss:$8 sps:$4 sm:$0xff]  }
 0x127   : > { %v917_v7 = vmul.f32 %v9571_v36, %v854_v5  ;;  %v856_v8 = vpop.f32.mrb[17].mxu1  ;;  %v9727_v13 = vpack.c.bf16 %v987_v60, %v985_v59  ;;  %v1956_v59 = vrot.slane %v7277_v41, 5  ;;  %v8440_v60 = vld [vmem:[%s9763_s21 + $0x100] ss:$8 sps:$4 sm:$0xff]   ;;  %4107 = vmatprep.subr.bf16.mxu0 %v8438_v55  ;;  %v1964_v55 = vrot.slane %v7281_v28, 5 }
 0x128   : > { %v918_v15 = vmul.f32 %v9579_v40, %v856_v8  ;;  %v858_v16 = vpop.f32.mrb[18].mxu1  ;;  %3588 = vmatpush1.bf16.msra.mxu1 %v8396_v54  ;;  %v9733_v20 = vpack.c.bf16 %v988_v4, %v986_v1  ;;  %v8407_v54 = vld [vmem:[%s8893_s17 + $0x400] ss:$8 sps:$4 sm:$0xff]   ;;  %v8410_v1 = vld [vmem:[%s10857_s1 + $0xc4] ss:$12 sps:$4 sm:$0xff]   ;;  %4108 = vmatpush1.bf16.msra.mxu0 %v8440_v60 }
 0x129   : > { %v957_v22 = vadd.f32 %v9591_v44, %v917_v7  ;;  %v919_v24 = vmul.f32 %v9571_v36, %v858_v16  ;;  %v860_v26 = vpop.f32.mrb[19].mxu1  ;;  %3589 = vmatprep.subr.bf16.mxu1 %v8402_v56  ;;  %v8441_v4 = vld [vmem:[%s9763_s21 + $0x114] ss:$8 sps:$4 sm:$0xff]   ;;  %v8411_v16 = vld [vmem:[%s8893_s17 + $0x410] ss:$8 sps:$4 sm:$0xff]  }
 0x12a   : > { %v958_v29 = vadd.f32 %v9599_v49, %v918_v15  ;;  %v920_v30 = vmul.f32 %v9579_v40, %v860_v26  ;;  %4109 = vmatprep.subr.bf16.mxu0 %v8441_v4  ;;  %v1957_v26 = vsel %vm8981_vm2, %v7305_v51, %v1956_v59 }
 0x12b   : > { %v959_v32 = vadd.f32 %v9591_v44, %v919_v24  ;;  %3551 = vmatmul.mubr.bf16.gmra.mrb[60].mxu1 %v8399_v61  ;;  %v989_v46 = vmax.f32 %v957_v22, 0.0  ;;  %v1953_v24 = vsel %vm8981_vm2, %v7304_v42, %v1952_v43  ;;  %v8414_v43 = vld [vmem:[%s10857_s1 + $0xdc] ss:$12 sps:$4 sm:$0xff]  }
 0x12c   : > { %v960_v34 = vadd.f32 %v9599_v49, %v920_v30  ;;  %3590 = vmatpush1.bf16.msra.mxu1 %v8400_v6  ;;  %3593 = vmatprep.mubr.bf16.mxu1 %v8406_v17  ;;  %v990_v47 = vmax.f32 %v958_v29, 0.0  ;;  %v7278_v17 = vld [vmem:[%s10857_s1 + $0xd8] sm:$0xe]  ;;  %v8417_v30 = vld [vmem:[%s8893_s17 + $0x424] ss:$8 sps:$4 sm:$0xff]   ;;  %v7319_v42 = vcombine.low %v1953_v24, %v1957_v26 }
 0x12d   : > { %v991_v48 = vmax.f32 %v959_v32, 0.0  ;;  %3591 = vmatprep.subr.bf16.mxu1 %v8405_v10  ;;  %v8413_v10 = vld [vmem:[%s8893_s17 + $0x414] ss:$8 sps:$4 sm:$0xff]   ;;  %4110 = vmatpush1.bf16.msra.mxu0 %v8443_v11 }
 0x12e   : > { %v992_v52 = vmax.f32 %v960_v34, 0.0  ;;  %v864_v53 = vpop.f32.mrb[20].mxu1  ;;  %v8447_v34 = vld [vmem:[%s9763_s21 + $0x134] ss:$8 sps:$4 sm:$0xff]   ;;  %4111 = vmatprep.subr.bf16.mxu0 %v8444_v19  ;;  %v8425_v19 = vld [vmem:[%s8893_s17 + $0x444] ss:$8 sps:$4 sm:$0xff]  }
 0x12f   : > { %v921_v56 = vmul.f32 %v9571_v36, %v864_v53  ;;  %v866_v57 = vpop.f32.mrb[21].mxu1  ;;  %v9769_v61 = vpack.c.bf16 %v991_v48, %v989_v46  ;;  %v7306_v48 = vrot.slane %v7278_v17, 9  ;;  %v7284_v11 = vld [vmem:[%s10857_s1 + $0xfc] sm:$0xe] }
 0x130   : > { %v922_v62 = vmul.f32 %v9579_v40, %v866_v57  ;;  %v868_v63 = vpop.f32.mrb[22].mxu1  ;;  %3592 = vmatpush1.bf16.msra.mxu1 %v8403_v37  ;;  %v9776_v5 = vpack.c.bf16 %v992_v52, %v990_v47 }
 0x131   : > { %v961_v6 = vadd.f32 %v9591_v44, %v921_v56  ;;  %v923_v7 = vmul.f32 %v9571_v36, %v868_v63  ;;  %v870_v8 = vpop.f32.mrb[23].mxu1  ;;  %3674 = vmatprep.subr.bf16.mxu1 %v8409_v50  ;;  %v1960_v50 = vrot.slane %v7279_v18, 5  ;;  %v8415_v56 = vld [vmem:[%s8893_s17 + $0x420] ss:$8 sps:$4 sm:$0xff]   ;;  %v8421_v63 = vld [vmem:[%s8893_s17 + $0x434] ss:$8 sps:$4 sm:$0xff]   ;;  %4112 = vmatpush1.bf16.msra.mxu0 %v8446_v31 }
 0x132   : > { %v962_v12 = vadd.f32 %v9599_v49, %v922_v62  ;;  %v924_v15 = vmul.f32 %v9579_v40, %v870_v8  ;;  %v9822_v62 = vld [vmem:[%s10857_s1 + $0xf0] sm:$0xe]  ;;  %4113 = vmatprep.subr.bf16.mxu0 %v8447_v34  ;;  %v8450_v8 = vld [vmem:[%s9763_s21 + $0x144] ss:$8 sps:$4 sm:$0xff]   ;;  %v8418_v31 = vld [vmem:[%s10857_s1 + $0xf4] ss:$12 sps:$4 sm:$0xff]  }
 0x133   : > { %v963_v22 = vadd.f32 %v9591_v44, %v923_v7  ;;  %3594 = vmatmul.mubr.bf16.vlgmr.msra.gmra.mrb[32].mxu1 %v7318_v58  ;;  %v993_v32 = vmax.f32 %v961_v6, 0.0  ;;  %v7283_v7 = vld [vmem:[%s10857_s1 + $0xf4] sm:$0x1]  ;;  %v1961_v17 = vsel %vm8981_vm2, %v7306_v48, %v1960_v50  ;;  %v7309_v50 = vrot.slane %v7284_v11, 9 }
 0x134   : > { %v964_v29 = vadd.f32 %v9599_v49, %v924_v15  ;;  %3675 = vmatpush1.bf16.msra.mxu1 %v8407_v54  ;;  %3603 = vmatprep.mubr.bf16.mxu1 %v8410_v1  ;;  %v994_v37 = vmax.f32 %v962_v12, 0.0  ;;  %v7307_v54 = vrot.slane %v7280_v27, 9  ;;  %v8449_v1 = vld [vmem:[%s9763_s21 + $0x130] ss:$8 sps:$4 sm:$0xff]   ;;  %v7285_v12 = vld [vmem:[%s10857_s1 + $0x100] sm:$0x1] }
 0x135   : > { %v995_v33 = vmax.f32 %v963_v22, 0.0  ;;  %3676 = vmatprep.subr.bf16.mxu1 %v8413_v10  ;;  %v8419_v15 = vld [vmem:[%s8893_s17 + $0x430] ss:$8 sps:$4 sm:$0xff]   ;;  %v8452_v22 = vld [vmem:[%s9763_s21 + $0x140] ss:$8 sps:$4 sm:$0xff]   ;;  %4114 = vmatpush1.bf16.msra.mxu0 %v8449_v1 }
 0x136   : > { %v996_v39 = vmax.f32 %v964_v29, 0.0  ;;  %v874_v41 = vpop.f32.mrb[24].mxu1  ;;  %v1965_v18 = vsel %vm8981_vm2, %v7307_v54, %v1964_v55  ;;  %v8453_v27 = vld [vmem:[%s9763_s21 + $0x154] ss:$8 sps:$4 sm:$0xff]   ;;  %4115 = vmatprep.subr.bf16.mxu0 %v8450_v8 }
 0x137   : > { %v925_v46 = vmul.f32 %v9571_v36, %v874_v41  ;;  %v876_v47 = vpop.f32.mrb[25].mxu1  ;;  %v9811_v51 = vpack.c.bf16 %v995_v33, %v993_v32  ;;  %v7308_v32 = vrot.slane %v9822_v62, 9  ;;  %v8423_v33 = vld [vmem:[%s8893_s17 + $0x440] ss:$8 sps:$4 sm:$0xff]   ;;  %v1968_v41 = vrot.slane %v7283_v7, 5 }
 0x138   : > { %v926_v52 = vmul.f32 %v9579_v40, %v876_v47  ;;  %v878_v53 = vpop.f32.mrb[26].mxu1  ;;  %3677 = vmatpush1.bf16.msra.mxu1 %v8411_v16  ;;  %v9815_v57 = vpack.c.bf16 %v996_v39, %v994_v37  ;;  %v7320_v39 = vcombine.low %v1961_v17, %v1965_v18  ;;  %v7286_v62 = vld [vmem:[%s10857_s1 + $0x1c8] sm:$0xe]  ;;  %v8459_v11 = vld [vmem:[%s9763_s21 + $0x174] ss:$8 sps:$4 sm:$0xff]  }
 0x139   : > { %v965_v58 = vadd.f32 %v9591_v44, %v925_v46  ;;  %v927_v59 = vmul.f32 %v9571_v36, %v878_v53  ;;  %v880_v60 = vpop.f32.mrb[27].mxu1  ;;  %3678 = vmatprep.subr.bf16.mxu1 %v8417_v30  ;;  %v8456_v53 = vld [vmem:[%s9763_s21 + $0x164] ss:$8 sps:$4 sm:$0xff]   ;;  %4116 = vmatpush1.bf16.msra.mxu0 %v8452_v22  ;;  %v8458_v7 = vld [vmem:[%s9763_s21 + $0x160] ss:$8 sps:$4 sm:$0xff]   ;;  %v7310_v22 = vrot.slane %v7286_v62, 9 }
 0x13a   : > { %v966_v4 = vadd.f32 %v9599_v49, %v926_v52  ;;  %v928_v6 = vmul.f32 %v9579_v40, %v880_v60  ;;  %v1972_v52 = vrot.slane %v7285_v12, 5  ;;  %4117 = vmatprep.subr.bf16.mxu0 %v8453_v27  ;;  %v8431_v18 = vld [vmem:[%s8893_s17 + $0x460] ss:$8 sps:$4 sm:$0xff]   ;;  %v7294_v62 = vld [vmem:[%s10857_s1 + $0x1f8] sm:$0xe] }
 0x13b   : > { %v967_v10 = vadd.f32 %v9591_v44, %v927_v59  ;;  %3604 = vmatmul.mubr.bf16.gmra.mrb[36].mxu1 %v7319_v42  ;;  %v997_v24 = vmax.f32 %v965_v58, 0.0  ;;  %v8429_v42 = vld [vmem:[%s8893_s17 + $0x454] ss:$8 sps:$4 sm:$0xff]  }
 0x13c   : > { %v968_v16 = vadd.f32 %v9599_v49, %v928_v6  ;;  %3613 = vmatprep.mubr.bf16.mxu1 %v8414_v43  ;;  %3679 = vmatpush1.bf16.msra.mxu1 %v8415_v56  ;;  %v998_v28 = vmax.f32 %v966_v4, 0.0  ;;  %v8455_v43 = vld [vmem:[%s9763_s21 + $0x150] ss:$8 sps:$4 sm:$0xff]   ;;  %v7288_v4 = vld [vmem:[%s10857_s1 + $0x1d4] sm:$0xe] }
 0x13d   : > { %v999_v26 = vmax.f32 %v967_v10, 0.0  ;;  %3680 = vmatprep.subr.bf16.mxu1 %v8421_v63  ;;  %v8427_v63 = vld [vmem:[%s8893_s17 + $0x450] ss:$8 sps:$4 sm:$0xff]   ;;  %v8433_v6 = vld [vmem:[%s8893_s17 + $0x464] ss:$8 sps:$4 sm:$0xff]   ;;  %v1973_v10 = vsel %vm8981_vm2, %v7309_v50, %v1972_v52  ;;  %4118 = vmatpush1.bf16.msra.mxu0 %v8455_v43 }
 0x13e   : > { %v1000_v29 = vmax.f32 %v968_v16, 0.0  ;;  %v884_v30 = vpop.f32.mrb[28].mxu1  ;;  %4119 = vmatprep.subr.bf16.mxu0 %v8456_v53  ;;  %v8426_v50 = vld [vmem:[%s10857_s1 + $0x1e4] ss:$12 sps:$4 sm:$0xff]  }
 0x13f   : > { %v929_v34 = vmul.f32 %v9571_v36, %v884_v30  ;;  %v886_v37 = vpop.f32.mrb[29].mxu1  ;;  %v9856_v46 = vpack.c.bf16 %v999_v26, %v997_v24  ;;  %v8437_v24 = vld [vmem:[%s8893_s17 + $0x474] ss:$8 sps:$4 sm:$0xff]   ;;  %v8461_v26 = vld [vmem:[%s9763_s21 + $0x170] ss:$8 sps:$4 sm:$0xff]  }
 0x140   : > { %v930_v47 = vmul.f32 %v9579_v40, %v886_v37  ;;  %v888_v48 = vpop.f32.mrb[30].mxu1  ;;  %3681 = vmatpush1.bf16.msra.mxu1 %v8419_v15  ;;  %v9860_v54 = vpack.c.bf16 %v1000_v29, %v998_v28  ;;  %v7311_v29 = vrot.slane %v7288_v4, 9  ;;  %v7291_v37 = vld [vmem:[%s10857_s1 + $0x1e4] sm:$0x1]  ;;  %v8470_v4 = vld [vmem:[%s9763_s21 + $0x1a0] ss:$8 sps:$4 sm:$0xff]  }
 0x141   : > { %v969_v55 = vadd.f32 %v9591_v44, %v929_v34  ;;  %v931_v56 = vmul.f32 %v9571_v36, %v888_v48  ;;  %v890_v58 = vpop.f32.mrb[31].mxu1  ;;  %3682 = vmatprep.subr.bf16.mxu1 %v8425_v19  ;;  %v7287_v36 = vld [vmem:[%s10857_s1 + $0x1cc] sm:$0x1]  ;;  %4120 = vmatpush1.bf16.msra.mxu0 %v8458_v7  ;;  %v8435_v34 = vld [vmem:[%s8893_s17 + $0x470] ss:$8 sps:$4 sm:$0xff]  }
 0x142   : > { %v970_v59 = vadd.f32 %v9599_v49, %v930_v47  ;;  %v932_v60 = vmul.f32 %v9579_v40, %v890_v58  ;;  %v7289_v40 = vld [vmem:[%s10857_s1 + $0x1d8] sm:$0x1]  ;;  %v1976_v28 = vrot.slane %v7287_v36, 5  ;;  %4121 = vmatprep.subr.bf16.mxu0 %v8459_v11  ;;  %v8465_v48 = vld [vmem:[%s9763_s21 + $0x194] ss:$8 sps:$4 sm:$0xff]  }
 0x143   : > { %v971_v1 = vadd.f32 %v9591_v44, %v931_v56  ;;  %3614 = vmatmul.mubr.bf16.gmra.mrb[40].mxu1 %v7320_v39  ;;  %v1969_v44 = vsel %vm8981_vm2, %v7308_v32, %v1968_v41  ;;  %v1001_v12 = vmax.f32 %v969_v55, 0.0  ;;  %v1980_v30 = vrot.slane %v7289_v40, 5  ;;  %v7292_v39 = vld [vmem:[%s10857_s1 + $0x1ec] sm:$0xe]  ;;  %v7293_v41 = vld [vmem:[%s10857_s1 + $0x1f0] sm:$0x1] }
 0x144   : > { %v972_v8 = vadd.f32 %v9599_v49, %v932_v60  ;;  %3623 = vmatprep.mubr.bf16.mxu1 %v8418_v31  ;;  %3683 = vmatpush1.bf16.msra.mxu1 %v8423_v33  ;;  %v1002_v16 = vmax.f32 %v970_v59, 0.0  ;;  %v8422_v49 = vld [vmem:[%s10857_s1 + $0x1cc] ss:$12 sps:$4 sm:$0xff]   ;;  %v7321_v19 = vcombine.low %v1969_v44, %v1973_v10  ;;  %v7290_v33 = vld [vmem:[%s10857_s1 + $0x1e0] sm:$0xe]  ;;  %v1977_v43 = vsel %vm8981_vm2, %v7310_v22, %v1976_v28 }
 0x145   : > { %v1003_v15 = vmax.f32 %v971_v1, 0.0  ;;  %3684 = vmatprep.subr.bf16.mxu1 %v8429_v42  ;;  %v8462_v31 = vld [vmem:[%s9763_s21 + $0x184] ss:$8 sps:$4 sm:$0xff]   ;;  %v8464_v42 = vld [vmem:[%s9763_s21 + $0x180] ss:$8 sps:$4 sm:$0xff]   ;;  %v1981_v47 = vsel %vm8981_vm2, %v7311_v29, %v1980_v30  ;;  %4122 = vmatpush1.bf16.msra.mxu0 %v8461_v26  ;;  %v7312_v53 = vrot.slane %v7290_v33, 9 }
 0x146   : > { %v1004_v17 = vmax.f32 %v972_v8, 0.0  ;;  %4123 = vmatprep.subr.bf16.mxu0 %v8462_v31  ;;  %v7322_v52 = vcombine.low %v1977_v43, %v1981_v47  ;;  %v8467_v55 = vld [vmem:[%s9763_s21 + $0x190] ss:$8 sps:$4 sm:$0xff]   ;;  %v1984_v56 = vrot.slane %v7291_v37, 5  ;;  %v7313_v58 = vrot.slane %v7292_v39, 9 }
 0x147   : > { %v9894_v27 = vpack.c.bf16 %v1003_v15, %v1001_v12  ;;  %v1988_v59 = vrot.slane %v7293_v41, 5  ;;  %v8468_v60 = vld [vmem:[%s9763_s21 + $0x1a4] ss:$8 sps:$4 sm:$0xff]   ;;  %v7297_v36 = vld [vmem:[%s10857_s1 + $0x208] sm:$0x1]  ;;  %v7314_v10 = vrot.slane %v7294_v62, 9 }
 0x148   : > { %3685 = vmatpush1.bf16.msra.mxu1 %v8427_v63  ;;  %v9897_v32 = vpack.c.bf16 %v1004_v17, %v1002_v16  ;;  %v7295_v63 = vld [vmem:[%s10857_s1 + $0x1fc] sm:$0x1]  ;;  %v7296_v1 = vld [vmem:[%s10857_s1 + $0x204] sm:$0xe]  ;;  %v1985_v40 = vsel %vm8981_vm2, %v7312_v53, %v1984_v56  ;;  %v8473_v11 = vld [vmem:[%s9763_s21 + $0x1b0] ss:$8 sps:$4 sm:$0xff]  }
 0x149   : > { %3686 = vmatprep.subr.bf16.mxu1 %v8433_v6  ;;  %4124 = vmatpush1.bf16.msra.mxu0 %v8464_v42  ;;  %v1989_v6 = vsel %vm8981_vm2, %v7313_v58, %v1988_v59  ;;  %v8471_v7 = vld [vmem:[%s9763_s21 + $0x1b4] ss:$8 sps:$4 sm:$0xff]   ;;  %v1992_v12 = vrot.slane %v7295_v63, 5  ;;  %v7315_v15 = vrot.slane %v7296_v1, 9  ;;  %v1996_v16 = vrot.slane %v7297_v36, 5 }
 0x14a   : > { %4125 = vmatprep.subr.bf16.mxu0 %v8465_v48  ;;  %v8430_v8 = vld [vmem:[%s10857_s1 + $0x1fc] ss:$12 sps:$4 sm:$0xff]   ;;  %v7323_v44 = vcombine.low %v1985_v40, %v1989_v6  ;;  %v8474_v17 = vld [vmem:[%s9763_s21 + $0x1c4] ss:$8 sps:$4 sm:$0xff]   ;;  %v7301_v22 = vld [vmem:[%s10857_s1 + $0x220] sm:$0x1] }
 0x14b   : > { %3624 = vmatmul.mubr.bf16.gmra.mrb[44].mxu1 %v7321_v19  ;;  %v7300_v19 = vld [vmem:[%s10857_s1 + $0x21c] sm:$0xe]  ;;  %v1993_v26 = vsel %vm8981_vm2, %v7314_v10, %v1992_v12  ;;  %v1997_v28 = vsel %vm8981_vm2, %v7315_v15, %v1996_v16  ;;  %v8434_v29 = vld [vmem:[%s10857_s1 + $0x214] ss:$12 sps:$4 sm:$0xff]   ;;  %v2004_v37 = vrot.slane %v7301_v22, 5 }
 0x14c   : > { %3633 = vmatprep.mubr.bf16.mxu1 %v8422_v49  ;;  %3687 = vmatpush1.bf16.msra.mxu1 %v8431_v18  ;;  %v7298_v49 = vld [vmem:[%s10857_s1 + $0x210] sm:$0xe]  ;;  %v7299_v18 = vld [vmem:[%s10857_s1 + $0x214] sm:$0x1]  ;;  %v7324_v30 = vcombine.low %v1993_v26, %v1997_v28  ;;  %v7350_v39 = vld [vmem:[%s10857_s1 + $0xac] sm:$0x8] }
 0x14d   : > { %3688 = vmatprep.subr.bf16.mxu1 %v8437_v24  ;;  %4126 = vmatpush1.bf16.msra.mxu0 %v8467_v55  ;;  %v8476_v24 = vld [vmem:[%s9763_s21 + $0x1c0] ss:$8 sps:$4 sm:$0xff]   ;;  %v7316_v31 = vrot.slane %v7298_v49, 9  ;;  %v2000_v33 = vrot.slane %v7299_v18, 5  ;;  %v7351_v41 = vld [vmem:[%s10857_s1 + $0xb0] sm:$0x7] }
 0x14e   : > { %4127 = vmatprep.subr.bf16.mxu0 %v8468_v60  ;;  %v7352_v42 = vld [vmem:[%s10857_s1 + $0xb8] sm:$0x8]  ;;  %v7353_v43 = vld [vmem:[%s10857_s1 + $0xbc] sm:$0x7]  ;;  %v2184_v53 = vrot.slane %v7351_v41, 7 }
 0x14f   : > { %v2001_v47 = vsel %vm8981_vm2, %v7316_v31, %v2000_v33  ;;  %v7383_v55 = vrot.slane %v7352_v42, 11  ;;  %v2188_v56 = vrot.slane %v7353_v43, 7  ;;  %v7354_v60 = vld [vmem:[%s10857_s1 + $0xc4] sm:$0x8]  ;;  %v7356_v62 = vld [vmem:[%s10857_s1 + $0xd0] sm:$0x8] }
 0x150   : > { %3689 = vmatpush1.bf16.msra.mxu1 %v8435_v34  ;;  %v7317_v34 = vrot.slane %v7300_v19, 9  ;;  %v7357_v63 = vld [vmem:[%s10857_s1 + $0xd4] sm:$0x7]  ;;  %v7384_v36 = vrot.slane %v7354_v60, 11  ;;  %v7385_v40 = vrot.slane %v7356_v62, 11 }
 0x151   : > { %4128 = vmatpush1.bf16.msra.mxu0 %v8470_v4  ;;  %v2189_v59 = vsel %vm9196_vm5, %v7383_v55, %v2188_v56  ;;  %v2192_v4 = vrot.slane %v7355_v2, 7  ;;  %v2196_v6 = vrot.slane %v7357_v63, 7  ;;  %v7359_v10 = vld [vmem:[%s10857_s1 + $0xe0] sm:$0x7]  ;;  %v7361_v12 = vld [vmem:[%s10857_s1 + $0xec] sm:$0x7] }
 0x152   : > { %4129 = vmatprep.subr.bf16.mxu0 %v8471_v7  ;;  %v2005_v48 = vsel %vm8981_vm2, %v7317_v34, %v2004_v37  ;;  %v2204_v18 = vrot.slane %v7361_v12, 7  ;;  %v7363_v26 = vld [vmem:[%s10857_s1 + $0xf8] sm:$0x7]  ;;  %v7364_v28 = vld [vmem:[%s10857_s1 + $0x100] sm:$0x8] }
 0x153   : > { %3634 = vmatmul.mubr.bf16.gmra.mrb[48].mxu1 %v7322_v52  ;;  %v7382_v52 = vrot.slane %v7350_v39, 11  ;;  %v2193_v7 = vsel %vm9196_vm5, %v7384_v36, %v2192_v4  ;;  %v2208_v33 = vrot.slane %v7363_v26, 7  ;;  %v7389_v34 = vrot.slane %v7364_v28, 11  ;;  %v7366_v42 = vld [vmem:[%s10857_s1 + $0x1cc] sm:$0x8] }
 0x154   : > { %3643 = vmatprep.mubr.bf16.mxu1 %v8426_v50  ;;  %v7325_v50 = vcombine.low %v2001_v47, %v2005_v48  ;;  %v7367_v43 = vld [vmem:[%s10857_s1 + $0x1d0] sm:$0x7]  ;;  %v7368_v47 = vld [vmem:[%s10857_s1 + $0x1d8] sm:$0x8]  ;;  %v7369_v48 = vld [vmem:[%s10857_s1 + $0x1dc] sm:$0x7] }
 0x155   : > { %4130 = vmatpush1.bf16.msra.mxu0 %v8473_v11  ;;  %v2185_v58 = vsel %vm9196_vm5, %v7382_v52, %v2184_v53  ;;  %v7360_v11 = vld [vmem:[%s10857_s1 + $0xe8] sm:$0x8]  ;;  %v7390_v52 = vrot.slane %v7366_v42, 11  ;;  %v2216_v53 = vrot.slane %v7367_v43, 7  ;;  %v7391_v55 = vrot.slane %v7368_v47, 11 }
 0x156   : > { %4131 = vmatprep.subr.bf16.mxu0 %v8474_v17  ;;  %v7398_v1 = vcombine.low %v2185_v58, %v2189_v59  ;;  %v2200_v17 = vrot.slane %v7359_v10, 7  ;;  %v7387_v49 = vrot.slane %v7360_v11, 11  ;;  %v2220_v56 = vrot.slane %v7369_v48, 7  ;;  %v7370_v60 = vld [vmem:[%s10857_s1 + $0x1e4] sm:$0x8] }
 0x157   : > { %v2217_v58 = vsel %vm9196_vm5, %v7390_v52, %v2216_v53  ;;  %v7371_v2 = vld [vmem:[%s10857_s1 + $0x1e8] sm:$0x7]  ;;  %v7372_v62 = vld [vmem:[%s10857_s1 + $0x1f0] sm:$0x8]  ;;  %v7373_v63 = vld [vmem:[%s10857_s1 + $0x1f4] sm:$0x7] }
 0x158   : > { %v2205_v22 = vsel %vm9196_vm5, %v7387_v49, %v2204_v18  ;;  %v2221_v59 = vsel %vm9196_vm5, %v7391_v55, %v2220_v56  ;;  %v7392_v36 = vrot.slane %v7370_v60, 11  ;;  %v2224_v4 = vrot.slane %v7371_v2, 7  ;;  %v7375_v10 = vld [vmem:[%s10857_s1 + $0x200] sm:$0x7]  ;;  %v7376_v11 = vld [vmem:[%s10857_s1 + $0x208] sm:$0x8] }
 0x159   : > { %4132 = vmatpush1.bf16.msra.mxu0 %v8476_v24  ;;  %v7362_v24 = vld [vmem:[%s10857_s1 + $0xf4] sm:$0x8]  ;;  %v7377_v12 = vld [vmem:[%s10857_s1 + $0x20c] sm:$0x7]  ;;  %v7395_v49 = vrot.slane %v7376_v11, 11  ;;  %v10121_v55 = vsub.s32 1, %v9529_v14 }
 0x15a   : > { %v7388_v31 = vrot.slane %v7362_v24, 11  ;;  %v2236_v18 = vrot.slane %v7377_v12, 7  ;;  %v7378_v24 = vld [vmem:[%s10857_s1 + $0x214] sm:$0x8]  ;;  %v7379_v26 = vld [vmem:[%s10857_s1 + $0x218] sm:$0x7] }
 0x15b   : > { %3644 = vmatmul.mubr.bf16.gmra.mrb[52].mxu1 %v7323_v44  ;;  %v7358_v44 = vld [vmem:[%s10857_s1 + $0xdc] sm:$0x8]  ;;  %v7380_v28 = vld [vmem:[%s10857_s1 + $0x220] sm:$0x8]  ;;  %v8479_v47 = vld [vmem:[%s9763_s21 + $0x1d0] ss:$8 sps:$4 sm:$0xff]  }
 0x15c   : > { %3653 = vmatprep.mubr.bf16.mxu1 %v8430_v8  ;;  %v2197_v8 = vsel %vm9196_vm5, %v7385_v40, %v2196_v6  ;;  %v7386_v16 = vrot.slane %v7358_v44, 11  ;;  %v2209_v39 = vsel %vm9196_vm5, %v7388_v31, %v2208_v33  ;;  %v7393_v40 = vrot.slane %v7372_v62, 11  ;;  %v7374_v44 = vld [vmem:[%s10857_s1 + $0x1fc] sm:$0x8]  ;;  %v8480_v48 = vld [vmem:[%s9763_s21 + $0x1e4] ss:$8 sps:$4 sm:$0xff]  }
 0x15d   : > { %v7399_v15 = vcombine.low %v2193_v7, %v2197_v8  ;;  %v2228_v6 = vrot.slane %v7373_v63, 7  ;;  %v2225_v7 = vsel %vm9196_vm5, %v7392_v36, %v2224_v4  ;;  %v7396_v31 = vrot.slane %v7378_v24, 11  ;;  %v8477_v43 = vld [vmem:[%s9763_s21 + $0x1d4] ss:$8 sps:$4 sm:$0xff]   ;;  %v8485_v52 = vld [vmem:[%s9763_s21 + $0x1f0] ss:$8 sps:$4 sm:$0xff]  }
 0x15e   : > { %v2201_v19 = vsel %vm9196_vm5, %v7386_v16, %v2200_v17  ;;  %v7394_v16 = vrot.slane %v7374_v44, 11  ;;  %v2232_v17 = vrot.slane %v7375_v10, 7  ;;  %v2240_v33 = vrot.slane %v7379_v26, 7  ;;  %4133 = vmatprep.subr.bf16.mxu0 %v8477_v43  ;;  %v8488_v53 = vld [vmem:[%s9763_s21 + $0x4] ss:$8 sps:$4 sm:$0xff]  }
 0x15f   : > { %v2229_v8 = vsel %vm9196_vm5, %v7393_v40, %v2228_v6  ;;  %4134 = vmatpush1.bf16.msra.mxu0 %v8479_v47  ;;  %v10124_v56 = vld [vmem:[%s9536_s30] sm:$0x3f] }
 0x160   : > { %4135 = vmatprep.subr.bf16.mxu0 %v8480_v48  ;;  %v10138_v2 = vld [vmem:[%s9560_s15] sm:$0x3f] }
 0x161   : > { %v10142_v62 = vrot.slane %v10138_v2, %v10121_v55 }
 0x163   : > { %3654 = vmatmul.mubr.bf16.gmra.mrb[56].mxu1 %v7324_v30  ;;  %v7400_v30 = vcombine.low %v2201_v19, %v2205_v22  ;;  %v2233_v19 = vsel %vm9196_vm5, %v7394_v16, %v2232_v17  ;;  %v2237_v22 = vsel %vm9196_vm5, %v7395_v49, %v2236_v18 }
 0x164   : > { %3663 = vmatprep.mubr.bf16.mxu1 %v8434_v29  ;;  %v7365_v29 = vld [vmem:[%s10857_s1 + $0x104] sm:$0x7] }
 0x165   : > { %v2212_v37 = vrot.slane %v7365_v29, 7  ;;  %v7381_v29 = vld [vmem:[%s10857_s1 + $0x224] sm:$0x7] }
 0x167   : > { %v2213_v41 = vsel %vm9196_vm5, %v7389_v34, %v2212_v37  ;;  %v7397_v34 = vrot.slane %v7380_v28, 11  ;;  %v2244_v37 = vrot.slane %v7381_v29, 7 }
 0x16b   : > { %3664 = vmatmul.mubr.bf16.gmra.mrb[60].mxu1 %v7325_v50  ;;  %v7401_v50 = vcombine.low %v2209_v39, %v2213_v41  ;;  %v2241_v39 = vsel %vm9196_vm5, %v7396_v31, %v2240_v33  ;;  %v2245_v41 = vsel %vm9196_vm5, %v7397_v34, %v2244_v37  ;;  %v8486_v33 = vld [vmem:[%s9763_s21] ss:$8 sps:$4 sm:$0xff]  }
 0x16c   : > { %3706 = vmatprep.mubr.bf16.mxu1 %v8790_v0  ;;  %v7405_v42 = vcombine.low %v2241_v39, %v2245_v41  ;;  %v8491_v41 = vld [vmem:[%s9763_s21 + $0x14] ss:$8 sps:$4 sm:$0xff]  }
 0x173   : > { %3707 = vmatmul.mubr.bf16.vlgmr.msra.gmra.mrb[32].mxu1 %v7398_v1  ;;  %v7402_v1 = vcombine.low %v2217_v58, %v2221_v59  ;;  %v10128_v58 = vrot.slane %v10124_v56, %v10121_v55  ;;  %v10131_v59 = vld [vmem:[%s9536_s30 + $0x8] sm:$0x3f] }
 0x174   : > { %3716 = vmatprep.mubr.bf16.mxu1 %v8790_v0  ;;  %v10135_v60 = vrot.slane %v10131_v59, %v10121_v55 }
 0x17b   : > { %3717 = vmatmul.mubr.bf16.gmra.mrb[36].mxu1 %v7399_v15  ;;  %v7403_v15 = vcombine.low %v2225_v7, %v2229_v8 }
 0x17c   : > { %3726 = vmatprep.mubr.bf16.mxu1 %v8790_v0 }
 0x183   : > { %3727 = vmatmul.mubr.bf16.gmra.mrb[40].mxu1 %v7400_v30  ;;  %v7404_v30 = vcombine.low %v2233_v19, %v2237_v22 }
 0x184   : > { %3736 = vmatprep.mubr.bf16.mxu1 %v8790_v0 }
 0x18b   : > { %3737 = vmatmul.mubr.bf16.gmra.mrb[44].mxu1 %v7401_v50  ;;  %v8482_v50 = vld [vmem:[%s9763_s21 + $0x1e0] ss:$8 sps:$4 sm:$0xff]  }
 0x18c   : > { %3746 = vmatprep.mubr.bf16.mxu1 %v8790_v0  ;;  %4136 = vmatpush1.bf16.msra.mxu0 %v8482_v50  ;;  %v8489_v50 = vld [vmem:[%s9763_s21 + $0x10] ss:$8 sps:$4 sm:$0xff]  }
 0x18d   : > { %4137 = vmatprep.subr.bf16.mxu0 %v8483_v21 }
 0x190   : > { %4138 = vmatpush1.bf16.msra.mxu0 %v8485_v52 }
 0x191   : > { %4380 = vmatprep.subr.bf16.mxu0 %v8488_v53  ;;  %v8494_v53 = vld [vmem:[%s9763_s21 + $0x24] ss:$8 sps:$4 sm:$0xff]  }
 0x193   : > { %3747 = vmatmul.mubr.bf16.gmra.mrb[48].mxu1 %v7402_v1  ;;  %v10145_v1 = vld [vmem:[%s9560_s15 + $0x8] sm:$0x3f] }
 0x194   : > { %3756 = vmatprep.mubr.bf16.mxu1 %v8790_v0  ;;  %v10149_v36 = vrot.slane %v10145_v1, %v10121_v55 }
 0x19b   : > { %3757 = vmatmul.mubr.bf16.gmra.mrb[52].mxu1 %v7403_v15 }
 0x19c   : > { %3766 = vmatprep.mubr.bf16.mxu1 %v8790_v0 }
 0x1a3   : > { %3767 = vmatmul.mubr.bf16.gmra.mrb[56].mxu1 %v7404_v30 }
 0x1a4   : > { %3776 = vmatprep.mubr.bf16.mxu1 %v8790_v0 }
 0x1ab   : > { %3777 = vmatmul.mubr.bf16.gmra.mrb[60].mxu1 %v7405_v42 }
 0x1ac   : > { %6008 = vmatprep.mubr.bf16.mxu1 %v8790_v0 }
 0x246   : > { %v3708_v63 = vpop.f32.mrb[32].mxu1 }
 0x247   : > { %v3795_v4 = vmul.f32 %v10128_v58, %v3708_v63  ;;  %v3710_v40 = vpop.f32.mrb[33].mxu1 }
 0x248   : > { %v3796_v6 = vmul.f32 %v10135_v60, %v3710_v40  ;;  %v3712_v7 = vpop.f32.mrb[34].mxu1 }
 0x249   : > { %v3835_v8 = vadd.f32 %v10142_v62, %v3795_v4  ;;  %v3797_v44 = vmul.f32 %v10128_v58, %v3712_v7  ;;  %v3714_v10 = vpop.f32.mrb[35].mxu1 }
 0x24a   : > { %v3798_v11 = vmul.f32 %v10135_v60, %v3714_v10  ;;  %v3836_v12 = vadd.f32 %v10149_v36, %v3796_v6 }
 0x24b   : > { %v3837_v15 = vadd.f32 %v10142_v62, %v3797_v44  ;;  %v3867_v17 = vmax.f32 %v3835_v8, 0.0 }
 0x24c   : > { %v3838_v16 = vadd.f32 %v10149_v36, %v3798_v11  ;;  %v3868_v19 = vmax.f32 %v3836_v12, 0.0  ;;  %v8492_v12 = vld [vmem:[%s9763_s21 + $0x20] ss:$8 sps:$4 sm:$0xff]  }
 0x24d   : > { %v3869_v49 = vmax.f32 %v3837_v15, 0.0 }
 0x24e   : > { %v3718_v18 = vpop.f32.mrb[36].mxu1  ;;  %v3870_v22 = vmax.f32 %v3838_v16, 0.0 }
 0x24f   : > { %v3799_v24 = vmul.f32 %v10128_v58, %v3718_v18  ;;  %v3720_v26 = vpop.f32.mrb[37].mxu1  ;;  %v3899_v28 = vpack.c.bf16 %v3869_v49, %v3867_v17  ;;  %v8497_v49 = vld [vmem:[%s9763_s21 + $0x34] ss:$8 sps:$4 sm:$0xff]  }
 0x250   : > { %v3800_v29 = vmul.f32 %v10135_v60, %v3720_v26  ;;  %v3722_v30 = vpop.f32.mrb[38].mxu1  ;;  %v3900_v31 = vpack.c.bf16 %v3870_v22, %v3868_v19  ;;  %v8495_v26 = vld [vmem:[%s9763_s21 + $0x30] ss:$8 sps:$4 sm:$0xff]  }
 0x251   : > { %v3839_v34 = vadd.f32 %v10142_v62, %v3799_v24  ;;  %v3801_v37 = vmul.f32 %v10128_v58, %v3722_v30  ;;  %v3724_v39 = vpop.f32.mrb[39].mxu1  ;;  %v8500_v30 = vld [vmem:[%s9763_s21 + $0x44] ss:$8 sps:$4 sm:$0xff]  }
 0x252   : > { %v3840_v42 = vadd.f32 %v10149_v36, %v3800_v29  ;;  %v3802_v43 = vmul.f32 %v10135_v60, %v3724_v39  ;;  %4139 = vmatprep.mubr.bf16.mxu0 %v3900_v31 }
 0x253   : > { %v3841_v47 = vadd.f32 %v10142_v62, %v3801_v37  ;;  %4140 = vmatmul.mubr.bf16.vlgmr.msra.gmra.mrb[0].mxu0 %v3899_v28  ;;  %v3871_v21 = vmax.f32 %v3839_v34, 0.0 }
 0x254   : > { %v3842_v48 = vadd.f32 %v10149_v36, %v3802_v43  ;;  %4381 = vmatpush1.bf16.msra.mxu0 %v8486_v33  ;;  %v3872_v63 = vmax.f32 %v3840_v42, 0.0 }
 0x255   : > { %v3873_v52 = vmax.f32 %v3841_v47, 0.0  ;;  %4382 = vmatprep.subr.bf16.mxu0 %v8491_v41 }
 0x256   : > { %v3874_v4 = vmax.f32 %v3842_v48, 0.0  ;;  %v3728_v40 = vpop.f32.mrb[40].mxu1  ;;  %v8498_v48 = vld [vmem:[%s9763_s21 + $0x40] ss:$8 sps:$4 sm:$0xff]  }
 0x257   : > { %v3803_v6 = vmul.f32 %v10128_v58, %v3728_v40  ;;  %v3730_v7 = vpop.f32.mrb[41].mxu1  ;;  %v3901_v8 = vpack.c.bf16 %v3873_v52, %v3871_v21 }
 0x258   : > { %v3804_v44 = vmul.f32 %v10135_v60, %v3730_v7  ;;  %v3732_v10 = vpop.f32.mrb[42].mxu1  ;;  %4383 = vmatpush1.bf16.msra.mxu0 %v8489_v50  ;;  %v3902_v11 = vpack.c.bf16 %v3874_v4, %v3872_v63  ;;  %v8501_v7 = vld [vmem:[%s9763_s21 + $0x50] ss:$8 sps:$4 sm:$0xff]  }
 0x259   : > { %v3843_v15 = vadd.f32 %v10142_v62, %v3803_v6  ;;  %v3805_v16 = vmul.f32 %v10128_v58, %v3732_v10  ;;  %v3734_v17 = vpop.f32.mrb[43].mxu1  ;;  %4384 = vmatprep.subr.bf16.mxu0 %v8494_v53  ;;  %v8503_v53 = vld [vmem:[%s9763_s21 + $0x54] ss:$8 sps:$4 sm:$0xff]   ;;  %v8506_v10 = vld [vmem:[%s9763_s21 + $0x64] ss:$8 sps:$4 sm:$0xff]  }
 0x25a   : > { %v3844_v18 = vadd.f32 %v10149_v36, %v3804_v44  ;;  %v3806_v19 = vmul.f32 %v10135_v60, %v3734_v17  ;;  %4149 = vmatprep.mubr.bf16.mxu0 %v3902_v11 }
 0x25b   : > { %v3845_v22 = vadd.f32 %v10142_v62, %v3805_v16  ;;  %4150 = vmatmul.mubr.bf16.gmra.mrb[4].mxu0 %v3901_v8  ;;  %v3875_v28 = vmax.f32 %v3843_v15, 0.0 }
 0x25c   : > { %v3846_v24 = vadd.f32 %v10149_v36, %v3806_v19  ;;  %4385 = vmatpush1.bf16.msra.mxu0 %v8492_v12  ;;  %v3876_v31 = vmax.f32 %v3844_v18, 0.0 }
 0x25d   : > { %v3877_v29 = vmax.f32 %v3845_v22, 0.0  ;;  %4386 = vmatprep.subr.bf16.mxu0 %v8497_v49 }
 0x25e   : > { %v3878_v33 = vmax.f32 %v3846_v24, 0.0  ;;  %v3738_v34 = vpop.f32.mrb[44].mxu1  ;;  %v8504_v24 = vld [vmem:[%s9763_s21 + $0x60] ss:$8 sps:$4 sm:$0xff]  }
 0x25f   : > { %v3807_v37 = vmul.f32 %v10128_v58, %v3738_v34  ;;  %v3740_v39 = vpop.f32.mrb[45].mxu1  ;;  %v3903_v41 = vpack.c.bf16 %v3877_v29, %v3875_v28 }
 0x260   : > { %v3808_v42 = vmul.f32 %v10135_v60, %v3740_v39  ;;  %v3742_v43 = vpop.f32.mrb[46].mxu1  ;;  %4387 = vmatpush1.bf16.msra.mxu0 %v8495_v26  ;;  %v3904_v47 = vpack.c.bf16 %v3878_v33, %v3876_v31  ;;  %v8507_v39 = vld [vmem:[%s9763_s21 + $0x70] ss:$8 sps:$4 sm:$0xff]  }
 0x261   : > { %v3847_v50 = vadd.f32 %v10142_v62, %v3807_v37  ;;  %v3809_v21 = vmul.f32 %v10128_v58, %v3742_v43  ;;  %v3744_v52 = vpop.f32.mrb[47].mxu1  ;;  %4388 = vmatprep.subr.bf16.mxu0 %v8500_v30  ;;  %v8509_v30 = vld [vmem:[%s9763_s21 + $0x74] ss:$8 sps:$4 sm:$0xff]   ;;  %v8512_v43 = vld [vmem:[%s9763_s21 + $0x84] ss:$8 sps:$4 sm:$0xff]  }
 0x262   : > { %v3848_v63 = vadd.f32 %v10149_v36, %v3808_v42  ;;  %v3810_v4 = vmul.f32 %v10135_v60, %v3744_v52  ;;  %4159 = vmatprep.mubr.bf16.mxu0 %v3904_v47 }
 0x263   : > { %v3849_v40 = vadd.f32 %v10142_v62, %v3809_v21  ;;  %4160 = vmatmul.mubr.bf16.gmra.mrb[8].mxu0 %v3903_v41  ;;  %v3879_v8 = vmax.f32 %v3847_v50, 0.0 }
 0x264   : > { %v3850_v6 = vadd.f32 %v10149_v36, %v3810_v4  ;;  %4389 = vmatpush1.bf16.msra.mxu0 %v8498_v48  ;;  %v3880_v11 = vmax.f32 %v3848_v63, 0.0 }
 0x265   : > { %v3881_v44 = vmax.f32 %v3849_v40, 0.0  ;;  %4390 = vmatprep.subr.bf16.mxu0 %v8503_v53 }
 0x266   : > { %v3882_v12 = vmax.f32 %v3850_v6, 0.0  ;;  %v3748_v15 = vpop.f32.mrb[48].mxu1  ;;  %v8510_v6 = vld [vmem:[%s9763_s21 + $0x80] ss:$8 sps:$4 sm:$0xff]  }
 0x267   : > { %v3811_v16 = vmul.f32 %v10128_v58, %v3748_v15  ;;  %v3750_v17 = vpop.f32.mrb[49].mxu1  ;;  %v3905_v49 = vpack.c.bf16 %v3881_v44, %v3879_v8 }
 0x268   : > { %v3812_v18 = vmul.f32 %v10135_v60, %v3750_v17  ;;  %v3752_v19 = vpop.f32.mrb[50].mxu1  ;;  %4391 = vmatpush1.bf16.msra.mxu0 %v8501_v7  ;;  %v3906_v22 = vpack.c.bf16 %v3882_v12, %v3880_v11  ;;  %v8513_v17 = vld [vmem:[%s9763_s21 + $0x90] ss:$8 sps:$4 sm:$0xff]  }
 0x269   : > { %v3851_v26 = vadd.f32 %v10142_v62, %v3811_v16  ;;  %v3813_v28 = vmul.f32 %v10128_v58, %v3752_v19  ;;  %v3754_v29 = vpop.f32.mrb[51].mxu1  ;;  %4392 = vmatprep.subr.bf16.mxu0 %v8506_v10  ;;  %v8515_v10 = vld [vmem:[%s9763_s21 + $0x94] ss:$8 sps:$4 sm:$0xff]   ;;  %v8518_v19 = vld [vmem:[%s9763_s21 + $0xa4] ss:$8 sps:$4 sm:$0xff]  }
 0x26a   : > { %v3852_v31 = vadd.f32 %v10149_v36, %v3812_v18  ;;  %v3814_v33 = vmul.f32 %v10135_v60, %v3754_v29  ;;  %4169 = vmatprep.mubr.bf16.mxu0 %v3906_v22 }
 0x26b   : > { %v3853_v34 = vadd.f32 %v10142_v62, %v3813_v28  ;;  %4170 = vmatmul.mubr.bf16.gmra.mrb[12].mxu0 %v3905_v49  ;;  %v3883_v41 = vmax.f32 %v3851_v26, 0.0 }
 0x26c   : > { %v3854_v37 = vadd.f32 %v10149_v36, %v3814_v33  ;;  %4393 = vmatpush1.bf16.msra.mxu0 %v8504_v24  ;;  %v3884_v47 = vmax.f32 %v3852_v31, 0.0 }
 0x26d   : > { %v3885_v42 = vmax.f32 %v3853_v34, 0.0  ;;  %4394 = vmatprep.subr.bf16.mxu0 %v8509_v30 }
 0x26e   : > { %v3886_v48 = vmax.f32 %v3854_v37, 0.0  ;;  %v3758_v50 = vpop.f32.mrb[52].mxu1  ;;  %v8516_v37 = vld [vmem:[%s9763_s21 + $0xa0] ss:$8 sps:$4 sm:$0xff]  }
 0x26f   : > { %v3815_v21 = vmul.f32 %v10128_v58, %v3758_v50  ;;  %v3760_v52 = vpop.f32.mrb[53].mxu1  ;;  %v3907_v53 = vpack.c.bf16 %v3885_v42, %v3883_v41 }
 0x270   : > { %v3816_v63 = vmul.f32 %v10135_v60, %v3760_v52  ;;  %v3762_v4 = vpop.f32.mrb[54].mxu1  ;;  %4395 = vmatpush1.bf16.msra.mxu0 %v8507_v39  ;;  %v3908_v40 = vpack.c.bf16 %v3886_v48, %v3884_v47  ;;  %v8519_v52 = vld [vmem:[%s9763_s21 + $0xb0] ss:$8 sps:$4 sm:$0xff]  }
 0x271   : > { %v3855_v7 = vadd.f32 %v10142_v62, %v3815_v21  ;;  %v3817_v8 = vmul.f32 %v10128_v58, %v3762_v4  ;;  %v3764_v44 = vpop.f32.mrb[55].mxu1  ;;  %4396 = vmatprep.subr.bf16.mxu0 %v8512_v43  ;;  %v8521_v43 = vld [vmem:[%s9763_s21 + $0xb4] ss:$8 sps:$4 sm:$0xff]   ;;  %v8524_v4 = vld [vmem:[%s9763_s21 + $0xc4] ss:$8 sps:$4 sm:$0xff]  }
 0x272   : > { %v3856_v11 = vadd.f32 %v10149_v36, %v3816_v63  ;;  %v3818_v12 = vmul.f32 %v10135_v60, %v3764_v44  ;;  %4179 = vmatprep.mubr.bf16.mxu0 %v3908_v40 }
 0x273   : > { %v3857_v15 = vadd.f32 %v10142_v62, %v3817_v8  ;;  %4180 = vmatmul.mubr.bf16.gmra.mrb[16].mxu0 %v3907_v53  ;;  %v3887_v49 = vmax.f32 %v3855_v7, 0.0 }
 0x274   : > { %v3858_v16 = vadd.f32 %v10149_v36, %v3818_v12  ;;  %4397 = vmatpush1.bf16.msra.mxu0 %v8510_v6  ;;  %v3888_v22 = vmax.f32 %v3856_v11, 0.0 }
 0x275   : > { %v3889_v18 = vmax.f32 %v3857_v15, 0.0  ;;  %4398 = vmatprep.subr.bf16.mxu0 %v8515_v10 }
 0x276   : > { %v3890_v24 = vmax.f32 %v3858_v16, 0.0  ;;  %v3768_v26 = vpop.f32.mrb[56].mxu1  ;;  %v8522_v16 = vld [vmem:[%s9763_s21 + $0xc0] ss:$8 sps:$4 sm:$0xff]  }
 0x277   : > { %v3819_v28 = vmul.f32 %v10128_v58, %v3768_v26  ;;  %v3770_v29 = vpop.f32.mrb[57].mxu1  ;;  %v3909_v30 = vpack.c.bf16 %v3889_v18, %v3887_v49 }
 0x278   : > { %v3820_v31 = vmul.f32 %v10135_v60, %v3770_v29  ;;  %v3772_v33 = vpop.f32.mrb[58].mxu1  ;;  %4399 = vmatpush1.bf16.msra.mxu0 %v8513_v17  ;;  %v3910_v34 = vpack.c.bf16 %v3890_v24, %v3888_v22  ;;  %v8525_v29 = vld [vmem:[%s9763_s21 + $0xd0] ss:$8 sps:$4 sm:$0xff]  }
 0x279   : > { %v3859_v39 = vadd.f32 %v10142_v62, %v3819_v28  ;;  %v3821_v41 = vmul.f32 %v10128_v58, %v3772_v33  ;;  %v3774_v42 = vpop.f32.mrb[59].mxu1  ;;  %4400 = vmatprep.subr.bf16.mxu0 %v8518_v19  ;;  %v8527_v19 = vld [vmem:[%s9763_s21 + $0xd4] ss:$8 sps:$4 sm:$0xff]  }
 0x27a   : > { %v3860_v47 = vadd.f32 %v10149_v36, %v3820_v31  ;;  %v3822_v48 = vmul.f32 %v10135_v60, %v3774_v42  ;;  %4189 = vmatprep.mubr.bf16.mxu0 %v3910_v34  ;;  %v8530_v31 = vld [vmem:[%s9763_s21 + $0xe4] ss:$8 sps:$4 sm:$0xff]   ;;  %v8534_v42 = vld [vmem:[%s10118_s20] ss:$8 sps:$4 sm:$0xff]  }
 0x27b   : > { %v3861_v50 = vadd.f32 %v10142_v62, %v3821_v41  ;;  %4190 = vmatmul.mubr.bf16.gmra.mrb[20].mxu0 %v3909_v30  ;;  %v3891_v53 = vmax.f32 %v3859_v39, 0.0  ;;  %v8533_v39 = vld [vmem:[%s9763_s21 + $0xf4] ss:$8 sps:$4 sm:$0xff]   ;;  %v8536_v41 = vld [vmem:[%s10118_s20 + $0x4] ss:$8 sps:$4 sm:$0xff]  }
 0x27c   : > { %v3862_v21 = vadd.f32 %v10149_v36, %v3822_v48  ;;  %4401 = vmatpush1.bf16.msra.mxu0 %v8516_v37  ;;  %v3892_v40 = vmax.f32 %v3860_v47, 0.0  ;;  %v8537_v47 = vld [vmem:[%s10118_s20 + $0x10] ss:$8 sps:$4 sm:$0xff]   ;;  %v8540_v48 = vld [vmem:[%s10118_s20 + $0x20] ss:$8 sps:$4 sm:$0xff]  }
 0x27d   : > { %v3893_v63 = vmax.f32 %v3861_v50, 0.0  ;;  %4402 = vmatprep.subr.bf16.mxu0 %v8521_v43  ;;  %v8539_v43 = vld [vmem:[%s10118_s20 + $0x14] ss:$8 sps:$4 sm:$0xff]  }
 0x27e   : > { %v3894_v6 = vmax.f32 %v3862_v21, 0.0  ;;  %v3778_v7 = vpop.f32.mrb[60].mxu1  ;;  %v8545_v50 = vld [vmem:[%s10118_s20 + $0x34] ss:$8 sps:$4 sm:$0xff]   ;;  %v8546_v21 = vld [vmem:[%s10118_s20 + $0x40] ss:$8 sps:$4 sm:$0xff]  }
 0x27f   : > { %v3823_v8 = vmul.f32 %v10128_v58, %v3778_v7  ;;  %v3780_v44 = vpop.f32.mrb[61].mxu1  ;;  %v3911_v10 = vpack.c.bf16 %v3893_v63, %v3891_v53  ;;  %v8552_v53 = vld [vmem:[%s10118_s20 + $0x60] ss:$8 sps:$4 sm:$0xff]   ;;  %v8557_v63 = vld [vmem:[%s10118_s20 + $0x74] ss:$8 sps:$4 sm:$0xff]  }
 0x280   : > { %v3824_v11 = vmul.f32 %v10135_v60, %v3780_v44  ;;  %v3782_v12 = vpop.f32.mrb[62].mxu1  ;;  %4403 = vmatpush1.bf16.msra.mxu0 %v8519_v52  ;;  %v3912_v15 = vpack.c.bf16 %v3894_v6, %v3892_v40  ;;  %v8551_v52 = vld [vmem:[%s10118_s20 + $0x54] ss:$8 sps:$4 sm:$0xff]   ;;  %v8570_v40 = vld [vmem:[%s9763_s21 + $0x240] ss:$8 sps:$4 sm:$0xff]  }
 0x281   : > { %v3863_v17 = vadd.f32 %v10142_v62, %v3823_v8  ;;  %v3825_v49 = vmul.f32 %v10128_v58, %v3782_v12  ;;  %v3784_v18 = vpop.f32.mrb[63].mxu1  ;;  %4404 = vmatprep.subr.bf16.mxu0 %v8524_v4  ;;  %v8555_v4 = vld [vmem:[%s10118_s20 + $0x70] ss:$8 sps:$4 sm:$0xff]   ;;  %v8575_v6 = vld [vmem:[%s9763_s21 + $0x254] ss:$8 sps:$4 sm:$0xff]  }
 0x282   : > { %v3864_v22 = vadd.f32 %v10149_v36, %v3824_v11  ;;  %v3826_v24 = vmul.f32 %v10135_v60, %v3784_v18  ;;  %4199 = vmatprep.mubr.bf16.mxu0 %v3912_v15  ;;  %v10307_v7 = vld [vmem:[%s10856_s0 + $0x10] sm:$0xff]   ;;  %v8578_v44 = vld [vmem:[%s9763_s21 + $0x264] ss:$8 sps:$4 sm:$0xff]   ;;  %v10318_v12 = vld [vmem:[%s10856_s0 + $0x18] sm:$0xff]  }
 0x283   : > { %v3865_v26 = vadd.f32 %v10142_v62, %v3825_v49  ;;  %4200 = vmatmul.mubr.bf16.gmra.mrb[24].mxu0 %v3911_v10  ;;  %v3895_v30 = vmax.f32 %v3863_v17, 0.0  ;;  %v8528_v62 = vld [vmem:[%s9763_s21 + $0xe0] ss:$8 sps:$4 sm:$0xff]   ;;  %v8573_v8 = vld [vmem:[%s9763_s21 + $0x250] ss:$8 sps:$4 sm:$0xff]  }
 0x284   : > { %v3866_v28 = vadd.f32 %v10149_v36, %v3826_v24  ;;  %4405 = vmatpush1.bf16.msra.mxu0 %v8522_v16  ;;  %v3896_v33 = vmax.f32 %v3864_v22, 0.0  ;;  %v8531_v36 = vld [vmem:[%s9763_s21 + $0xf0] ss:$8 sps:$4 sm:$0xff]   ;;  %v8576_v10 = vld [vmem:[%s9763_s21 + $0x260] ss:$8 sps:$4 sm:$0xff]  }
 0x285   : > { %v3897_v58 = vmax.f32 %v3865_v26, 0.0  ;;  %4406 = vmatprep.subr.bf16.mxu0 %v8527_v19  ;;  %v8581_v11 = vld [vmem:[%s9763_s21 + $0x274] ss:$8 sps:$4 sm:$0xff]   ;;  %v8579_v15 = vld [vmem:[%s9763_s21 + $0x270] ss:$8 sps:$4 sm:$0xff]   ;;  %v10329_v18 = vld [vmem:[%s10856_s0 + $0x20] sm:$0xff]  }
 0x286   : > { %v3898_v34 = vmax.f32 %v3866_v28, 0.0  ;;  %v8584_v16 = vld [vmem:[%s9763_s21 + $0x284] ss:$8 sps:$4 sm:$0xff]   ;;  %v8582_v17 = vld [vmem:[%s9763_s21 + $0x280] ss:$8 sps:$4 sm:$0xff]  }
 0x287   : > { %v3913_v60 = vpack.c.bf16 %v3897_v58, %v3895_v30  ;;  %v8587_v49 = vld [vmem:[%s9763_s21 + $0x294] ss:$8 sps:$4 sm:$0xff]   ;;  %v8585_v19 = vld [vmem:[%s9763_s21 + $0x290] ss:$8 sps:$4 sm:$0xff]   ;;  %v8590_v22 = vld [vmem:[%s9763_s21 + $0x2a4] ss:$8 sps:$4 sm:$0xff]  }
 0x288   : > { %4407 = vmatpush1.bf16.msra.mxu0 %v8525_v29  ;;  %v3914_v37 = vpack.c.bf16 %v3898_v34, %v3896_v33  ;;  %v8588_v24 = vld [vmem:[%s9763_s21 + $0x2a0] ss:$8 sps:$4 sm:$0xff]   ;;  %v8593_v26 = vld [vmem:[%s9763_s21 + $0x2b4] ss:$8 sps:$4 sm:$0xff]   ;;  %v8591_v29 = vld [vmem:[%s9763_s21 + $0x2b0] ss:$8 sps:$4 sm:$0xff]  }
 0x289   : > { %4408 = vmatprep.subr.bf16.mxu0 %v8530_v31  ;;  %v10340_v28 = vld [vmem:[%s10856_s0 + $0x28] sm:$0xff]   ;;  %v10350_v31 = vld [vmem:[%s10856_s0 + $0x30] sm:$0xff]   ;;  %v10357_v33 = vld [vmem:[%s10856_s0 + $0x38] sm:$0xff]  }
 0x28a   : > { %4209 = vmatprep.mubr.bf16.mxu0 %v3914_v37  ;;  %v8596_v30 = vld [vmem:[%s9763_s21 + $0x2c4] ss:$8 sps:$4 sm:$0xff]   ;;  %v8594_v58 = vld [vmem:[%s9763_s21 + $0x2c0] ss:$8 sps:$4 sm:$0xff]   ;;  %v8599_v34 = vld [vmem:[%s9763_s21 + $0x2d4] ss:$8 sps:$4 sm:$0xff]  }
 0x28b   : > { %4210 = vmatmul.mubr.bf16.gmra.mrb[28].mxu0 %v3913_v60  ;;  %v8597_v60 = vld [vmem:[%s9763_s21 + $0x2d0] ss:$8 sps:$4 sm:$0xff]   ;;  %v8602_v37 = vld [vmem:[%s9763_s21 + $0x2e4] ss:$8 sps:$4 sm:$0xff]  }
 0x28c   : > { %4409 = vmatpush1.bf16.msra.mxu0 %v8528_v62  ;;  %4412 = vmatprep.mubr.bf16.mxu0 %v9640_v35  ;;  %v8542_v35 = vld [vmem:[%s10118_s20 + $0x24] ss:$8 sps:$4 sm:$0xff]   ;;  %v8600_v62 = vld [vmem:[%s9763_s21 + $0x2e0] ss:$8 sps:$4 sm:$0xff]  }
 0x28d   : > { %4410 = vmatprep.subr.bf16.mxu0 %v8533_v39  ;;  %v8605_v39 = vld [vmem:[%s9763_s21 + $0x2f4] ss:$8 sps:$4 sm:$0xff]  }
 0x290   : > { %4411 = vmatpush1.bf16.msra.mxu0 %v8531_v36  ;;  %v8603_v36 = vld [vmem:[%s9763_s21 + $0x2f0] ss:$8 sps:$4 sm:$0xff]  }
 0x291   : > { %4589 = vmatprep.subr.bf16.mxu0 %v8536_v41  ;;  %v8606_v41 = vld [vmem:[%s10370_s24] ss:$8 sps:$4 sm:$0xff]  }
 0x293   : > { %4413 = vmatmul.mubr.bf16.vlgmr.msra.gmra.mrb[0].mxu0 %v9632_v23  ;;  %v8543_v23 = vld [vmem:[%s10118_s20 + $0x30] ss:$8 sps:$4 sm:$0xff]  }
 0x294   : > { %4422 = vmatprep.mubr.bf16.mxu0 %v9675_v9  ;;  %4590 = vmatpush1.bf16.msra.mxu0 %v8534_v42  ;;  %v8548_v9 = vld [vmem:[%s10118_s20 + $0x44] ss:$8 sps:$4 sm:$0xff]  }
 0x295   : > { %4591 = vmatprep.subr.bf16.mxu0 %v8539_v43  ;;  %v8608_v42 = vld [vmem:[%s10370_s24 + $0x4] ss:$8 sps:$4 sm:$0xff]  }
 0x296   : > { %5976 = vmatprep.subr.bf16.mxu1 %v8608_v42  ;;  %v8611_v43 = vld [vmem:[%s10378_s18 + $0x4] ss:$8 sps:$4 sm:$0xff]  }
 0x297   : > { %5977 = vmatpush1.bf16.msra.mxu1 %v8606_v41 }
 0x298   : > { %4592 = vmatpush1.bf16.msra.mxu0 %v8537_v47  ;;  %v8612_v47 = vld [vmem:[%s10370_s24 + $0x10] ss:$8 sps:$4 sm:$0xff]  }
 0x299   : > { %4593 = vmatprep.subr.bf16.mxu0 %v8542_v35  ;;  %v8614_v35 = vld [vmem:[%s10370_s24 + $0x14] ss:$8 sps:$4 sm:$0xff]  }
 0x29a   : > { %5978 = vmatprep.subr.bf16.mxu1 %v8614_v35 }
 0x29b   : > { %4423 = vmatmul.mubr.bf16.gmra.mrb[4].mxu0 %v9671_v3  ;;  %v8549_v3 = vld [vmem:[%s10118_s20 + $0x50] ss:$8 sps:$4 sm:$0xff]   ;;  %5979 = vmatpush1.bf16.msra.mxu1 %v8612_v47 }
 0x29c   : > { %4432 = vmatprep.mubr.bf16.mxu0 %v9698_v45  ;;  %4594 = vmatpush1.bf16.msra.mxu0 %v8540_v48  ;;  %v8554_v45 = vld [vmem:[%s10118_s20 + $0x64] ss:$8 sps:$4 sm:$0xff]   ;;  %v8618_v48 = vld [vmem:[%s10370_s24 + $0x20] ss:$8 sps:$4 sm:$0xff]   ;;  %v8657_v47 = vld [vmem:[%s9763_s21 + $0x410] ss:$8 sps:$4 sm:$0xff]  }
 0x29d   : > { %4595 = vmatprep.subr.bf16.mxu0 %v8545_v50  ;;  %v8620_v50 = vld [vmem:[%s10370_s24 + $0x24] ss:$8 sps:$4 sm:$0xff]  }
 0x29e   : > { %5980 = vmatprep.subr.bf16.mxu1 %v8620_v50 }
 0x29f   : > { %5981 = vmatpush1.bf16.msra.mxu1 %v8618_v48 }
 0x2a0   : > { %4596 = vmatpush1.bf16.msra.mxu0 %v8543_v23  ;;  %v8624_v23 = vld [vmem:[%s10370_s24 + $0x30] ss:$8 sps:$4 sm:$0xff]  }
 0x2a1   : > { %4597 = vmatprep.subr.bf16.mxu0 %v8548_v9  ;;  %v8626_v9 = vld [vmem:[%s10370_s24 + $0x34] ss:$8 sps:$4 sm:$0xff]  }
 0x2a2   : > { %5982 = vmatprep.subr.bf16.mxu1 %v8626_v9 }
 0x2a3   : > { %4433 = vmatmul.mubr.bf16.gmra.mrb[8].mxu0 %v9694_v38  ;;  %v8560_v38 = vld [vmem:[%s9763_s21 + $0x204] ss:$8 sps:$4 sm:$0xff]   ;;  %5983 = vmatpush1.bf16.msra.mxu1 %v8624_v23 }
 0x2a4   : > { %4442 = vmatprep.mubr.bf16.mxu0 %v9733_v20  ;;  %4598 = vmatpush1.bf16.msra.mxu0 %v8546_v21  ;;  %v8563_v20 = vld [vmem:[%s9763_s21 + $0x214] ss:$8 sps:$4 sm:$0xff]   ;;  %v8630_v21 = vld [vmem:[%s10370_s24 + $0x40] ss:$8 sps:$4 sm:$0xff]   ;;  %v8662_v23 = vld [vmem:[%s9763_s21 + $0x424] ss:$8 sps:$4 sm:$0xff]  }
 0x2a5   : > { %4599 = vmatprep.subr.bf16.mxu0 %v8551_v52  ;;  %v8632_v52 = vld [vmem:[%s10370_s24 + $0x44] ss:$8 sps:$4 sm:$0xff]  }
 0x2a6   : > { %5984 = vmatprep.subr.bf16.mxu1 %v8632_v52 }
 0x2a7   : > { %5985 = vmatpush1.bf16.msra.mxu1 %v8630_v21 }
 0x2a8   : > { %4600 = vmatpush1.bf16.msra.mxu0 %v8549_v3  ;;  %v8791_v3 = vmov 1966171168  }
 0x2a9   : > { %4601 = vmatprep.subr.bf16.mxu0 %v8554_v45  ;;  %v5869_v45 = vunpack.c.l.s4 %v8791_v3  ;;  %v8609_v3 = vld [vmem:[%s10378_s18] ss:$8 sps:$4 sm:$0xff]  }
 0x2ab   : > { %4443 = vmatmul.mubr.bf16.gmra.mrb[12].mxu0 %v9727_v13  ;;  %v8558_v13 = vld [vmem:[%s9763_s21 + $0x200] ss:$8 sps:$4 sm:$0xff]  }
 0x2ac   : > { %4452 = vmatprep.mubr.bf16.mxu0 %v9776_v5  ;;  %4602 = vmatpush1.bf16.msra.mxu0 %v8552_v53  ;;  %v8561_v5 = vld [vmem:[%s9763_s21 + $0x210] ss:$8 sps:$4 sm:$0xff]  }
 0x2ad   : > { %4603 = vmatprep.subr.bf16.mxu0 %v8557_v63  ;;  %v8636_v53 = vld [vmem:[%s10370_s24 + $0x50] ss:$8 sps:$4 sm:$0xff]   ;;  %v8638_v63 = vld [vmem:[%s10370_s24 + $0x54] ss:$8 sps:$4 sm:$0xff]  }
 0x2ae   : > { %5986 = vmatprep.subr.bf16.mxu1 %v8638_v63 }
 0x2af   : > { %5987 = vmatpush1.bf16.msra.mxu1 %v8636_v53 }
 0x2b0   : > { %4604 = vmatpush1.bf16.msra.mxu0 %v8555_v4  ;;  %v5870_v4 = vunpack.c.0.s8 %v5869_v45 }
 0x2b1   : > { %5022 = vmatprep.subr.bf16.mxu0 %v8560_v38 }
 0x2b2   : > { %v10392_v38 = vsub.s32 %v5870_v4, %v9529_v14  ;;  %v8617_v4 = vld [vmem:[%s10378_s18 + $0x14] ss:$8 sps:$4 sm:$0xff]  }
 0x2b3   : > { %4453 = vmatmul.mubr.bf16.gmra.mrb[16].mxu0 %v9769_v61  ;;  %v10285_v61 = vld [vmem:[%s10856_s0] sm:$0xff]  }
 0x2b4   : > { %4462 = vmatprep.mubr.bf16.mxu0 %v9815_v57  ;;  %v8564_v57 = vld [vmem:[%s9763_s21 + $0x220] ss:$8 sps:$4 sm:$0xff]  }
 0x2bb   : > { %4463 = vmatmul.mubr.bf16.gmra.mrb[20].mxu0 %v9811_v51  ;;  %v8566_v51 = vld [vmem:[%s9763_s21 + $0x224] ss:$8 sps:$4 sm:$0xff]  }
 0x2bc   : > { %4472 = vmatprep.mubr.bf16.mxu0 %v9860_v54  ;;  %v10296_v54 = vld [vmem:[%s10856_s0 + $0x8] sm:$0xff]  }
 0x2c3   : > { %4473 = vmatmul.mubr.bf16.gmra.mrb[24].mxu0 %v9856_v46  ;;  %v8569_v46 = vld [vmem:[%s9763_s21 + $0x234] ss:$8 sps:$4 sm:$0xff]  }
 0x2c4   : > { %4482 = vmatprep.mubr.bf16.mxu0 %v9897_v32  ;;  %v8572_v32 = vld [vmem:[%s9763_s21 + $0x244] ss:$8 sps:$4 sm:$0xff]  }
 0x2cb   : > { %4483 = vmatmul.mubr.bf16.gmra.mrb[28].mxu0 %v9894_v27  ;;  %v8567_v27 = vld [vmem:[%s9763_s21 + $0x230] ss:$8 sps:$4 sm:$0xff]  }
 0x2cc   : > { %4621 = vmatprep.mubr.bf16.mxu0 %v8790_v0 }
 0x2d3   : > { %4622 = vmatmul.mubr.bf16.vlgmr.msra.gmra.mrb[32].mxu0 %v10285_v61 }
 0x2d4   : > { %4631 = vmatprep.mubr.bf16.mxu0 %v8790_v0  ;;  %5023 = vmatpush1.bf16.msra.mxu0 %v8558_v13  ;;  %v8644_v13 = vld [vmem:[%s10370_s24 + $0x64] ss:$8 sps:$4 sm:$0xff]  }
 0x2d5   : > { %5024 = vmatprep.subr.bf16.mxu0 %v8563_v20  ;;  %v7711_v20 = vld.sshfl [vmem:[%s10858_s2 + $0x1] sm:$0x1 pattern:$0x75316420]  ;;  %5988 = vmatprep.subr.bf16.mxu1 %v8644_v13 }
 0x2d8   : > { %5025 = vmatpush1.bf16.msra.mxu0 %v8561_v5  ;;  %v8642_v5 = vld [vmem:[%s10370_s24 + $0x60] ss:$8 sps:$4 sm:$0xff]  }
 0x2d9   : > { %5026 = vmatprep.subr.bf16.mxu0 %v8566_v51  ;;  %v5888_v51 = vrot.slane %v7711_v20, %v10392_v38  ;;  %5989 = vmatpush1.bf16.msra.mxu1 %v8642_v5  ;;  %v8660_v5 = vld [vmem:[%s9763_s21 + $0x420] ss:$8 sps:$4 sm:$0xff]  }
 0x2db   : > { %4632 = vmatmul.mubr.bf16.gmra.mrb[36].mxu0 %v10296_v54 }
 0x2dc   : > { %4641 = vmatprep.mubr.bf16.mxu0 %v8790_v0  ;;  %5027 = vmatpush1.bf16.msra.mxu0 %v8564_v57  ;;  %v7710_v57 = vld.sshfl [vmem:[%s10858_s2] sm:$0x1 pattern:$0x75316420] }
 0x2dd   : > { %5028 = vmatprep.subr.bf16.mxu0 %v8569_v46  ;;  %v5874_v46 = vrot.slane %v7710_v57, %v10392_v38  ;;  %v8668_v57 = vld [vmem:[%s9763_s21 + $0x434] ss:$8 sps:$4 sm:$0xff]  }
 0x2e0   : > { %5029 = vmatpush1.bf16.msra.mxu0 %v8567_v27  ;;  %v5890_v27 = vunpack.c.l.b16 %v5888_v51 }
 0x2e1   : > { %5030 = vmatprep.subr.bf16.mxu0 %v8572_v32  ;;  %v8650_v32 = vld [vmem:[%s10370_s24 + $0x74] ss:$8 sps:$4 sm:$0xff]  }
 0x2e2   : > { %5990 = vmatprep.subr.bf16.mxu1 %v8650_v32 }
 0x2e3   : > { %4642 = vmatmul.mubr.bf16.gmra.mrb[40].mxu0 %v10307_v7 }
 0x2e4   : > { %4651 = vmatprep.mubr.bf16.mxu0 %v8790_v0  ;;  %5031 = vmatpush1.bf16.msra.mxu0 %v8570_v40  ;;  %v8648_v40 = vld [vmem:[%s10370_s24 + $0x70] ss:$8 sps:$4 sm:$0xff]  }
 0x2e5   : > { %5032 = vmatprep.subr.bf16.mxu0 %v8575_v6  ;;  %v5889_v6 = vunpack.c.l.b16 %v5874_v46  ;;  %5991 = vmatpush1.bf16.msra.mxu1 %v8648_v40 }
 0x2e8   : > { %5033 = vmatpush1.bf16.msra.mxu0 %v8573_v8  ;;  %v5891_v8 = vrot.slane %v5890_v27, 7  ;;  %v8615_v27 = vld [vmem:[%s10378_s18 + $0x10] ss:$8 sps:$4 sm:$0xff]  }
 0x2e9   : > { %5034 = vmatprep.subr.bf16.mxu0 %v8578_v44 }
 0x2ea   : > { %v5893_v44 = vsel %vm5892_vm6, %v5891_v8, %v5889_v6  ;;  %v8623_v6 = vld [vmem:[%s10378_s18 + $0x24] ss:$8 sps:$4 sm:$0xff]  }
 0x2eb   : > { %4652 = vmatmul.mubr.bf16.gmra.mrb[44].mxu0 %v10318_v12 }
 0x2ec   : > { %4661 = vmatprep.mubr.bf16.mxu0 %v8790_v0  ;;  %5035 = vmatpush1.bf16.msra.mxu0 %v8576_v10  ;;  %v5894_v10 = vpack.c.b16 %v5893_v44, %v5893_v44 }
 0x2ed   : > { %5036 = vmatprep.subr.bf16.mxu0 %v8581_v11  ;;  %v4704_v11 = vsub.s32 2, %v9529_v14 }
 0x2ee   : > { %6009 = vmatmul.mubr.bf16.vlgmr.msra.gmra.mrb[64].mxu1 %v5894_v10 }
 0x2f0   : > { %5037 = vmatpush1.bf16.msra.mxu0 %v8579_v15  ;;  %v10408_v15 = vrot.slane %v10124_v56, %v4704_v11 }
 0x2f1   : > { %5038 = vmatprep.subr.bf16.mxu0 %v8584_v16  ;;  %v10411_v16 = vrot.slane %v10131_v59, %v4704_v11 }
 0x2f3   : > { %4662 = vmatmul.mubr.bf16.gmra.mrb[48].mxu0 %v10329_v18 }
 0x2f4   : > { %4671 = vmatprep.mubr.bf16.mxu0 %v8790_v0  ;;  %5039 = vmatpush1.bf16.msra.mxu0 %v8582_v17  ;;  %v10414_v17 = vrot.slane %v10138_v2, %v4704_v11 }
 0x2f5   : > { %5040 = vmatprep.subr.bf16.mxu0 %v8587_v49 }
 0x2f8   : > { %5041 = vmatpush1.bf16.msra.mxu0 %v8585_v19  ;;  %v10417_v19 = vrot.slane %v10145_v1, %v4704_v11  ;;  %v8654_v1 = vld [vmem:[%s9763_s21 + $0x400] ss:$8 sps:$4 sm:$0xff]   ;;  %v8666_v11 = vld [vmem:[%s9763_s21 + $0x430] ss:$8 sps:$4 sm:$0xff]  }
 0x2f9   : > { %5042 = vmatprep.subr.bf16.mxu0 %v8590_v22 }
 0x2fb   : > { %4672 = vmatmul.mubr.bf16.gmra.mrb[52].mxu0 %v10340_v28 }
 0x2fc   : > { %4681 = vmatprep.mubr.bf16.mxu0 %v8790_v0  ;;  %5043 = vmatpush1.bf16.msra.mxu0 %v8588_v24 }
 0x2fd   : > { %5044 = vmatprep.subr.bf16.mxu0 %v8593_v26 }
 0x300   : > { %5045 = vmatpush1.bf16.msra.mxu0 %v8591_v29 }
 0x301   : > { %5046 = vmatprep.subr.bf16.mxu0 %v8596_v30 }
 0x303   : > { %4682 = vmatmul.mubr.bf16.gmra.mrb[56].mxu0 %v10350_v31 }
 0x304   : > { %4691 = vmatprep.mubr.bf16.mxu0 %v8790_v0  ;;  %5047 = vmatpush1.bf16.msra.mxu0 %v8594_v58 }
 0x305   : > { %5048 = vmatprep.subr.bf16.mxu0 %v8599_v34 }
 0x308   : > { %5049 = vmatpush1.bf16.msra.mxu0 %v8597_v60  ;;  %v8656_v60 = vld [vmem:[%s9763_s21 + $0x404] ss:$8 sps:$4 sm:$0xff]  }
 0x309   : > { %5050 = vmatprep.subr.bf16.mxu0 %v8602_v37  ;;  %6233 = vmatprep.subr.bf16.mxu1 %v8656_v60 }
 0x30a   : > { %6234 = vmatpush1.bf16.msra.mxu1 %v8654_v1  ;;  %v8629_v1 = vld [vmem:[%s10378_s18 + $0x34] ss:$8 sps:$4 sm:$0xff]  }
 0x30b   : > { %4692 = vmatmul.mubr.bf16.gmra.mrb[60].mxu0 %v10357_v33 }
 0x30c   : > { %5051 = vmatpush1.bf16.msra.mxu0 %v8600_v62  ;;  %v8659_v62 = vld [vmem:[%s9763_s21 + $0x414] ss:$8 sps:$4 sm:$0xff]  }
 0x30d   : > { %5052 = vmatprep.subr.bf16.mxu0 %v8605_v39  ;;  %6235 = vmatprep.subr.bf16.mxu1 %v8659_v62  ;;  %v8672_v62 = vld [vmem:[%s9763_s21 + $0x440] ss:$8 sps:$4 sm:$0xff]  }
 0x30e   : > { %6236 = vmatpush1.bf16.msra.mxu1 %v8657_v47 }
 0x30f   : > { %6237 = vmatprep.subr.bf16.mxu1 %v8662_v23 }
 0x310   : > { %5053 = vmatpush1.bf16.msra.mxu0 %v8603_v36 }
 0x311   : > { %5263 = vmatprep.subr.bf16.mxu0 %v8611_v43 }
 0x312   : > { %6238 = vmatpush1.bf16.msra.mxu1 %v8660_v5 }
 0x313   : > { %6239 = vmatprep.subr.bf16.mxu1 %v8668_v57  ;;  %v8641_v57 = vld [vmem:[%s10378_s18 + $0x54] ss:$8 sps:$4 sm:$0xff]  }
 0x316   : > { %6240 = vmatpush1.bf16.msra.mxu1 %v8666_v11 }
 0x3a6   : > { %v4623_v49 = vpop.f32.mrb[32].mxu0 }
 0x3a7   : > { %v4710_v22 = vmul.f32 %v10408_v15, %v4623_v49  ;;  %v4625_v24 = vpop.f32.mrb[33].mxu0 }
 0x3a8   : > { %v4711_v26 = vmul.f32 %v10411_v16, %v4625_v24  ;;  %v4627_v29 = vpop.f32.mrb[34].mxu0 }
 0x3a9   : > { %v4750_v56 = vadd.f32 %v10414_v17, %v4710_v22  ;;  %v4712_v30 = vmul.f32 %v10408_v15, %v4627_v29  ;;  %v4629_v59 = vpop.f32.mrb[35].mxu0 }
 0x3aa   : > { %v4751_v2 = vadd.f32 %v10417_v19, %v4711_v26  ;;  %v4713_v58 = vmul.f32 %v10411_v16, %v4629_v59  ;;  %v8674_v26 = vld [vmem:[%s9763_s21 + $0x444] ss:$8 sps:$4 sm:$0xff]   ;;  %v8621_v59 = vld [vmem:[%s10378_s18 + $0x20] ss:$8 sps:$4 sm:$0xff]  }
 0x3ab   : > { %v4752_v34 = vadd.f32 %v10414_v17, %v4712_v30  ;;  %v4782_v39 = vmax.f32 %v4750_v56, 0.0  ;;  %6241 = vmatprep.subr.bf16.mxu1 %v8674_v26 }
 0x3ac   : > { %v4753_v37 = vadd.f32 %v10417_v19, %v4713_v58  ;;  %v4783_v41 = vmax.f32 %v4751_v2, 0.0  ;;  %6242 = vmatpush1.bf16.msra.mxu1 %v8672_v62 }
 0x3ad   : > { %v4784_v36 = vmax.f32 %v4752_v34, 0.0 }
 0x3ae   : > { %v4785_v42 = vmax.f32 %v4753_v37, 0.0  ;;  %v4633_v43 = vpop.f32.mrb[36].mxu0 }
 0x3af   : > { %v4814_v35 = vpack.c.bf16 %v4784_v36, %v4782_v39  ;;  %v4714_v48 = vmul.f32 %v10408_v15, %v4633_v43  ;;  %v4635_v50 = vpop.f32.mrb[37].mxu0  ;;  %v8680_v36 = vld [vmem:[%s9763_s21 + $0x454] ss:$8 sps:$4 sm:$0xff]  }
 0x3b0   : > { %v4715_v9 = vmul.f32 %v10411_v16, %v4635_v50  ;;  %v4637_v21 = vpop.f32.mrb[38].mxu0  ;;  %v4815_v52 = vpack.c.bf16 %v4785_v42, %v4783_v41  ;;  %v8627_v42 = vld [vmem:[%s10378_s18 + $0x30] ss:$8 sps:$4 sm:$0xff]   ;;  %6243 = vmatprep.subr.bf16.mxu1 %v8680_v36  ;;  %v8653_v36 = vld [vmem:[%s10378_s18 + $0x74] ss:$8 sps:$4 sm:$0xff]  }
 0x3b1   : > { %v4754_v45 = vadd.f32 %v10414_v17, %v4714_v48  ;;  %v4716_v53 = vmul.f32 %v10408_v15, %v4637_v21  ;;  %v4639_v63 = vpop.f32.mrb[39].mxu0 }
 0x3b2   : > { %v4755_v13 = vadd.f32 %v10417_v19, %v4715_v9  ;;  %v4717_v20 = vmul.f32 %v10411_v16, %v4639_v63  ;;  %5054 = vmatprep.mubr.bf16.mxu0 %v4815_v52  ;;  %v8678_v9 = vld [vmem:[%s9763_s21 + $0x450] ss:$8 sps:$4 sm:$0xff]  }
 0x3b3   : > { %v4756_v51 = vadd.f32 %v10414_v17, %v4716_v53  ;;  %5055 = vmatmul.mubr.bf16.vlgmr.msra.gmra.mrb[0].mxu0 %v4814_v35  ;;  %v4786_v32 = vmax.f32 %v4754_v45, 0.0  ;;  %v8635_v35 = vld [vmem:[%s10378_s18 + $0x44] ss:$8 sps:$4 sm:$0xff]   ;;  %6244 = vmatpush1.bf16.msra.mxu1 %v8678_v9 }
 0x3b4   : > { %v4757_v46 = vadd.f32 %v10417_v19, %v4717_v20  ;;  %5264 = vmatpush1.bf16.msra.mxu0 %v8609_v3  ;;  %v4787_v8 = vmax.f32 %v4755_v13, 0.0  ;;  %v8686_v45 = vld [vmem:[%s9763_s21 + $0x464] ss:$8 sps:$4 sm:$0xff]   ;;  %v8633_v13 = vld [vmem:[%s10378_s18 + $0x40] ss:$8 sps:$4 sm:$0xff]  }
 0x3b5   : > { %v4788_v40 = vmax.f32 %v4756_v51, 0.0  ;;  %5265 = vmatprep.subr.bf16.mxu0 %v8617_v4  ;;  %6245 = vmatprep.subr.bf16.mxu1 %v8686_v45 }
 0x3b6   : > { %v4789_v44 = vmax.f32 %v4757_v46, 0.0  ;;  %v4643_v10 = vpop.f32.mrb[40].mxu0 }
 0x3b7   : > { %v4718_v49 = vmul.f32 %v10408_v15, %v4643_v10  ;;  %v4645_v22 = vpop.f32.mrb[41].mxu0  ;;  %v4816_v24 = vpack.c.bf16 %v4788_v40, %v4786_v32  ;;  %v8684_v32 = vld [vmem:[%s9763_s21 + $0x460] ss:$8 sps:$4 sm:$0xff]  }
 0x3b8   : > { %v4719_v29 = vmul.f32 %v10411_v16, %v4645_v22  ;;  %v4647_v56 = vpop.f32.mrb[42].mxu0  ;;  %v4817_v30 = vpack.c.bf16 %v4789_v44, %v4787_v8  ;;  %5266 = vmatpush1.bf16.msra.mxu0 %v8615_v27  ;;  %v8639_v44 = vld [vmem:[%s10378_s18 + $0x50] ss:$8 sps:$4 sm:$0xff]   ;;  %6246 = vmatpush1.bf16.msra.mxu1 %v8684_v32 }
 0x3b9   : > { %v4758_v2 = vadd.f32 %v10414_v17, %v4718_v49  ;;  %v4720_v58 = vmul.f32 %v10408_v15, %v4647_v56  ;;  %v4649_v34 = vpop.f32.mrb[43].mxu0  ;;  %5267 = vmatprep.subr.bf16.mxu0 %v8623_v6  ;;  %v8692_v6 = vld [vmem:[%s9763_s21 + $0x474] ss:$8 sps:$4 sm:$0xff]   ;;  %v8647_v49 = vld [vmem:[%s10378_s18 + $0x64] ss:$8 sps:$4 sm:$0xff]  }
 0x3ba   : > { %v4759_v60 = vadd.f32 %v10417_v19, %v4719_v29  ;;  %v4721_v37 = vmul.f32 %v10411_v16, %v4649_v34  ;;  %5064 = vmatprep.mubr.bf16.mxu0 %v4817_v30  ;;  %v8690_v29 = vld [vmem:[%s9763_s21 + $0x470] ss:$8 sps:$4 sm:$0xff]   ;;  %6247 = vmatprep.subr.bf16.mxu1 %v8692_v6 }
 0x3bb   : > { %v4760_v39 = vadd.f32 %v10414_v17, %v4720_v58  ;;  %5065 = vmatmul.mubr.bf16.gmra.mrb[4].mxu0 %v4816_v24  ;;  %v4790_v43 = vmax.f32 %v4758_v2, 0.0  ;;  %v8698_v2 = vld [vmem:[%s9763_s21 + $0x484] ss:$8 sps:$4 sm:$0xff]  }
 0x3bc   : > { %v4761_v41 = vadd.f32 %v10417_v19, %v4721_v37  ;;  %5268 = vmatpush1.bf16.msra.mxu0 %v8621_v59  ;;  %v4791_v48 = vmax.f32 %v4759_v60, 0.0  ;;  %v8645_v60 = vld [vmem:[%s10378_s18 + $0x60] ss:$8 sps:$4 sm:$0xff]   ;;  %6248 = vmatpush1.bf16.msra.mxu1 %v8690_v29 }
 0x3bd   : > { %v4792_v47 = vmax.f32 %v4760_v39, 0.0  ;;  %5269 = vmatprep.subr.bf16.mxu0 %v8629_v1  ;;  %6249 = vmatprep.subr.bf16.mxu1 %v8698_v2 }
 0x3be   : > { %v4793_v50 = vmax.f32 %v4761_v41, 0.0  ;;  %v4653_v23 = vpop.f32.mrb[44].mxu0 }
 0x3bf   : > { %v4722_v21 = vmul.f32 %v10408_v15, %v4653_v23  ;;  %v4655_v52 = vpop.f32.mrb[45].mxu0  ;;  %v4818_v3 = vpack.c.bf16 %v4792_v47, %v4790_v43  ;;  %v8696_v43 = vld [vmem:[%s9763_s21 + $0x480] ss:$8 sps:$4 sm:$0xff]  }
 0x3c0   : > { %v4723_v53 = vmul.f32 %v10411_v16, %v4655_v52  ;;  %v4657_v63 = vpop.f32.mrb[46].mxu0  ;;  %v4819_v4 = vpack.c.bf16 %v4793_v50, %v4791_v48  ;;  %5270 = vmatpush1.bf16.msra.mxu0 %v8627_v42  ;;  %v8651_v50 = vld [vmem:[%s10378_s18 + $0x70] ss:$8 sps:$4 sm:$0xff]   ;;  %6250 = vmatpush1.bf16.msra.mxu1 %v8696_v43 }
 0x3c1   : > { %v4762_v20 = vadd.f32 %v10414_v17, %v4722_v21  ;;  %v4724_v5 = vmul.f32 %v10408_v15, %v4657_v63  ;;  %v4659_v51 = vpop.f32.mrb[47].mxu0  ;;  %5271 = vmatprep.subr.bf16.mxu0 %v8635_v35  ;;  %v8704_v35 = vld [vmem:[%s9763_s21 + $0x494] ss:$8 sps:$4 sm:$0xff]   ;;  %v8665_v21 = vld [vmem:[%s9763_s21 + $0x304] ss:$8 sps:$4 sm:$0xff]  }
 0x3c2   : > { %v4763_v46 = vadd.f32 %v10417_v19, %v4723_v53  ;;  %v4725_v27 = vmul.f32 %v10411_v16, %v4659_v51  ;;  %5074 = vmatprep.mubr.bf16.mxu0 %v4819_v4  ;;  %v8702_v53 = vld [vmem:[%s9763_s21 + $0x490] ss:$8 sps:$4 sm:$0xff]   ;;  %6251 = vmatprep.subr.bf16.mxu1 %v8704_v35 }
 0x3c3   : > { %v4764_v40 = vadd.f32 %v10414_v17, %v4724_v5  ;;  %5075 = vmatmul.mubr.bf16.gmra.mrb[8].mxu0 %v4818_v3  ;;  %v4794_v10 = vmax.f32 %v4762_v20, 0.0  ;;  %v8710_v20 = vld [vmem:[%s9763_s21 + $0x4a4] ss:$8 sps:$4 sm:$0xff]  }
 0x3c4   : > { %v4765_v8 = vadd.f32 %v10417_v19, %v4725_v27  ;;  %5272 = vmatpush1.bf16.msra.mxu0 %v8633_v13  ;;  %v4795_v22 = vmax.f32 %v4763_v46, 0.0  ;;  %6252 = vmatpush1.bf16.msra.mxu1 %v8702_v53 }
 0x3c5   : > { %v4796_v11 = vmax.f32 %v4764_v40, 0.0  ;;  %5273 = vmatprep.subr.bf16.mxu0 %v8641_v57  ;;  %6253 = vmatprep.subr.bf16.mxu1 %v8710_v20 }
 0x3c6   : > { %v4797_v24 = vmax.f32 %v4765_v8, 0.0  ;;  %v4663_v26 = vpop.f32.mrb[48].mxu0  ;;  %v8708_v8 = vld [vmem:[%s9763_s21 + $0x4a0] ss:$8 sps:$4 sm:$0xff]  }
 0x3c7   : > { %v4726_v56 = vmul.f32 %v10408_v15, %v4663_v26  ;;  %v4665_v30 = vpop.f32.mrb[49].mxu0  ;;  %v4820_v59 = vpack.c.bf16 %v4796_v11, %v4794_v10  ;;  %v8716_v10 = vld [vmem:[%s9763_s21 + $0x4b4] ss:$8 sps:$4 sm:$0xff]  }
 0x3c8   : > { %v4727_v58 = vmul.f32 %v10411_v16, %v4665_v30  ;;  %v4667_v34 = vpop.f32.mrb[50].mxu0  ;;  %v4821_v1 = vpack.c.bf16 %v4797_v24, %v4795_v22  ;;  %5274 = vmatpush1.bf16.msra.mxu0 %v8639_v44  ;;  %6254 = vmatpush1.bf16.msra.mxu1 %v8708_v8 }
 0x3c9   : > { %v4766_v37 = vadd.f32 %v10414_v17, %v4726_v56  ;;  %v4728_v62 = vmul.f32 %v10408_v15, %v4667_v34  ;;  %v4669_v39 = vpop.f32.mrb[51].mxu0  ;;  %5275 = vmatprep.subr.bf16.mxu0 %v8647_v49  ;;  %v8714_v56 = vld [vmem:[%s9763_s21 + $0x4b0] ss:$8 sps:$4 sm:$0xff]   ;;  %6255 = vmatprep.subr.bf16.mxu1 %v8716_v10 }
 0x3ca   : > { %v4767_v41 = vadd.f32 %v10417_v19, %v4727_v58  ;;  %v4729_v42 = vmul.f32 %v10411_v16, %v4669_v39  ;;  %5084 = vmatprep.mubr.bf16.mxu0 %v4821_v1  ;;  %v8722_v58 = vld [vmem:[%s9763_s21 + $0x4c4] ss:$8 sps:$4 sm:$0xff]  }
 0x3cb   : > { %v4768_v47 = vadd.f32 %v10414_v17, %v4728_v62  ;;  %5085 = vmatmul.mubr.bf16.gmra.mrb[12].mxu0 %v4820_v59  ;;  %v4798_v23 = vmax.f32 %v4766_v37, 0.0 }
 0x3cc   : > { %v4769_v48 = vadd.f32 %v10417_v19, %v4729_v42  ;;  %5276 = vmatpush1.bf16.msra.mxu0 %v8645_v60  ;;  %v4799_v52 = vmax.f32 %v4767_v41, 0.0  ;;  %6256 = vmatpush1.bf16.msra.mxu1 %v8714_v56  ;;  %v8720_v42 = vld [vmem:[%s9763_s21 + $0x4c0] ss:$8 sps:$4 sm:$0xff]   ;;  %v8683_v56 = vld [vmem:[%s9763_s21 + $0x334] ss:$8 sps:$4 sm:$0xff]  }
 0x3cd   : > { %v4800_v9 = vmax.f32 %v4768_v47, 0.0  ;;  %5277 = vmatprep.subr.bf16.mxu0 %v8653_v36  ;;  %6257 = vmatprep.subr.bf16.mxu1 %v8722_v58  ;;  %v8728_v47 = vld [vmem:[%s9763_s21 + $0x4d4] ss:$8 sps:$4 sm:$0xff]   ;;  %v8701_v58 = vld [vmem:[%s9763_s21 + $0x364] ss:$8 sps:$4 sm:$0xff]  }
 0x3ce   : > { %v4801_v3 = vmax.f32 %v4769_v48, 0.0  ;;  %v4673_v45 = vpop.f32.mrb[52].mxu0 }
 0x3cf   : > { %v4730_v63 = vmul.f32 %v10408_v15, %v4673_v45  ;;  %v4675_v4 = vpop.f32.mrb[53].mxu0  ;;  %v4822_v13 = vpack.c.bf16 %v4800_v9, %v4798_v23 }
 0x3d0   : > { %v4731_v5 = vmul.f32 %v10411_v16, %v4675_v4  ;;  %v4677_v51 = vpop.f32.mrb[54].mxu0  ;;  %v4823_v57 = vpack.c.bf16 %v4801_v3, %v4799_v52  ;;  %5278 = vmatpush1.bf16.msra.mxu0 %v8651_v50  ;;  %6258 = vmatpush1.bf16.msra.mxu1 %v8720_v42  ;;  %v8726_v52 = vld [vmem:[%s9763_s21 + $0x4d0] ss:$8 sps:$4 sm:$0xff]   ;;  %v8737_v42 = vld [vmem:[%s9763_s21 + $0x3c4] ss:$8 sps:$4 sm:$0xff]  }
 0x3d1   : > { %v4770_v46 = vadd.f32 %v10414_v17, %v4730_v63  ;;  %v4732_v27 = vmul.f32 %v10408_v15, %v4677_v51  ;;  %v4679_v32 = vpop.f32.mrb[55].mxu0  ;;  %5696 = vmatprep.subr.bf16.mxu0 %v8665_v21  ;;  %6259 = vmatprep.subr.bf16.mxu1 %v8728_v47  ;;  %v8734_v63 = vld [vmem:[%s9763_s21 + $0x4e4] ss:$8 sps:$4 sm:$0xff]  }
 0x3d2   : > { %v4771_v40 = vadd.f32 %v10417_v19, %v4731_v5  ;;  %v4733_v6 = vmul.f32 %v10411_v16, %v4679_v32  ;;  %5094 = vmatprep.mubr.bf16.mxu0 %v4823_v57  ;;  %v8732_v32 = vld [vmem:[%s9763_s21 + $0x4e0] ss:$8 sps:$4 sm:$0xff]  }
 0x3d3   : > { %v4772_v44 = vadd.f32 %v10414_v17, %v4732_v27  ;;  %5095 = vmatmul.mubr.bf16.gmra.mrb[16].mxu0 %v4822_v13  ;;  %v4802_v49 = vmax.f32 %v4770_v46, 0.0  ;;  %v10574_v47 = vld [vmem:[%s9536_s30] sm:$0x3f] }
 0x3d4   : > { %v4773_v11 = vadd.f32 %v10417_v19, %v4733_v6  ;;  %v4803_v24 = vmax.f32 %v4771_v40, 0.0  ;;  %6260 = vmatpush1.bf16.msra.mxu1 %v8726_v52  ;;  %v8740_v6 = vld [vmem:[%s9763_s21 + $0x4f4] ss:$8 sps:$4 sm:$0xff]  }
 0x3d5   : > { %v4804_v22 = vmax.f32 %v4772_v44, 0.0  ;;  %6261 = vmatprep.subr.bf16.mxu1 %v8734_v63 }
 0x3d6   : > { %v4805_v26 = vmax.f32 %v4773_v11, 0.0  ;;  %v4683_v29 = vpop.f32.mrb[56].mxu0 }
 0x3d7   : > { %v4734_v30 = vmul.f32 %v10408_v15, %v4683_v29  ;;  %v4685_v59 = vpop.f32.mrb[57].mxu0  ;;  %v4824_v2 = vpack.c.bf16 %v4804_v22, %v4802_v49  ;;  %v8675_v29 = vld [vmem:[%s9763_s21 + $0x320] ss:$8 sps:$4 sm:$0xff]  }
 0x3d8   : > { %v4735_v34 = vmul.f32 %v10411_v16, %v4685_v59  ;;  %v4687_v1 = vpop.f32.mrb[58].mxu0  ;;  %v4825_v60 = vpack.c.bf16 %v4805_v26, %v4803_v24  ;;  %6262 = vmatpush1.bf16.msra.mxu1 %v8732_v32  ;;  %v8669_v24 = vld [vmem:[%s9763_s21 + $0x310] ss:$8 sps:$4 sm:$0xff]   ;;  %v8677_v26 = vld [vmem:[%s9763_s21 + $0x324] ss:$8 sps:$4 sm:$0xff]  }
 0x3d9   : > { %v4774_v37 = vadd.f32 %v10414_v17, %v4734_v30  ;;  %v4736_v62 = vmul.f32 %v10408_v15, %v4687_v1  ;;  %v4689_v39 = vpop.f32.mrb[59].mxu0  ;;  %6263 = vmatprep.subr.bf16.mxu1 %v8740_v6  ;;  %v8689_v30 = vld [vmem:[%s9763_s21 + $0x344] ss:$8 sps:$4 sm:$0xff]   ;;  %v8687_v59 = vld [vmem:[%s9763_s21 + $0x340] ss:$8 sps:$4 sm:$0xff]  }
 0x3da   : > { %v4775_v36 = vadd.f32 %v10417_v19, %v4735_v34  ;;  %v4737_v41 = vmul.f32 %v10411_v16, %v4689_v39  ;;  %5104 = vmatprep.mubr.bf16.mxu0 %v4825_v60  ;;  %v8699_v34 = vld [vmem:[%s9763_s21 + $0x360] ss:$8 sps:$4 sm:$0xff]   ;;  %v8707_v1 = vld [vmem:[%s9763_s21 + $0x374] ss:$8 sps:$4 sm:$0xff]   ;;  %v8713_v60 = vld [vmem:[%s9763_s21 + $0x384] ss:$8 sps:$4 sm:$0xff]  }
 0x3db   : > { %v4776_v43 = vadd.f32 %v10414_v17, %v4736_v62  ;;  %5105 = vmatmul.mubr.bf16.gmra.mrb[20].mxu0 %v4824_v2  ;;  %v4806_v48 = vmax.f32 %v4774_v37, 0.0  ;;  %v8695_v2 = vld [vmem:[%s9763_s21 + $0x354] ss:$8 sps:$4 sm:$0xff]   ;;  %v8711_v37 = vld [vmem:[%s9763_s21 + $0x380] ss:$8 sps:$4 sm:$0xff]  }
 0x3dc   : > { %v4777_v35 = vadd.f32 %v10417_v19, %v4737_v41  ;;  %v4807_v23 = vmax.f32 %v4775_v36, 0.0  ;;  %v8719_v62 = vld [vmem:[%s9763_s21 + $0x394] ss:$8 sps:$4 sm:$0xff]   ;;  %v8725_v39 = vld [vmem:[%s9763_s21 + $0x3a4] ss:$8 sps:$4 sm:$0xff]  }
 0x3dd   : > { %v4808_v50 = vmax.f32 %v4776_v43, 0.0  ;;  %v8723_v36 = vld [vmem:[%s9763_s21 + $0x3a0] ss:$8 sps:$4 sm:$0xff]   ;;  %v8731_v41 = vld [vmem:[%s9763_s21 + $0x3b4] ss:$8 sps:$4 sm:$0xff]  }
 0x3de   : > { %v4809_v9 = vmax.f32 %v4777_v35, 0.0  ;;  %v4693_v21 = vpop.f32.mrb[60].mxu0  ;;  %v8735_v43 = vld [vmem:[%s9763_s21 + $0x3c0] ss:$8 sps:$4 sm:$0xff]   ;;  %v8747_v6 = vld [vmem:[%s9763_s21 + $0x3f0] ss:$8 sps:$4 sm:$0xff]  }
 0x3df   : > { %v4738_v3 = vmul.f32 %v10408_v15, %v4693_v21  ;;  %v4695_v45 = vpop.f32.mrb[61].mxu0  ;;  %v4826_v53 = vpack.c.bf16 %v4808_v50, %v4806_v48  ;;  %v10578_v48 = vld [vmem:[%s9536_s30 + $0x8] sm:$0x3f] }
 0x3e0   : > { %v4739_v4 = vmul.f32 %v10411_v16, %v4695_v45  ;;  %v4697_v13 = vpop.f32.mrb[62].mxu0  ;;  %v4827_v20 = vpack.c.bf16 %v4809_v9, %v4807_v23  ;;  %v10582_v23 = vld [vmem:[%s9560_s15] sm:$0x3f]  ;;  %v10586_v9 = vld [vmem:[%s9560_s15 + $0x8] sm:$0x3f]  ;;  %s609_s15 = scalar_lea.vmem %s10868_s12, %s10879_s26 }
 0x3e1   : > { %v4778_v5 = vadd.f32 %v10414_v17, %v4738_v3  ;;  %v4740_v51 = vmul.f32 %v10408_v15, %v4697_v13  ;;  %v4699_v57 = vpop.f32.mrb[63].mxu0  ;;  %v8744_v32 = vld [vmem:[%s9763_s21 + $0x3e0] ss:$8 sps:$4 sm:$0xff]  }
 0x3e2   : > { %v4779_v46 = vadd.f32 %v10417_v19, %v4739_v4  ;;  %v4741_v27 = vmul.f32 %v10411_v16, %v4699_v57  ;;  %5114 = vmatprep.mubr.bf16.mxu0 %v4827_v20  ;;  %v8738_v16 = vld [vmem:[%s9763_s21 + $0x4f0] ss:$8 sps:$4 sm:$0xff]   ;;  %v8743_v57 = vld [vmem:[%s9763_s21 + $0x3d4] ss:$8 sps:$4 sm:$0xff]  }
 0x3e3   : > { %v4780_v40 = vadd.f32 %v10414_v17, %v4740_v51  ;;  %5115 = vmatmul.mubr.bf16.gmra.mrb[24].mxu0 %v4826_v53  ;;  %v4810_v44 = vmax.f32 %v4778_v5, 0.0  ;;  %6264 = vmatpush1.bf16.msra.mxu1 %v8738_v16  ;;  %v8663_v17 = vld [vmem:[%s9763_s21 + $0x300] ss:$8 sps:$4 sm:$0xff]  }
 0x3e4   : > { %v4781_v8 = vadd.f32 %v10417_v19, %v4741_v27  ;;  %v4811_v10 = vmax.f32 %v4779_v46, 0.0  ;;  %v8671_v19 = vld [vmem:[%s9763_s21 + $0x314] ss:$8 sps:$4 sm:$0xff]   ;;  %v8741_v46 = vld [vmem:[%s9763_s21 + $0x3d0] ss:$8 sps:$4 sm:$0xff]  }
 0x3e5   : > { %v4812_v15 = vmax.f32 %v4780_v40, 0.0  ;;  %v8746_v27 = vld [vmem:[%s9763_s21 + $0x3e4] ss:$8 sps:$4 sm:$0xff]   ;;  %v8749_v40 = vld [vmem:[%s9763_s21 + $0x3f4] ss:$8 sps:$4 sm:$0xff]  }
 0x3e6   : > { %v4813_v11 = vmax.f32 %v4781_v8, 0.0  ;;  %v8750_v8 = vld [vmem:[%s9415_s14 + $0x40] sm:$0xff]  }
 0x3e7   : > { %v4828_v49 = vpack.c.bf16 %v4812_v15, %v4810_v44  ;;  %v5378_v44 = vsub.s32 3, %v9529_v14 }
 0x3e8   : > { %v4829_v22 = vpack.c.bf16 %v4813_v11, %v4811_v10 }
 0x3e9   : > { %v10598_v15 = vrot.slane %v10574_v47, %v5378_v44  ;;  %v10601_v10 = vrot.slane %v10578_v48, %v5378_v44  ;;  %v10604_v11 = vrot.slane %v10582_v23, %v5378_v44 }
 0x3ea   : > { %5124 = vmatprep.mubr.bf16.mxu0 %v4829_v22 }
 0x3eb   : > { %5125 = vmatmul.mubr.bf16.gmra.mrb[28].mxu0 %v4828_v49  ;;  %v10607_v49 = vrot.slane %v10586_v9, %v5378_v44 }
 0x3ec   : > { %5295 = vmatprep.mubr.bf16.mxu0 %v8790_v0 }
 0x3f3   : > { %5296 = vmatmul.mubr.bf16.vlgmr.msra.gmra.mrb[64].mxu0 %v10285_v61  ;;  %v8681_v61 = vld [vmem:[%s9763_s21 + $0x330] ss:$8 sps:$4 sm:$0xff]  }
 0x3f4   : > { %5305 = vmatprep.mubr.bf16.mxu0 %v8790_v0  ;;  %5697 = vmatpush1.bf16.msra.mxu0 %v8663_v17 }
 0x3f5   : > { %5698 = vmatprep.subr.bf16.mxu0 %v8671_v19 }
 0x3f8   : > { %5699 = vmatpush1.bf16.msra.mxu0 %v8669_v24 }
 0x3f9   : > { %5700 = vmatprep.subr.bf16.mxu0 %v8677_v26 }
 0x3fb   : > { %5306 = vmatmul.mubr.bf16.gmra.mrb[68].mxu0 %v10296_v54  ;;  %v8693_v54 = vld [vmem:[%s9763_s21 + $0x350] ss:$8 sps:$4 sm:$0xff]  }
 0x3fc   : > { %5315 = vmatprep.mubr.bf16.mxu0 %v8790_v0  ;;  %5701 = vmatpush1.bf16.msra.mxu0 %v8675_v29 }
 0x3fd   : > { %5702 = vmatprep.subr.bf16.mxu0 %v8683_v56 }
 0x400   : > { %5703 = vmatpush1.bf16.msra.mxu0 %v8681_v61 }
 0x401   : > { %5704 = vmatprep.subr.bf16.mxu0 %v8689_v30 }
 0x403   : > { %5316 = vmatmul.mubr.bf16.gmra.mrb[72].mxu0 %v10307_v7  ;;  %v8705_v7 = vld [vmem:[%s9763_s21 + $0x370] ss:$8 sps:$4 sm:$0xff]  }
 0x404   : > { %5325 = vmatprep.mubr.bf16.mxu0 %v8790_v0  ;;  %5705 = vmatpush1.bf16.msra.mxu0 %v8687_v59 }
 0x405   : > { %5706 = vmatprep.subr.bf16.mxu0 %v8695_v2 }
 0x408   : > { %5707 = vmatpush1.bf16.msra.mxu0 %v8693_v54 }
 0x409   : > { %5708 = vmatprep.subr.bf16.mxu0 %v8701_v58 }
 0x40b   : > { %5326 = vmatmul.mubr.bf16.gmra.mrb[76].mxu0 %v10318_v12  ;;  %v8717_v12 = vld [vmem:[%s9763_s21 + $0x390] ss:$8 sps:$4 sm:$0xff]  }
 0x40c   : > { %5335 = vmatprep.mubr.bf16.mxu0 %v8790_v0  ;;  %5709 = vmatpush1.bf16.msra.mxu0 %v8699_v34 }
 0x40d   : > { %5710 = vmatprep.subr.bf16.mxu0 %v8707_v1 }
 0x410   : > { %5711 = vmatpush1.bf16.msra.mxu0 %v8705_v7 }
 0x411   : > { %5712 = vmatprep.subr.bf16.mxu0 %v8713_v60 }
 0x413   : > { %5336 = vmatmul.mubr.bf16.gmra.mrb[80].mxu0 %v10329_v18  ;;  %v8729_v18 = vld [vmem:[%s9763_s21 + $0x3b0] ss:$8 sps:$4 sm:$0xff]   ;;  %s7802_s21 = sshll.u32 %s10879_s26, 6 }
 0x414   : > { %5345 = vmatprep.mubr.bf16.mxu0 %v8790_v0  ;;  %5713 = vmatpush1.bf16.msra.mxu0 %v8711_v37  ;;  %s10829_s29 = scalar_lea.vmem %s10869_s13, %s7802_s21 }
 0x415   : > { %5714 = vmatprep.subr.bf16.mxu0 %v8719_v62 }
 0x418   : > { %5715 = vmatpush1.bf16.msra.mxu0 %v8717_v12 }
 0x419   : > { %5716 = vmatprep.subr.bf16.mxu0 %v8725_v39 }
 0x41b   : > { %5346 = vmatmul.mubr.bf16.gmra.mrb[84].mxu0 %v10340_v28  ;;  %v6019_v28 = vsub.s32 4, %v9529_v14 }
 0x41c   : > { %5355 = vmatprep.mubr.bf16.mxu0 %v8790_v0  ;;  %5717 = vmatpush1.bf16.msra.mxu0 %v8723_v36 }
 0x41d   : > { %5718 = vmatprep.subr.bf16.mxu0 %v8731_v41  ;;  %v6020_v35 = vrot.slane %v10574_v47, %v6019_v28  ;;  %v6024_v50 = vrot.slane %v10578_v48, %v6019_v28  ;;  %v8751_v41 = vld [vmem:[%s9415_s14] sm:$0xff]  }
 0x420   : > { %5719 = vmatpush1.bf16.msra.mxu0 %v8729_v18 }
 0x421   : > { %5720 = vmatprep.subr.bf16.mxu0 %v8737_v42 }
 0x423   : > { %5356 = vmatmul.mubr.bf16.gmra.mrb[88].mxu0 %v10350_v31  ;;  %v6030_v31 = vrot.slane %v10582_v23, %v6019_v28 }
 0x424   : > { %5365 = vmatprep.mubr.bf16.mxu0 %v8790_v0  ;;  %5721 = vmatpush1.bf16.msra.mxu0 %v8735_v43  ;;  %v6010_v0 = vpop.f32.mrb[64].mxu1 }
 0x425   : > { %v6025_v21 = vmul.f32 %v6020_v35, %v6010_v0  ;;  %v6012_v52 = vpop.f32.mrb[65].mxu1  ;;  %5722 = vmatprep.subr.bf16.mxu0 %v8743_v57 }
 0x426   : > { %v6026_v3 = vmul.f32 %v6024_v50, %v6012_v52  ;;  %v6014_v45 = vpop.f32.mrb[66].mxu1 }
 0x427   : > { %v6035_v53 = vadd.f32 %v6030_v31, %v6025_v21  ;;  %v6015_v63 = vpop.f32.mrb[67].mxu1 }
 0x428   : > { %5723 = vmatpush1.bf16.msra.mxu0 %v8741_v46  ;;  %v8755_v46 = vld [vmem:[%s9415_s14 + $0x10] sm:$0xff]  }
 0x429   : > { %v6037_v13 = vmax.f32 %v6035_v53, 0.0  ;;  %5724 = vmatprep.subr.bf16.mxu0 %v8746_v27 }
 0x42b   : > { %5366 = vmatmul.mubr.bf16.gmra.mrb[92].mxu0 %v10357_v33  ;;  %v6034_v33 = vrot.slane %v10586_v9, %v6019_v28  ;;  %v6039_v5 = vpack.c.bf16 %v6037_v13, %v6037_v13  ;;  %v8752_v28 = vld [vmem:[%s9415_s14 + $0x48] sm:$0xff]  }
 0x42c   : > { %5725 = vmatpush1.bf16.msra.mxu0 %v8744_v32 }
 0x42d   : > { %v6036_v4 = vadd.f32 %v6034_v33, %v6026_v3  ;;  %5726 = vmatprep.subr.bf16.mxu0 %v8749_v40  ;;  %v8753_v33 = vld [vmem:[%s9415_s14 + $0x8] sm:$0xff]   ;;  %v8754_v3 = vld [vmem:[%s9415_s14 + $0x50] sm:$0xff]  }
 0x42f   : > { %v6038_v20 = vmax.f32 %v6036_v4, 0.0 }
 0x430   : > { %5727 = vmatpush1.bf16.msra.mxu0 %v8747_v6  ;;  %v8756_v6 = vld [vmem:[%s9415_s14 + $0x58] sm:$0xff]  }
 0x431   : > { %v6040_v51 = vpack.c.bf16 %v6038_v20, %v6038_v20  ;;  %7866 = vmatprep.subr.bf16.mxu0 %v8750_v8 }
 0x433   : > { %6265 = vmatprep.mubr.bf16.mxu1 %v6040_v51 }
 0x434   : > { %6266 = vmatmul.mubr.bf16.vlgmr.msra.gmra.mrb[68].mxu1 %v6039_v5 }
 0x4c6   : > { %v5297_v16 = vpop.f32.mrb[64].mxu0 }
 0x4c7   : > { %v5384_v22 = vmul.f32 %v10598_v15, %v5297_v16  ;;  %v5299_v17 = vpop.f32.mrb[65].mxu0 }
 0x4c8   : > { %v5385_v19 = vmul.f32 %v10601_v10, %v5299_v17  ;;  %v5301_v24 = vpop.f32.mrb[66].mxu0  ;;  %v8757_v17 = vld [vmem:[%s9415_s14 + $0x18] sm:$0xff]  }
 0x4c9   : > { %v5424_v26 = vadd.f32 %v10604_v11, %v5384_v22  ;;  %v5386_v29 = vmul.f32 %v10598_v15, %v5301_v24  ;;  %v5303_v56 = vpop.f32.mrb[67].mxu0 }
 0x4ca   : > { %v5425_v61 = vadd.f32 %v10607_v49, %v5385_v19  ;;  %v5387_v30 = vmul.f32 %v10601_v10, %v5303_v56 }
 0x4cb   : > { %v5426_v59 = vadd.f32 %v10604_v11, %v5386_v29  ;;  %v5456_v54 = vmax.f32 %v5424_v26, 0.0  ;;  %v8758_v26 = vld [vmem:[%s9415_s14 + $0x60] sm:$0xff]  }
 0x4cc   : > { %v5427_v2 = vadd.f32 %v10607_v49, %v5387_v30  ;;  %v5457_v34 = vmax.f32 %v5425_v61, 0.0 }
 0x4cd   : > { %v5458_v58 = vmax.f32 %v5426_v59, 0.0 }
 0x4ce   : > { %v5459_v1 = vmax.f32 %v5427_v2, 0.0  ;;  %v5307_v7 = vpop.f32.mrb[68].mxu0 }
 0x4cf   : > { %v5488_v60 = vpack.c.bf16 %v5458_v58, %v5456_v54  ;;  %v5388_v37 = vmul.f32 %v10598_v15, %v5307_v7  ;;  %v5309_v62 = vpop.f32.mrb[69].mxu0 }
 0x4d0   : > { %v5389_v12 = vmul.f32 %v10601_v10, %v5309_v62  ;;  %v5311_v39 = vpop.f32.mrb[70].mxu0  ;;  %v5489_v36 = vpack.c.bf16 %v5459_v1, %v5457_v34  ;;  %v8759_v1 = vld [vmem:[%s9415_s14 + $0x20] sm:$0xff]   ;;  %v8760_v62 = vld [vmem:[%s9415_s14 + $0x68] sm:$0xff]  }
 0x4d1   : > { %v5428_v18 = vadd.f32 %v10604_v11, %v5388_v37  ;;  %v5390_v42 = vmul.f32 %v10598_v15, %v5311_v39  ;;  %v5313_v43 = vpop.f32.mrb[71].mxu0 }
 0x4d2   : > { %v5429_v35 = vadd.f32 %v10607_v49, %v5389_v12  ;;  %v5391_v50 = vmul.f32 %v10601_v10, %v5313_v43  ;;  %5728 = vmatprep.mubr.bf16.mxu0 %v5489_v36 }
 0x4d3   : > { %v5430_v31 = vadd.f32 %v10604_v11, %v5390_v42  ;;  %5729 = vmatmul.mubr.bf16.vlgmr.msra.gmra.mrb[0].mxu0 %v5488_v60  ;;  %v5460_v21 = vmax.f32 %v5428_v18, 0.0  ;;  %v8761_v18 = vld [vmem:[%s9415_s14 + $0x28] sm:$0xff]  }
 0x4d4   : > { %v5431_v0 = vadd.f32 %v10607_v49, %v5391_v50  ;;  %7867 = vmatpush3.bf16.msra.mxu0 %v8751_v41  ;;  %v5461_v45 = vmax.f32 %v5429_v35, 0.0 }
 0x4d5   : > { %v5462_v52 = vmax.f32 %v5430_v31, 0.0  ;;  %7868 = vmatprep.subr.bf16.mxu0 %v8752_v28  ;;  %v8762_v28 = vld [vmem:[%s9415_s14 + $0x70] sm:$0xff]  }
 0x4d6   : > { %v5463_v53 = vmax.f32 %v5431_v0, 0.0  ;;  %v5317_v63 = vpop.f32.mrb[72].mxu0 }
 0x4d7   : > { %v5392_v4 = vmul.f32 %v10598_v15, %v5317_v63  ;;  %v5319_v13 = vpop.f32.mrb[73].mxu0  ;;  %v5490_v20 = vpack.c.bf16 %v5462_v52, %v5460_v21 }
 0x4d8   : > { %v5393_v5 = vmul.f32 %v10601_v10, %v5319_v13  ;;  %v5321_v51 = vpop.f32.mrb[74].mxu0  ;;  %v5491_v57 = vpack.c.bf16 %v5463_v53, %v5461_v45  ;;  %7869 = vmatpush3.bf16.msra.mxu0 %v8753_v33 }
 0x4d9   : > { %v5432_v27 = vadd.f32 %v10604_v11, %v5392_v4  ;;  %v5394_v32 = vmul.f32 %v10598_v15, %v5321_v51  ;;  %v5323_v40 = vpop.f32.mrb[75].mxu0  ;;  %7870 = vmatprep.subr.bf16.mxu0 %v8754_v3 }
 0x4da   : > { %v5433_v8 = vadd.f32 %v10607_v49, %v5393_v5  ;;  %v5395_v44 = vmul.f32 %v10601_v10, %v5323_v40  ;;  %5738 = vmatprep.mubr.bf16.mxu0 %v5491_v57 }
 0x4db   : > { %v5434_v16 = vadd.f32 %v10604_v11, %v5394_v32  ;;  %5739 = vmatmul.mubr.bf16.gmra.mrb[4].mxu0 %v5490_v20  ;;  %v5464_v19 = vmax.f32 %v5432_v27, 0.0 }
 0x4dc   : > { %v5435_v22 = vadd.f32 %v10607_v49, %v5395_v44  ;;  %7871 = vmatpush3.bf16.msra.mxu0 %v8755_v46  ;;  %v5465_v29 = vmax.f32 %v5433_v8, 0.0 }
 0x4dd   : > { %v5466_v24 = vmax.f32 %v5434_v16, 0.0  ;;  %7872 = vmatprep.subr.bf16.mxu0 %v8756_v6 }
 0x4de   : > { %v5467_v56 = vmax.f32 %v5435_v22, 0.0  ;;  %v5327_v61 = vpop.f32.mrb[76].mxu0 }
 0x4df   : > { %v5396_v30 = vmul.f32 %v10598_v15, %v5327_v61  ;;  %v5329_v59 = vpop.f32.mrb[77].mxu0  ;;  %v5492_v2 = vpack.c.bf16 %v5466_v24, %v5464_v19 }
 0x4e0   : > { %v5397_v54 = vmul.f32 %v10601_v10, %v5329_v59  ;;  %v5331_v58 = vpop.f32.mrb[78].mxu0  ;;  %v5493_v34 = vpack.c.bf16 %v5467_v56, %v5465_v29  ;;  %7873 = vmatpush3.bf16.msra.mxu0 %v8757_v17 }
 0x4e1   : > { %v5436_v7 = vadd.f32 %v10604_v11, %v5396_v30  ;;  %v5398_v60 = vmul.f32 %v10598_v15, %v5331_v58  ;;  %v5333_v37 = vpop.f32.mrb[79].mxu0  ;;  %7874 = vmatprep.subr.bf16.mxu0 %v8758_v26 }
 0x4e2   : > { %v5437_v12 = vadd.f32 %v10607_v49, %v5397_v54  ;;  %v5399_v39 = vmul.f32 %v10601_v10, %v5333_v37  ;;  %5748 = vmatprep.mubr.bf16.mxu0 %v5493_v34 }
 0x4e3   : > { %v5438_v36 = vadd.f32 %v10604_v11, %v5398_v60  ;;  %5749 = vmatmul.mubr.bf16.gmra.mrb[8].mxu0 %v5492_v2  ;;  %v5468_v42 = vmax.f32 %v5436_v7, 0.0 }
 0x4e4   : > { %v5439_v41 = vadd.f32 %v10607_v49, %v5399_v39  ;;  %7875 = vmatpush3.bf16.msra.mxu0 %v8759_v1  ;;  %v5469_v35 = vmax.f32 %v5437_v12, 0.0 }
 0x4e5   : > { %v5470_v43 = vmax.f32 %v5438_v36, 0.0  ;;  %7876 = vmatprep.subr.bf16.mxu0 %v8760_v62 }
 0x4e6   : > { %v5471_v50 = vmax.f32 %v5439_v41, 0.0  ;;  %v5337_v31 = vpop.f32.mrb[80].mxu0 }
 0x4e7   : > { %v5400_v0 = vmul.f32 %v10598_v15, %v5337_v31  ;;  %v5339_v33 = vpop.f32.mrb[81].mxu0  ;;  %v5494_v21 = vpack.c.bf16 %v5470_v43, %v5468_v42 }
 0x4e8   : > { %v5401_v52 = vmul.f32 %v10601_v10, %v5339_v33  ;;  %v5341_v3 = vpop.f32.mrb[82].mxu0  ;;  %v5495_v45 = vpack.c.bf16 %v5471_v50, %v5469_v35  ;;  %7877 = vmatpush3.bf16.msra.mxu0 %v8761_v18 }
 0x4e9   : > { %v5440_v53 = vadd.f32 %v10604_v11, %v5400_v0  ;;  %v5402_v63 = vmul.f32 %v10598_v15, %v5341_v3  ;;  %v5343_v4 = vpop.f32.mrb[83].mxu0  ;;  %7878 = vmatprep.subr.bf16.mxu0 %v8762_v28 }
 0x4ea   : > { %v5441_v13 = vadd.f32 %v10607_v49, %v5401_v52  ;;  %v5403_v20 = vmul.f32 %v10601_v10, %v5343_v4  ;;  %5758 = vmatprep.mubr.bf16.mxu0 %v5495_v45 }
 0x4eb   : > { %v5442_v5 = vadd.f32 %v10604_v11, %v5402_v63  ;;  %5759 = vmatmul.mubr.bf16.gmra.mrb[12].mxu0 %v5494_v21  ;;  %v5472_v57 = vmax.f32 %v5440_v53, 0.0 }
 0x4ec   : > { %v5443_v51 = vadd.f32 %v10607_v49, %v5403_v20  ;;  %v5473_v27 = vmax.f32 %v5441_v13, 0.0 }
 0x4ed   : > { %v5474_v46 = vmax.f32 %v5442_v5, 0.0 }
 0x4ee   : > { %v5475_v32 = vmax.f32 %v5443_v51, 0.0  ;;  %v5347_v40 = vpop.f32.mrb[84].mxu0 }
 0x4ef   : > { %v5404_v6 = vmul.f32 %v10598_v15, %v5347_v40  ;;  %v5349_v8 = vpop.f32.mrb[85].mxu0  ;;  %v5496_v44 = vpack.c.bf16 %v5474_v46, %v5472_v57 }
 0x4f0   : > { %v5405_v16 = vmul.f32 %v10601_v10, %v5349_v8  ;;  %v5351_v22 = vpop.f32.mrb[86].mxu0  ;;  %v5497_v17 = vpack.c.bf16 %v5475_v32, %v5473_v27 }
 0x4f1   : > { %v5444_v19 = vadd.f32 %v10604_v11, %v5404_v6  ;;  %v5406_v24 = vmul.f32 %v10598_v15, %v5351_v22  ;;  %v5353_v26 = vpop.f32.mrb[87].mxu0 }
 0x4f2   : > { %v5445_v29 = vadd.f32 %v10607_v49, %v5405_v16  ;;  %v5407_v56 = vmul.f32 %v10601_v10, %v5353_v26  ;;  %5768 = vmatprep.mubr.bf16.mxu0 %v5497_v17 }
 0x4f3   : > { %v5446_v61 = vadd.f32 %v10604_v11, %v5406_v24  ;;  %5769 = vmatmul.mubr.bf16.gmra.mrb[16].mxu0 %v5496_v44  ;;  %v5476_v59 = vmax.f32 %v5444_v19, 0.0  ;;  %v8764_v19 = vld [vmem:[%s9415_s14 + $0x78] sm:$0xff]  }
 0x4f4   : > { %v5447_v30 = vadd.f32 %v10607_v49, %v5407_v56  ;;  %v5477_v54 = vmax.f32 %v5445_v29, 0.0  ;;  %v8765_v24 = vld [vmem:[%s9415_s14 + $0x38] sm:$0xff]   ;;  %v6353_v29 = vsub.s32 5, %v9529_v14 }
 0x4f5   : > { %v5478_v2 = vmax.f32 %v5446_v61, 0.0 }
 0x4f6   : > { %v5479_v58 = vmax.f32 %v5447_v30, 0.0  ;;  %v5357_v34 = vpop.f32.mrb[88].mxu0  ;;  %v10701_v30 = vrot.slane %v10574_v47, %v6353_v29 }
 0x4f7   : > { %v5408_v1 = vmul.f32 %v10598_v15, %v5357_v34  ;;  %v5359_v7 = vpop.f32.mrb[89].mxu0  ;;  %v5498_v60 = vpack.c.bf16 %v5478_v2, %v5476_v59  ;;  %v10704_v2 = vrot.slane %v10578_v48, %v6353_v29 }
 0x4f8   : > { %v5409_v37 = vmul.f32 %v10601_v10, %v5359_v7  ;;  %v5361_v62 = vpop.f32.mrb[90].mxu0  ;;  %v5499_v12 = vpack.c.bf16 %v5479_v58, %v5477_v54  ;;  %v10708_v58 = vrot.slane %v10582_v23, %v6353_v29 }
 0x4f9   : > { %v5448_v39 = vadd.f32 %v10604_v11, %v5408_v1  ;;  %v5410_v36 = vmul.f32 %v10598_v15, %v5361_v62  ;;  %v5363_v41 = vpop.f32.mrb[91].mxu0  ;;  %v10712_v1 = vrot.slane %v10586_v9, %v6353_v29 }
 0x4fa   : > { %v5449_v18 = vadd.f32 %v10607_v49, %v5409_v37  ;;  %v5411_v42 = vmul.f32 %v10601_v10, %v5363_v41  ;;  %5778 = vmatprep.mubr.bf16.mxu0 %v5499_v12 }
 0x4fb   : > { %v5450_v43 = vadd.f32 %v10604_v11, %v5410_v36  ;;  %5779 = vmatmul.mubr.bf16.gmra.mrb[20].mxu0 %v5498_v60  ;;  %v5480_v35 = vmax.f32 %v5448_v39, 0.0 }
 0x4fc   : > { %v5451_v28 = vadd.f32 %v10607_v49, %v5411_v42  ;;  %v5481_v31 = vmax.f32 %v5449_v18, 0.0 }
 0x4fd   : > { %v5482_v50 = vmax.f32 %v5450_v43, 0.0 }
 0x4fe   : > { %v5483_v0 = vmax.f32 %v5451_v28, 0.0  ;;  %v5367_v33 = vpop.f32.mrb[92].mxu0 }
 0x4ff   : > { %v5412_v21 = vmul.f32 %v10598_v15, %v5367_v33  ;;  %v5369_v52 = vpop.f32.mrb[93].mxu0  ;;  %v5500_v3 = vpack.c.bf16 %v5482_v50, %v5480_v35 }
 0x500   : > { %v5413_v45 = vmul.f32 %v10601_v10, %v5369_v52  ;;  %v5371_v53 = vpop.f32.mrb[94].mxu0  ;;  %v5501_v63 = vpack.c.bf16 %v5483_v0, %v5481_v31 }
 0x501   : > { %v5452_v4 = vadd.f32 %v10604_v11, %v5412_v21  ;;  %v5414_v13 = vmul.f32 %v10598_v15, %v5371_v53  ;;  %v5373_v20 = vpop.f32.mrb[95].mxu0 }
 0x502   : > { %v5453_v5 = vadd.f32 %v10607_v49, %v5413_v45  ;;  %v5415_v51 = vmul.f32 %v10601_v10, %v5373_v20  ;;  %5788 = vmatprep.mubr.bf16.mxu0 %v5501_v63 }
 0x503   : > { %v5454_v57 = vadd.f32 %v10604_v11, %v5414_v13  ;;  %5789 = vmatmul.mubr.bf16.gmra.mrb[24].mxu0 %v5500_v3  ;;  %v5484_v27 = vmax.f32 %v5452_v4, 0.0  ;;  %v8763_v11 = vld [vmem:[%s9415_s14 + $0x30] sm:$0xff]  }
 0x504   : > { %v5455_v46 = vadd.f32 %v10607_v49, %v5415_v51  ;;  %v5485_v40 = vmax.f32 %v5453_v5, 0.0  ;;  %7879 = vmatpush3.bf16.msra.mxu0 %v8763_v11 }
 0x505   : > { %v5486_v32 = vmax.f32 %v5454_v57, 0.0  ;;  %7880 = vmatprep.subr.bf16.mxu0 %v8764_v19 }
 0x506   : > { %v5487_v6 = vmax.f32 %v5455_v46, 0.0 }
 0x507   : > { %v5502_v8 = vpack.c.bf16 %v5486_v32, %v5484_v27  ;;  %v6267_v44 = vpop.f32.mrb[68].mxu1 }
 0x508   : > { %v5503_v15 = vpack.c.bf16 %v5487_v6, %v5485_v40  ;;  %v6269_v16 = vpop.f32.mrb[69].mxu1  ;;  %7881 = vmatpush3.bf16.msra.mxu0 %v8765_v24 }
 0x509   : > { %v6276_v10 = vcombine.low %v6267_v44, %v6269_v16  ;;  %v6271_v22 = vpop.f32.mrb[70].mxu1 }
 0x50a   : > { %5798 = vmatprep.mubr.bf16.mxu0 %v5503_v15  ;;  %v6272_v17 = vpop.f32.mrb[71].mxu1 }
 0x50b   : > { %5799 = vmatmul.mubr.bf16.gmra.mrb[28].mxu0 %v5502_v8  ;;  %v10689_v49 = vrot.slane %v6276_v10, %v10392_v38 }
 0x50d   : > { %v6291_v26 = vrot.slane %v10689_v49, %v10392_v38 }
 0x50f   : > { %v10695_v56 = vrot.slane %v6291_v26, %v9563_v25  ;;  %v10698_v61 = vrot.slane %v6291_v26, %v10121_v55 }
 0x5a6   : > { %v5730_v59 = vpop.f32.mrb[0].mxu0 }
 0x5a7   : > { %v6319_v54 = vadd.f32 %v10695_v56, %v5730_v59  ;;  %v5732_v34 = vpop.f32.mrb[1].mxu0 }
 0x5a8   : > { %v6320_v14 = vadd.f32 %v10698_v61, %v5732_v34  ;;  %v5734_v7 = vpop.f32.mrb[2].mxu0 }
 0x5a9   : > { %v6359_v60 = vmul.f32 %v10701_v30, %v6319_v54  ;;  %v6321_v47 = vadd.f32 %v10695_v56, %v5734_v7  ;;  %v5736_v37 = vpop.f32.mrb[3].mxu0  ;;  %v6284_v7 = vcombine.high %v10689_v49, %v10689_v49 }
 0x5aa   : > { %v6360_v48 = vmul.f32 %v10704_v2, %v6320_v14  ;;  %v6322_v62 = vadd.f32 %v10698_v61, %v5736_v37 }
 0x5ab   : > { %v6399_v12 = vadd.f32 %v10708_v58, %v6359_v60  ;;  %v6361_v23 = vmul.f32 %v10701_v30, %v6321_v47 }
 0x5ac   : > { %v6400_v39 = vadd.f32 %v10712_v1, %v6360_v48  ;;  %v6362_v36 = vmul.f32 %v10704_v2, %v6322_v62 }
 0x5ad   : > { %v6401_v9 = vadd.f32 %v10708_v58, %v6361_v23  ;;  %v6431_v42 = vmax.f32 %v6399_v12, 0.0 }
 0x5ae   : > { %v6402_v41 = vadd.f32 %v10712_v1, %v6362_v36  ;;  %v5740_v18 = vpop.f32.mrb[4].mxu0  ;;  %v6432_v50 = vmax.f32 %v6400_v39, 0.0 }
 0x5af   : > { %v6433_v43 = vmax.f32 %v6401_v9, 0.0  ;;  %v6323_v28 = vadd.f32 %v10695_v56, %v5740_v18  ;;  %v5742_v35 = vpop.f32.mrb[5].mxu0  ;;  %v6298_v18 = vrot.slane %v6284_v7, %v10392_v38 }
 0x5b0   : > { %v6434_v31 = vmax.f32 %v6402_v41, 0.0  ;;  %v6324_v0 = vadd.f32 %v10698_v61, %v5742_v35  ;;  %v5744_v33 = vpop.f32.mrb[6].mxu0 }
 0x5b1   : > { %v6463_v21 = vpack.c.bf16 %v6433_v43, %v6431_v42  ;;  %v6363_v52 = vmul.f32 %v10701_v30, %v6323_v28  ;;  %v6325_v3 = vadd.f32 %v10695_v56, %v5744_v33  ;;  %v5746_v45 = vpop.f32.mrb[7].mxu0  ;;  %v10762_v38 = vrot.slane %v6298_v18, %v9563_v25 }
 0x5b2   : > { %v6364_v53 = vmul.f32 %v10704_v2, %v6324_v0  ;;  %v6326_v63 = vadd.f32 %v10698_v61, %v5746_v45  ;;  %v6464_v4 = vpack.c.bf16 %v6434_v31, %v6432_v50 }
 0x5b3   : > { %v6403_v13 = vadd.f32 %v10708_v58, %v6363_v52  ;;  %v6365_v20 = vmul.f32 %v10701_v30, %v6325_v3  ;;  %v10766_v3 = vrot.slane %v6298_v18, %v10121_v55 }
 0x5b4   : > { %v6404_v5 = vadd.f32 %v10712_v1, %v6364_v53  ;;  %v6366_v51 = vmul.f32 %v10704_v2, %v6326_v63  ;;  %6646 = vmatprep.mubr.bf16.mxu0 %v6464_v4 }
 0x5b5   : > { %v6405_v57 = vadd.f32 %v10708_v58, %v6365_v20  ;;  %6647 = vmatmul.mubr.bf16.vlgmr.msra.gmra.mrb[96].mxu0 %v6463_v21  ;;  %v6435_v32 = vmax.f32 %v6403_v13, 0.0 }
 0x5b6   : > { %v6406_v46 = vadd.f32 %v10712_v1, %v6366_v51  ;;  %v5750_v27 = vpop.f32.mrb[8].mxu0  ;;  %v6436_v15 = vmax.f32 %v6404_v5, 0.0 }
 0x5b7   : > { %v6437_v40 = vmax.f32 %v6405_v57, 0.0  ;;  %v6327_v6 = vadd.f32 %v10695_v56, %v5750_v27  ;;  %v5752_v8 = vpop.f32.mrb[9].mxu0 }
 0x5b8   : > { %v6438_v44 = vmax.f32 %v6406_v46, 0.0  ;;  %v6328_v16 = vadd.f32 %v10698_v61, %v5752_v8  ;;  %v5754_v10 = vpop.f32.mrb[10].mxu0 }
 0x5b9   : > { %v6367_v22 = vmul.f32 %v10701_v30, %v6327_v6  ;;  %v6329_v17 = vadd.f32 %v10695_v56, %v5754_v10  ;;  %v5756_v11 = vpop.f32.mrb[11].mxu0  ;;  %v6465_v19 = vpack.c.bf16 %v6437_v40, %v6435_v32 }
 0x5ba   : > { %v6368_v24 = vmul.f32 %v10704_v2, %v6328_v16  ;;  %v6330_v26 = vadd.f32 %v10698_v61, %v5756_v11  ;;  %v6466_v29 = vpack.c.bf16 %v6438_v44, %v6436_v15 }
 0x5bb   : > { %v6407_v59 = vadd.f32 %v10708_v58, %v6367_v22  ;;  %v6369_v54 = vmul.f32 %v10701_v30, %v6329_v17 }
 0x5bc   : > { %v6408_v34 = vadd.f32 %v10712_v1, %v6368_v24  ;;  %v6370_v14 = vmul.f32 %v10704_v2, %v6330_v26  ;;  %6654 = vmatprep.mubr.bf16.mxu0 %v6466_v29 }
 0x5bd   : > { %v6409_v60 = vadd.f32 %v10708_v58, %v6369_v54  ;;  %6655 = vmatmul.mubr.bf16.gmra.mrb[100].mxu0 %v6465_v19  ;;  %v6439_v48 = vmax.f32 %v6407_v59, 0.0 }
 0x5be   : > { %v6410_v47 = vadd.f32 %v10712_v1, %v6370_v14  ;;  %v5760_v37 = vpop.f32.mrb[12].mxu0  ;;  %v6440_v39 = vmax.f32 %v6408_v34, 0.0 }
 0x5bf   : > { %v6441_v62 = vmax.f32 %v6409_v60, 0.0  ;;  %v6331_v12 = vadd.f32 %v10695_v56, %v5760_v37  ;;  %v5762_v23 = vpop.f32.mrb[13].mxu0 }
 0x5c0   : > { %v6442_v36 = vmax.f32 %v6410_v47, 0.0  ;;  %v6332_v9 = vadd.f32 %v10698_v61, %v5762_v23  ;;  %v5764_v41 = vpop.f32.mrb[14].mxu0 }
 0x5c1   : > { %v6371_v49 = vmul.f32 %v10701_v30, %v6331_v12  ;;  %v6333_v42 = vadd.f32 %v10695_v56, %v5764_v41  ;;  %v5766_v43 = vpop.f32.mrb[15].mxu0  ;;  %v6467_v28 = vpack.c.bf16 %v6441_v62, %v6439_v48 }
 0x5c2   : > { %v6372_v35 = vmul.f32 %v10704_v2, %v6332_v9  ;;  %v6334_v50 = vadd.f32 %v10698_v61, %v5766_v43  ;;  %v6468_v31 = vpack.c.bf16 %v6442_v36, %v6440_v39 }
 0x5c3   : > { %v6411_v0 = vadd.f32 %v10708_v58, %v6371_v49  ;;  %v6373_v33 = vmul.f32 %v10701_v30, %v6333_v42 }
 0x5c4   : > { %v6412_v21 = vadd.f32 %v10712_v1, %v6372_v35  ;;  %v6374_v52 = vmul.f32 %v10704_v2, %v6334_v50  ;;  %6662 = vmatprep.mubr.bf16.mxu0 %v6468_v31 }
 0x5c5   : > { %v6413_v56 = vadd.f32 %v10708_v58, %v6373_v33  ;;  %6663 = vmatmul.mubr.bf16.gmra.mrb[104].mxu0 %v6467_v28  ;;  %v6443_v53 = vmax.f32 %v6411_v0, 0.0 }
 0x5c6   : > { %v6414_v61 = vadd.f32 %v10712_v1, %v6374_v52  ;;  %v5770_v45 = vpop.f32.mrb[16].mxu0  ;;  %v6444_v20 = vmax.f32 %v6412_v21, 0.0 }
 0x5c7   : > { %v6445_v63 = vmax.f32 %v6413_v56, 0.0  ;;  %v6335_v4 = vadd.f32 %v10762_v38, %v5770_v45  ;;  %v5772_v13 = vpop.f32.mrb[17].mxu0 }
 0x5c8   : > { %v6446_v5 = vmax.f32 %v6414_v61, 0.0  ;;  %v6336_v51 = vadd.f32 %v10766_v3, %v5772_v13  ;;  %v5774_v25 = vpop.f32.mrb[18].mxu0 }
 0x5c9   : > { %v6375_v57 = vmul.f32 %v10701_v30, %v6335_v4  ;;  %v6337_v46 = vadd.f32 %v10762_v38, %v5774_v25  ;;  %v5776_v27 = vpop.f32.mrb[19].mxu0  ;;  %v6469_v55 = vpack.c.bf16 %v6445_v63, %v6443_v53 }
 0x5ca   : > { %v6376_v32 = vmul.f32 %v10704_v2, %v6336_v51  ;;  %v6338_v40 = vadd.f32 %v10766_v3, %v5776_v27  ;;  %v6470_v6 = vpack.c.bf16 %v6446_v5, %v6444_v20 }
 0x5cb   : > { %v6415_v8 = vadd.f32 %v10708_v58, %v6375_v57  ;;  %v6377_v15 = vmul.f32 %v10701_v30, %v6337_v46 }
 0x5cc   : > { %v6416_v44 = vadd.f32 %v10712_v1, %v6376_v32  ;;  %v6378_v16 = vmul.f32 %v10704_v2, %v6338_v40  ;;  %6670 = vmatprep.mubr.bf16.mxu0 %v6470_v6 }
 0x5cd   : > { %v6417_v10 = vadd.f32 %v10708_v58, %v6377_v15  ;;  %6671 = vmatmul.mubr.bf16.gmra.mrb[108].mxu0 %v6469_v55  ;;  %v6447_v11 = vmax.f32 %v6415_v8, 0.0 }
 0x5ce   : > { %v6418_v22 = vadd.f32 %v10712_v1, %v6378_v16  ;;  %v5780_v17 = vpop.f32.mrb[20].mxu0  ;;  %v6448_v29 = vmax.f32 %v6416_v44, 0.0 }
 0x5cf   : > { %v6449_v19 = vmax.f32 %v6417_v10, 0.0  ;;  %v6339_v24 = vadd.f32 %v10762_v38, %v5780_v17  ;;  %v5782_v26 = vpop.f32.mrb[21].mxu0 }
 0x5d0   : > { %v6450_v59 = vmax.f32 %v6418_v22, 0.0  ;;  %v6340_v54 = vadd.f32 %v10766_v3, %v5782_v26  ;;  %v5784_v34 = vpop.f32.mrb[22].mxu0 }
 0x5d1   : > { %v6379_v14 = vmul.f32 %v10701_v30, %v6339_v24  ;;  %v6341_v7 = vadd.f32 %v10762_v38, %v5784_v34  ;;  %v5786_v60 = vpop.f32.mrb[23].mxu0  ;;  %v6471_v47 = vpack.c.bf16 %v6449_v19, %v6447_v11 }
 0x5d2   : > { %v6380_v37 = vmul.f32 %v10704_v2, %v6340_v54  ;;  %v6342_v48 = vadd.f32 %v10766_v3, %v5786_v60  ;;  %v6472_v62 = vpack.c.bf16 %v6450_v59, %v6448_v29 }
 0x5d3   : > { %v6419_v12 = vadd.f32 %v10708_v58, %v6379_v14  ;;  %v6381_v23 = vmul.f32 %v10701_v30, %v6341_v7 }
 0x5d4   : > { %v6420_v39 = vadd.f32 %v10712_v1, %v6380_v37  ;;  %v6382_v36 = vmul.f32 %v10704_v2, %v6342_v48  ;;  %6678 = vmatprep.mubr.bf16.mxu0 %v6472_v62  ;;  %v10821_v37 = vld [vmem:[%s609_s15] ss:$0 sm:$0xff] }
 0x5d5   : > { %v6421_v9 = vadd.f32 %v10708_v58, %v6381_v23  ;;  %6679 = vmatmul.mubr.bf16.gmra.mrb[112].mxu0 %v6471_v47  ;;  %v6451_v49 = vmax.f32 %v6419_v12, 0.0 }
 0x5d6   : > { %v6422_v41 = vadd.f32 %v10712_v1, %v6382_v36  ;;  %v5790_v18 = vpop.f32.mrb[24].mxu0  ;;  %v6452_v35 = vmax.f32 %v6420_v39, 0.0 }
 0x5d7   : > { %v6453_v42 = vmax.f32 %v6421_v9, 0.0  ;;  %v6343_v43 = vadd.f32 %v10762_v38, %v5790_v18  ;;  %v5792_v28 = vpop.f32.mrb[25].mxu0 }
 0x5d8   : > { %v6454_v50 = vmax.f32 %v6422_v41, 0.0  ;;  %v6344_v31 = vadd.f32 %v10766_v3, %v5792_v28  ;;  %v5794_v0 = vpop.f32.mrb[26].mxu0 }
 0x5d9   : > { %v6383_v33 = vmul.f32 %v10701_v30, %v6343_v43  ;;  %v6345_v21 = vadd.f32 %v10762_v38, %v5794_v0  ;;  %v5796_v52 = vpop.f32.mrb[27].mxu0  ;;  %v6473_v56 = vpack.c.bf16 %v6453_v42, %v6451_v49 }
 0x5da   : > { %v6384_v61 = vmul.f32 %v10704_v2, %v6344_v31  ;;  %v6346_v45 = vadd.f32 %v10766_v3, %v5796_v52  ;;  %v6474_v53 = vpack.c.bf16 %v6454_v50, %v6452_v35 }
 0x5db   : > { %v6423_v63 = vadd.f32 %v10708_v58, %v6383_v33  ;;  %v6385_v4 = vmul.f32 %v10701_v30, %v6345_v21 }
 0x5dc   : > { %v6424_v13 = vadd.f32 %v10712_v1, %v6384_v61  ;;  %v6386_v20 = vmul.f32 %v10704_v2, %v6346_v45  ;;  %6686 = vmatprep.mubr.bf16.mxu0 %v6474_v53 }
 0x5dd   : > { %v6425_v5 = vadd.f32 %v10708_v58, %v6385_v4  ;;  %6687 = vmatmul.mubr.bf16.gmra.mrb[116].mxu0 %v6473_v56  ;;  %v6455_v57 = vmax.f32 %v6423_v63, 0.0 }
 0x5de   : > { %v6426_v51 = vadd.f32 %v10712_v1, %v6386_v20  ;;  %v5800_v25 = vpop.f32.mrb[28].mxu0  ;;  %v6456_v32 = vmax.f32 %v6424_v13, 0.0 }
 0x5df   : > { %v6457_v46 = vmax.f32 %v6425_v5, 0.0  ;;  %v6347_v27 = vadd.f32 %v10762_v38, %v5800_v25  ;;  %v5802_v55 = vpop.f32.mrb[29].mxu0 }
 0x5e0   : > { %v6458_v40 = vmax.f32 %v6426_v51, 0.0  ;;  %v6348_v6 = vadd.f32 %v10766_v3, %v5802_v55  ;;  %v5804_v8 = vpop.f32.mrb[30].mxu0 }
 0x5e1   : > { %v6387_v15 = vmul.f32 %v10701_v30, %v6347_v27  ;;  %v6349_v44 = vadd.f32 %v10762_v38, %v5804_v8  ;;  %v5806_v16 = vpop.f32.mrb[31].mxu0  ;;  %v6475_v10 = vpack.c.bf16 %v6457_v46, %v6455_v57 }
 0x5e2   : > { %v6388_v22 = vmul.f32 %v10704_v2, %v6348_v6  ;;  %v6350_v17 = vadd.f32 %v10766_v3, %v5806_v16  ;;  %v6476_v11 = vpack.c.bf16 %v6458_v40, %v6456_v32 }
 0x5e3   : > { %v6427_v19 = vadd.f32 %v10708_v58, %v6387_v15  ;;  %v6389_v24 = vmul.f32 %v10701_v30, %v6349_v44 }
 0x5e4   : > { %v6428_v26 = vadd.f32 %v10712_v1, %v6388_v22  ;;  %v6390_v29 = vmul.f32 %v10704_v2, %v6350_v17  ;;  %6694 = vmatprep.mubr.bf16.mxu0 %v6476_v11 }
 0x5e5   : > { %v6429_v59 = vadd.f32 %v10708_v58, %v6389_v24  ;;  %6695 = vmatmul.mubr.bf16.gmra.mrb[120].mxu0 %v6475_v10  ;;  %v6459_v54 = vmax.f32 %v6427_v19, 0.0 }
 0x5e6   : > { %v6430_v38 = vadd.f32 %v10712_v1, %v6390_v29  ;;  %v6460_v3 = vmax.f32 %v6428_v26, 0.0 }
 0x5e7   : > { %v6461_v34 = vmax.f32 %v6429_v59, 0.0 }
 0x5e8   : > { %v6462_v14 = vmax.f32 %v6430_v38, 0.0 }
 0x5e9   : > { %v6477_v7 = vpack.c.bf16 %v6461_v34, %v6459_v54 }
 0x5ea   : > { %v6478_v60 = vpack.c.bf16 %v6462_v14, %v6460_v3 }
 0x5ec   : > { %6702 = vmatprep.mubr.bf16.mxu0 %v6478_v60 }
 0x5ed   : > { %6703 = vmatmul.mubr.bf16.gmra.mrb[124].mxu0 %v6477_v7 }
 0x688   : > { %v7882_v30 = vpop.f32.mrb[96].mxu0 }
 0x689   : > { %v7883_v2 = vpop.f32.mrb[97].mxu0 }
 0x68a   : > { %v7884_v47 = vadd.f32 %v7883_v2, %v7882_v30  ;;  %v7885_v58 = vpop.f32.mrb[98].mxu0 }
 0x68b   : > { %v7886_v1 = vpop.f32.mrb[99].mxu0 }
 0x68c   : > { %v7887_v48 = vadd.f32 %v7886_v1, %v7885_v58  ;;  %v6649_v62 = vadd.f32 %v7884_v47, %v10821_v37 }
 0x68e   : > { %v6652_v12 = vadd.f32 %v7887_v48, %v10821_v37 }
 0x690   : > { %v7822_v23 = vpack.c.bf16 %v6652_v12, %v6649_v62  ;;  %v7888_v39 = vpop.f32.mrb[100].mxu0 }
 0x691   : > { %v7889_v36 = vpop.f32.mrb[101].mxu0 }
 0x692   : > { %7823 = vst [vmem:[%s10829_s29] sm:$0xff] %v7822_v23   ;;  %v7890_v9 = vadd.f32 %v7889_v36, %v7888_v39  ;;  %v7891_v41 = vpop.f32.mrb[102].mxu0 }
 0x693   : > { %v7892_v18 = vpop.f32.mrb[103].mxu0 }
 0x694   : > { %v7893_v49 = vadd.f32 %v7892_v18, %v7891_v41  ;;  %v6657_v42 = vadd.f32 %v7890_v9, %v10821_v37 }
 0x696   : > { %v6660_v43 = vadd.f32 %v7893_v49, %v10821_v37 }
 0x698   : > { %v7827_v28 = vpack.c.bf16 %v6660_v43, %v6657_v42  ;;  %v7894_v35 = vpop.f32.mrb[104].mxu0 }
 0x699   : > { %v7895_v50 = vpop.f32.mrb[105].mxu0 }
 0x69a   : > { %7859 = vst [vmem:[%s10829_s29 + $0x8] sm:$0xff] %v7827_v28   ;;  %v7896_v31 = vadd.f32 %v7895_v50, %v7894_v35  ;;  %v7897_v0 = vpop.f32.mrb[106].mxu0 }
 0x69b   : > { %v7898_v33 = vpop.f32.mrb[107].mxu0 }
 0x69c   : > { %v7899_v21 = vadd.f32 %v7898_v33, %v7897_v0  ;;  %v6665_v52 = vadd.f32 %v7896_v31, %v10821_v37 }
 0x69e   : > { %v6668_v56 = vadd.f32 %v7899_v21, %v10821_v37 }
 0x6a0   : > { %v7832_v61 = vpack.c.bf16 %v6668_v56, %v6665_v52  ;;  %v7900_v45 = vpop.f32.mrb[108].mxu0 }
 0x6a1   : > { %v7901_v53 = vpop.f32.mrb[109].mxu0 }
 0x6a2   : > { %7860 = vst [vmem:[%s10829_s29 + $0x10] sm:$0xff] %v7832_v61   ;;  %v7902_v63 = vadd.f32 %v7901_v53, %v7900_v45  ;;  %v7903_v4 = vpop.f32.mrb[110].mxu0 }
 0x6a3   : > { %v7904_v13 = vpop.f32.mrb[111].mxu0 }
 0x6a4   : > { %v7905_v20 = vadd.f32 %v7904_v13, %v7903_v4  ;;  %v6673_v5 = vadd.f32 %v7902_v63, %v10821_v37 }
 0x6a6   : > { %v6676_v51 = vadd.f32 %v7905_v20, %v10821_v37 }
 0x6a8   : > { %v7837_v25 = vpack.c.bf16 %v6676_v51, %v6673_v5  ;;  %v7906_v57 = vpop.f32.mrb[112].mxu0 }
 0x6a9   : > { %v7907_v46 = vpop.f32.mrb[113].mxu0 }
 0x6aa   : > { %7861 = vst [vmem:[%s10829_s29 + $0x18] sm:$0xff] %v7837_v25   ;;  %v7908_v27 = vadd.f32 %v7907_v46, %v7906_v57  ;;  %v7909_v55 = vpop.f32.mrb[114].mxu0 }
 0x6ab   : > { %v7910_v32 = vpop.f32.mrb[115].mxu0 }
 0x6ac   : > { %v7911_v40 = vadd.f32 %v7910_v32, %v7909_v55  ;;  %v6681_v6 = vadd.f32 %v7908_v27, %v10821_v37 }
 0x6ae   : > { %v6684_v8 = vadd.f32 %v7911_v40, %v10821_v37 }
 0x6b0   : > { %v7842_v15 = vpack.c.bf16 %v6684_v8, %v6681_v6  ;;  %v7912_v44 = vpop.f32.mrb[116].mxu0 }
 0x6b1   : > { %v7913_v16 = vpop.f32.mrb[117].mxu0 }
 0x6b2   : > { %7862 = vst [vmem:[%s10829_s29 + $0x20] sm:$0xff] %v7842_v15   ;;  %v7914_v10 = vadd.f32 %v7913_v16, %v7912_v44  ;;  %v7915_v22 = vpop.f32.mrb[118].mxu0 }
 0x6b3   : > { %v7916_v17 = vpop.f32.mrb[119].mxu0 }
 0x6b4   : > { %v7917_v11 = vadd.f32 %v7916_v17, %v7915_v22  ;;  %v6689_v19 = vadd.f32 %v7914_v10, %v10821_v37 }
 0x6b6   : > { %v6692_v24 = vadd.f32 %v7917_v11, %v10821_v37 }
 0x6b8   : > { %v7847_v26 = vpack.c.bf16 %v6692_v24, %v6689_v19  ;;  %v7918_v29 = vpop.f32.mrb[120].mxu0 }
 0x6b9   : > { %v7919_v59 = vpop.f32.mrb[121].mxu0 }
 0x6ba   : > { %7863 = vst [vmem:[%s10829_s29 + $0x28] sm:$0xff] %v7847_v26   ;;  %v7920_v38 = vadd.f32 %v7919_v59, %v7918_v29  ;;  %v7921_v54 = vpop.f32.mrb[122].mxu0 }
 0x6bb   : > { %v7922_v34 = vpop.f32.mrb[123].mxu0 }
 0x6bc   : > { %v7923_v3 = vadd.f32 %v7922_v34, %v7921_v54  ;;  %v6697_v14 = vadd.f32 %v7920_v38, %v10821_v37 }
 0x6be   : > { %v6700_v7 = vadd.f32 %v7923_v3, %v10821_v37 }
 0x6c0   : > { %v7852_v60 = vpack.c.bf16 %v6700_v7, %v6697_v14  ;;  %v7924_v30 = vpop.f32.mrb[124].mxu0 }
 0x6c1   : > { %v7925_v2 = vpop.f32.mrb[125].mxu0 }
 0x6c2   : > { %7864 = vst [vmem:[%s10829_s29 + $0x30] sm:$0xff] %v7852_v60   ;;  %v7926_v47 = vadd.f32 %v7925_v2, %v7924_v30  ;;  %v7927_v58 = vpop.f32.mrb[126].mxu0 }
 0x6c3   : > { %v7928_v1 = vpop.f32.mrb[127].mxu0 }
 0x6c4   : > { %v7929_v48 = vadd.f32 %v7928_v1, %v7927_v58  ;;  %v6705_v62 = vadd.f32 %v7926_v47, %v10821_v37 }
 0x6c6   : > { %v6708_v12 = vadd.f32 %v7929_v48, %v10821_v37 }
 0x6c8   : > { %v7857_v23 = vpack.c.bf16 %v6708_v12, %v6705_v62 }
 0x6ca   : > { %7865 = vst [vmem:[%s10829_s29 + $0x38] sm:$0xff] %v7857_v23  }
 0x6cb PF: > { %s23_s25 = sadd.s32 1, %s8788_s25  }
 0x6cc   : > { %p20_p4 = scmp.ge.s32.totalorder %s23_s25, 4  }
 0x6ce   :  { %22 = sbr.rel (!%p20_p4) target bundleno = 3 (0x3), region = 132 }

</bundles_post_ra>
